<compile_context>
chip_gen: v5e
topology: v5e:2x2
jax: 0.10.0
libtpu: 0.0.40
codegen_flags: <defaults>
</compile_context>

<pallas_src>
import functools
import math

import jax
import jax.numpy as jnp
from jax.experimental import pallas as pl
from jax.experimental.pallas import tpu as pltpu
from jax.scipy.special import gammaln

f32 = jnp.float32


# --------------------- lgamma: rational Lanczos (g=7, n=9) --------------------

_LANCZOS_COEF = (
    0.99999999999980993, 676.5203681218851, -1259.1392167224028,
    771.32342877765313, -176.61502916214059, 12.507343278686905,
    -0.13857109526572012, 9.9843695780195716e-6, 1.5056327351493116e-7)


def _poly_mul(p, q):
    r = [0.0] * (len(p) + len(q) - 1)
    for i, a in enumerate(p):
        for j, b in enumerate(q):
            r[i + j] += a * b
    return r


def _poly_add(p, q):
    n = max(len(p), len(q))
    p = [0.0] * (n - len(p)) + list(p)
    q = [0.0] * (n - len(q)) + list(q)
    return [a + b for a, b in zip(p, q)]


def _build_lanczos_rational():
    # A(z) = c0 + sum_{k=1..8} c_k / (z + k - 1)  ==  N(z) / D(z)
    # D(z) = prod_{k=1..8} (z + k - 1)            (note: z itself is a factor,
    #                                              so small z stays well-conditioned)
    # N(z) = c0*D(z) + sum_k c_k * prod_{j != k} (z + j - 1)
    den = [1.0]
    for k in range(8):
        den = _poly_mul(den, [1.0, float(k)])
    num = [_LANCZOS_COEF[0] * c for c in den]
    for k in range(1, 9):
        p = [1.0]
        for j in range(1, 9):
            if j != k:
                p = _poly_mul(p, [1.0, float(j - 1)])
        num = _poly_add(num, [_LANCZOS_COEF[k] * c for c in p])
    return tuple(num), tuple(den)


_LG_NUM, _LG_DEN = _build_lanczos_rational()   # coefficients, highest degree first
_HALF_LOG_2PI = 0.5 * math.log(2.0 * math.pi)


def _lgamma_pos(z):
    """log Gamma(z) for z > 0.  Two Horner chains + 1 divide + 1 log.
    Valid while z**8 stays finite in f32 (z up to ~6e4) — ample for counts."""
    num = _LG_NUM[0]
    for c in _LG_NUM[1:]:
        num = num * z + c
    den = _LG_DEN[0]
    for c in _LG_DEN[1:]:
        den = den * z + c
    t = z + 6.5                                   # z + g - 0.5
    return _HALF_LOG_2PI + (z - 0.5) * jnp.log(t) - t + jnp.log(num / den)


def _softplus(x):
    return jnp.maximum(x, 0.0) + jnp.log(1.0 + jnp.exp(-jnp.abs(x)))


# ----------------------------- kernel 1: BN stats ------------------------------

def _bn_stats_kernel(n_rows, emb_ref, wd_ref, bd_ref, gamma_ref, beta_ref,
                     out_ref, sum_ref, ssq_ref):
    """Accumulate batch sum / sum-of-squares of h = emb @ Wd + bd across row
    tiles; on the last tile emit fused BatchNorm (scale, shift)."""
    i = pl.program_id(0)

    @pl.when(i == 0)
    def _():
        sum_ref[...] = jnp.zeros_like(sum_ref)
        ssq_ref[...] = jnp.zeros_like(ssq_ref)

    h = jnp.dot(emb_ref[...], wd_ref[...], preferred_element_type=f32) + bd_ref[...]
    tm = emb_ref.shape[0]
    row = i * tm + jax.lax.broadcasted_iota(jnp.int32, (tm, 1), 0)
    valid = (row < n_rows).astype(f32)            # mask padded rows
    hm = h * valid
    sum_ref[...] += jnp.sum(hm, axis=0, keepdims=True)
    ssq_ref[...] += jnp.sum(hm * h, axis=0, keepdims=True)

    @pl.when(i == pl.num_programs(0) - 1)
    def _():
        inv_n = 1.0 / float(n_rows)
        mean = sum_ref[...] * inv_n
        var = ssq_ref[...] * inv_n - mean * mean   # biased var (PyTorch train mode)
        scale = gamma_ref[...] * jax.lax.rsqrt(var + 1e-5)
        out_ref[0:1, :] = scale
        out_ref[1:2, :] = beta_ref[...] - mean * scale


# --------------------------- kernel 2: ZINB mixture ----------------------------

def _zinb_kernel(n_rows, nfeat, emb_ref, y_ref, eps_ref, wd_ref, bd_ref,
                 ss_ref, wh_ref, bh_ref, out_ref):
    e = 1e-8
    i = pl.program_id(0)
    tm = emb_ref.shape[0]

    # decoder: Linear -> BatchNorm(precomputed scale/shift) -> ReLU
    h = jnp.dot(emb_ref[...], wd_ref[...], preferred_element_type=f32) + bd_ref[...]
    h = jnp.maximum(h * ss_ref[0:1, :] + ss_ref[1:2, :], 0.0)

    # six heads fused into ONE matmul over concatenated weights, sliced in-register
    heads = jnp.dot(h, wh_ref[...], preferred_element_type=f32) + bh_ref[...]
    m_back   = heads[:, 0 * nfeat:1 * nfeat]
    ls_back  = heads[:, 1 * nfeat:2 * nfeat]
    pi_logit = heads[:, 2 * nfeat:3 * nfeat]
    a_logit  = heads[:, 3 * nfeat:4 * nfeat]
    db_raw   = heads[:, 4 * nfeat:5 * nfeat]
    df_raw   = heads[:, 5 * nfeat:6 * nfeat]

    y = y_ref[...]
    v_back = jnp.exp(m_back + jnp.exp(ls_back) * eps_ref[...])
    v_fore = (1.0 + jnp.exp(a_logit)) * v_back
    d_back = _softplus(db_raw)
    d_fore = _softplus(df_raw)

    # log(pi) / log(1-pi) straight from the logits (log-sigmoid).  Difference
    # vs. the reference's log(sigmoid(x)+1e-8) is bounded by the 1e-8
    # regularizer itself; avoids 1 exp + 2 logs per element and saturation.
    log_pi = -_softplus(-pi_logit)
    log_1mpi = -_softplus(pi_logit)

    lg_y1 = _lgamma_pos(y + 1.0)                  # shared by both NB terms

    def nb(mean, disp):
        log_dm = jnp.log(disp + mean + e)         # reused by both log terms
        return (_lgamma_pos(y + disp) - _lgamma_pos(disp) - lg_y1
                + disp * (jnp.log(disp + e) - log_dm)
                + y * (jnp.log(mean + e) - log_dm))

    la = log_pi + nb(v_back, d_back)
    lb = log_1mpi + nb(v_fore, d_fore)
    m = jnp.maximum(la, lb)
    mix = m + jnp.log(jnp.exp(la - m) + jnp.exp(lb - m))   # 2-way logsumexp

    row = i * tm + jax.lax.broadcasted_iota(jnp.int32, (tm, 1), 0)
    valid = (row < n_rows).astype(f32)            # drop padded rows
    partial = jnp.sum(mix * valid)
    out_ref[...] = jnp.full((8, 128), partial, dtype=f32)  # lane-dense partial


# ---------------------------------- wrapper ------------------------------------

def _round_up(x, m):
    return (x + m - 1) // m * m


def mixture_nb_lognormal(params, emb, y_protein, eps, *, block_rows=256):
    """Pallas forward of MixtureNBLogNormal: returns the scalar mean
    ZINB-mixture log-likelihood (same sign convention as the PyTorch module)."""
    n, nhid1 = emb.shape
    nfeat = y_protein.shape[1]

    tm = min(_round_up(block_rows, 8), _round_up(n, 8))
    n_pad = _round_up(n, tm)
    n_tiles = n_pad // tm
    if n_pad != n:
        pad = ((0, n_pad - n), (0, 0))
        emb = jnp.pad(emb, pad)
        y_protein = jnp.pad(y_protein, pad)
        eps = jnp.pad(eps, pad)

    wd = params['wd']
    bd = params['bd'].reshape(1, nhid1)
    gamma = params['gamma'].reshape(1, nhid1)
    beta = params['beta'].reshape(1, nhid1)
    w_heads = jnp.concatenate(
        [params[k] for k in ('wm', 'ws', 'wp', 'wa', 'wdb', 'wdf')], axis=1)
    b_heads = jnp.concatenate(
        [params[k] for k in ('bm', 'bs', 'bp', 'ba', 'bdb', 'bdf')]).reshape(1, 6 * nfeat)

    vmem_cap = 32 * 1024 * 1024

    # Pass 1: BatchNorm batch statistics -> fused (scale, shift).
    scale_shift = pl.pallas_call(
        functools.partial(_bn_stats_kernel, n),
        out_shape=jax.ShapeDtypeStruct((2, nhid1), f32),
        grid=(n_tiles,),
        in_specs=[
            pl.BlockSpec((tm, nhid1), lambda i: (i, 0)),
            pl.BlockSpec((nhid1, nhid1), lambda i: (0, 0)),
            pl.BlockSpec((1, nhid1), lambda i: (0, 0)),
            pl.BlockSpec((1, nhid1), lambda i: (0, 0)),
            pl.BlockSpec((1, nhid1), lambda i: (0, 0)),
        ],
        out_specs=pl.BlockSpec((2, nhid1), lambda i: (0, 0)),
        scratch_shapes=[pltpu.VMEM((1, nhid1), f32),
                        pltpu.VMEM((1, nhid1), f32)],
        compiler_params=pltpu.CompilerParams(
            dimension_semantics=("arbitrary",),
            vmem_limit_bytes=vmem_cap),
    )(emb, wd, bd, gamma, beta)

    # Pass 2: fully fused decoder + 6 heads + ZINB mixture + in-tile reduction.
    partials = pl.pallas_call(
        functools.partial(_zinb_kernel, n, nfeat),
        out_shape=jax.ShapeDtypeStruct((n_tiles * 8, 128), f32),
        grid=(n_tiles,),
        in_specs=[
            pl.BlockSpec((tm, nhid1), lambda i: (i, 0)),
            pl.BlockSpec((tm, nfeat), lambda i: (i, 0)),
            pl.BlockSpec((tm, nfeat), lambda i: (i, 0)),
            pl.BlockSpec((nhid1, nhid1), lambda i: (0, 0)),
            pl.BlockSpec((1, nhid1), lambda i: (0, 0)),
            pl.BlockSpec((2, nhid1), lambda i: (0, 0)),
            pl.BlockSpec((nhid1, 6 * nfeat), lambda i: (0, 0)),
            pl.BlockSpec((1, 6 * nfeat), lambda i: (0, 0)),
        ],
        out_specs=pl.BlockSpec((8, 128), lambda i: (i, 0)),
        compiler_params=pltpu.CompilerParams(
            dimension_semantics=("parallel",),   # megacore sharding on v7x
            vmem_limit_bytes=vmem_cap),
    )(emb, y_protein, eps, wd, bd, scale_shift, w_heads, b_heads)

    total = jnp.sum(partials.reshape(n_tiles, 8, 128)[:, 0, 0])
    return total / (n * nfeat)


# ----------------------------- pure-JAX reference ------------------------------

def mixture_nb_lognormal_reference(params, emb, y, eps):
    e = 1e-8
    h = emb @ params['wd'] + params['bd']
    mu = jnp.mean(h, axis=0)
    var = jnp.mean((h - mu) ** 2, axis=0)
    h = (h - mu) * jax.lax.rsqrt(var + 1e-5) * params['gamma'] + params['beta']
    h = jnp.maximum(h, 0.0)

    def head(w, b):
        return h @ params[w] + params[b]

    m_back = head('wm', 'bm')
    sigma_back = jnp.exp(head('ws', 'bs'))
    v_back = jnp.exp(m_back + sigma_back * eps)
    v_fore = (1.0 + jnp.exp(head('wa', 'ba'))) * v_back
    pi = jax.nn.sigmoid(head('wp', 'bp'))
    d_back = jax.nn.softplus(head('wdb', 'bdb'))
    d_fore = jax.nn.softplus(head('wdf', 'bdf'))

    def nb(mean, disp):
        return (gammaln(y + disp) - gammaln(disp) - gammaln(y + 1.0)
                + disp * (jnp.log(disp + e) - jnp.log(disp + mean + e))
                + y * (jnp.log(mean + e) - jnp.log(disp + mean + e)))

    a = jnp.log(pi + e) + nb(v_back, d_back)
    b = jnp.log(1.0 - pi + e) + nb(v_fore, d_fore)
    return jnp.mean(jnp.logaddexp(a, b))


# ------------------------------------ main --------------------------------------

if __name__ == "__main__":
    N = 200        # rows (spots) — not a multiple of the tile to exercise masking
    nhid1 = 32     # latent / hidden width of the decoder
    nfeat = 24     # number of protein features

    keys = jax.random.split(jax.random.PRNGKey(0), 20)

    def linear_params(kw, kb, fin, fout):
        lim = 1.0 / math.sqrt(fin)
        return (jax.random.uniform(kw, (fin, fout), f32, -lim, lim),
                jax.random.uniform(kb, (fout,), f32, -lim, lim))

    wd, bd = linear_params(keys[0], keys[1], nhid1, nhid1)
    wm, bm = linear_params(keys[2], keys[3], nhid1, nfeat)
    ws, bs = linear_params(keys[4], keys[5], nhid1, nfeat)
    wp, bp = linear_params(keys[6], keys[7], nhid1, nfeat)
    wa, ba = linear_params(keys[8], keys[9], nhid1, nfeat)
    wdb, bdb = linear_params(keys[10], keys[11], nhid1, nfeat)
    wdf, bdf = linear_params(keys[12], keys[13], nhid1, nfeat)

    params = dict(wd=wd, bd=bd,
                  gamma=jnp.ones((nhid1,), f32), beta=jnp.zeros((nhid1,), f32),
                  wm=wm, bm=bm, ws=ws, bs=bs, wp=wp, bp=bp, wa=wa, ba=ba,
                  wdb=wdb, bdb=bdb, wdf=wdf, bdf=bdf)

    emb = jax.random.normal(keys[14], (N, nhid1), f32)
    # count-like protein targets
    y = jnp.floor(jax.random.uniform(keys[15], (N, nfeat), f32, 0.0, 8.0))
    # torch.randn_like(m_back) equivalent, generated outside the kernel
    eps = jax.random.normal(keys[16], (N, nfeat), f32)

    fwd = jax.jit(functools.partial(mixture_nb_lognormal, block_rows=64))
    out = fwd(params, emb, y, eps)
    jax.block_until_ready(out)

    ref = mixture_nb_lognormal_reference(params, emb, y, eps)

    assert out.shape == ()
    assert bool(jnp.isfinite(out))
    assert abs(float(out) - float(ref)) <= 5e-3 * (1.0 + abs(float(ref))), (float(out), float(ref))

    print("KERNEL_OK")
</pallas_src>

<mosaic_0001>
module attributes {stable_mosaic.version = 11 : i64} {
  func.func @_bn_stats_kernel(%arg0: i32, %arg1: memref<64x32xf32, #tpu.memory_space<vmem>>, %arg2: memref<32x32xf32, #tpu.memory_space<vmem>>, %arg3: memref<1x32xf32, #tpu.memory_space<vmem>>, %arg4: memref<1x32xf32, #tpu.memory_space<vmem>>, %arg5: memref<1x32xf32, #tpu.memory_space<vmem>>, %arg6: memref<2x32xf32, #tpu.memory_space<vmem>>, %arg7: memref<1x32xf32, #tpu.memory_space<vmem>>, %arg8: memref<1x32xf32, #tpu.memory_space<vmem>>) attributes {dimension_semantics = [#tpu.dimension_semantics<arbitrary>], iteration_bounds = array<i64: 4>, scalar_prefetch = 0 : i64, scratch_operands = 2 : i64, tpu.core_type = #tpu.core_type<tc>, window_params = [{transform_indices = @transform_0, window_bounds = array<i64: 64, 32>}, {pipeline_mode = #tpu.pipeline_mode<synchronous>, transform_indices = @transform_1, window_bounds = array<i64: 32, 32>}, {pipeline_mode = #tpu.pipeline_mode<synchronous>, transform_indices = @transform_2, window_bounds = array<i64: 1, 32>}, {pipeline_mode = #tpu.pipeline_mode<synchronous>, transform_indices = @transform_3, window_bounds = array<i64: 1, 32>}, {pipeline_mode = #tpu.pipeline_mode<synchronous>, transform_indices = @transform_4, window_bounds = array<i64: 1, 32>}, {pipeline_mode = #tpu.pipeline_mode<synchronous>, transform_indices = @transform_5, window_bounds = array<i64: 2, 32>}]} {
    %c0_i32 = arith.constant 0 : i32
    %0 = arith.cmpi eq, %arg0, %c0_i32 : i32
    %1 = arith.extui %0 : i1 to i32
    %c0_i32_0 = arith.constant 0 : i32
    %2 = arith.cmpi ne, %1, %c0_i32_0 : i32
    scf.if %2 {
      %cst_17 = arith.constant 0.000000e+00 : f32
      %33 = vector.broadcast %cst_17 : f32 to vector<1x32xf32>
      %c0_18 = arith.constant 0 : index
      %c0_19 = arith.constant 0 : index
      %34 = vector.load %arg7[%c0_18, %c0_19] : memref<1x32xf32, #tpu.memory_space<vmem>>, vector<1x32xf32>
      tpu.vector_store %arg7[%c0_18, %c0_19], %33 {strides = array<i32>} : memref<1x32xf32, #tpu.memory_space<vmem>>, vector<1x32xf32>,
      %cst_20 = arith.constant 0.000000e+00 : f32
      %35 = vector.broadcast %cst_20 : f32 to vector<1x32xf32>
      %c0_21 = arith.constant 0 : index
      %c0_22 = arith.constant 0 : index
      %36 = vector.load %arg8[%c0_21, %c0_22] : memref<1x32xf32, #tpu.memory_space<vmem>>, vector<1x32xf32>
      tpu.vector_store %arg8[%c0_21, %c0_22], %35 {strides = array<i32>} : memref<1x32xf32, #tpu.memory_space<vmem>>, vector<1x32xf32>,
    } else {
    }
    %c0 = arith.constant 0 : index
    %c0_1 = arith.constant 0 : index
    %3 = vector.load %arg1[%c0, %c0_1] : memref<64x32xf32, #tpu.memory_space<vmem>>, vector<64x32xf32>
    %c0_2 = arith.constant 0 : index
    %c0_3 = arith.constant 0 : index
    %4 = vector.load %arg2[%c0_2, %c0_3] : memref<32x32xf32, #tpu.memory_space<vmem>>, vector<32x32xf32>
    %cst = arith.constant dense<0.000000e+00> : vector<64x32xf32>
    %5 = tpu.matmul %3, %4, %cst {dimension_numbers = #tpu.dot_dimension_numbers<[1], [0], [0], [1], [0, 0, 1, 1], [], []>} : vector<64x32xf32>, vector<32x32xf32>, vector<64x32xf32> -> vector<64x32xf32>
    %c0_4 = arith.constant 0 : index
    %c0_5 = arith.constant 0 : index
    %6 = vector.load %arg3[%c0_4, %c0_5] : memref<1x32xf32, #tpu.memory_space<vmem>>, vector<1x32xf32>
    %7 = vector.broadcast %6 : vector<1x32xf32> to vector<64x32xf32>
    %8 = arith.addf %5, %7 : vector<64x32xf32>
    %c64_i32 = arith.constant 64 : i32
    %9 = arith.muli %arg0, %c64_i32 : i32
    %10 = tpu.iota {dimensions = array<i32: 0>} : vector<64x1xi32>
    %11 = vector.broadcast %9 : i32 to vector<64x1xi32>
    %12 = arith.addi %11, %10 : vector<64x1xi32>
    %c200_i32 = arith.constant 200 : i32
    %13 = vector.broadcast %c200_i32 : i32 to vector<64x1xi32>
    %14 = arith.cmpi slt, %12, %13 : vector<64x1xi32>
    %15 = arith.extui %14 : vector<64x1xi1> to vector<64x1xi32>
    %16 = arith.sitofp %15 : vector<64x1xi32> to vector<64x1xf32>
    %17 = vector.broadcast %16 : vector<64x1xf32> to vector<64x32xf32>
    %18 = arith.mulf %8, %17 : vector<64x32xf32>
    %c0_6 = arith.constant 0 : index
    %c0_7 = arith.constant 0 : index
    %19 = vector.load %arg7[%c0_6, %c0_7] : memref<1x32xf32, #tpu.memory_space<vmem>>, vector<1x32xf32>
    %cst_8 = arith.constant dense<0.000000e+00> : vector<32xf32>
    %20 = vector.multi_reduction <add>, %18, %cst_8 [0] : vector<64x32xf32> to vector<32xf32>
    %21 = vector.shape_cast %20 : vector<32xf32> to vector<1x32xf32>
    %22 = arith.addf %19, %21 : vector<1x32xf32>
    %c0_9 = arith.constant 0 : index
    %c0_10 = arith.constant 0 : index
    %23 = vector.load %arg7[%c0_9, %c0_10] : memref<1x32xf32, #tpu.memory_space<vmem>>, vector<1x32xf32>
    tpu.vector_store %arg7[%c0_9, %c0_10], %22 {strides = array<i32>} : memref<1x32xf32, #tpu.memory_space<vmem>>, vector<1x32xf32>,
    %c0_11 = arith.constant 0 : index
    %c0_12 = arith.constant 0 : index
    %24 = vector.load %arg8[%c0_11, %c0_12] : memref<1x32xf32, #tpu.memory_space<vmem>>, vector<1x32xf32>
    %25 = arith.mulf %18, %8 : vector<64x32xf32>
    %cst_13 = arith.constant dense<0.000000e+00> : vector<32xf32>
    %26 = vector.multi_reduction <add>, %25, %cst_13 [0] : vector<64x32xf32> to vector<32xf32>
    %27 = vector.shape_cast %26 : vector<32xf32> to vector<1x32xf32>
    %28 = arith.addf %24, %27 : vector<1x32xf32>
    %c0_14 = arith.constant 0 : index
    %c0_15 = arith.constant 0 : index
    %29 = vector.load %arg8[%c0_14, %c0_15] : memref<1x32xf32, #tpu.memory_space<vmem>>, vector<1x32xf32>
    tpu.vector_store %arg8[%c0_14, %c0_15], %28 {strides = array<i32>} : memref<1x32xf32, #tpu.memory_space<vmem>>, vector<1x32xf32>,
    %c3_i32 = arith.constant 3 : i32
    %30 = arith.cmpi eq, %arg0, %c3_i32 : i32
    %31 = arith.extui %30 : i1 to i32
    %c0_i32_16 = arith.constant 0 : i32
    %32 = arith.cmpi ne, %31, %c0_i32_16 : i32
    scf.if %32 {
      %c0_17 = arith.constant 0 : index
      %c0_18 = arith.constant 0 : index
      %33 = vector.load %arg7[%c0_17, %c0_18] : memref<1x32xf32, #tpu.memory_space<vmem>>, vector<1x32xf32>
      %cst_19 = arith.constant 5.000000e-03 : f32
      %34 = vector.broadcast %cst_19 : f32 to vector<1x32xf32>
      %35 = arith.mulf %33, %34 : vector<1x32xf32>
      %c0_20 = arith.constant 0 : index
      %c0_21 = arith.constant 0 : index
      %36 = vector.load %arg8[%c0_20, %c0_21] : memref<1x32xf32, #tpu.memory_space<vmem>>, vector<1x32xf32>
      %cst_22 = arith.constant 5.000000e-03 : f32
      %37 = vector.broadcast %cst_22 : f32 to vector<1x32xf32>
      %38 = arith.mulf %36, %37 : vector<1x32xf32>
      %39 = arith.mulf %35, %35 : vector<1x32xf32>
      %40 = arith.subf %38, %39 : vector<1x32xf32>
      %c0_23 = arith.constant 0 : index
      %c0_24 = arith.constant 0 : index
      %41 = vector.load %arg4[%c0_23, %c0_24] : memref<1x32xf32, #tpu.memory_space<vmem>>, vector<1x32xf32>
      %cst_25 = arith.constant 9.99999974E-6 : f32
      %42 = vector.broadcast %cst_25 : f32 to vector<1x32xf32>
      %43 = arith.addf %40, %42 : vector<1x32xf32>
      %44 = math.rsqrt %43 : vector<1x32xf32>
      %45 = arith.mulf %41, %44 : vector<1x32xf32>
      %c0_26 = arith.constant 0 : index
      %c0_27 = arith.constant 0 : index
      %46 = vector.load %arg6[%c0_26, %c0_27] : memref<2x32xf32, #tpu.memory_space<vmem>>, vector<1x32xf32>
      tpu.vector_store %arg6[%c0_26, %c0_27], %45 {strides = array<i32>} : memref<2x32xf32, #tpu.memory_space<vmem>>, vector<1x32xf32>,
      %c0_28 = arith.constant 0 : index
      %c0_29 = arith.constant 0 : index
      %47 = vector.load %arg5[%c0_28, %c0_29] : memref<1x32xf32, #tpu.memory_space<vmem>>, vector<1x32xf32>
      %48 = arith.mulf %35, %45 : vector<1x32xf32>
      %49 = arith.subf %47, %48 : vector<1x32xf32>
      %c1 = arith.constant 1 : index
      %c0_30 = arith.constant 0 : index
      %50 = vector.load %arg6[%c1, %c0_30] : memref<2x32xf32, #tpu.memory_space<vmem>>, vector<1x32xf32>
      tpu.vector_store %arg6[%c1, %c0_30], %49 {strides = array<i32>} : memref<2x32xf32, #tpu.memory_space<vmem>>, vector<1x32xf32>,
    } else {
    }
    return
  }
  func.func @transform_0(%arg0: i32) -> (i32, i32) {
    %c0_i32 = arith.constant 0 : i32
    %c0_i32_0 = arith.constant 0 : i32
    return %arg0, %c0_i32 : i32, i32
  }
  func.func @transform_1(%arg0: i32) -> (i32, i32) {
    %c0_i32 = arith.constant 0 : i32
    %c0_i32_0 = arith.constant 0 : i32
    %c0_i32_1 = arith.constant 0 : i32
    return %c0_i32, %c0_i32_0 : i32, i32
  }
  func.func @transform_2(%arg0: i32) -> (i32, i32) {
    %c0_i32 = arith.constant 0 : i32
    %c0_i32_0 = arith.constant 0 : i32
    %c0_i32_1 = arith.constant 0 : i32
    return %c0_i32, %c0_i32_0 : i32, i32
  }
  func.func @transform_3(%arg0: i32) -> (i32, i32) {
    %c0_i32 = arith.constant 0 : i32
    %c0_i32_0 = arith.constant 0 : i32
    %c0_i32_1 = arith.constant 0 : i32
    return %c0_i32, %c0_i32_0 : i32, i32
  }
  func.func @transform_4(%arg0: i32) -> (i32, i32) {
    %c0_i32 = arith.constant 0 : i32
    %c0_i32_0 = arith.constant 0 : i32
    %c0_i32_1 = arith.constant 0 : i32
    return %c0_i32, %c0_i32_0 : i32, i32
  }
  func.func @transform_5(%arg0: i32) -> (i32, i32) {
    %c0_i32 = arith.constant 0 : i32
    %c0_i32_0 = arith.constant 0 : i32
    %c0_i32_1 = arith.constant 0 : i32
    return %c0_i32, %c0_i32_0 : i32, i32
  }
}

module attributes {stable_mosaic.version = 11 : i64} {
  func.func @_zinb_kernel(%arg0: i32, %arg1: memref<64x32xf32, #tpu.memory_space<vmem>>, %arg2: memref<64x24xf32, #tpu.memory_space<vmem>>, %arg3: memref<64x24xf32, #tpu.memory_space<vmem>>, %arg4: memref<32x32xf32, #tpu.memory_space<vmem>>, %arg5: memref<1x32xf32, #tpu.memory_space<vmem>>, %arg6: memref<2x32xf32, #tpu.memory_space<vmem>>, %arg7: memref<32x144xf32, #tpu.memory_space<vmem>>, %arg8: memref<1x144xf32, #tpu.memory_space<vmem>>, %arg9: memref<8x128xf32, #tpu.memory_space<vmem>>) attributes {dimension_semantics = [#tpu.dimension_semantics<parallel>], iteration_bounds = array<i64: 4>, scalar_prefetch = 0 : i64, scratch_operands = 0 : i64, tpu.core_type = #tpu.core_type<tc>, window_params = [{transform_indices = @transform_0, window_bounds = array<i64: 64, 32>}, {transform_indices = @transform_1, window_bounds = array<i64: 64, 24>}, {transform_indices = @transform_2, window_bounds = array<i64: 64, 24>}, {pipeline_mode = #tpu.pipeline_mode<synchronous>, transform_indices = @transform_3, window_bounds = array<i64: 32, 32>}, {pipeline_mode = #tpu.pipeline_mode<synchronous>, transform_indices = @transform_4, window_bounds = array<i64: 1, 32>}, {pipeline_mode = #tpu.pipeline_mode<synchronous>, transform_indices = @transform_5, window_bounds = array<i64: 2, 32>}, {pipeline_mode = #tpu.pipeline_mode<synchronous>, transform_indices = @transform_6, window_bounds = array<i64: 32, 144>}, {pipeline_mode = #tpu.pipeline_mode<synchronous>, transform_indices = @transform_7, window_bounds = array<i64: 1, 144>}, {transform_indices = @transform_8, window_bounds = array<i64: 8, 128>}]} {
    %c0 = arith.constant 0 : index
    %c0_0 = arith.constant 0 : index
    %0 = vector.load %arg1[%c0, %c0_0] : memref<64x32xf32, #tpu.memory_space<vmem>>, vector<64x32xf32>
    %c0_1 = arith.constant 0 : index
    %c0_2 = arith.constant 0 : index
    %1 = vector.load %arg4[%c0_1, %c0_2] : memref<32x32xf32, #tpu.memory_space<vmem>>, vector<32x32xf32>
    %cst = arith.constant dense<0.000000e+00> : vector<64x32xf32>
    %2 = tpu.matmul %0, %1, %cst {dimension_numbers = #tpu.dot_dimension_numbers<[1], [0], [0], [1], [0, 0, 1, 1], [], []>} : vector<64x32xf32>, vector<32x32xf32>, vector<64x32xf32> -> vector<64x32xf32>
    %c0_3 = arith.constant 0 : index
    %c0_4 = arith.constant 0 : index
    %3 = vector.load %arg5[%c0_3, %c0_4] : memref<1x32xf32, #tpu.memory_space<vmem>>, vector<1x32xf32>
    %4 = vector.broadcast %3 : vector<1x32xf32> to vector<64x32xf32>
    %5 = arith.addf %2, %4 : vector<64x32xf32>
    %c0_5 = arith.constant 0 : index
    %c0_6 = arith.constant 0 : index
    %6 = vector.load %arg6[%c0_5, %c0_6] : memref<2x32xf32, #tpu.memory_space<vmem>>, vector<1x32xf32>
    %7 = vector.broadcast %6 : vector<1x32xf32> to vector<64x32xf32>
    %8 = arith.mulf %5, %7 : vector<64x32xf32>
    %c1 = arith.constant 1 : index
    %c0_7 = arith.constant 0 : index
    %9 = vector.load %arg6[%c1, %c0_7] : memref<2x32xf32, #tpu.memory_space<vmem>>, vector<1x32xf32>
    %10 = vector.broadcast %9 : vector<1x32xf32> to vector<64x32xf32>
    %11 = arith.addf %8, %10 : vector<64x32xf32>
    %cst_8 = arith.constant 0.000000e+00 : f32
    %12 = vector.broadcast %cst_8 : f32 to vector<64x32xf32>
    %13 = arith.maximumf %11, %12 : vector<64x32xf32>
    %c0_9 = arith.constant 0 : index
    %c0_10 = arith.constant 0 : index
    %14 = vector.load %arg7[%c0_9, %c0_10] : memref<32x144xf32, #tpu.memory_space<vmem>>, vector<32x144xf32>
    %cst_11 = arith.constant dense<0.000000e+00> : vector<64x144xf32>
    %15 = tpu.matmul %13, %14, %cst_11 {dimension_numbers = #tpu.dot_dimension_numbers<[1], [0], [0], [1], [0, 0, 1, 1], [], []>} : vector<64x32xf32>, vector<32x144xf32>, vector<64x144xf32> -> vector<64x144xf32>
    %c0_12 = arith.constant 0 : index
    %c0_13 = arith.constant 0 : index
    %16 = vector.load %arg8[%c0_12, %c0_13] : memref<1x144xf32, #tpu.memory_space<vmem>>, vector<1x144xf32>
    %17 = vector.broadcast %16 : vector<1x144xf32> to vector<64x144xf32>
    %18 = arith.addf %15, %17 : vector<64x144xf32>
    %19 = vector.extract_strided_slice %18 {offsets = [0, 0], sizes = [64, 24], strides = [1, 1]} : vector<64x144xf32> to vector<64x24xf32>
    %20 = vector.extract_strided_slice %18 {offsets = [0, 24], sizes = [64, 24], strides = [1, 1]} : vector<64x144xf32> to vector<64x24xf32>
    %21 = vector.extract_strided_slice %18 {offsets = [0, 48], sizes = [64, 24], strides = [1, 1]} : vector<64x144xf32> to vector<64x24xf32>
    %22 = vector.extract_strided_slice %18 {offsets = [0, 72], sizes = [64, 24], strides = [1, 1]} : vector<64x144xf32> to vector<64x24xf32>
    %23 = vector.extract_strided_slice %18 {offsets = [0, 96], sizes = [64, 24], strides = [1, 1]} : vector<64x144xf32> to vector<64x24xf32>
    %24 = vector.extract_strided_slice %18 {offsets = [0, 120], sizes = [64, 24], strides = [1, 1]} : vector<64x144xf32> to vector<64x24xf32>
    %c0_14 = arith.constant 0 : index
    %c0_15 = arith.constant 0 : index
    %25 = vector.load %arg2[%c0_14, %c0_15] : memref<64x24xf32, #tpu.memory_space<vmem>>, vector<64x24xf32>
    %26 = math.exp %20 : vector<64x24xf32>
    %c0_16 = arith.constant 0 : index
    %c0_17 = arith.constant 0 : index
    %27 = vector.load %arg3[%c0_16, %c0_17] : memref<64x24xf32, #tpu.memory_space<vmem>>, vector<64x24xf32>
    %28 = arith.mulf %26, %27 : vector<64x24xf32>
    %29 = arith.addf %19, %28 : vector<64x24xf32>
    %30 = math.exp %29 : vector<64x24xf32>
    %31 = math.exp %22 : vector<64x24xf32>
    %cst_18 = arith.constant 1.000000e+00 : f32
    %32 = vector.broadcast %cst_18 : f32 to vector<64x24xf32>
    %33 = arith.addf %32, %31 : vector<64x24xf32>
    %34 = arith.mulf %33, %30 : vector<64x24xf32>
    %cst_19 = arith.constant 0.000000e+00 : f32
    %35 = vector.broadcast %cst_19 : f32 to vector<64x24xf32>
    %36 = arith.maximumf %23, %35 : vector<64x24xf32>
    %37 = math.absf %23 : vector<64x24xf32>
    %cst_20 = arith.constant 0.000000e+00 : f32
    %38 = vector.broadcast %cst_20 : f32 to vector<64x24xf32>
    %39 = arith.subf %38, %37 : vector<64x24xf32>
    %40 = math.exp %39 : vector<64x24xf32>
    %cst_21 = arith.constant 1.000000e+00 : f32
    %41 = vector.broadcast %cst_21 : f32 to vector<64x24xf32>
    %42 = arith.addf %41, %40 : vector<64x24xf32>
    %43 = math.log %42 : vector<64x24xf32>
    %44 = arith.addf %36, %43 : vector<64x24xf32>
    %cst_22 = arith.constant 0.000000e+00 : f32
    %45 = vector.broadcast %cst_22 : f32 to vector<64x24xf32>
    %46 = arith.maximumf %24, %45 : vector<64x24xf32>
    %47 = math.absf %24 : vector<64x24xf32>
    %cst_23 = arith.constant 0.000000e+00 : f32
    %48 = vector.broadcast %cst_23 : f32 to vector<64x24xf32>
    %49 = arith.subf %48, %47 : vector<64x24xf32>
    %50 = math.exp %49 : vector<64x24xf32>
    %cst_24 = arith.constant 1.000000e+00 : f32
    %51 = vector.broadcast %cst_24 : f32 to vector<64x24xf32>
    %52 = arith.addf %51, %50 : vector<64x24xf32>
    %53 = math.log %52 : vector<64x24xf32>
    %54 = arith.addf %46, %53 : vector<64x24xf32>
    %cst_25 = arith.constant 0.000000e+00 : f32
    %55 = vector.broadcast %cst_25 : f32 to vector<64x24xf32>
    %56 = arith.subf %55, %21 : vector<64x24xf32>
    %cst_26 = arith.constant 0.000000e+00 : f32
    %57 = vector.broadcast %cst_26 : f32 to vector<64x24xf32>
    %58 = arith.maximumf %56, %57 : vector<64x24xf32>
    %59 = math.absf %56 : vector<64x24xf32>
    %cst_27 = arith.constant 0.000000e+00 : f32
    %60 = vector.broadcast %cst_27 : f32 to vector<64x24xf32>
    %61 = arith.subf %60, %59 : vector<64x24xf32>
    %62 = math.exp %61 : vector<64x24xf32>
    %cst_28 = arith.constant 1.000000e+00 : f32
    %63 = vector.broadcast %cst_28 : f32 to vector<64x24xf32>
    %64 = arith.addf %63, %62 : vector<64x24xf32>
    %65 = math.log %64 : vector<64x24xf32>
    %66 = arith.addf %58, %65 : vector<64x24xf32>
    %cst_29 = arith.constant 0.000000e+00 : f32
    %67 = vector.broadcast %cst_29 : f32 to vector<64x24xf32>
    %68 = arith.subf %67, %66 : vector<64x24xf32>
    %cst_30 = arith.constant 0.000000e+00 : f32
    %69 = vector.broadcast %cst_30 : f32 to vector<64x24xf32>
    %70 = arith.maximumf %21, %69 : vector<64x24xf32>
    %71 = math.absf %21 : vector<64x24xf32>
    %cst_31 = arith.constant 0.000000e+00 : f32
    %72 = vector.broadcast %cst_31 : f32 to vector<64x24xf32>
    %73 = arith.subf %72, %71 : vector<64x24xf32>
    %74 = math.exp %73 : vector<64x24xf32>
    %cst_32 = arith.constant 1.000000e+00 : f32
    %75 = vector.broadcast %cst_32 : f32 to vector<64x24xf32>
    %76 = arith.addf %75, %74 : vector<64x24xf32>
    %77 = math.log %76 : vector<64x24xf32>
    %78 = arith.addf %70, %77 : vector<64x24xf32>
    %cst_33 = arith.constant 0.000000e+00 : f32
    %79 = vector.broadcast %cst_33 : f32 to vector<64x24xf32>
    %80 = arith.subf %79, %78 : vector<64x24xf32>
    %cst_34 = arith.constant 1.000000e+00 : f32
    %81 = vector.broadcast %cst_34 : f32 to vector<64x24xf32>
    %82 = arith.addf %25, %81 : vector<64x24xf32>
    %cst_35 = arith.constant 1.000000e+00 : f32
    %83 = vector.broadcast %cst_35 : f32 to vector<64x24xf32>
    %84 = arith.mulf %83, %82 : vector<64x24xf32>
    %cst_36 = arith.constant 52.4583321 : f32
    %85 = vector.broadcast %cst_36 : f32 to vector<64x24xf32>
    %86 = arith.addf %84, %85 : vector<64x24xf32>
    %87 = arith.mulf %86, %82 : vector<64x24xf32>
    %cst_37 = arith.constant 1203.83423 : f32
    %88 = vector.broadcast %cst_37 : f32 to vector<64x24xf32>
    %89 = arith.addf %87, %88 : vector<64x24xf32>
    %90 = arith.mulf %89, %82 : vector<64x24xf32>
    %cst_38 = arith.constant 15784.8809 : f32
    %91 = vector.broadcast %cst_38 : f32 to vector<64x24xf32>
    %92 = arith.addf %90, %91 : vector<64x24xf32>
    %93 = arith.mulf %92, %82 : vector<64x24xf32>
    %cst_39 = arith.constant 129347.258 : f32
    %94 = vector.broadcast %cst_39 : f32 to vector<64x24xf32>
    %95 = arith.addf %93, %94 : vector<64x24xf32>
    %96 = arith.mulf %95, %82 : vector<64x24xf32>
    %cst_40 = arith.constant 678289.688 : f32
    %97 = vector.broadcast %cst_40 : f32 to vector<64x24xf32>
    %98 = arith.addf %96, %97 : vector<64x24xf32>
    %99 = arith.mulf %98, %82 : vector<64x24xf32>
    %cst_41 = arith.constant 2222880.5 : f32
    %100 = vector.broadcast %cst_41 : f32 to vector<64x24xf32>
    %101 = arith.addf %99, %100 : vector<64x24xf32>
    %102 = arith.mulf %101, %82 : vector<64x24xf32>
    %cst_42 = arith.constant 0x4A7E0D50 : f32
    %103 = vector.broadcast %cst_42 : f32 to vector<64x24xf32>
    %104 = arith.addf %102, %103 : vector<64x24xf32>
    %105 = arith.mulf %104, %82 : vector<64x24xf32>
    %cst_43 = arith.constant 3409662.75 : f32
    %106 = vector.broadcast %cst_43 : f32 to vector<64x24xf32>
    %107 = arith.addf %105, %106 : vector<64x24xf32>
    %cst_44 = arith.constant 1.000000e+00 : f32
    %108 = vector.broadcast %cst_44 : f32 to vector<64x24xf32>
    %109 = arith.mulf %108, %82 : vector<64x24xf32>
    %cst_45 = arith.constant 2.800000e+01 : f32
    %110 = vector.broadcast %cst_45 : f32 to vector<64x24xf32>
    %111 = arith.addf %109, %110 : vector<64x24xf32>
    %112 = arith.mulf %111, %82 : vector<64x24xf32>
    %cst_46 = arith.constant 3.220000e+02 : f32
    %113 = vector.broadcast %cst_46 : f32 to vector<64x24xf32>
    %114 = arith.addf %112, %113 : vector<64x24xf32>
    %115 = arith.mulf %114, %82 : vector<64x24xf32>
    %cst_47 = arith.constant 1.960000e+03 : f32
    %116 = vector.broadcast %cst_47 : f32 to vector<64x24xf32>
    %117 = arith.addf %115, %116 : vector<64x24xf32>
    %118 = arith.mulf %117, %82 : vector<64x24xf32>
    %cst_48 = arith.constant 6.769000e+03 : f32
    %119 = vector.broadcast %cst_48 : f32 to vector<64x24xf32>
    %120 = arith.addf %118, %119 : vector<64x24xf32>
    %121 = arith.mulf %120, %82 : vector<64x24xf32>
    %cst_49 = arith.constant 1.313200e+04 : f32
    %122 = vector.broadcast %cst_49 : f32 to vector<64x24xf32>
    %123 = arith.addf %121, %122 : vector<64x24xf32>
    %124 = arith.mulf %123, %82 : vector<64x24xf32>
    %cst_50 = arith.constant 1.306800e+04 : f32
    %125 = vector.broadcast %cst_50 : f32 to vector<64x24xf32>
    %126 = arith.addf %124, %125 : vector<64x24xf32>
    %127 = arith.mulf %126, %82 : vector<64x24xf32>
    %cst_51 = arith.constant 5.040000e+03 : f32
    %128 = vector.broadcast %cst_51 : f32 to vector<64x24xf32>
    %129 = arith.addf %127, %128 : vector<64x24xf32>
    %130 = arith.mulf %129, %82 : vector<64x24xf32>
    %cst_52 = arith.constant 0.000000e+00 : f32
    %131 = vector.broadcast %cst_52 : f32 to vector<64x24xf32>
    %132 = arith.addf %130, %131 : vector<64x24xf32>
    %cst_53 = arith.constant 6.500000e+00 : f32
    %133 = vector.broadcast %cst_53 : f32 to vector<64x24xf32>
    %134 = arith.addf %82, %133 : vector<64x24xf32>
    %cst_54 = arith.constant 5.000000e-01 : f32
    %135 = vector.broadcast %cst_54 : f32 to vector<64x24xf32>
    %136 = arith.subf %82, %135 : vector<64x24xf32>
    %137 = math.log %134 : vector<64x24xf32>
    %138 = arith.mulf %136, %137 : vector<64x24xf32>
    %cst_55 = arith.constant 0.918938517 : f32
    %139 = vector.broadcast %cst_55 : f32 to vector<64x24xf32>
    %140 = arith.addf %139, %138 : vector<64x24xf32>
    %141 = arith.subf %140, %134 : vector<64x24xf32>
    %142 = arith.divf %107, %132 : vector<64x24xf32>
    %143 = math.log %142 : vector<64x24xf32>
    %144 = arith.addf %141, %143 : vector<64x24xf32>
    %145 = arith.addf %44, %30 : vector<64x24xf32>
    %cst_56 = arith.constant 9.99999993E-9 : f32
    %146 = vector.broadcast %cst_56 : f32 to vector<64x24xf32>
    %147 = arith.addf %145, %146 : vector<64x24xf32>
    %148 = math.log %147 : vector<64x24xf32>
    %149 = arith.addf %25, %44 : vector<64x24xf32>
    %cst_57 = arith.constant 1.000000e+00 : f32
    %150 = vector.broadcast %cst_57 : f32 to vector<64x24xf32>
    %151 = arith.mulf %150, %149 : vector<64x24xf32>
    %cst_58 = arith.constant 52.4583321 : f32
    %152 = vector.broadcast %cst_58 : f32 to vector<64x24xf32>
    %153 = arith.addf %151, %152 : vector<64x24xf32>
    %154 = arith.mulf %153, %149 : vector<64x24xf32>
    %cst_59 = arith.constant 1203.83423 : f32
    %155 = vector.broadcast %cst_59 : f32 to vector<64x24xf32>
    %156 = arith.addf %154, %155 : vector<64x24xf32>
    %157 = arith.mulf %156, %149 : vector<64x24xf32>
    %cst_60 = arith.constant 15784.8809 : f32
    %158 = vector.broadcast %cst_60 : f32 to vector<64x24xf32>
    %159 = arith.addf %157, %158 : vector<64x24xf32>
    %160 = arith.mulf %159, %149 : vector<64x24xf32>
    %cst_61 = arith.constant 129347.258 : f32
    %161 = vector.broadcast %cst_61 : f32 to vector<64x24xf32>
    %162 = arith.addf %160, %161 : vector<64x24xf32>
    %163 = arith.mulf %162, %149 : vector<64x24xf32>
    %cst_62 = arith.constant 678289.688 : f32
    %164 = vector.broadcast %cst_62 : f32 to vector<64x24xf32>
    %165 = arith.addf %163, %164 : vector<64x24xf32>
    %166 = arith.mulf %165, %149 : vector<64x24xf32>
    %cst_63 = arith.constant 2222880.5 : f32
    %167 = vector.broadcast %cst_63 : f32 to vector<64x24xf32>
    %168 = arith.addf %166, %167 : vector<64x24xf32>
    %169 = arith.mulf %168, %149 : vector<64x24xf32>
    %cst_64 = arith.constant 0x4A7E0D50 : f32
    %170 = vector.broadcast %cst_64 : f32 to vector<64x24xf32>
    %171 = arith.addf %169, %170 : vector<64x24xf32>
    %172 = arith.mulf %171, %149 : vector<64x24xf32>
    %cst_65 = arith.constant 3409662.75 : f32
    %173 = vector.broadcast %cst_65 : f32 to vector<64x24xf32>
    %174 = arith.addf %172, %173 : vector<64x24xf32>
    %cst_66 = arith.constant 1.000000e+00 : f32
    %175 = vector.broadcast %cst_66 : f32 to vector<64x24xf32>
    %176 = arith.mulf %175, %149 : vector<64x24xf32>
    %cst_67 = arith.constant 2.800000e+01 : f32
    %177 = vector.broadcast %cst_67 : f32 to vector<64x24xf32>
    %178 = arith.addf %176, %177 : vector<64x24xf32>
    %179 = arith.mulf %178, %149 : vector<64x24xf32>
    %cst_68 = arith.constant 3.220000e+02 : f32
    %180 = vector.broadcast %cst_68 : f32 to vector<64x24xf32>
    %181 = arith.addf %179, %180 : vector<64x24xf32>
    %182 = arith.mulf %181, %149 : vector<64x24xf32>
    %cst_69 = arith.constant 1.960000e+03 : f32
    %183 = vector.broadcast %cst_69 : f32 to vector<64x24xf32>
    %184 = arith.addf %182, %183 : vector<64x24xf32>
    %185 = arith.mulf %184, %149 : vector<64x24xf32>
    %cst_70 = arith.constant 6.769000e+03 : f32
    %186 = vector.broadcast %cst_70 : f32 to vector<64x24xf32>
    %187 = arith.addf %185, %186 : vector<64x24xf32>
    %188 = arith.mulf %187, %149 : vector<64x24xf32>
    %cst_71 = arith.constant 1.313200e+04 : f32
    %189 = vector.broadcast %cst_71 : f32 to vector<64x24xf32>
    %190 = arith.addf %188, %189 : vector<64x24xf32>
    %191 = arith.mulf %190, %149 : vector<64x24xf32>
    %cst_72 = arith.constant 1.306800e+04 : f32
    %192 = vector.broadcast %cst_72 : f32 to vector<64x24xf32>
    %193 = arith.addf %191, %192 : vector<64x24xf32>
    %194 = arith.mulf %193, %149 : vector<64x24xf32>
    %cst_73 = arith.constant 5.040000e+03 : f32
    %195 = vector.broadcast %cst_73 : f32 to vector<64x24xf32>
    %196 = arith.addf %194, %195 : vector<64x24xf32>
    %197 = arith.mulf %196, %149 : vector<64x24xf32>
    %cst_74 = arith.constant 0.000000e+00 : f32
    %198 = vector.broadcast %cst_74 : f32 to vector<64x24xf32>
    %199 = arith.addf %197, %198 : vector<64x24xf32>
    %cst_75 = arith.constant 6.500000e+00 : f32
    %200 = vector.broadcast %cst_75 : f32 to vector<64x24xf32>
    %201 = arith.addf %149, %200 : vector<64x24xf32>
    %cst_76 = arith.constant 5.000000e-01 : f32
    %202 = vector.broadcast %cst_76 : f32 to vector<64x24xf32>
    %203 = arith.subf %149, %202 : vector<64x24xf32>
    %204 = math.log %201 : vector<64x24xf32>
    %205 = arith.mulf %203, %204 : vector<64x24xf32>
    %cst_77 = arith.constant 0.918938517 : f32
    %206 = vector.broadcast %cst_77 : f32 to vector<64x24xf32>
    %207 = arith.addf %206, %205 : vector<64x24xf32>
    %208 = arith.subf %207, %201 : vector<64x24xf32>
    %209 = arith.divf %174, %199 : vector<64x24xf32>
    %210 = math.log %209 : vector<64x24xf32>
    %211 = arith.addf %208, %210 : vector<64x24xf32>
    %cst_78 = arith.constant 1.000000e+00 : f32
    %212 = vector.broadcast %cst_78 : f32 to vector<64x24xf32>
    %213 = arith.mulf %212, %44 : vector<64x24xf32>
    %cst_79 = arith.constant 52.4583321 : f32
    %214 = vector.broadcast %cst_79 : f32 to vector<64x24xf32>
    %215 = arith.addf %213, %214 : vector<64x24xf32>
    %216 = arith.mulf %215, %44 : vector<64x24xf32>
    %cst_80 = arith.constant 1203.83423 : f32
    %217 = vector.broadcast %cst_80 : f32 to vector<64x24xf32>
    %218 = arith.addf %216, %217 : vector<64x24xf32>
    %219 = arith.mulf %218, %44 : vector<64x24xf32>
    %cst_81 = arith.constant 15784.8809 : f32
    %220 = vector.broadcast %cst_81 : f32 to vector<64x24xf32>
    %221 = arith.addf %219, %220 : vector<64x24xf32>
    %222 = arith.mulf %221, %44 : vector<64x24xf32>
    %cst_82 = arith.constant 129347.258 : f32
    %223 = vector.broadcast %cst_82 : f32 to vector<64x24xf32>
    %224 = arith.addf %222, %223 : vector<64x24xf32>
    %225 = arith.mulf %224, %44 : vector<64x24xf32>
    %cst_83 = arith.constant 678289.688 : f32
    %226 = vector.broadcast %cst_83 : f32 to vector<64x24xf32>
    %227 = arith.addf %225, %226 : vector<64x24xf32>
    %228 = arith.mulf %227, %44 : vector<64x24xf32>
    %cst_84 = arith.constant 2222880.5 : f32
    %229 = vector.broadcast %cst_84 : f32 to vector<64x24xf32>
    %230 = arith.addf %228, %229 : vector<64x24xf32>
    %231 = arith.mulf %230, %44 : vector<64x24xf32>
    %cst_85 = arith.constant 0x4A7E0D50 : f32
    %232 = vector.broadcast %cst_85 : f32 to vector<64x24xf32>
    %233 = arith.addf %231, %232 : vector<64x24xf32>
    %234 = arith.mulf %233, %44 : vector<64x24xf32>
    %cst_86 = arith.constant 3409662.75 : f32
    %235 = vector.broadcast %cst_86 : f32 to vector<64x24xf32>
    %236 = arith.addf %234, %235 : vector<64x24xf32>
    %cst_87 = arith.constant 1.000000e+00 : f32
    %237 = vector.broadcast %cst_87 : f32 to vector<64x24xf32>
    %238 = arith.mulf %237, %44 : vector<64x24xf32>
    %cst_88 = arith.constant 2.800000e+01 : f32
    %239 = vector.broadcast %cst_88 : f32 to vector<64x24xf32>
    %240 = arith.addf %238, %239 : vector<64x24xf32>
    %241 = arith.mulf %240, %44 : vector<64x24xf32>
    %cst_89 = arith.constant 3.220000e+02 : f32
    %242 = vector.broadcast %cst_89 : f32 to vector<64x24xf32>
    %243 = arith.addf %241, %242 : vector<64x24xf32>
    %244 = arith.mulf %243, %44 : vector<64x24xf32>
    %cst_90 = arith.constant 1.960000e+03 : f32
    %245 = vector.broadcast %cst_90 : f32 to vector<64x24xf32>
    %246 = arith.addf %244, %245 : vector<64x24xf32>
    %247 = arith.mulf %246, %44 : vector<64x24xf32>
    %cst_91 = arith.constant 6.769000e+03 : f32
    %248 = vector.broadcast %cst_91 : f32 to vector<64x24xf32>
    %249 = arith.addf %247, %248 : vector<64x24xf32>
    %250 = arith.mulf %249, %44 : vector<64x24xf32>
    %cst_92 = arith.constant 1.313200e+04 : f32
    %251 = vector.broadcast %cst_92 : f32 to vector<64x24xf32>
    %252 = arith.addf %250, %251 : vector<64x24xf32>
    %253 = arith.mulf %252, %44 : vector<64x24xf32>
    %cst_93 = arith.constant 1.306800e+04 : f32
    %254 = vector.broadcast %cst_93 : f32 to vector<64x24xf32>
    %255 = arith.addf %253, %254 : vector<64x24xf32>
    %256 = arith.mulf %255, %44 : vector<64x24xf32>
    %cst_94 = arith.constant 5.040000e+03 : f32
    %257 = vector.broadcast %cst_94 : f32 to vector<64x24xf32>
    %258 = arith.addf %256, %257 : vector<64x24xf32>
    %259 = arith.mulf %258, %44 : vector<64x24xf32>
    %cst_95 = arith.constant 0.000000e+00 : f32
    %260 = vector.broadcast %cst_95 : f32 to vector<64x24xf32>
    %261 = arith.addf %259, %260 : vector<64x24xf32>
    %cst_96 = arith.constant 6.500000e+00 : f32
    %262 = vector.broadcast %cst_96 : f32 to vector<64x24xf32>
    %263 = arith.addf %44, %262 : vector<64x24xf32>
    %cst_97 = arith.constant 5.000000e-01 : f32
    %264 = vector.broadcast %cst_97 : f32 to vector<64x24xf32>
    %265 = arith.subf %44, %264 : vector<64x24xf32>
    %266 = math.log %263 : vector<64x24xf32>
    %267 = arith.mulf %265, %266 : vector<64x24xf32>
    %cst_98 = arith.constant 0.918938517 : f32
    %268 = vector.broadcast %cst_98 : f32 to vector<64x24xf32>
    %269 = arith.addf %268, %267 : vector<64x24xf32>
    %270 = arith.subf %269, %263 : vector<64x24xf32>
    %271 = arith.divf %236, %261 : vector<64x24xf32>
    %272 = math.log %271 : vector<64x24xf32>
    %273 = arith.addf %270, %272 : vector<64x24xf32>
    %274 = arith.subf %211, %273 : vector<64x24xf32>
    %275 = arith.subf %274, %144 : vector<64x24xf32>
    %cst_99 = arith.constant 9.99999993E-9 : f32
    %276 = vector.broadcast %cst_99 : f32 to vector<64x24xf32>
    %277 = arith.addf %44, %276 : vector<64x24xf32>
    %278 = math.log %277 : vector<64x24xf32>
    %279 = arith.subf %278, %148 : vector<64x24xf32>
    %280 = arith.mulf %44, %279 : vector<64x24xf32>
    %281 = arith.addf %275, %280 : vector<64x24xf32>
    %cst_100 = arith.constant 9.99999993E-9 : f32
    %282 = vector.broadcast %cst_100 : f32 to vector<64x24xf32>
    %283 = arith.addf %30, %282 : vector<64x24xf32>
    %284 = math.log %283 : vector<64x24xf32>
    %285 = arith.subf %284, %148 : vector<64x24xf32>
    %286 = arith.mulf %25, %285 : vector<64x24xf32>
    %287 = arith.addf %281, %286 : vector<64x24xf32>
    %288 = arith.addf %68, %287 : vector<64x24xf32>
    %289 = arith.addf %54, %34 : vector<64x24xf32>
    %cst_101 = arith.constant 9.99999993E-9 : f32
    %290 = vector.broadcast %cst_101 : f32 to vector<64x24xf32>
    %291 = arith.addf %289, %290 : vector<64x24xf32>
    %292 = math.log %291 : vector<64x24xf32>
    %293 = arith.addf %25, %54 : vector<64x24xf32>
    %cst_102 = arith.constant 1.000000e+00 : f32
    %294 = vector.broadcast %cst_102 : f32 to vector<64x24xf32>
    %295 = arith.mulf %294, %293 : vector<64x24xf32>
    %cst_103 = arith.constant 52.4583321 : f32
    %296 = vector.broadcast %cst_103 : f32 to vector<64x24xf32>
    %297 = arith.addf %295, %296 : vector<64x24xf32>
    %298 = arith.mulf %297, %293 : vector<64x24xf32>
    %cst_104 = arith.constant 1203.83423 : f32
    %299 = vector.broadcast %cst_104 : f32 to vector<64x24xf32>
    %300 = arith.addf %298, %299 : vector<64x24xf32>
    %301 = arith.mulf %300, %293 : vector<64x24xf32>
    %cst_105 = arith.constant 15784.8809 : f32
    %302 = vector.broadcast %cst_105 : f32 to vector<64x24xf32>
    %303 = arith.addf %301, %302 : vector<64x24xf32>
    %304 = arith.mulf %303, %293 : vector<64x24xf32>
    %cst_106 = arith.constant 129347.258 : f32
    %305 = vector.broadcast %cst_106 : f32 to vector<64x24xf32>
    %306 = arith.addf %304, %305 : vector<64x24xf32>
    %307 = arith.mulf %306, %293 : vector<64x24xf32>
    %cst_107 = arith.constant 678289.688 : f32
    %308 = vector.broadcast %cst_107 : f32 to vector<64x24xf32>
    %309 = arith.addf %307, %308 : vector<64x24xf32>
    %310 = arith.mulf %309, %293 : vector<64x24xf32>
    %cst_108 = arith.constant 2222880.5 : f32
    %311 = vector.broadcast %cst_108 : f32 to vector<64x24xf32>
    %312 = arith.addf %310, %311 : vector<64x24xf32>
    %313 = arith.mulf %312, %293 : vector<64x24xf32>
    %cst_109 = arith.constant 0x4A7E0D50 : f32
    %314 = vector.broadcast %cst_109 : f32 to vector<64x24xf32>
    %315 = arith.addf %313, %314 : vector<64x24xf32>
    %316 = arith.mulf %315, %293 : vector<64x24xf32>
    %cst_110 = arith.constant 3409662.75 : f32
    %317 = vector.broadcast %cst_110 : f32 to vector<64x24xf32>
    %318 = arith.addf %316, %317 : vector<64x24xf32>
    %cst_111 = arith.constant 1.000000e+00 : f32
    %319 = vector.broadcast %cst_111 : f32 to vector<64x24xf32>
    %320 = arith.mulf %319, %293 : vector<64x24xf32>
    %cst_112 = arith.constant 2.800000e+01 : f32
    %321 = vector.broadcast %cst_112 : f32 to vector<64x24xf32>
    %322 = arith.addf %320, %321 : vector<64x24xf32>
    %323 = arith.mulf %322, %293 : vector<64x24xf32>
    %cst_113 = arith.constant 3.220000e+02 : f32
    %324 = vector.broadcast %cst_113 : f32 to vector<64x24xf32>
    %325 = arith.addf %323, %324 : vector<64x24xf32>
    %326 = arith.mulf %325, %293 : vector<64x24xf32>
    %cst_114 = arith.constant 1.960000e+03 : f32
    %327 = vector.broadcast %cst_114 : f32 to vector<64x24xf32>
    %328 = arith.addf %326, %327 : vector<64x24xf32>
    %329 = arith.mulf %328, %293 : vector<64x24xf32>
    %cst_115 = arith.constant 6.769000e+03 : f32
    %330 = vector.broadcast %cst_115 : f32 to vector<64x24xf32>
    %331 = arith.addf %329, %330 : vector<64x24xf32>
    %332 = arith.mulf %331, %293 : vector<64x24xf32>
    %cst_116 = arith.constant 1.313200e+04 : f32
    %333 = vector.broadcast %cst_116 : f32 to vector<64x24xf32>
    %334 = arith.addf %332, %333 : vector<64x24xf32>
    %335 = arith.mulf %334, %293 : vector<64x24xf32>
    %cst_117 = arith.constant 1.306800e+04 : f32
    %336 = vector.broadcast %cst_117 : f32 to vector<64x24xf32>
    %337 = arith.addf %335, %336 : vector<64x24xf32>
    %338 = arith.mulf %337, %293 : vector<64x24xf32>
    %cst_118 = arith.constant 5.040000e+03 : f32
    %339 = vector.broadcast %cst_118 : f32 to vector<64x24xf32>
    %340 = arith.addf %338, %339 : vector<64x24xf32>
    %341 = arith.mulf %340, %293 : vector<64x24xf32>
    %cst_119 = arith.constant 0.000000e+00 : f32
    %342 = vector.broadcast %cst_119 : f32 to vector<64x24xf32>
    %343 = arith.addf %341, %342 : vector<64x24xf32>
    %cst_120 = arith.constant 6.500000e+00 : f32
    %344 = vector.broadcast %cst_120 : f32 to vector<64x24xf32>
    %345 = arith.addf %293, %344 : vector<64x24xf32>
    %cst_121 = arith.constant 5.000000e-01 : f32
    %346 = vector.broadcast %cst_121 : f32 to vector<64x24xf32>
    %347 = arith.subf %293, %346 : vector<64x24xf32>
    %348 = math.log %345 : vector<64x24xf32>
    %349 = arith.mulf %347, %348 : vector<64x24xf32>
    %cst_122 = arith.constant 0.918938517 : f32
    %350 = vector.broadcast %cst_122 : f32 to vector<64x24xf32>
    %351 = arith.addf %350, %349 : vector<64x24xf32>
    %352 = arith.subf %351, %345 : vector<64x24xf32>
    %353 = arith.divf %318, %343 : vector<64x24xf32>
    %354 = math.log %353 : vector<64x24xf32>
    %355 = arith.addf %352, %354 : vector<64x24xf32>
    %cst_123 = arith.constant 1.000000e+00 : f32
    %356 = vector.broadcast %cst_123 : f32 to vector<64x24xf32>
    %357 = arith.mulf %356, %54 : vector<64x24xf32>
    %cst_124 = arith.constant 52.4583321 : f32
    %358 = vector.broadcast %cst_124 : f32 to vector<64x24xf32>
    %359 = arith.addf %357, %358 : vector<64x24xf32>
    %360 = arith.mulf %359, %54 : vector<64x24xf32>
    %cst_125 = arith.constant 1203.83423 : f32
    %361 = vector.broadcast %cst_125 : f32 to vector<64x24xf32>
    %362 = arith.addf %360, %361 : vector<64x24xf32>
    %363 = arith.mulf %362, %54 : vector<64x24xf32>
    %cst_126 = arith.constant 15784.8809 : f32
    %364 = vector.broadcast %cst_126 : f32 to vector<64x24xf32>
    %365 = arith.addf %363, %364 : vector<64x24xf32>
    %366 = arith.mulf %365, %54 : vector<64x24xf32>
    %cst_127 = arith.constant 129347.258 : f32
    %367 = vector.broadcast %cst_127 : f32 to vector<64x24xf32>
    %368 = arith.addf %366, %367 : vector<64x24xf32>
    %369 = arith.mulf %368, %54 : vector<64x24xf32>
    %cst_128 = arith.constant 678289.688 : f32
    %370 = vector.broadcast %cst_128 : f32 to vector<64x24xf32>
    %371 = arith.addf %369, %370 : vector<64x24xf32>
    %372 = arith.mulf %371, %54 : vector<64x24xf32>
    %cst_129 = arith.constant 2222880.5 : f32
    %373 = vector.broadcast %cst_129 : f32 to vector<64x24xf32>
    %374 = arith.addf %372, %373 : vector<64x24xf32>
    %375 = arith.mulf %374, %54 : vector<64x24xf32>
    %cst_130 = arith.constant 0x4A7E0D50 : f32
    %376 = vector.broadcast %cst_130 : f32 to vector<64x24xf32>
    %377 = arith.addf %375, %376 : vector<64x24xf32>
    %378 = arith.mulf %377, %54 : vector<64x24xf32>
    %cst_131 = arith.constant 3409662.75 : f32
    %379 = vector.broadcast %cst_131 : f32 to vector<64x24xf32>
    %380 = arith.addf %378, %379 : vector<64x24xf32>
    %cst_132 = arith.constant 1.000000e+00 : f32
    %381 = vector.broadcast %cst_132 : f32 to vector<64x24xf32>
    %382 = arith.mulf %381, %54 : vector<64x24xf32>
    %cst_133 = arith.constant 2.800000e+01 : f32
    %383 = vector.broadcast %cst_133 : f32 to vector<64x24xf32>
    %384 = arith.addf %382, %383 : vector<64x24xf32>
    %385 = arith.mulf %384, %54 : vector<64x24xf32>
    %cst_134 = arith.constant 3.220000e+02 : f32
    %386 = vector.broadcast %cst_134 : f32 to vector<64x24xf32>
    %387 = arith.addf %385, %386 : vector<64x24xf32>
    %388 = arith.mulf %387, %54 : vector<64x24xf32>
    %cst_135 = arith.constant 1.960000e+03 : f32
    %389 = vector.broadcast %cst_135 : f32 to vector<64x24xf32>
    %390 = arith.addf %388, %389 : vector<64x24xf32>
    %391 = arith.mulf %390, %54 : vector<64x24xf32>
    %cst_136 = arith.constant 6.769000e+03 : f32
    %392 = vector.broadcast %cst_136 : f32 to vector<64x24xf32>
    %393 = arith.addf %391, %392 : vector<64x24xf32>
    %394 = arith.mulf %393, %54 : vector<64x24xf32>
    %cst_137 = arith.constant 1.313200e+04 : f32
    %395 = vector.broadcast %cst_137 : f32 to vector<64x24xf32>
    %396 = arith.addf %394, %395 : vector<64x24xf32>
    %397 = arith.mulf %396, %54 : vector<64x24xf32>
    %cst_138 = arith.constant 1.306800e+04 : f32
    %398 = vector.broadcast %cst_138 : f32 to vector<64x24xf32>
    %399 = arith.addf %397, %398 : vector<64x24xf32>
    %400 = arith.mulf %399, %54 : vector<64x24xf32>
    %cst_139 = arith.constant 5.040000e+03 : f32
    %401 = vector.broadcast %cst_139 : f32 to vector<64x24xf32>
    %402 = arith.addf %400, %401 : vector<64x24xf32>
    %403 = arith.mulf %402, %54 : vector<64x24xf32>
    %cst_140 = arith.constant 0.000000e+00 : f32
    %404 = vector.broadcast %cst_140 : f32 to vector<64x24xf32>
    %405 = arith.addf %403, %404 : vector<64x24xf32>
    %cst_141 = arith.constant 6.500000e+00 : f32
    %406 = vector.broadcast %cst_141 : f32 to vector<64x24xf32>
    %407 = arith.addf %54, %406 : vector<64x24xf32>
    %cst_142 = arith.constant 5.000000e-01 : f32
    %408 = vector.broadcast %cst_142 : f32 to vector<64x24xf32>
    %409 = arith.subf %54, %408 : vector<64x24xf32>
    %410 = math.log %407 : vector<64x24xf32>
    %411 = arith.mulf %409, %410 : vector<64x24xf32>
    %cst_143 = arith.constant 0.918938517 : f32
    %412 = vector.broadcast %cst_143 : f32 to vector<64x24xf32>
    %413 = arith.addf %412, %411 : vector<64x24xf32>
    %414 = arith.subf %413, %407 : vector<64x24xf32>
    %415 = arith.divf %380, %405 : vector<64x24xf32>
    %416 = math.log %415 : vector<64x24xf32>
    %417 = arith.addf %414, %416 : vector<64x24xf32>
    %418 = arith.subf %355, %417 : vector<64x24xf32>
    %419 = arith.subf %418, %144 : vector<64x24xf32>
    %cst_144 = arith.constant 9.99999993E-9 : f32
    %420 = vector.broadcast %cst_144 : f32 to vector<64x24xf32>
    %421 = arith.addf %54, %420 : vector<64x24xf32>
    %422 = math.log %421 : vector<64x24xf32>
    %423 = arith.subf %422, %292 : vector<64x24xf32>
    %424 = arith.mulf %54, %423 : vector<64x24xf32>
    %425 = arith.addf %419, %424 : vector<64x24xf32>
    %cst_145 = arith.constant 9.99999993E-9 : f32
    %426 = vector.broadcast %cst_145 : f32 to vector<64x24xf32>
    %427 = arith.addf %34, %426 : vector<64x24xf32>
    %428 = math.log %427 : vector<64x24xf32>
    %429 = arith.subf %428, %292 : vector<64x24xf32>
    %430 = arith.mulf %25, %429 : vector<64x24xf32>
    %431 = arith.addf %425, %430 : vector<64x24xf32>
    %432 = arith.addf %80, %431 : vector<64x24xf32>
    %433 = arith.maximumf %288, %432 : vector<64x24xf32>
    %434 = arith.subf %288, %433 : vector<64x24xf32>
    %435 = math.exp %434 : vector<64x24xf32>
    %436 = arith.subf %432, %433 : vector<64x24xf32>
    %437 = math.exp %436 : vector<64x24xf32>
    %438 = arith.addf %435, %437 : vector<64x24xf32>
    %439 = math.log %438 : vector<64x24xf32>
    %440 = arith.addf %433, %439 : vector<64x24xf32>
    %c64_i32 = arith.constant 64 : i32
    %441 = arith.muli %arg0, %c64_i32 : i32
    %442 = tpu.iota {dimensions = array<i32: 0>} : vector<64x1xi32>
    %443 = vector.broadcast %441 : i32 to vector<64x1xi32>
    %444 = arith.addi %443, %442 : vector<64x1xi32>
    %c200_i32 = arith.constant 200 : i32
    %445 = vector.broadcast %c200_i32 : i32 to vector<64x1xi32>
    %446 = arith.cmpi slt, %444, %445 : vector<64x1xi32>
    %447 = arith.extui %446 : vector<64x1xi1> to vector<64x1xi32>
    %448 = arith.sitofp %447 : vector<64x1xi32> to vector<64x1xf32>
    %449 = vector.broadcast %448 : vector<64x1xf32> to vector<64x24xf32>
    %450 = arith.mulf %440, %449 : vector<64x24xf32>
    %451 = vector.shape_cast %450 : vector<64x24xf32> to vector<1x64x24xf32>
    %cst_146 = arith.constant dense<0.000000e+00> : vector<1xf32>
    %452 = vector.multi_reduction <add>, %451, %cst_146 [1, 2] : vector<1x64x24xf32> to vector<1xf32>
    %453 = vector.shape_cast %452 : vector<1xf32> to vector<1x1x1xf32>
    %454 = vector.extract %453[0, 0, 0] : f32 from vector<1x1x1xf32>
    %455 = vector.broadcast %454 : f32 to vector<8x128xf32>
    %c0_147 = arith.constant 0 : index
    %c0_148 = arith.constant 0 : index
    %456 = vector.load %arg9[%c0_147, %c0_148] : memref<8x128xf32, #tpu.memory_space<vmem>>, vector<8x128xf32>
    tpu.vector_store %arg9[%c0_147, %c0_148], %455 {strides = array<i32>} : memref<8x128xf32, #tpu.memory_space<vmem>>, vector<8x128xf32>,
    return
  }
  func.func @transform_0(%arg0: i32) -> (i32, i32) {
    %c0_i32 = arith.constant 0 : i32
    %c0_i32_0 = arith.constant 0 : i32
    return %arg0, %c0_i32 : i32, i32
  }
  func.func @transform_1(%arg0: i32) -> (i32, i32) {
    %c0_i32 = arith.constant 0 : i32
    %c0_i32_0 = arith.constant 0 : i32
    return %arg0, %c0_i32 : i32, i32
  }
  func.func @transform_2(%arg0: i32) -> (i32, i32) {
    %c0_i32 = arith.constant 0 : i32
    %c0_i32_0 = arith.constant 0 : i32
    return %arg0, %c0_i32 : i32, i32
  }
  func.func @transform_3(%arg0: i32) -> (i32, i32) {
    %c0_i32 = arith.constant 0 : i32
    %c0_i32_0 = arith.constant 0 : i32
    %c0_i32_1 = arith.constant 0 : i32
    return %c0_i32, %c0_i32_0 : i32, i32
  }
  func.func @transform_4(%arg0: i32) -> (i32, i32) {
    %c0_i32 = arith.constant 0 : i32
    %c0_i32_0 = arith.constant 0 : i32
    %c0_i32_1 = arith.constant 0 : i32
    return %c0_i32, %c0_i32_0 : i32, i32
  }
  func.func @transform_5(%arg0: i32) -> (i32, i32) {
    %c0_i32 = arith.constant 0 : i32
    %c0_i32_0 = arith.constant 0 : i32
    %c0_i32_1 = arith.constant 0 : i32
    return %c0_i32, %c0_i32_0 : i32, i32
  }
  func.func @transform_6(%arg0: i32) -> (i32, i32) {
    %c0_i32 = arith.constant 0 : i32
    %c0_i32_0 = arith.constant 0 : i32
    %c0_i32_1 = arith.constant 0 : i32
    return %c0_i32, %c0_i32_0 : i32, i32
  }
  func.func @transform_7(%arg0: i32) -> (i32, i32) {
    %c0_i32 = arith.constant 0 : i32
    %c0_i32_0 = arith.constant 0 : i32
    %c0_i32_1 = arith.constant 0 : i32
    return %c0_i32, %c0_i32_0 : i32, i32
  }
  func.func @transform_8(%arg0: i32) -> (i32, i32) {
    %c0_i32 = arith.constant 0 : i32
    %c0_i32_0 = arith.constant 0 : i32
    return %arg0, %c0_i32 : i32, i32
  }
}

</mosaic_0001>

<bundles_post_ra>
// kernel: mixture_nb_lognormal.2
= control target key start
LH: loop header
LB: loop body
LE: loop exit
PB: predicated region body
PF: predicated region fallthrough
CT: control target
= control target key end

     0   :  { %s557_s18 = smov 0   ;;  %s653_s0 = inlined_call_operand.vmem [shape: f32[256,32], index: 0, kind: input, shape index: {}]   ;;  %s654_s1 = inlined_call_operand.vmem [shape: f32[32,32], index: 1, kind: input, shape index: {}]   ;;  %s655_s2 = inlined_call_operand.vmem [shape: f32[1,32], index: 2, kind: input, shape index: {}]   ;;  %s656_s3 = inlined_call_operand.vmem [shape: f32[1,32], index: 3, kind: input, shape index: {}]   ;;  %s657_s4 = inlined_call_operand.vmem [shape: f32[1,32], index: 4, kind: input, shape index: {}]   ;;  %s658_s5 = inlined_call_operand.vmem [shape: f32[2,32], index: 5, kind: output, shape index: {}]  }
   0x1 LB: > { %s563_s19 = sadd.s32 4294967295, %s523_s18   ;;  %p468_p0 = scmp.ge.s32.totalorder %s523_s18, 1  ;;  %s523_s18 = sphi %s557_s18, %s15_s18  }
   0x2   : > { %p183_p1 = scmp.lt.s32.totalorder %s523_s18, 5 }
   0x4   : > { %p184_p2 = pnand %p468_p0, %p183_p1 }
   0x5   : > { %s469_s20 = sshll.u32 (!%p184_p2), %s563_s19, 3  ;;  %p471_p4 = scmp.ne.s32.totalorder (!%p184_p2), %s563_s19, 0 }
   0x6   : > { %187 = sbr.rel (%p184_p2) target bundleno = 235 (0xeb), region = 40  ;;  %p207_p3 = scmp.lt.s32.totalorder (!%p184_p2), %s469_s20, 31 }
   0xb   : > { %s660_s20 = smov (!%p207_p3, %s469_s20), 31  ;;  %215 = sbr.rel (%p471_p4) target bundleno = 19 (0x13), region = 44 }
   0xc   : > { %s470_s21 = sshll.u32 %s660_s20, 3 }
   0xd   : > { %s571_s24 = scalar_lea.vmem %s653_s0, %s470_s21 }
  0x10   : > { %vm216_vm0 = vcmask 253952   ;;  %v525_v0 = vmov 0.0  }
  0x11   : > { %217 = vst.msk [vmem:[#allocation2] sm:$0x1] %vm216_vm0, %v525_v0 }
  0x12   : > { %218 = vst.msk [vmem:[#allocation3] sm:$0x1] %vm216_vm0, %v525_v0 }
  0x13 PF: > { %v230_v1 = vld [vmem:[%s654_s1 + $0x18] sm:$0xff]  ;;  %v229_v2 = vld [vmem:[%s654_s1 + $0x10] sm:$0xff]  ;;  %v228_v3 = vld [vmem:[%s654_s1 + $0x8] sm:$0xff]  ;;  %vm235_vm1 = vcmask 261120   ;;  %v302_v13 = vlaneseq  ;;  %s480_s8 = sshll.u32 %s563_s19, 6  ;;  %v526_v29 = vmov 0.0  }
  0x14   : > { %272 = vmatpush.msra.mxu0 %v230_v1  ;;  %493 = vmatpush.msra.mxu2 %v230_v1  ;;  %v227_v4 = vld [vmem:[%s654_s1] sm:$0xff]  ;;  %v221_v7 = vld [vmem:[%s571_s24 + $0x10] sm:$0xff]  ;;  %v220_v9 = vld [vmem:[%s571_s24 + $0x8] sm:$0xff]  ;;  %v311_v15 = vstv %s480_s8  ;;  %vm375_vm10 = vcmask 253952   ;;  %p489_p5 = scmp.ne.s32.totalorder %s563_s19, 3 }
  0x15   : > { %492 = vmatpush.msra.mxu1 %v230_v1  ;;  %494 = vmatpush.msra.mxu3 %v230_v1  ;;  %v219_v5 = vld [vmem:[%s571_s24] sm:$0xff]  ;;  %v225_v8 = vld [vmem:[%s571_s24 + $0x30] sm:$0xff]  ;;  %v224_v10 = vld [vmem:[%s571_s24 + $0x28] sm:$0xff]  ;;  %v303_v14 = vshrl.u32 %v302_v13, 7 }
  0x16   : > { %273 = vmatpush.msra.mxu0 %v229_v2  ;;  %496 = vmatpush.msra.mxu2 %v229_v2  ;;  %v223_v6 = vld [vmem:[%s571_s24 + $0x20] sm:$0xff]  ;;  %v222_v11 = vld [vmem:[%s571_s24 + $0x18] sm:$0xff] }
  0x17   : > { %495 = vmatpush.msra.mxu1 %v229_v2  ;;  %497 = vmatpush.msra.mxu3 %v229_v2  ;;  %v226_v12 = vld [vmem:[%s571_s24 + $0x38] sm:$0xff]  ;;  %v305_v16 = vadd.s32 16, %v303_v14  ;;  %v312_v17 = vadd.s32 %v311_v15, %v303_v14  ;;  %v304_v18 = vadd.s32 8, %v303_v14  ;;  %v606_v19 = vld [vmem:[%s655_s2] ss:$0 sm:$0xff]  ;;  %v307_v21 = vadd.s32 32, %v303_v14 }
  0x18   : > { %274 = vmatpush.msra.mxu0 %v228_v3  ;;  %499 = vmatpush.msra.mxu2 %v228_v3  ;;  %v306_v22 = vadd.s32 24, %v303_v14  ;;  %v309_v25 = vadd.s32 48, %v303_v14  ;;  %v308_v32 = vadd.s32 40, %v303_v14  ;;  %v310_v35 = vadd.s32 56, %v303_v14 }
  0x19   : > { %498 = vmatpush.msra.mxu1 %v228_v3  ;;  %500 = vmatpush.msra.mxu3 %v228_v3  ;;  %v314_v20 = vadd.s32 %v311_v15, %v305_v16  ;;  %vm320_vm2 = vcmp.lt.s32.totalorder %v312_v17, 200  ;;  %v313_v24 = vadd.s32 %v311_v15, %v304_v18  ;;  %v316_v28 = vadd.s32 %v311_v15, %v307_v21 }
  0x1a   : > { %275 = vmatpush.msra.mxu0 %v227_v4  ;;  %502 = vmatpush.msra.mxu2 %v227_v4  ;;  %v481_v30 = vsel %vm320_vm2, 1.0, %v526_v29  ;;  %v315_v31 = vadd.s32 %v311_v15, %v306_v22  ;;  %v318_v34 = vadd.s32 %v311_v15, %v309_v25  ;;  %v317_v40 = vadd.s32 %v311_v15, %v308_v32 }
  0x1b   : > { %472 = vmatmul.msk.f32.vlgmr.msra.gmra.mxu0 %vm235_vm1, %v219_v5  ;;  %476 = vmatmul.msk.f32.vlgmr.msra.gmra.mxu2 %vm235_vm1, %v223_v6  ;;  %vm322_vm3 = vcmp.lt.s32.totalorder %v314_v20, 200  ;;  %vm321_vm4 = vcmp.lt.s32.totalorder %v313_v24, 200  ;;  %vm324_vm5 = vcmp.lt.s32.totalorder %v316_v28, 200  ;;  %v319_v45 = vadd.s32 %v311_v15, %v310_v35 }
  0x1c   : > { %501 = vmatpush.msra.mxu1 %v227_v4  ;;  %503 = vmatpush.msra.mxu3 %v227_v4  ;;  %v483_v36 = vsel %vm322_vm3, 1.0, %v526_v29  ;;  %v482_v39 = vsel %vm321_vm4, 1.0, %v526_v29  ;;  %vm323_vm6 = vcmp.lt.s32.totalorder %v315_v31, 200  ;;  %vm326_vm7 = vcmp.lt.s32.totalorder %v318_v34, 200 }
  0x1d   : > { %474 = vmatmul.msk.f32.vlgmr.msra.gmra.mxu1 %vm235_vm1, %v221_v7  ;;  %478 = vmatmul.msk.f32.vlgmr.msra.gmra.mxu3 %vm235_vm1, %v225_v8  ;;  %v485_v46 = vsel %vm324_vm5, 1.0, %v526_v29  ;;  %v484_v50 = vsel %vm323_vm6, 1.0, %v526_v29  ;;  %v487_v53 = vsel %vm326_vm7, 1.0, %v526_v29  ;;  %vm325_vm8 = vcmp.lt.s32.totalorder %v317_v40, 200 }
  0x1e   : > { %vm327_vm9 = vcmp.lt.s32.totalorder %v319_v45, 200  ;;  %v486_v1 = vsel %vm325_vm8, 1.0, %v526_v29 }
  0x23   : > { %473 = vmatmul.msk.f32.gmra.mxu0 %vm235_vm1, %v220_v9  ;;  %477 = vmatmul.msk.f32.gmra.mxu2 %vm235_vm1, %v224_v10  ;;  %v488_v10 = vsel %vm327_vm9, 1.0, %v526_v29 }
  0x25   : > { %475 = vmatmul.msk.f32.gmra.mxu1 %vm235_vm1, %v222_v11  ;;  %479 = vmatmul.msk.f32.gmra.mxu3 %vm235_vm1, %v226_v12 }
  0x98   : > { %v277_v23 = vpop.f32.mrf.mxu0 }
  0x99   : > { %v278_v26 = vadd.f32 %v606_v19, %v277_v23 }
  0x9a   : > { %v283_v27 = vpop.f32.mrf.mxu1 }
  0x9b   : > { %v284_v33 = vadd.f32 %v606_v19, %v283_v27  ;;  %v344_v37 = vmul.f32 %v481_v30, %v278_v26 }
  0x9d   : > { %v346_v41 = vmul.f32 %v483_v36, %v284_v33  ;;  %v378_v48 = vmul.f32 %v344_v37, %v278_v26  ;;  %v353_v54 = vsel %vm235_vm1, %v344_v37, 0.0 }
  0x9e   : > { %v289_v38 = vpop.f32.mrf.mxu2 }
  0x9f   : > { %v290_v42 = vadd.f32 %v606_v19, %v289_v38  ;;  %v380_v55 = vmul.f32 %v346_v41, %v284_v33  ;;  %v386_v61 = vsel %vm235_vm1, %v378_v48, 0.0  ;;  %v356_v62 = vsel %vm235_vm1, %v346_v41, 0.0  ;;  %v352_v48 = vld [vmem:[#allocation2] sm:$0x1] }
  0xa0   : > { %v280_v43 = vpop.f32.mrf.mxu0  ;;  %v295_v44 = vpop.f32.mrf.mxu3 }
  0xa1   : > { %v281_v47 = vadd.f32 %v606_v19, %v280_v43  ;;  %v348_v56 = vmul.f32 %v485_v46, %v290_v42  ;;  %v296_v60 = vadd.f32 %v606_v19, %v295_v44  ;;  %v389_v6 = vsel %vm235_vm1, %v380_v55, 0.0 }
  0xa2   : > { %v286_v49 = vpop.f32.mrf.mxu1 }
  0xa3   : > { %v345_v51 = vmul.f32 %v482_v39, %v281_v47  ;;  %v287_v52 = vadd.f32 %v606_v19, %v286_v49  ;;  %v382_v11 = vmul.f32 %v348_v56, %v290_v42  ;;  %v350_v12 = vmul.f32 %v487_v53, %v296_v60 }
  0xa4   : > { %v360_v15 = vsel %vm235_vm1, %v348_v56, 0.0 }
  0xa5   : > { %v354_v57 = vsel %vm235_vm1, %v345_v51, 0.0  ;;  %v379_v58 = vmul.f32 %v345_v51, %v281_v47  ;;  %v347_v59 = vmul.f32 %v484_v50, %v287_v52  ;;  %v393_v25 = vsel %vm235_vm1, %v382_v11, 0.0  ;;  %v377_v51 = vld [vmem:[#allocation3] sm:$0x1] }
  0xa6   : > { %v355_v63 = vadd.f32 %v354_v57, %v353_v54  ;;  %v292_v0 = vpop.f32.mrf.mxu2  ;;  %v384_v26 = vmul.f32 %v350_v12, %v296_v60  ;;  %v364_v29 = vsel %vm235_vm1, %v350_v12, 0.0 }
  0xa7   : > { %v387_v2 = vsel %vm235_vm1, %v379_v58, 0.0  ;;  %v358_v3 = vsel %vm235_vm1, %v347_v59, 0.0  ;;  %v381_v4 = vmul.f32 %v347_v59, %v287_v52  ;;  %v293_v5 = vadd.f32 %v606_v19, %v292_v0 }
  0xa8   : > { %v388_v7 = vadd.f32 %v387_v2, %v386_v61  ;;  %v357_v8 = vadd.f32 %v356_v62, %v355_v63  ;;  %v298_v9 = vpop.f32.mrf.mxu3  ;;  %v397_v34 = vsel %vm235_vm1, %v384_v26, 0.0 }
  0xa9   : > { %v349_v13 = vmul.f32 %v486_v1, %v293_v5  ;;  %v299_v14 = vadd.f32 %v606_v19, %v298_v9  ;;  %v391_v18 = vsel %vm235_vm1, %v381_v4, 0.0 }
  0xaa   : > { %v359_v16 = vadd.f32 %v358_v3, %v357_v8  ;;  %v390_v17 = vadd.f32 %v389_v6, %v388_v7 }
  0xab   : > { %v362_v20 = vsel %vm235_vm1, %v349_v13, 0.0  ;;  %v383_v21 = vmul.f32 %v349_v13, %v293_v5  ;;  %v351_v22 = vmul.f32 %v488_v10, %v299_v14 }
  0xac   : > { %v392_v23 = vadd.f32 %v391_v18, %v390_v17  ;;  %v361_v24 = vadd.f32 %v360_v15, %v359_v16 }
  0xad   : > { %v395_v19 = vsel %vm235_vm1, %v383_v21, 0.0  ;;  %v366_v30 = vsel %vm235_vm1, %v351_v22, 0.0  ;;  %v385_v31 = vmul.f32 %v351_v22, %v299_v14 }
  0xae   : > { %v363_v27 = vadd.f32 %v362_v20, %v361_v24  ;;  %v394_v28 = vadd.f32 %v393_v25, %v392_v23 }
  0xaf   : > { %v399_v37 = vsel %vm235_vm1, %v385_v31, 0.0 }
  0xb0   : > { %v396_v32 = vadd.f32 %v395_v19, %v394_v28  ;;  %v365_v33 = vadd.f32 %v364_v29, %v363_v27 }
  0xb2   : > { %v367_v35 = vadd.f32 %v366_v30, %v365_v33  ;;  %v398_v36 = vadd.f32 %v397_v34, %v396_v32 }
  0xb4   : > { %v368_v38 = vrot.slane %v367_v35, 4  ;;  %v400_v39 = vadd.f32 %v399_v37, %v398_v36 }
  0xb6   : > { %v369_v40 = vadd.f32 %v368_v38, %v367_v35  ;;  %v401_v41 = vrot.slane %v400_v39, 4 }
  0xb8   : > { %v370_v42 = vrot.slane %v369_v40, 2  ;;  %v402_v43 = vadd.f32 %v401_v41, %v400_v39 }
  0xba   : > { %v371_v44 = vadd.f32 %v370_v42, %v369_v40  ;;  %v403_v45 = vrot.slane %v402_v43, 2 }
  0xbc   : > { %v372_v46 = vrot.slane %v371_v44, 1  ;;  %v404_v47 = vadd.f32 %v403_v45, %v402_v43 }
  0xbe   : > { %v373_v49 = vadd.f32 %v372_v46, %v371_v44  ;;  %v405_v50 = vrot.slane %v404_v47, 1 }
  0xc0   : > { %v374_v52 = vadd.f32 %v373_v49, %v352_v48  ;;  %v406_v53 = vadd.f32 %v405_v50, %v404_v47  ;;  %412 = sbr.rel (%p489_p5) target bundleno = 235 (0xeb), region = 48 }
  0xc2   : > { %376 = vst.msk [vmem:[#allocation2] sm:$0x1] %vm375_vm10, %v374_v52  ;;  %v407_v54 = vadd.f32 %v406_v53, %v377_v51 }
  0xc4   : > { %408 = vst.msk [vmem:[#allocation3] sm:$0x1] %vm375_vm10, %v407_v54 }
  0xc5   : > { %v419_v3 = vld [vmem:[%s656_s3] sm:$0x1] }
  0xc6   : > { %v433_v7 = vld [vmem:[%s657_s4] sm:$0x1] }
  0xc9   : > { %v413_v55 = vld [vmem:[#allocation2] sm:$0x1] }
  0xca   : > { %v414_v57 = vmul.f32 0.005, %v413_v55 }
  0xcb   : > { %v415_v56 = vld [vmem:[#allocation3] sm:$0x1] }
  0xcc   : > { %v416_v58 = vmul.f32 0.005, %v415_v56  ;;  %v417_v59 = vmul.f32 %v414_v57, %v414_v57 }
  0xce   : > { %v418_v60 = vsub.f32 %v416_v58, %v417_v59 }
  0xd0   : > { %v420_v61 = vadd.f32 1e-05, %v418_v60 }
  0xd2   : > { %515 = vrsqrt.f32 %v420_v61  ;;  %vm427_vm11 = vweird.f32 %v420_v61 }
  0xd8   : > { %v516_v62 = vpop.eup %515 }
  0xd9   : > { %v422_v63 = vmul.f32 %v516_v62, %v420_v61  ;;  %vm428_vm12 = vweird.f32 %v516_v62 }
  0xda   : > { %vm429_vm13 = vmor %vm427_vm11, %vm428_vm12 }
  0xdb   : > { %v423_v0 = vmul.f32 %v516_v62, %v422_v63 }
  0xdd   : > { %v424_v1 = vmul.f32 0.5, %v423_v0 }
  0xdf   : > { %v425_v2 = vsub.f32 1.5, %v424_v1 }
  0xe1   : > { %v426_v4 = vmul.f32 %v516_v62, %v425_v2 }
  0xe3   : > { %v430_v5 = vsel %vm429_vm13, %v516_v62, %v426_v4 }
  0xe4   : > { %v431_v6 = vmul.f32 %v430_v5, %v419_v3 }
  0xe6   : > { %432 = vst.msk [vmem:[%s658_s5] sm:$0x1] %vm375_vm10, %v431_v6  ;;  %v434_v8 = vmul.f32 %v431_v6, %v414_v57 }
  0xe8   : > { %v435_v9 = vsub.f32 %v433_v7, %v434_v8 }
  0xea   : > { %436 = vst.msk [vmem:[%s658_s5 + $0x1] sm:$0x1] %vm375_vm10, %v435_v9 }
  0xeb PF: > { %s15_s18 = sadd.s32 1, %s523_s18  }
  0xec   : > { %p12_p6 = scmp.ge.s32.totalorder %s15_s18, 6  }
  0xee   :  { %14 = sbr.rel (!%p12_p6) target bundleno = 1 (0x1), region = 74 }

// kernel: mixture_nb_lognormal.3
= control target key start
LH: loop header
LB: loop body
LE: loop exit
PB: predicated region body
PF: predicated region fallthrough
CT: control target
= control target key end

     0   :  { %s5098_s27 = smov 0   ;;  %s7937_s0 = inlined_call_operand.vmem [shape: f32[256,32], index: 0, kind: input, shape index: {}]   ;;  %s7938_s1 = inlined_call_operand.vmem [shape: f32[256,24], index: 1, kind: input, shape index: {}]   ;;  %s7939_s2 = inlined_call_operand.vmem [shape: f32[256,24], index: 2, kind: input, shape index: {}]   ;;  %s7940_s3 = inlined_call_operand.vmem [shape: f32[32,32], index: 3, kind: input, shape index: {}]   ;;  %s7941_s4 = inlined_call_operand.vmem [shape: f32[1,32], index: 4, kind: input, shape index: {}]   ;;  %s7942_s5 = inlined_call_operand.vmem [shape: f32[2,32], index: 5, kind: input, shape index: {}]   ;;  %s7943_s6 = inlined_call_operand.vmem [shape: f32[32,144], index: 6, kind: input, shape index: {}]   ;;  %s7944_s7 = inlined_call_operand.vmem [shape: f32[1,144], index: 7, kind: input, shape index: {}]   ;;  %s7945_s8 = inlined_call_operand.vmem [shape: f32[32,128], index: 8, kind: output, shape index: {}]  }
   0x1 LB: > { %s5104_s28 = sadd.s32 4294967295, %s5041_s27   ;;  %p4373_p0 = scmp.ge.s32.totalorder %s5041_s27, 1  ;;  %s5041_s27 = sphi %s5098_s27, %s18_s27  }
   0x2   : > { %p285_p1 = scmp.lt.s32.totalorder %s5041_s27, 5 }
   0x4   : > { %p286_p2 = pnand %p4373_p0, %p285_p1 }
   0x6   : > { %289 = sbr.rel (%p286_p2) target bundleno = 1605 (0x645), region = 52 }
   0xb   : > { %v361_v0 = vld [vmem:[%s7940_s3 + $0x18] sm:$0xff]  ;;  %v360_v1 = vld [vmem:[%s7940_s3 + $0x10] sm:$0xff]  ;;  %s4374_s11 = sshll.u32 %s5104_s28, 3  ;;  %v359_v2 = vld [vmem:[%s7940_s3 + $0x8] sm:$0xff]  ;;  %vm366_vm0 = vcmask 261120   ;;  %s5043_s20 = smov 24  }
   0xc   : > { %403 = vmatpush.msra.mxu0 %v361_v0  ;;  %4456 = vmatpush.msra.mxu3 %v361_v0  ;;  %p329_p3 = scmp.lt.s32.totalorder %s4374_s11, 31  ;;  %v358_v3 = vld [vmem:[%s7940_s3] sm:$0xff]  ;;  %v466_v12 = vld [vmem:[%s7943_s6 + $0x30] sm:$0xff]  ;;  %v467_v13 = vld [vmem:[%s7943_s6 + $0x38] sm:$0xff]  ;;  %s5044_s9 = smov 104  }
   0xd   : > { %510 = vmatpush.msra.mxu1 %v466_v12  ;;  %551 = vmatpush.msra.mxu2 %v467_v13  ;;  %v464_v14 = vld [vmem:[%s7943_s6 + $0x20] sm:$0xff]  ;;  %v465_v15 = vld [vmem:[%s7943_s6 + $0x28] sm:$0xff]  ;;  %v462_v16 = vld [vmem:[%s7943_s6 + $0x10] sm:$0xff]  ;;  %s5045_s10 = smov 32   ;;  %s5047_s12 = smov 72  }
   0xe   : > { %404 = vmatpush.msra.mxu0 %v360_v1  ;;  %4457 = vmatpush.msra.mxu3 %v360_v1  ;;  %s8249_s11 = smov (!%p329_p3, %s4374_s11), 31  ;;  %v463_v17 = vld [vmem:[%s7943_s6 + $0x18] sm:$0xff]  ;;  %v460_v18 = vld [vmem:[%s7943_s6] sm:$0xff]  ;;  %v461_v19 = vld [vmem:[%s7943_s6 + $0x8] sm:$0xff]  ;;  %s5048_s13 = smov 96  }
   0xf   : > { %s5121_s16 = sshll.u32 %s8249_s11, 3  ;;  %511 = vmatpush.msra.mxu1 %v464_v14  ;;  %552 = vmatpush.msra.mxu2 %v465_v15  ;;  %v5170_v21 = vld [vmem:[%s7941_s4] ss:$0 sm:$0xff]  ;;  %v5181_v25 = vld [vmem:[%s7942_s5 + $0x1] ss:$0 sm:$0xff]  ;;  %s5046_s11 = smov 8  }
  0x10   : > { %405 = vmatpush.msra.mxu0 %v359_v2  ;;  %4458 = vmatpush.msra.mxu3 %v359_v2  ;;  %s332_s19 = scalar_lea.vmem %s7937_s0, %s5121_s16  ;;  %v5175_v22 = vld [vmem:[%s7942_s5] ss:$0 sm:$0xff]  ;;  %s6024_s17 = scalar_lea.vmem %s7938_s1, %s5121_s16 }
  0x11   : > { %v350_v4 = vld [vmem:[%s332_s19] sm:$0xff]  ;;  %v356_v5 = vld [vmem:[%s332_s19 + $0x30] sm:$0xff]  ;;  %v351_v6 = vld [vmem:[%s332_s19 + $0x8] sm:$0xff]  ;;  %512 = vmatpush.msra.mxu1 %v462_v16  ;;  %553 = vmatpush.msra.mxu2 %v463_v17  ;;  %s5050_s18 = smov 80   ;;  %p346_p4 = scmp.lt.s32.totalorder %s5104_s28, 3 }
  0x12   : > { %406 = vmatpush.msra.mxu0 %v358_v3  ;;  %4459 = vmatpush.msra.mxu3 %v358_v3  ;;  %v357_v7 = vld [vmem:[%s332_s19 + $0x38] sm:$0xff]  ;;  %v352_v8 = vld [vmem:[%s332_s19 + $0x10] sm:$0xff]  ;;  %v354_v10 = vld [vmem:[%s332_s19 + $0x20] sm:$0xff] }
  0x13   : > { %4381 = vmatmul.msk.f32.vlgmr.msra.gmra.mxu0 %vm366_vm0, %v350_v4  ;;  %4387 = vmatmul.msk.f32.vlgmr.msra.gmra.mxu3 %vm366_vm0, %v356_v5  ;;  %v353_v9 = vld [vmem:[%s332_s19 + $0x18] sm:$0xff]  ;;  %v355_v11 = vld [vmem:[%s332_s19 + $0x28] sm:$0xff]  ;;  %s5163_s19 = scalar_lea.vmem %s7939_s2, %s5121_s16  ;;  %s5049_s16 = smov 48  }
  0x14   : > { %4460 = vmatpush.msrb.mxu3 %v466_v12  ;;  %513 = vmatpush.msra.mxu1 %v460_v18  ;;  %v604_v20 = vld [vmem:[%s5163_s19] sm:$0xff]  ;;  %v606_v26 = vld [vmem:[%s5163_s19 + $0x10] sm:$0xff]  ;;  %v605_v27 = vld [vmem:[%s5163_s19 + $0x8] sm:$0xff] }
  0x15   : > { %554 = vmatpush.msra.mxu2 %v461_v19  ;;  %620 = vrot.lane.b32.xlu0 %v604_v20, %s5043_s20  ;;  %v607_v36 = vld [vmem:[%s5163_s19 + $0x18] sm:$0xff]  ;;  %v610_v37 = vld [vmem:[%s5163_s19 + $0x30] sm:$0xff]  ;;  %v608_v49 = vld [vmem:[%s5163_s19 + $0x20] sm:$0xff] }
  0x16   : > { %4461 = vmatpush.msrb.mxu3 %v464_v14  ;;  %624 = vrot.lane.b32.xlu1 %v606_v26, %s5043_s20  ;;  %v611_v48 = vld [vmem:[%s5163_s19 + $0x38] sm:$0xff]  ;;  %v609_v55 = vld [vmem:[%s5163_s19 + $0x28] sm:$0xff]  ;;  %s5051_s19 = smov 56  }
  0x17   : > { %628 = vrot.lane.b32.xlu2 %v608_v49, %s5043_s20 }
  0x18   : > { %4462 = vmatpush.msrb.mxu3 %v462_v16 }
  0x1a   : > { %4463 = vmatpush.msrb.mxu3 %v460_v18 }
  0x1b   : > { %4382 = vmatmul.msk.f32.gmra.mxu0 %vm366_vm0, %v351_v6  ;;  %4388 = vmatmul.msk.f32.gmra.mxu3 %vm366_vm0, %v357_v7  ;;  %v468_v7 = vld [vmem:[%s7944_s7] sm:$0x3] }
  0x1c   : > { %4464 = vmatpush.msra.mxu3 %v467_v13  ;;  %v5245_v12 = vperm.slane %v468_v7, 1 }
  0x1d   : > { %622 = vrot.lane.b32.xlu0 %v605_v27, %s5043_s20 }
  0x1e   : > { %4465 = vmatpush.msra.mxu3 %v465_v15  ;;  %626 = vrot.lane.b32.xlu1 %v607_v36, %s5043_s20 }
  0x1f   : > { %630 = vrot.lane.b32.xlu2 %v609_v55, %s5043_s20 }
  0x20   : > { %4466 = vmatpush.msra.mxu3 %v463_v17 }
  0x22   : > { %4467 = vmatpush.msra.mxu3 %v461_v19 }
  0x23   : > { %4383 = vmatmul.msk.f32.gmra.mxu0 %vm366_vm0, %v352_v8  ;;  %v5239_v8 = vperm.slane %v468_v7, 0 }
  0x25   : > { %632 = vrot.lane.b32.xlu0 %v610_v37, %s5043_s20 }
  0x26   : > { %634 = vrot.lane.b32.xlu1 %v611_v48, %s5043_s20  ;;  %s4445_s20 = sshll.u32 %s5104_s28, 6  ;;  %s8251_s28 = smov (!%p346_p4, %s5104_s28), 3 }
  0x27   : > { %s4380_s21 = sshll.u32 %s8251_s28, 3 }
  0x28   : > { %s349_s24 = scalar_lea.vmem %s7945_s8, %s4380_s21 }
  0x2b   : > { %4384 = vmatmul.msk.f32.gmra.mxu0 %vm366_vm0, %v353_v9 }
  0x33   : > { %4385 = vmatmul.msk.f32.gmra.mxu0 %vm366_vm0, %v354_v10 }
  0x3b   : > { %4386 = vmatmul.msk.f32.gmra.mxu0 %vm366_vm0, %v355_v11 }
  0x87   : > { %v621_v13 = vpop.permute.xlu0 %620 }
  0x90   : > { %v408_v23 = vpop.f32.mrf.mxu0 }
  0x91   : > { %v409_v24 = vadd.f32 %v5170_v21, %v408_v23 }
  0x93   : > { %v434_v28 = vmul.f32 %v5175_v22, %v409_v24 }
  0x95   : > { %v444_v29 = vadd.f32 %v5181_v25, %v434_v28 }
  0x96   : > { %v426_v30 = vpop.f32.mrf.mxu3 }
  0x97   : > { %v427_v31 = vadd.f32 %v5170_v21, %v426_v30  ;;  %v452_v32 = vmax.f32 %v444_v29, 0.0  ;;  %v623_v30 = vpop.permute.xlu0 %622 }
  0x98   : > { %v411_v33 = vpop.f32.mrf.mxu0 }
  0x99   : > { %v440_v34 = vmul.f32 %v5175_v22, %v427_v31  ;;  %v412_v35 = vadd.f32 %v5170_v21, %v411_v33  ;;  %4389 = vmatmul.msk.f32.vlgmr.msra.gmra.mxu1 %vm366_vm0, %v452_v32  ;;  %4397 = vmatmul.msk.f32.vlgmr.msra.gmra.mxu2 %vm366_vm0, %v452_v32 }
  0x9b   : > { %v450_v38 = vadd.f32 %v5181_v25, %v440_v34  ;;  %v435_v39 = vmul.f32 %v5175_v22, %v412_v35 }
  0x9d   : > { %v458_v40 = vmax.f32 %v450_v38, 0.0  ;;  %v445_v41 = vadd.f32 %v5181_v25, %v435_v39 }
  0x9e   : > { %v429_v42 = vpop.f32.mrf.mxu3 }
  0x9f   : > { %v430_v43 = vadd.f32 %v5170_v21, %v429_v42  ;;  %4395 = vmatmul.msk.f32.vlgmr.msrb.gmra.mxu3 %vm366_vm0, %v458_v40  ;;  %v453_v44 = vmax.f32 %v445_v41, 0.0 }
  0xa0   : > { %v414_v45 = vpop.f32.mrf.mxu0 }
  0xa1   : > { %v441_v46 = vmul.f32 %v5175_v22, %v430_v43  ;;  %v415_v47 = vadd.f32 %v5170_v21, %v414_v45  ;;  %4390 = vmatmul.msk.f32.gmra.mxu1 %vm366_vm0, %v453_v44  ;;  %4398 = vmatmul.msk.f32.gmra.mxu2 %vm366_vm0, %v453_v44 }
  0xa3   : > { %v436_v50 = vmul.f32 %v5175_v22, %v415_v47  ;;  %v451_v51 = vadd.f32 %v5181_v25, %v441_v46 }
  0xa5   : > { %v459_v52 = vmax.f32 %v451_v51, 0.0  ;;  %v446_v53 = vadd.f32 %v5181_v25, %v436_v50 }
  0xa7   : > { %4396 = vmatmul.msk.f32.gmra.mxu3 %vm366_vm0, %v459_v52  ;;  %v454_v54 = vmax.f32 %v446_v53, 0.0 }
  0xa8   : > { %v417_v56 = vpop.f32.mrf.mxu0 }
  0xa9   : > { %v418_v57 = vadd.f32 %v5170_v21, %v417_v56  ;;  %4391 = vmatmul.msk.f32.gmra.mxu1 %vm366_vm0, %v454_v54  ;;  %4399 = vmatmul.msk.f32.gmra.mxu2 %vm366_vm0, %v454_v54  ;;  %v633_v56 = vpop.permute.xlu0 %632 }
  0xab   : > { %v437_v58 = vmul.f32 %v5175_v22, %v418_v57 }
  0xad   : > { %v447_v59 = vadd.f32 %v5181_v25, %v437_v58 }
  0xaf   : > { %4403 = vmatmul.msk.f32.vlgmr.msra.gmra.mxu3 %vm366_vm0, %v458_v40  ;;  %v455_v60 = vmax.f32 %v447_v59, 0.0 }
  0xb0   : > { %v420_v61 = vpop.f32.mrf.mxu0 }
  0xb1   : > { %v421_v62 = vadd.f32 %v5170_v21, %v420_v61  ;;  %4392 = vmatmul.msk.f32.gmra.mxu1 %vm366_vm0, %v455_v60  ;;  %4400 = vmatmul.msk.f32.gmra.mxu2 %vm366_vm0, %v455_v60 }
  0xb3   : > { %v438_v63 = vmul.f32 %v5175_v22, %v421_v62 }
  0xb5   : > { %v448_v0 = vadd.f32 %v5181_v25, %v438_v63 }
  0xb7   : > { %4404 = vmatmul.msk.f32.gmra.mxu3 %vm366_vm0, %v459_v52  ;;  %v456_v1 = vmax.f32 %v448_v0, 0.0  ;;  %v625_v52 = vpop.permute.xlu1 %624 }
  0xb8   : > { %v423_v2 = vpop.f32.mrf.mxu0 }
  0xb9   : > { %v424_v3 = vadd.f32 %v5170_v21, %v423_v2  ;;  %4393 = vmatmul.msk.f32.gmra.mxu1 %vm366_vm0, %v456_v1  ;;  %4401 = vmatmul.msk.f32.gmra.mxu2 %vm366_vm0, %v456_v1 }
  0xbb   : > { %v439_v4 = vmul.f32 %v5175_v22, %v424_v3 }
  0xbd   : > { %v449_v5 = vadd.f32 %v5181_v25, %v439_v4 }
  0xbf   : > { %v457_v6 = vmax.f32 %v449_v5, 0.0 }
  0xc1   : > { %4394 = vmatmul.msk.f32.gmra.mxu1 %vm366_vm0, %v457_v6  ;;  %4402 = vmatmul.msk.f32.gmra.mxu2 %vm366_vm0, %v457_v6 }
 0x116   : > { %v515_v9 = vpop.f32.mrf.mxu1 }
 0x117   : > { %v5242_v10 = vadd.f32 %v515_v9, %v5239_v8 }
 0x119   : > { %8034 = vst [vmem:[#allocation2_spill] sm:$0xff] %v5242_v10  ;;  %v764_v11 = vand.u32 2147483647, %v5242_v10  ;;  %v588_v14 = vmul.f32 1.442695, %v5242_v10  ;;  %v756_v58 = vmax.f32 %v5242_v10, 0.0 }
 0x11b   : > { %v772_v15 = vsub.f32 0.0, %v764_v11  ;;  %4491 = vpow2.f32 %v588_v14 }
 0x11c   : > { %v556_v16 = vpop.f32.mrf.mxu2 }
 0x11d   : > { %v780_v17 = vmul.f32 1.442695, %v772_v15  ;;  %v5249_v18 = vadd.f32 %v556_v16, %v5245_v12 }
 0x11e   : > { %v518_v19 = vpop.f32.mrf.mxu1 }
 0x11f   : > { %4493 = vpow2.f32 %v780_v17  ;;  %v836_v20 = vand.u32 2147483647, %v5249_v18  ;;  %v5253_v21 = vadd.f32 %v518_v19, %v5239_v8 }
 0x121   : > { %8035 = vst [vmem:[#allocation3_spill] sm:$0xff] %v5253_v21  ;;  %v5255_v22 = vpop.eup %4491  ;;  %v765_v23 = vand.u32 2147483647, %v5253_v21  ;;  %v590_v24 = vmul.f32 1.442695, %v5253_v21  ;;  %v844_v25 = vsub.f32 0.0, %v836_v20 }
 0x122   : > { %v644_v26 = vmul.f32 %v5255_v22, %v621_v13  ;;  %v533_v27 = vpop.f32.mrf.mxu3 }
 0x123   : > { %v773_v28 = vsub.f32 0.0, %v765_v23  ;;  %v5261_v29 = vadd.f32 %v533_v27, %v5239_v8  ;;  %4495 = vpow2.f32 %v590_v24  ;;  %v852_v35 = vmul.f32 1.442695, %v844_v25 }
 0x124   : > { %v559_v31 = vpop.f32.mrf.mxu2  ;;  %660 = vrot.lane.b32.xlu2 %v644_v26, %s5044_s9 }
 0x125   : > { %8036 = vst [vmem:[#allocation4_spill] sm:$0xff] %v5261_v29  ;;  %v4494_v32 = vpop.eup %4493  ;;  %v782_v33 = vmul.f32 1.442695, %v773_v28  ;;  %v600_v37 = vmul.f32 1.442695, %v5261_v29  ;;  %v5267_v39 = vadd.f32 %v559_v31, %v5245_v12  ;;  %v757_v28 = vmax.f32 %v5253_v21, 0.0 }
 0x126   : > { %v796_v34 = vadd.f32 1.0, %v4494_v32  ;;  %v521_v36 = vpop.f32.mrf.mxu1  ;;  %v770_v38 = vand.u32 2147483647, %v5261_v29 }
 0x127   : > { %4497 = vpow2.f32 %v782_v33  ;;  %v5270_v40 = vadd.f32 %v521_v36, %v5239_v8  ;;  %v837_v47 = vand.u32 2147483647, %v5267_v39 }
 0x128   : > { %4499 = vlog2.f32 %v796_v34  ;;  %v778_v46 = vsub.f32 0.0, %v770_v38  ;;  %v5311_v34 = vpop.permute.xlu1 %626 }
 0x129   : > { %8037 = vst [vmem:[#allocation5_spill] sm:$0xff] %v5270_v40  ;;  %v5272_v41 = vpop.eup %4495  ;;  %v766_v42 = vand.u32 2147483647, %v5270_v40  ;;  %4501 = vpow2.f32 %v600_v37  ;;  %v592_v45 = vmul.f32 1.442695, %v5270_v40  ;;  %v845_v0 = vsub.f32 0.0, %v837_v47 }
 0x12a   : > { %4503 = vpow2.f32 %v852_v35  ;;  %v645_v43 = vmul.f32 %v5272_v41, %v623_v30  ;;  %v536_v44 = vpop.f32.mrf.mxu3  ;;  %v792_v63 = vmul.f32 1.442695, %v778_v46 }
 0x12b   : > { %v774_v48 = vsub.f32 0.0, %v766_v42  ;;  %v5279_v49 = vadd.f32 %v536_v44, %v5239_v8  ;;  %4505 = vpow2.f32 %v592_v45  ;;  %v854_v15 = vmul.f32 1.442695, %v845_v0 }
 0x12c   : > { %v562_v50 = vpop.f32.mrf.mxu2  ;;  %662 = vrot.lane.b32.xlu0 %v645_v43, %s5044_s9 }
 0x12d   : > { %8038 = vst [vmem:[#allocation6_spill] sm:$0xff] %v5279_v49  ;;  %v4498_v51 = vpop.eup %4497  ;;  %v784_v53 = vmul.f32 1.442695, %v774_v48  ;;  %v771_v54 = vand.u32 2147483647, %v5279_v49  ;;  %v5284_v55 = vadd.f32 %v562_v50, %v5245_v12 }
 0x12e   : > { %v4500_v57 = vpop.eup %4499  ;;  %v797_v59 = vadd.f32 1.0, %v4498_v51  ;;  %v524_v60 = vpop.f32.mrf.mxu1  ;;  %v602_v46 = vmul.f32 1.442695, %v5279_v49 }
 0x12f   : > { %v5287_v61 = vpop.eup %4501  ;;  %v805_v62 = vmul.f32 0.6931472, %v4500_v57  ;;  %v779_v1 = vsub.f32 0.0, %v771_v54  ;;  %v838_v3 = vand.u32 2147483647, %v5284_v55  ;;  %v5292_v5 = vadd.f32 %v524_v60, %v5239_v8 }
 0x130   : > { %v4504_v2 = vpop.eup %4503  ;;  %4507 = vlog2.f32 %v797_v59  ;;  %v650_v4 = vmul.f32 %v5287_v61, %v633_v56 }
 0x131   : > { %8039 = vst [vmem:[#allocation7_spill] sm:$0xff] %v5292_v5  ;;  %4509 = vpow2.f32 %v784_v53  ;;  %v794_v6 = vmul.f32 1.442695, %v779_v1  ;;  %v5294_v7 = vpop.eup %4505  ;;  %v5296_v9 = vadd.f32 %v805_v62, %v756_v58  ;;  %v846_v11 = vsub.f32 0.0, %v838_v3 }
 0x132   : > { %v767_v13 = vand.u32 2147483647, %v5292_v5  ;;  %672 = vrot.lane.b32.xlu2 %v650_v4, %s5044_s9  ;;  %v574_v14 = vpop.f32.mrf.mxu3  ;;  %v646_v17 = vmul.f32 %v5294_v7, %v625_v52  ;;  %v868_v19 = vadd.f32 1.0, %v4504_v2  ;;  %v828_v3 = vmax.f32 %v5249_v18, 0.0  ;;  %v635_v18 = vpop.permute.xlu1 %634 }
 0x133   : > { %8040 = vst [vmem:[#allocation8_spill] sm:$0xff] %v5296_v9  ;;  %4511 = vpow2.f32 %v794_v6  ;;  %v5301_v16 = vadd.f32 %v574_v14, %v5245_v12  ;;  %v856_v24 = vmul.f32 1.442695, %v846_v11  ;;  %v1980_v31 = vadd.f32 52.458332, %v5296_v9 }
 0x134   : > { %4513 = vpow2.f32 %v792_v63  ;;  %v775_v20 = vsub.f32 0.0, %v767_v13  ;;  %v565_v23 = vpop.f32.mrf.mxu2  ;;  %664 = vrot.lane.b32.xlu1 %v646_v17, %s5044_s9  ;;  %v594_v11 = vmul.f32 1.442695, %v5292_v5  ;;  %v762_v14 = vmax.f32 %v5261_v29, 0.0 }
 0x135   : > { %v842_v25 = vand.u32 2147483647, %v5301_v16  ;;  %v5306_v26 = vadd.f32 %v565_v23, %v5245_v12  ;;  %4515 = vpow2.f32 %v854_v15  ;;  %v1988_v52 = vmul.f32 %v1980_v31, %v5296_v9 }
 0x136   : > { %v4508_v27 = vpop.eup %4507  ;;  %v527_v30 = vpop.f32.mrf.mxu1  ;;  %v786_v35 = vmul.f32 1.442695, %v775_v20  ;;  %4517 = vlog2.f32 %v868_v19  ;;  %v758_v20 = vmax.f32 %v5270_v40, 0.0 }
 0x137   : > { %v4510_v32 = vpop.eup %4509  ;;  %v807_v33 = vmul.f32 0.6931472, %v4508_v27  ;;  %v850_v36 = vsub.f32 0.0, %v842_v25  ;;  %v839_v38 = vand.u32 2147483647, %v5306_v26  ;;  %v5315_v42 = vadd.f32 %v527_v30, %v5239_v8 }
 0x138   : > { %v798_v37 = vadd.f32 1.0, %v4510_v32  ;;  %4519 = vpow2.f32 %v856_v24  ;;  %v1996_v1 = vadd.f32 1203.8342, %v1988_v52 }
 0x139   : > { %8041 = vst [vmem:[#allocation9_spill] sm:$0xff] %v5315_v42  ;;  %v4512_v43 = vpop.eup %4511  ;;  %v5317_v44 = vadd.f32 %v807_v33, %v757_v28  ;;  %v864_v45 = vmul.f32 1.442695, %v850_v36  ;;  %v847_v50 = vsub.f32 0.0, %v839_v38  ;;  %v768_v53 = vand.u32 2147483647, %v5315_v42 }
 0x13a   : > { %v4514_v47 = vpop.eup %4513  ;;  %4521 = vlog2.f32 %v798_v37  ;;  %v803_v48 = vadd.f32 1.0, %v4512_v43  ;;  %1508 = vrot.lane.b32.xlu2 %v5296_v9, %s5045_s10  ;;  %v577_v51 = vpop.f32.mrf.mxu3  ;;  %v2004_v30 = vmul.f32 %v1996_v1, %v5296_v9 }
 0x13b   : > { %8042 = vst [vmem:[#allocation10_spill] sm:$0xff] %v5317_v44  ;;  %4523 = vpow2.f32 %v786_v35  ;;  %v5325_v54 = vadd.f32 %v577_v51, %v5245_v12  ;;  %v858_v56 = vmul.f32 1.442695, %v847_v50  ;;  %v4516_v58 = vpop.eup %4515  ;;  %v802_v59 = vadd.f32 1.0, %v4514_v47 }
 0x13c   : > { %4525 = vpow2.f32 %v864_v45  ;;  %v568_v57 = vpop.f32.mrf.mxu2  ;;  %v776_v60 = vsub.f32 0.0, %v768_v53  ;;  %2776 = vrot.lane.b32.xlu1 %v5317_v44, %s5046_s11  ;;  %v4518_v62 = vpop.eup %4517  ;;  %v869_v15 = vadd.f32 1.0, %v4516_v58  ;;  %v830_v47 = vmax.f32 %v5284_v55, 0.0 }
 0x13d   : > { %4527 = vpow2.f32 %v602_v46  ;;  %v5330_v63 = vadd.f32 %v568_v57, %v5245_v12  ;;  %v843_v4 = vand.u32 2147483647, %v5325_v54  ;;  %v877_v27 = vmul.f32 0.6931472, %v4518_v62 }
 0x13e   : > { %4529 = vlog2.f32 %v803_v48  ;;  %v530_v0 = vpop.f32.mrf.mxu1  ;;  %v4520_v2 = vpop.eup %4519  ;;  %v788_v24 = vmul.f32 1.442695, %v776_v60  ;;  %v763_v46 = vmax.f32 %v5279_v49, 0.0  ;;  %v759_v48 = vmax.f32 %v5292_v5, 0.0 }
 0x13f   : > { %v5335_v6 = vadd.f32 %v530_v0, %v5239_v8  ;;  %4531 = vpow2.f32 %v858_v56  ;;  %v840_v17 = vand.u32 2147483647, %v5330_v63  ;;  %v829_v8 = vmax.f32 %v5267_v39, 0.0 }
 0x140   : > { %v4522_v13 = vpop.eup %4521  ;;  %4533 = vlog2.f32 %v802_v59  ;;  %v870_v28 = vadd.f32 1.0, %v4520_v2  ;;  %v851_v33 = vsub.f32 0.0, %v843_v4  ;;  %v2012_v53 = vadd.f32 15784.881, %v2004_v30 }
 0x141   : > { %8043 = vst [vmem:[#allocation11_spill] sm:$0xff] %v5335_v6  ;;  %v4524_v19 = vpop.eup %4523  ;;  %v809_v23 = vmul.f32 0.6931472, %v4522_v13  ;;  %v769_v35 = vand.u32 2147483647, %v5335_v6  ;;  %4535 = vpow2.f32 %v594_v11  ;;  %v848_v43 = vsub.f32 0.0, %v840_v17 }
 0x142   : > { %v4526_v25 = vpop.eup %4525  ;;  %2772 = vrot.lane.b32.xlu2 %v5296_v9, %s5046_s11  ;;  %4537 = vlog2.f32 %v869_v15  ;;  %v799_v37 = vadd.f32 1.0, %v4524_v19  ;;  %v866_v58 = vmul.f32 1.442695, %v851_v33  ;;  %v2100_v60 = vadd.f32 28.0, %v5296_v9 }
 0x143   : > { %v5345_v31 = vpop.eup %4527  ;;  %v5347_v32 = vadd.f32 %v809_v23, %v758_v20  ;;  %4539 = vpow2.f32 %v788_v24  ;;  %v874_v51 = vadd.f32 1.0, %v4526_v25  ;;  %v777_v59 = vsub.f32 0.0, %v769_v35 }
 0x144   : > { %v4530_v36 = vpop.eup %4529  ;;  %v651_v38 = vmul.f32 %v5345_v31, %v635_v18  ;;  %v571_v45 = vpop.f32.mrf.mxu2  ;;  %4541 = vlog2.f32 %v870_v28  ;;  %v5361_v62 = vadd.f32 %v877_v27, %v828_v3  ;;  %v834_v0 = vmax.f32 %v5301_v16, 0.0 }
 0x145   : > { %1512 = vrot.lane.b32.xlu1 %v5347_v32, %s5045_s10  ;;  %v4532_v50 = vpop.eup %4531  ;;  %v5358_v52 = vadd.f32 %v571_v45, %v5245_v12  ;;  %v819_v57 = vmul.f32 0.6931472, %v4530_v36  ;;  %4543 = vlog2.f32 %v799_v37  ;;  %v860_v1 = vmul.f32 1.442695, %v848_v43  ;;  %v5376_v28 = vpop.permute.xlu2 %628 }
 0x146   : > { %674 = vrot.lane.b32.xlu0 %v651_v38, %s5044_s9  ;;  %v4534_v56 = vpop.eup %4533  ;;  %8044 = vst [vmem:[#allocation12_spill] sm:$0xff] %v5361_v62  ;;  %v831_v4 = vmax.f32 %v5306_v26, 0.0  ;;  %v871_v11 = vadd.f32 1.0, %v4532_v50  ;;  %v2020_v12 = vmul.f32 %v2012_v53, %v5296_v9  ;;  %v2108_v13 = vmul.f32 %v2100_v60, %v5296_v9 }
 0x147   : > { %v5364_v2 = vpop.eup %4535  ;;  %v817_v17 = vmul.f32 0.6931472, %v4534_v56  ;;  %4545 = vlog2.f32 %v874_v51  ;;  %v841_v19 = vand.u32 2147483647, %v5358_v52  ;;  %v5372_v23 = vadd.f32 %v819_v57, %v763_v46 }
 0x148   : > { %v4538_v15 = vpop.eup %4537  ;;  %v647_v3 = vmul.f32 %v5364_v2, %v5311_v34  ;;  %4547 = vpow2.f32 %v866_v58  ;;  %v790_v18 = vmul.f32 1.442695, %v777_v59  ;;  %v2028_v24 = vadd.f32 129347.26, %v2020_v12 }
 0x149   : > { %v4540_v20 = vpop.eup %4539  ;;  %8045 = vst [vmem:[#allocation13_spill] sm:$0xff] %v5372_v23  ;;  %v760_v27 = vmax.f32 %v5315_v42, 0.0  ;;  %4549 = vpow2.f32 %v860_v1  ;;  %v598_v30 = vmul.f32 1.442695, %v5335_v6  ;;  %v2116_v33 = vadd.f32 322.0, %v2108_v13 }
 0x14a   : > { %v4542_v25 = vpop.eup %4541  ;;  %666 = vrot.lane.b32.xlu2 %v647_v3, %s5044_s9  ;;  %v879_v35 = vmul.f32 0.6931472, %v4538_v15  ;;  %4551 = vlog2.f32 %v871_v11  ;;  %v596_v34 = vmul.f32 1.442695, %v5315_v42  ;;  %v2036_v36 = vmul.f32 %v2028_v24, %v5296_v9 }
 0x14b   : > { %v4544_v37 = vpop.eup %4543  ;;  %v800_v38 = vadd.f32 1.0, %v4540_v20  ;;  %v849_v43 = vsub.f32 0.0, %v841_v19  ;;  %v2124_v45 = vmul.f32 %v2116_v33, %v5296_v9  ;;  %v1981_v46 = vadd.f32 52.458332, %v5317_v44 }
 0x14c   : > { %v5389_v50 = vadd.f32 %v817_v17, %v762_v14  ;;  %v881_v51 = vmul.f32 0.6931472, %v4542_v25  ;;  %4553 = vpow2.f32 %v790_v18  ;;  %v2101_v53 = vadd.f32 28.0, %v5317_v44 }
 0x14d   : > { %2800 = vrot.lane.b32.xlu1 %v5372_v23, %s5046_s11  ;;  %v4546_v56 = vpop.eup %4545  ;;  %v835_v57 = vmax.f32 %v5325_v54, 0.0  ;;  %v832_v58 = vmax.f32 %v5330_v63, 0.0  ;;  %4555 = vpow2.f32 %v598_v30  ;;  %v2132_v59 = vadd.f32 1960.0, %v2124_v45 }
 0x14e   : > { %2774 = vrot.lane.b32.xlu0 %v5361_v62, %s5046_s11  ;;  %8046 = vst [vmem:[#allocation14_spill] sm:$0xff] %v5389_v50  ;;  %v4548_v60 = vpop.eup %4547  ;;  %v811_v1 = vmul.f32 0.6931472, %v4544_v37  ;;  %v2044_v11 = vadd.f32 678289.7, %v2036_v36  ;;  %v1989_v12 = vmul.f32 %v1981_v46, %v5317_v44  ;;  %v2109_v13 = vmul.f32 %v2101_v53, %v5317_v44 }
 0x14f   : > { %v4550_v14 = vpop.eup %4549  ;;  %v5398_v15 = vadd.f32 %v879_v35, %v829_v8  ;;  %4557 = vlog2.f32 %v800_v38  ;;  %v862_v17 = vmul.f32 1.442695, %v849_v43  ;;  %v2140_v19 = vmul.f32 %v2132_v59, %v5296_v9  ;;  %v631_v43 = vpop.permute.xlu2 %630 }
 0x150   : > { %v4552_v3 = vpop.eup %4551  ;;  %v5403_v20 = vadd.f32 %v881_v51, %v830_v47  ;;  %v761_v18 = vmax.f32 %v5335_v6, 0.0  ;;  %v5407_v24 = vadd.f32 6.5, %v5296_v9  ;;  %v1997_v25 = vadd.f32 1203.8342, %v1989_v12 }
 0x151   : > { %8047 = vst [vmem:[#allocation15_spill] sm:$0xff] %v5398_v15  ;;  %v833_v30 = vmax.f32 %v5358_v52, 0.0  ;;  %v2148_v39 = vadd.f32 6769.0, %v2140_v19  ;;  %v5413_v8 = vadd.f32 -0.5, %v5296_v9  ;;  %v2117_v33 = vadd.f32 322.0, %v2109_v13 }
 0x152   : > { %8048 = vst [vmem:[#allocation16_spill] sm:$0xff] %v5403_v20  ;;  %1520 = vrot.lane.b32.xlu2 %v5389_v50, %s5045_s10  ;;  %v4554_v35 = vpop.eup %4553  ;;  %v5417_v55 = vadd.f32 %v811_v1, %v759_v48  ;;  %v875_v47 = vadd.f32 1.0, %v4548_v60  ;;  %v2052_v36 = vmul.f32 %v2044_v11, %v5296_v9  ;;  %v2005_v37 = vmul.f32 %v1997_v25, %v5317_v44 }
 0x153   : > { %v5423_v38 = vpop.eup %4555  ;;  %4559 = vpow2.f32 %v862_v17  ;;  %v2156_v45 = vmul.f32 %v2148_v39, %v5296_v9  ;;  %v2125_v48 = vmul.f32 %v2117_v33, %v5317_v44  ;;  %v3269_v46 = vadd.f32 52.458332, %v5361_v62 }
 0x154   : > { %v889_v51 = vmul.f32 0.6931472, %v4546_v56  ;;  %v872_v53 = vadd.f32 1.0, %v4550_v14  ;;  %4561 = vpow2.f32 %v596_v34  ;;  %v2013_v59 = vadd.f32 15784.881, %v2005_v37 }
 0x155   : > { %2782 = vrot.lane.b32.xlu1 %v5403_v20, %s5046_s11  ;;  %v4558_v60 = vpop.eup %4557  ;;  %v883_v1 = vmul.f32 0.6931472, %v4552_v3  ;;  %v2164_v11 = vadd.f32 13132.0, %v2156_v45  ;;  %4563 = vlog2.f32 %v5407_v24  ;;  %v2133_v12 = vadd.f32 1960.0, %v2125_v48 }
 0x156   : > { %1510 = vrot.lane.b32.xlu0 %v5317_v44, %s5045_s10  ;;  %v801_v13 = vadd.f32 1.0, %v4554_v35  ;;  %v649_v17 = vmul.f32 %v5423_v38, %v631_v43  ;;  %v2060_v19 = vadd.f32 2222880.5, %v2052_v36  ;;  %v2021_v25 = vmul.f32 %v2013_v59, %v5317_v44 }
 0x157   : > { %4565 = vlog2.f32 %v875_v47  ;;  %v2172_v39 = vmul.f32 %v2164_v11, %v5296_v9  ;;  %v2141_v56 = vmul.f32 %v2133_v12, %v5317_v44  ;;  %v3277_v34 = vmul.f32 %v3269_v46, %v5361_v62 }
 0x158   : > { %v813_v14 = vmul.f32 0.6931472, %v4558_v60  ;;  %4567 = vlog2.f32 %v872_v53  ;;  %v2029_v3 = vadd.f32 129347.26, %v2021_v25  ;;  %v5437_v33 = vadd.f32 6.5, %v5317_v44 }
 0x159   : > { %v4560_v37 = vpop.eup %4559  ;;  %v2180_v35 = vadd.f32 13068.0, %v2172_v39  ;;  %v2149_v36 = vadd.f32 6769.0, %v2141_v56  ;;  %v3285_v43 = vadd.f32 1203.8342, %v3277_v34  ;;  %v3389_v47 = vadd.f32 28.0, %v5361_v62 }
 0x15a   : > { %2796 = vrot.lane.b32.xlu2 %v5389_v50, %s5046_s11  ;;  %v5442_v45 = vpop.eup %4561  ;;  %v5446_v48 = vadd.f32 %v889_v51, %v834_v0  ;;  %4569 = vlog2.f32 %v801_v13  ;;  %v2068_v46 = vmul.f32 %v2060_v19, %v5296_v9  ;;  %v2037_v53 = vmul.f32 %v2029_v3, %v5317_v44 }
 0x15b   : > { %v4564_v59 = vpop.eup %4563  ;;  %v2188_v60 = vmul.f32 %v2180_v35, %v5296_v9  ;;  %v2157_v11 = vmul.f32 %v2149_v36, %v5317_v44  ;;  %v3293_v12 = vmul.f32 %v3285_v43, %v5361_v62  ;;  %v3397_v16 = vmul.f32 %v3389_v47, %v5361_v62 }
 0x15c   : > { %8049 = vst [vmem:[#allocation17_spill] sm:$0xff] %v5446_v48  ;;  %v5459_v0 = vadd.f32 %v883_v1, %v831_v4  ;;  %v5463_v51 = vadd.f32 %v813_v14, %v760_v27  ;;  %v873_v13 = vadd.f32 1.0, %v4560_v37  ;;  %4571 = vlog2.f32 %v5437_v33 }
 0x15d   : > { %670 = vrot.lane.b32.xlu1 %v649_v17, %s5044_s9  ;;  %v1986_v17 = vadd.f32 52.458332, %v5389_v50  ;;  %v4566_v19 = vpop.eup %4565  ;;  %v2196_v25 = vadd.f32 5040.0, %v2188_v60  ;;  %v2165_v39 = vadd.f32 13132.0, %v2157_v11  ;;  %v3301_v56 = vadd.f32 15784.881, %v3293_v12 }
 0x15e   : > { %2780 = vrot.lane.b32.xlu0 %v5347_v32, %s5046_s11  ;;  %8050 = vst [vmem:[#allocation18_spill] sm:$0xff] %v5459_v0  ;;  %v4568_v34 = vpop.eup %4567  ;;  %v2076_v3 = vadd.f32 4162388.0, %v2068_v46  ;;  %v2237_v35 = vmul.f32 0.6931472, %v4564_v59  ;;  %v3405_v36 = vadd.f32 322.0, %v3397_v16  ;;  %4573 = vlog2.f32 %v873_v13 }
 0x15f   : > { %8051 = vst [vmem:[#allocation19_spill] sm:$0xff] %v5463_v51  ;;  %v1994_v26 = vmul.f32 %v1986_v17, %v5389_v50  ;;  %v5469_v4 = vmul.f32 %v2196_v25, %v5296_v9  ;;  %v2045_v27 = vadd.f32 678289.7, %v2037_v53  ;;  %v2173_v1 = vmul.f32 %v2165_v39, %v5317_v44 }
 0x160   : > { %v3309_v14 = vmul.f32 %v3301_v56, %v5361_v62  ;;  %v4570_v37 = vpop.eup %4569  ;;  %v891_v43 = vmul.f32 0.6931472, %v4566_v19  ;;  %v3413_v47 = vmul.f32 %v3405_v36, %v5361_v62  ;;  %v885_v11 = vmul.f32 0.6931472, %v4568_v34 }
 0x161   : > { %v2002_v60 = vadd.f32 1203.8342, %v1994_v26  ;;  %v648_v46 = vmul.f32 %v5442_v45, %v5376_v28  ;;  %4575 = vrcp.f32 %v5469_v4  ;;  %v2106_v53 = vadd.f32 28.0, %v5389_v50 }
 0x162   : > { %2778 = vrot.lane.b32.xlu2 %v5398_v15, %s5046_s11  ;;  %v2252_v59 = vmul.f32 %v5413_v8, %v2237_v35  ;;  %v2181_v12 = vadd.f32 13068.0, %v2173_v1  ;;  %v3317_v16 = vadd.f32 129347.26, %v3309_v14  ;;  %v3421_v13 = vadd.f32 1960.0, %v3413_v47  ;;  %v4572_v17 = vpop.eup %4571 }
 0x163   : > { %v815_v19 = vmul.f32 0.6931472, %v4570_v37  ;;  %v2084_v28 = vmul.f32 %v2076_v3, %v5296_v9  ;;  %v2053_v25 = vmul.f32 %v2045_v27, %v5317_v44  ;;  %v2010_v39 = vmul.f32 %v2002_v60, %v5389_v50 }
 0x164   : > { %v5489_v56 = vadd.f32 %v891_v43, %v835_v57  ;;  %v2189_v34 = vmul.f32 %v2181_v12, %v5317_v44  ;;  %v4422_v8 = vadd.f32 -0.5, %v5317_v44  ;;  %v3429_v35 = vmul.f32 %v3421_v13, %v5361_v62  ;;  %v4574_v1 = vpop.eup %4573 }
 0x165   : > { %2788 = vrot.lane.b32.xlu1 %v5463_v51, %s5046_s11  ;;  %v3325_v36 = vmul.f32 %v3317_v16, %v5361_v62  ;;  %v5496_v26 = vadd.f32 6.5, %v5361_v62  ;;  %v2018_v3 = vadd.f32 15784.881, %v2010_v39  ;;  %v2114_v27 = vmul.f32 %v2106_v53, %v5389_v50 }
 0x166   : > { %668 = vrot.lane.b32.xlu0 %v648_v46, %s5044_s9  ;;  %8052 = vst [vmem:[#allocation20_spill] sm:$0xff] %v5489_v56  ;;  %v5501_v54 = vadd.f32 %v885_v11, %v832_v58  ;;  %v2197_v57 = vadd.f32 5040.0, %v2189_v34  ;;  %v2239_v14 = vmul.f32 0.6931472, %v4572_v17  ;;  %v3437_v37 = vadd.f32 6769.0, %v3429_v35 }
 0x167   : > { %v4576_v43 = vpop.eup %4575  ;;  %v5505_v47 = vadd.f32 %v815_v19, %v761_v18  ;;  %v2092_v60 = vadd.f32 3409662.8, %v2084_v28  ;;  %v5507_v46 = vadd.f32 0.9189385, %v2252_v59  ;;  %v2061_v12 = vadd.f32 2222880.5, %v2053_v25 }
 0x168   : > { %8053 = vst [vmem:[#allocation21_spill] sm:$0xff] %v5501_v54  ;;  %v2277_v16 = vmul.f32 %v4576_v43, %v5469_v4  ;;  %v5511_v53 = vmul.f32 %v2197_v57, %v5317_v44  ;;  %v2026_v63 = vmul.f32 %v2018_v3, %v5389_v50  ;;  %v2122_v58 = vadd.f32 322.0, %v2114_v27 }
 0x169   : > { %8054 = vst [vmem:[#allocation22_spill] sm:$0xff] %v5505_v47  ;;  %v887_v11 = vmul.f32 0.6931472, %v4574_v1  ;;  %v3333_v13 = vadd.f32 678289.7, %v3325_v36  ;;  %v3445_v18 = vmul.f32 %v3437_v37, %v5361_v62  ;;  %4577 = vlog2.f32 %v5496_v26 }
 0x16a   : > { %1514 = vrot.lane.b32.xlu2 %v5417_v55, %s5045_s10  ;;  %v2278_v59 = vsub.f32 1.0, %v2277_v16  ;;  %v5520_v17 = vmul.f32 %v4422_v8, %v2239_v14  ;;  %4579 = vrcp.f32 %v5511_v53  ;;  %v5524_v19 = vadd.f32 -0.5, %v5361_v62 }
 0x16b   : > { %v2285_v28 = vand.u32 2147483647, %v5469_v4  ;;  %v2287_v25 = vand.u32 2147483648, %v5469_v4  ;;  %v2069_v39 = vmul.f32 %v2061_v12, %v5317_v44  ;;  %v3453_v34 = vadd.f32 13132.0, %v3445_v18 }
 0x16c   : > { %v2279_v35 = vmul.f32 %v4576_v43, %v2278_v59  ;;  %vm2282_vm1 = vweird.f32 %v4576_v43  ;;  %v2034_v36 = vadd.f32 129347.26, %v2026_v63  ;;  %v2130_v8 = vmul.f32 %v2122_v58, %v5389_v50 }
 0x16d   : > { %1518 = vrot.lane.b32.xlu1 %v5505_v47, %s5045_s10  ;;  %v5534_v3 = vadd.f32 %v887_v11, %v833_v30  ;;  %vm2281_vm2 = vweird.f32 %v5469_v4  ;;  %v3341_v27 = vmul.f32 %v3333_v13, %v5361_v62  ;;  %v3461_v1 = vmul.f32 %v3453_v34, %v5361_v62 }
 0x16e   : > { %1522 = vrot.lane.b32.xlu0 %v5372_v23, %s5045_s10  ;;  %v2280_v57 = vadd.f32 %v4576_v43, %v2279_v35  ;;  %v2138_v14 = vadd.f32 1960.0, %v2130_v8  ;;  %v3270_v37 = vadd.f32 52.458332, %v5398_v15  ;;  %v3390_v12 = vadd.f32 28.0, %v5398_v15  ;;  %vm2283_vm3 = vmor %vm2281_vm2, %vm2282_vm1 }
 0x16f   : > { %8055 = vst [vmem:[#allocation23_spill] sm:$0xff] %v5534_v3  ;;  %v4578_v16 = vpop.eup %4577  ;;  %vm2286_vm4 = vcmp.eq.f32.partialorder %v2285_v28, 8.507059e+37  ;;  %v2288_v63 = vor.u32 1.1754944e-38, %v2287_v25  ;;  %v2077_v58 = vadd.f32 4162388.0, %v2069_v39  ;;  %v3469_v52 = vadd.f32 13068.0, %v3461_v1 }
 0x170   : > { %v4580_v30 = vpop.eup %4579  ;;  %v2284_v11 = vsel %vm2283_vm3, %v4576_v43, %v2280_v57  ;;  %v2042_v4 = vmul.f32 %v2034_v36, %v5389_v50  ;;  %v2146_v13 = vmul.f32 %v2138_v14, %v5389_v50  ;;  %v3398_v18 = vmul.f32 %v3390_v12, %v5398_v15 }
 0x171   : > { %v2289_v59 = vsel %vm2286_vm4, %v2288_v63, %v2284_v11  ;;  %v2292_v34 = vmul.f32 %v4580_v30, %v5511_v53  ;;  %v5548_v35 = vadd.f32 6.5, %v5389_v50  ;;  %v3278_v28 = vmul.f32 %v3270_v37, %v5398_v15 }
 0x172   : > { %2784 = vrot.lane.b32.xlu2 %v5417_v55, %s5046_s11  ;;  %v2290_v43 = vmul.f32 %v2289_v59, %v2092_v60  ;;  %v3349_v25 = vadd.f32 2222880.5, %v3341_v27  ;;  %v3477_v39 = vmul.f32 %v3469_v52, %v5361_v62  ;;  %v2154_v36 = vadd.f32 6769.0, %v2146_v13 }
 0x173   : > { %v2293_v8 = vsub.f32 1.0, %v2292_v34  ;;  %v2300_v1 = vand.u32 2147483647, %v5511_v53  ;;  %v2302_v57 = vand.u32 2147483648, %v5511_v53  ;;  %v3406_v14 = vadd.f32 322.0, %v3398_v18 }
 0x174   : > { %4581 = vlog2.f32 %v2290_v43  ;;  %v3485_v12 = vadd.f32 5040.0, %v3477_v39  ;;  %v2050_v37 = vadd.f32 678289.7, %v2042_v4  ;;  %v2162_v63 = vmul.f32 %v2154_v36, %v5389_v50 }
 0x175   : > { %2794 = vrot.lane.b32.xlu1 %v5534_v3, %s5046_s11  ;;  %v2294_v11 = vmul.f32 %v4580_v30, %v2293_v8  ;;  %vm2297_vm5 = vweird.f32 %v4580_v30  ;;  %v3286_v60 = vadd.f32 1203.8342, %v3278_v28  ;;  %v3414_v27 = vmul.f32 %v3406_v14, %v5398_v15 }
 0x176   : > { %2798 = vrot.lane.b32.xlu0 %v5446_v48, %s5046_s11  ;;  %v3357_v52 = vmul.f32 %v3349_v25, %v5361_v62  ;;  %v5562_v13 = vmul.f32 %v3485_v12, %v5361_v62  ;;  %v2170_v59 = vadd.f32 13132.0, %v2162_v63  ;;  %4583 = vlog2.f32 %v5548_v35 }
 0x177   : > { %v2295_v34 = vadd.f32 %v4580_v30, %v2294_v11  ;;  %vm2296_vm6 = vweird.f32 %v5511_v53  ;;  %v3526_v18 = vmul.f32 0.6931472, %v4578_v16  ;;  %v3294_v4 = vmul.f32 %v3286_v60, %v5398_v15 }
 0x178   : > { %v2085_v43 = vmul.f32 %v2077_v58, %v5317_v44  ;;  %vm5568_vm7 = vmor %vm2296_vm6, %vm2297_vm5  ;;  %4585 = vrcp.f32 %v5562_v13  ;;  %v2058_v25 = vmul.f32 %v2050_v37, %v5389_v50  ;;  %v3422_v39 = vadd.f32 1960.0, %v3414_v27 }
 0x179   : > { %v5577_v36 = vadd.f32 0.9189385, %v5520_v17  ;;  %v2299_v53 = vsel %vm5568_vm7, %v4580_v30, %v2295_v34  ;;  %v2303_v16 = vor.u32 1.1754944e-38, %v2302_v57  ;;  %v2178_v58 = vmul.f32 %v2170_v59, %v5389_v50 }
 0x17a   : > { %2802 = vrot.lane.b32.xlu2 %v5489_v56, %s5046_s11  ;;  %v4582_v8 = vpop.eup %4581  ;;  %v2268_v14 = vsub.f32 %v5507_v46, %v5407_v24  ;;  %vm2301_vm8 = vcmp.eq.f32.partialorder %v2300_v1, 8.507059e+37  ;;  %v3365_v12 = vadd.f32 4162388.0, %v3357_v52  ;;  %v3302_v37 = vadd.f32 15784.881, %v3294_v4 }
 0x17b   : > { %v2397_v63 = vmul.f32 0.6931472, %v4582_v8  ;;  %v2304_v11 = vsel %vm2301_vm8, %v2303_v16, %v2299_v53  ;;  %v3541_v17 = vmul.f32 %v5524_v19, %v3526_v18  ;;  %v2186_v60 = vadd.f32 13068.0, %v2178_v58 }
 0x17c   : > { %v4584_v27 = vpop.eup %4583  ;;  %v2093_v30 = vadd.f32 3409662.8, %v2085_v43  ;;  %v2066_v57 = vadd.f32 2222880.5, %v2058_v25  ;;  %v3310_v59 = vmul.f32 %v3302_v37, %v5398_v15  ;;  %v3430_v34 = vmul.f32 %v3422_v39, %v5398_v15 }
 0x17d   : > { %v2412_v28 = vadd.f32 %v2397_v63, %v2268_v14  ;;  %v2194_v24 = vmul.f32 %v2186_v60, %v5389_v50  ;;  %v4427_v46 = vadd.f32 -0.5, %v5389_v50  ;;  %v1982_v1 = vadd.f32 52.458332, %v5347_v32 }
 0x17e   : > { %2786 = vrot.lane.b32.xlu0 %v5459_v0, %s5046_s11  ;;  %v4586_v52 = vpop.eup %4585  ;;  %v2305_v4 = vmul.f32 %v2304_v11, %v2093_v30  ;;  %v3373_v53 = vmul.f32 %v3365_v12, %v5361_v62  ;;  %v3318_v19 = vadd.f32 129347.26, %v3310_v59  ;;  %v3438_v18 = vadd.f32 6769.0, %v3430_v34 }
 0x17f   : > { %2428 = vrot.lane.b32.xlu1 %v2412_v28, %s5045_s10  ;;  %v3566_v43 = vmul.f32 %v4586_v52, %v5562_v13  ;;  %v2202_v25 = vadd.f32 5040.0, %v2194_v24  ;;  %v2249_v16 = vmul.f32 0.6931472, %v4584_v27  ;;  %v1990_v39 = vmul.f32 %v1982_v1, %v5347_v32 }
 0x180   : > { %v2074_v58 = vmul.f32 %v2066_v57, %v5389_v50  ;;  %v3326_v8 = vmul.f32 %v3318_v19, %v5398_v15  ;;  %v3446_v14 = vmul.f32 %v3438_v18, %v5398_v15  ;;  %v2102_v37 = vadd.f32 28.0, %v5347_v32 }
 0x181   : > { %v3567_v12 = vsub.f32 1.0, %v3566_v43  ;;  %v3574_v63 = vand.u32 2147483647, %v5562_v13  ;;  %v5604_v11 = vmul.f32 %v2202_v25, %v5389_v50  ;;  %v1998_v60 = vadd.f32 1203.8342, %v1990_v39 }
 0x182   : > { %2790 = vrot.lane.b32.xlu2 %v5501_v54, %s5046_s11  ;;  %4587 = vlog2.f32 %v2305_v4  ;;  %vm3571_vm9 = vweird.f32 %v4586_v52  ;;  %v3576_v27 = vand.u32 2147483648, %v5562_v13  ;;  %v3454_v30 = vadd.f32 13132.0, %v3446_v14 }
 0x183   : > { %v3568_v57 = vmul.f32 %v4586_v52, %v3567_v12  ;;  %4589 = vrcp.f32 %v5604_v11  ;;  %v3334_v59 = vadd.f32 678289.7, %v3326_v8  ;;  %v2110_v34 = vmul.f32 %v2102_v37, %v5347_v32 }
 0x184   : > { %v3381_v24 = vadd.f32 3409662.8, %v3373_v53  ;;  %v5611_v1 = vadd.f32 0.9189385, %v3541_v17  ;;  %v3462_v19 = vmul.f32 %v3454_v30, %v5398_v15  ;;  %v5615_v4 = vadd.f32 6.5, %v5398_v15 }
 0x185   : > { %v3569_v18 = vadd.f32 %v4586_v52, %v3568_v57  ;;  %vm3570_vm10 = vweird.f32 %v5562_v13  ;;  %v2258_v43 = vmul.f32 %v4427_v46, %v2249_v16  ;;  %v2006_v25 = vmul.f32 %v1998_v60, %v5347_v32 }
 0x186   : > { %1516 = vrot.lane.b32.xlu0 %v5463_v51, %s5045_s10  ;;  %vm3572_vm11 = vmor %vm3570_vm10, %vm3571_vm9  ;;  %vm3575_vm12 = vcmp.eq.f32.partialorder %v3574_v63, 8.507059e+37  ;;  %v3577_v39 = vor.u32 1.1754944e-38, %v3576_v27  ;;  %v2082_v8 = vadd.f32 4162388.0, %v2074_v58  ;;  %v3470_v14 = vadd.f32 13068.0, %v3462_v19 }
 0x187   : > { %3717 = vrot.lane.b32.xlu1 %v2412_v28, %s5046_s11  ;;  %v3573_v17 = vsel %vm3572_vm11, %v4586_v52, %v3569_v18  ;;  %v3342_v53 = vmul.f32 %v3334_v59, %v5398_v15  ;;  %v2014_v37 = vadd.f32 15784.881, %v2006_v25  ;;  %v2118_v12 = vadd.f32 322.0, %v2110_v34 }
 0x188   : > { %v4588_v30 = vpop.eup %4587  ;;  %v2269_v13 = vsub.f32 %v5577_v36, %v5437_v33  ;;  %v3578_v46 = vsel %vm3575_vm12, %v3577_v39, %v3573_v17  ;;  %v3478_v16 = vmul.f32 %v3470_v14, %v5398_v15  ;;  %4591 = vlog2.f32 %v5615_v4 }
 0x189   : > { %v4590_v60 = vpop.eup %4589  ;;  %v3579_v57 = vmul.f32 %v3578_v46, %v3381_v24  ;;  %v2022_v58 = vmul.f32 %v2014_v37, %v5347_v32  ;;  %v2126_v28 = vmul.f32 %v2118_v12, %v5347_v32  ;;  %v3557_v52 = vsub.f32 %v5611_v1, %v5496_v26 }
 0x18a   : > { %v5630_v63 = vadd.f32 0.9189385, %v2258_v43  ;;  %v2367_v27 = vmul.f32 %v4590_v60, %v5604_v11  ;;  %v4438_v33 = vadd.f32 -0.5, %v5398_v15  ;;  %v2090_v36 = vmul.f32 %v2082_v8, %v5389_v50 }
 0x18b   : > { %4593 = vlog2.f32 %v3579_v57  ;;  %v3350_v59 = vadd.f32 2222880.5, %v3342_v53  ;;  %v3486_v34 = vadd.f32 5040.0, %v3478_v16  ;;  %v2399_v24 = vmul.f32 0.6931472, %v4588_v30 }
 0x18c   : > { %v2368_v19 = vsub.f32 1.0, %v2367_v27  ;;  %v2030_v18 = vadd.f32 129347.26, %v2022_v58  ;;  %v2134_v25 = vadd.f32 1960.0, %v2126_v28  ;;  %v2377_v26 = vand.u32 2147483648, %v5604_v11 }
 0x18d   : > { %v5639_v1 = vmul.f32 %v3486_v34, %v5398_v15  ;;  %v1983_v43 = vadd.f32 52.458332, %v5417_v55  ;;  %v2103_v39 = vadd.f32 28.0, %v5417_v55  ;;  %vm2372_vm13 = vweird.f32 %v4590_v60 }
 0x18e   : > { %2792 = vrot.lane.b32.xlu0 %v5505_v47, %s5046_s11  ;;  %v2369_v14 = vmul.f32 %v4590_v60, %v2368_v19  ;;  %v2375_v17 = vand.u32 2147483647, %v5604_v11  ;;  %v2142_v8 = vmul.f32 %v2134_v25, %v5347_v32  ;;  %v4592_v53 = vpop.eup %4591  ;;  %v2098_v37 = vadd.f32 3409662.8, %v2090_v36 }
 0x18f   : > { %v3358_v12 = vmul.f32 %v3350_v59, %v5398_v15  ;;  %4595 = vrcp.f32 %v5639_v1  ;;  %v5648_v30 = vadd.f32 6.5, %v5347_v32  ;;  %vm2371_vm14 = vweird.f32 %v5604_v11 }
 0x190   : > { %v2370_v46 = vadd.f32 %v4590_v60, %v2369_v14  ;;  %v2038_v16 = vmul.f32 %v2030_v18, %v5347_v32  ;;  %v2150_v57 = vadd.f32 6769.0, %v2142_v8  ;;  %v2413_v28 = vadd.f32 %v2399_v24, %v2269_v13  ;;  %vm2373_vm15 = vmor %vm2371_vm14, %vm2372_vm13 }
 0x191   : > { %v4594_v58 = vpop.eup %4593  ;;  %v2378_v27 = vor.u32 1.1754944e-38, %v2377_v26  ;;  %v1991_v34 = vmul.f32 %v1983_v43, %v5417_v55  ;;  %v2111_v36 = vmul.f32 %v2103_v39, %v5417_v55  ;;  %vm2376_vm0 = vcmp.eq.f32.partialorder %v2375_v17, 8.507059e+37 }
 0x192   : > { %v3686_v59 = vmul.f32 0.6931472, %v4594_v58  ;;  %v2374_v19 = vsel %vm2373_vm15, %v4590_v60, %v2370_v46  ;;  %v3528_v25 = vmul.f32 0.6931472, %v4592_v53  ;;  %v3366_v50 = vadd.f32 4162388.0, %v3358_v12 }
 0x193   : > { %v2379_v14 = vsel %vm2376_vm0, %v2378_v27, %v2374_v19  ;;  %v2158_v11 = vmul.f32 %v2150_v57, %v5347_v32  ;;  %v1999_v18 = vadd.f32 1203.8342, %v1991_v34  ;;  %v2046_v13 = vadd.f32 678289.7, %v2038_v16 }
 0x194   : > { %v3701_v8 = vadd.f32 %v3686_v59, %v3557_v52  ;;  %v2380_v62 = vmul.f32 %v2379_v14, %v2098_v37  ;;  %v2119_v24 = vadd.f32 322.0, %v2111_v36  ;;  %4597 = vlog2.f32 %v5648_v30 }
 0x195   : > { %v4596_v26 = vpop.eup %4595  ;;  %v2166_v56 = vadd.f32 13132.0, %v2158_v11  ;;  %v2007_v43 = vmul.f32 %v1999_v18, %v5417_v55  ;;  %v2274_v60 = vsub.f32 %v5630_v63, %v5548_v35  ;;  %v3542_v39 = vmul.f32 %v4438_v33, %v3528_v25 }
 0x196   : > { %3721 = vrot.lane.b32.xlu0 %v2413_v28, %s5046_s11  ;;  %3719 = vrot.lane.b32.xlu2 %v3701_v8, %s5046_s11  ;;  %4599 = vlog2.f32 %v2380_v62  ;;  %v3581_v17 = vmul.f32 %v4596_v26, %v5639_v1  ;;  %v3374_v52 = vmul.f32 %v3366_v50, %v5398_v15  ;;  %v2127_v12 = vmul.f32 %v2119_v24, %v5417_v55 }
 0x197   : > { %v2174_v53 = vmul.f32 %v2166_v56, %v5347_v32  ;;  %v2015_v37 = vadd.f32 15784.881, %v2007_v43  ;;  %vm3585_vm1 = vweird.f32 %v5639_v1  ;;  %v3591_v16 = vand.u32 2147483648, %v5639_v1 }
 0x198   : > { %v3582_v46 = vsub.f32 1.0, %v3581_v17  ;;  %v2054_v57 = vmul.f32 %v2046_v13, %v5347_v32  ;;  %v2135_v35 = vadd.f32 1960.0, %v2127_v12  ;;  %v3271_v63 = vadd.f32 52.458332, %v5403_v20 }
 0x199   : > { %v2182_v58 = vadd.f32 13068.0, %v2174_v53  ;;  %v2023_v62 = vmul.f32 %v2015_v37, %v5417_v55  ;;  %vm3586_vm2 = vweird.f32 %v4596_v26  ;;  %v3589_v50 = vand.u32 2147483647, %v5639_v1 }
 0x19a   : > { %v3583_v33 = vmul.f32 %v4596_v26, %v3582_v46  ;;  %v3391_v56 = vadd.f32 28.0, %v5403_v20  ;;  %v4598_v27 = vpop.eup %4597  ;;  %v2143_v59 = vmul.f32 %v2135_v35, %v5417_v55  ;;  %v3279_v19 = vmul.f32 %v3271_v63, %v5403_v20  ;;  %vm3587_vm3 = vmor %vm3585_vm1, %vm3586_vm2 }
 0x19b   : > { %v2190_v34 = vmul.f32 %v2182_v58, %v5347_v32  ;;  %v2031_v36 = vadd.f32 129347.26, %v2023_v62  ;;  %v3592_v11 = vor.u32 1.1754944e-38, %v3591_v16  ;;  %v2062_v18 = vadd.f32 2222880.5, %v2054_v57 }
 0x19c   : > { %v4600_v25 = vpop.eup %4599  ;;  %v3584_v14 = vadd.f32 %v4596_v26, %v3583_v33  ;;  %v3399_v8 = vmul.f32 %v3391_v56, %v5403_v20  ;;  %v2151_v17 = vadd.f32 6769.0, %v2143_v59  ;;  %v3382_v53 = vadd.f32 3409662.8, %v3374_v52 }
 0x19d   : > { %v2409_v13 = vmul.f32 0.6931472, %v4600_v25  ;;  %v2198_v24 = vadd.f32 5040.0, %v2190_v34  ;;  %v2039_v43 = vmul.f32 %v2031_v36, %v5417_v55  ;;  %vm3590_vm4 = vcmp.eq.f32.partialorder %v3589_v50, 8.507059e+37 }
 0x19e   : > { %2430 = vrot.lane.b32.xlu2 %v2413_v28, %s5045_s10  ;;  %v3588_v37 = vsel %vm3587_vm3, %v4596_v26, %v3584_v14  ;;  %v3287_v12 = vadd.f32 1203.8342, %v3279_v19  ;;  %v3407_v57 = vadd.f32 322.0, %v3399_v8  ;;  %v2070_v1 = vmul.f32 %v2062_v18, %v5347_v32 }
 0x19f   : > { %v2418_v46 = vadd.f32 %v2409_v13, %v2274_v60  ;;  %v3593_v58 = vsel %vm3590_vm4, %v3592_v11, %v3588_v37  ;;  %v5681_v16 = vmul.f32 %v2198_v24, %v5347_v32  ;;  %v2159_v35 = vmul.f32 %v2151_v17, %v5417_v55 }
 0x1a0   : > { %v3594_v62 = vmul.f32 %v3593_v58, %v3382_v53  ;;  %v3295_v63 = vmul.f32 %v3287_v12, %v5403_v20  ;;  %v2047_v28 = vadd.f32 678289.7, %v2039_v43  ;;  %v4423_v26 = vadd.f32 -0.5, %v5347_v32 }
 0x1a1   : > { %2440 = vrot.lane.b32.xlu1 %v2418_v46, %s5045_s10  ;;  %3741 = vrot.lane.b32.xlu0 %v2418_v46, %s5046_s11  ;;  %4601 = vrcp.f32 %v5681_v16  ;;  %v2167_v60 = vadd.f32 13132.0, %v2159_v35  ;;  %v3550_v52 = vadd.f32 0.9189385, %v3542_v39  ;;  %v2241_v33 = vmul.f32 0.6931472, %v4598_v27 }
 0x1a2   : > { %4603 = vlog2.f32 %v3594_v62  ;;  %v3303_v50 = vadd.f32 15784.881, %v3295_v63  ;;  %v3415_v56 = vmul.f32 %v3407_v57, %v5403_v20  ;;  %v2078_v34 = vadd.f32 4162388.0, %v2070_v1 }
 0x1a3   : > { %v2175_v36 = vmul.f32 %v2167_v60, %v5417_v55  ;;  %v5693_v59 = vadd.f32 6.5, %v5417_v55  ;;  %v1987_v19 = vadd.f32 52.458332, %v5372_v23  ;;  %v2055_v25 = vmul.f32 %v2047_v28, %v5417_v55 }
 0x1a4   : > { %v3311_v14 = vmul.f32 %v3303_v50, %v5403_v20  ;;  %v3423_v11 = vadd.f32 1960.0, %v3415_v56  ;;  %v2107_v18 = vadd.f32 28.0, %v5372_v23  ;;  %v3558_v13 = vsub.f32 %v3550_v52, %v5615_v4 }
 0x1a5   : > { %v2183_v39 = vadd.f32 13068.0, %v2175_v36  ;;  %v1995_v27 = vmul.f32 %v1987_v19, %v5372_v23  ;;  %v2254_v24 = vmul.f32 %v4423_v26, %v2241_v33  ;;  %v2086_v37 = vmul.f32 %v2078_v34, %v5347_v32 }
 0x1a6   : > { %v3319_v43 = vadd.f32 129347.26, %v3311_v14  ;;  %v3431_v17 = vmul.f32 %v3423_v11, %v5403_v20  ;;  %4605 = vlog2.f32 %v5693_v59  ;;  %v2063_v57 = vadd.f32 2222880.5, %v2055_v25 }
 0x1a7   : > { %v4602_v8 = vpop.eup %4601  ;;  %v2191_v46 = vmul.f32 %v2183_v39, %v5417_v55  ;;  %v2115_v1 = vmul.f32 %v2107_v18, %v5372_v23  ;;  %v2315_v4 = vand.u32 2147483647, %v5681_v16  ;;  %v2003_v28 = vadd.f32 1203.8342, %v1995_v27 }
 0x1a8   : > { %v4604_v53 = vpop.eup %4603  ;;  %v2307_v12 = vmul.f32 %v4602_v8, %v5681_v16  ;;  %v3439_v62 = vadd.f32 6769.0, %v3431_v17  ;;  %v2317_v60 = vand.u32 2147483648, %v5681_v16  ;;  %v3327_v52 = vmul.f32 %v3319_v43, %v5403_v20 }
 0x1a9   : > { %v3688_v58 = vmul.f32 0.6931472, %v4604_v53  ;;  %v2199_v63 = vadd.f32 5040.0, %v2191_v46  ;;  %vm2312_vm5 = vweird.f32 %v4602_v8  ;;  %v2011_v34 = vmul.f32 %v2003_v28, %v5372_v23 }
 0x1aa   : > { %v2308_v35 = vsub.f32 1.0, %v2307_v12  ;;  %v3447_v33 = vmul.f32 %v3439_v62, %v5403_v20  ;;  %v2071_v36 = vmul.f32 %v2063_v57, %v5417_v55  ;;  %v5718_v25 = vadd.f32 6.5, %v5403_v20 }
 0x1ab   : > { %v3702_v26 = vadd.f32 %v3688_v58, %v3558_v13  ;;  %v5712_v56 = vmul.f32 %v2199_v63, %v5417_v55  ;;  %v2123_v14 = vadd.f32 322.0, %v2115_v1  ;;  %v5720_v18 = vadd.f32 0.9189385, %v2254_v24 }
 0x1ac   : > { %v2309_v50 = vmul.f32 %v4602_v8, %v2308_v35  ;;  %v3455_v19 = vadd.f32 13132.0, %v3447_v33  ;;  %v4606_v11 = vpop.eup %4605  ;;  %vm2311_vm6 = vweird.f32 %v5681_v16  ;;  %v2094_v27 = vadd.f32 3409662.8, %v2086_v37 }
 0x1ad   : > { %3723 = vrot.lane.b32.xlu1 %v3702_v26, %s5046_s11  ;;  %4607 = vrcp.f32 %v5712_v56  ;;  %vm2313_vm7 = vmor %vm2311_vm6, %vm2312_vm5  ;;  %v2318_v13 = vor.u32 1.1754944e-38, %v2317_v60  ;;  %v3335_v43 = vadd.f32 678289.7, %v3327_v52  ;;  %vm2316_vm8 = vcmp.eq.f32.partialorder %v2315_v4, 8.507059e+37 }
 0x1ae   : > { %v2310_v39 = vadd.f32 %v4602_v8, %v2309_v50  ;;  %v3463_v17 = vmul.f32 %v3455_v19, %v5403_v20  ;;  %v2019_v12 = vadd.f32 15784.881, %v2011_v34  ;;  %v2131_v46 = vmul.f32 %v2123_v14, %v5372_v23 }
 0x1af   : > { %v2079_v57 = vadd.f32 4162388.0, %v2071_v36  ;;  %4609 = vlog2.f32 %v5718_v25  ;;  %v2270_v37 = vsub.f32 %v5720_v18, %v5648_v30  ;;  %v4424_v35 = vadd.f32 -0.5, %v5417_v55 }
 0x1b0   : > { %v2314_v53 = vsel %vm2313_vm7, %v4602_v8, %v2310_v39  ;;  %v3471_v62 = vadd.f32 13068.0, %v3463_v17  ;;  %v2027_v16 = vmul.f32 %v2019_v12, %v5372_v23  ;;  %v2139_v1 = vadd.f32 1960.0, %v2131_v46 }
 0x1b1   : > { %v2319_v58 = vsel %vm2316_vm8, %v2318_v13, %v2314_v53  ;;  %v3343_v8 = vmul.f32 %v3335_v43, %v5403_v20  ;;  %v3275_v4 = vadd.f32 52.458332, %v5446_v48  ;;  %v2087_v52 = vmul.f32 %v2079_v57, %v5417_v55 }
 0x1b2   : > { %v2320_v24 = vmul.f32 %v2319_v58, %v2094_v27  ;;  %v3479_v28 = vmul.f32 %v3471_v62, %v5403_v20  ;;  %v2035_v26 = vadd.f32 129347.26, %v2027_v16  ;;  %v2147_v60 = vmul.f32 %v2139_v1, %v5372_v23 }
 0x1b3   : > { %v4608_v63 = vpop.eup %4607  ;;  %v2243_v33 = vmul.f32 0.6931472, %v4606_v11  ;;  %v4439_v30 = vadd.f32 -0.5, %v5403_v20  ;;  %v3283_v14 = vmul.f32 %v3275_v4, %v5446_v48  ;;  %v2332_v27 = vand.u32 2147483648, %v5712_v56 }
 0x1b4   : > { %4611 = vlog2.f32 %v2320_v24  ;;  %v2322_v50 = vmul.f32 %v4608_v63, %v5712_v56  ;;  %v3487_v34 = vadd.f32 5040.0, %v3479_v28  ;;  %v2043_v36 = vmul.f32 %v2035_v26, %v5372_v23 }
 0x1b5   : > { %v2155_v19 = vadd.f32 6769.0, %v2147_v60  ;;  %v4610_v18 = vpop.eup %4609  ;;  %v3351_v13 = vadd.f32 2222880.5, %v3343_v8  ;;  %v3395_v43 = vadd.f32 28.0, %v5446_v48  ;;  %v2255_v46 = vmul.f32 %v4424_v35, %v2243_v33 }
 0x1b6   : > { %v2323_v39 = vsub.f32 1.0, %v2322_v50  ;;  %v5743_v17 = vmul.f32 %v3487_v34, %v5403_v20  ;;  %v2051_v11 = vadd.f32 678289.7, %v2043_v36  ;;  %v3291_v12 = vadd.f32 1203.8342, %v3283_v14 }
 0x1b7   : > { %v2163_v53 = vmul.f32 %v2155_v19, %v5372_v23  ;;  %vm2327_vm9 = vweird.f32 %v4608_v63  ;;  %v2330_v57 = vand.u32 2147483647, %v5712_v56  ;;  %vm2326_vm10 = vweird.f32 %v5712_v56 }
 0x1b8   : > { %v2324_v58 = vmul.f32 %v4608_v63, %v2323_v39  ;;  %v3530_v62 = vmul.f32 0.6931472, %v4610_v18  ;;  %4613 = vrcp.f32 %v5743_v17  ;;  %v3403_v16 = vmul.f32 %v3395_v43, %v5446_v48  ;;  %vm2328_vm11 = vmor %vm2326_vm10, %vm2327_vm9 }
 0x1b9   : > { %v2059_v4 = vmul.f32 %v2051_v11, %v5372_v23  ;;  %v2171_v28 = vadd.f32 13132.0, %v2163_v53  ;;  %v2095_v26 = vadd.f32 3409662.8, %v2087_v52  ;;  %v2333_v35 = vor.u32 1.1754944e-38, %v2332_v27 }
 0x1ba   : > { %v4612_v24 = vpop.eup %4611  ;;  %v2325_v8 = vadd.f32 %v4608_v63, %v2324_v58  ;;  %v3359_v60 = vmul.f32 %v3351_v13, %v5403_v20  ;;  %v3299_v33 = vmul.f32 %v3291_v12, %v5446_v48  ;;  %vm2331_vm12 = vcmp.eq.f32.partialorder %v2330_v57, 8.507059e+37 }
 0x1bb   : > { %v2401_v1 = vmul.f32 0.6931472, %v4612_v24  ;;  %v2179_v56 = vmul.f32 %v2171_v28, %v5372_v23  ;;  %v5755_v19 = vadd.f32 6.5, %v5372_v23  ;;  %v3411_v18 = vadd.f32 322.0, %v3403_v16 }
 0x1bc   : > { %v2329_v34 = vsel %vm2328_vm11, %v4608_v63, %v2325_v8  ;;  %v3307_v14 = vadd.f32 15784.881, %v3299_v33  ;;  %v2067_v39 = vadd.f32 2222880.5, %v2059_v4  ;;  %v1984_v13 = vadd.f32 52.458332, %v5463_v51 }
 0x1bd   : > { %v2414_v50 = vadd.f32 %v2401_v1, %v2270_v37  ;;  %v2334_v36 = vsel %vm2331_vm12, %v2333_v35, %v2329_v34  ;;  %v2187_v27 = vadd.f32 13068.0, %v2179_v56  ;;  %v3367_v63 = vadd.f32 4162388.0, %v3359_v60 }
 0x1be   : > { %v2335_v52 = vmul.f32 %v2334_v36, %v2095_v26  ;;  %v4614_v37 = vpop.eup %4613  ;;  %v3315_v43 = vmul.f32 %v3307_v14, %v5446_v48  ;;  %v3419_v11 = vmul.f32 %v3411_v18, %v5446_v48  ;;  %v2263_v53 = vadd.f32 0.9189385, %v2255_v46 }
 0x1bf   : > { %2432 = vrot.lane.b32.xlu0 %v2414_v50, %s5045_s10  ;;  %3725 = vrot.lane.b32.xlu2 %v2414_v50, %s5046_s11  ;;  %v3543_v12 = vmul.f32 %v4439_v30, %v3530_v62  ;;  %v3596_v58 = vmul.f32 %v4614_v37, %v5743_v17  ;;  %v3606_v57 = vand.u32 2147483648, %v5743_v17  ;;  %v2195_v24 = vmul.f32 %v2187_v27, %v5372_v23 }
 0x1c0   : > { %4615 = vlog2.f32 %v2335_v52  ;;  %v3427_v16 = vadd.f32 1960.0, %v3419_v11  ;;  %v2075_v8 = vmul.f32 %v2067_v39, %v5372_v23  ;;  %v3323_v4 = vadd.f32 129347.26, %v3315_v43 }
 0x1c1   : > { %4617 = vlog2.f32 %v5755_v19  ;;  %v3597_v1 = vsub.f32 1.0, %v3596_v58  ;;  %v1992_v28 = vmul.f32 %v1984_v13, %v5463_v51  ;;  %v3375_v26 = vmul.f32 %v3367_v63, %v5403_v20 }
 0x1c2   : > { %v2203_v46 = vadd.f32 5040.0, %v2195_v24  ;;  %v3435_v30 = vmul.f32 %v3427_v16, %v5446_v48  ;;  %v2104_v62 = vadd.f32 28.0, %v5463_v51  ;;  %vm3601_vm13 = vweird.f32 %v4614_v37 }
 0x1c3   : > { %v3598_v35 = vmul.f32 %v4614_v37, %v3597_v1  ;;  %v3604_v60 = vand.u32 2147483647, %v5743_v17  ;;  %v2000_v33 = vadd.f32 1203.8342, %v1992_v28  ;;  %v2271_v50 = vsub.f32 %v2263_v53, %v5693_v59 }
 0x1c4   : > { %vm3600_vm14 = vweird.f32 %v5743_v17  ;;  %v5775_v34 = vmul.f32 %v2203_v46, %v5372_v23  ;;  %v3443_v56 = vadd.f32 6769.0, %v3435_v30  ;;  %v3607_v18 = vor.u32 1.1754944e-38, %v3606_v57 }
 0x1c5   : > { %v3599_v14 = vadd.f32 %v4614_v37, %v3598_v35  ;;  %v2083_v52 = vadd.f32 4162388.0, %v2075_v8  ;;  %v3331_v39 = vmul.f32 %v3323_v4, %v5446_v48  ;;  %vm3602_vm15 = vmor %vm3600_vm14, %vm3601_vm13  ;;  %v2008_v63 = vmul.f32 %v2000_v33, %v5463_v51 }
 0x1c6   : > { %v4616_v36 = vpop.eup %4615  ;;  %4619 = vrcp.f32 %v5775_v34  ;;  %v2112_v59 = vmul.f32 %v2104_v62, %v5463_v51  ;;  %v3383_v17 = vadd.f32 3409662.8, %v3375_v26  ;;  %v3551_v43 = vadd.f32 0.9189385, %v3543_v12  ;;  %v5790_v26 = vpop.permute.xlu2 %660 }
 0x1c7   : > { %v4618_v27 = vpop.eup %4617  ;;  %v2403_v13 = vmul.f32 0.6931472, %v4616_v36  ;;  %v3603_v11 = vsel %vm3602_vm15, %v4614_v37, %v3599_v14  ;;  %vm3605_vm0 = vcmp.eq.f32.partialorder %v3604_v60, 8.507059e+37  ;;  %v3451_v57 = vmul.f32 %v3443_v56, %v5446_v48 }
 0x1c8   : > { %v3608_v58 = vsel %vm3605_vm0, %v3607_v18, %v3603_v11  ;;  %v5785_v24 = vadd.f32 6.5, %v5446_v48  ;;  %v2091_v1 = vmul.f32 %v2083_v52, %v5372_v23  ;;  %v2251_v8 = vmul.f32 0.6931472, %v4618_v27 }
 0x1c9   : > { %v5781_v53 = vadd.f32 %v2403_v13, %v2271_v50  ;;  %v3609_v16 = vmul.f32 %v3608_v58, %v3383_v17  ;;  %v3339_v4 = vadd.f32 678289.7, %v3331_v39  ;;  %v3459_v28 = vadd.f32 13132.0, %v3451_v57 }
 0x1ca   : > { %v2016_v12 = vadd.f32 15784.881, %v2008_v63  ;;  %v2120_v37 = vadd.f32 322.0, %v2112_v59  ;;  %v3559_v46 = vsub.f32 %v3551_v43, %v5718_v25  ;;  %v4428_v30 = vadd.f32 -0.5, %v5372_v23 }
 0x1cb   : > { %2434 = vrot.lane.b32.xlu1 %v5781_v53, %s5045_s10  ;;  %4621 = vlog2.f32 %v3609_v16  ;;  %v3272_v62 = vadd.f32 52.458332, %v5459_v0  ;;  %v3467_v60 = vmul.f32 %v3459_v28, %v5446_v48  ;;  %v2099_v56 = vadd.f32 3409662.8, %v2091_v1 }
 0x1cc   : > { %v4620_v35 = vpop.eup %4619  ;;  %4623 = vlog2.f32 %v5785_v24  ;;  %v2024_v33 = vmul.f32 %v2016_v12, %v5463_v51  ;;  %v2128_v50 = vmul.f32 %v2120_v37, %v5463_v51  ;;  %v2259_v36 = vmul.f32 %v4428_v30, %v2251_v8 }
 0x1cd   : > { %v2382_v14 = vmul.f32 %v4620_v35, %v5775_v34  ;;  %v3280_v25 = vmul.f32 %v3272_v62, %v5459_v0  ;;  %v3347_v18 = vmul.f32 %v3339_v4, %v5446_v48  ;;  %v3475_v52 = vadd.f32 13068.0, %v3467_v60 }
 0x1ce   : > { %v2136_v39 = vadd.f32 1960.0, %v2128_v50  ;;  %v3392_v27 = vadd.f32 28.0, %v5459_v0  ;;  %v2392_v63 = vand.u32 2147483648, %v5775_v34  ;;  %v2032_v59 = vadd.f32 129347.26, %v2024_v33  ;;  %v5810_v62 = vpop.permute.xlu2 %672 }
 0x1cf   : > { %v2383_v13 = vsub.f32 1.0, %v2382_v14  ;;  %v3288_v17 = vadd.f32 1203.8342, %v3280_v25  ;;  %vm2386_vm1 = vweird.f32 %v5775_v34  ;;  %v3483_v43 = vmul.f32 %v3475_v52, %v5446_v48 }
 0x1d0   : > { %v2144_v11 = vmul.f32 %v2136_v39, %v5463_v51  ;;  %v3400_v58 = vmul.f32 %v3392_v27, %v5459_v0  ;;  %vm2387_vm2 = vweird.f32 %v4620_v35  ;;  %v2390_v1 = vand.u32 2147483647, %v5775_v34 }
 0x1d1   : > { %v4622_v57 = vpop.eup %4621  ;;  %v2384_v16 = vmul.f32 %v4620_v35, %v2383_v13  ;;  %v3296_v8 = vmul.f32 %v3288_v17, %v5459_v0  ;;  %v3355_v12 = vadd.f32 2222880.5, %v3347_v18  ;;  %v3491_v37 = vadd.f32 5040.0, %v3483_v43  ;;  %vm2388_vm3 = vmor %vm2386_vm1, %vm2387_vm2 }
 0x1d2   : > { %v4624_v4 = vpop.eup %4623  ;;  %v3690_v28 = vmul.f32 0.6931472, %v4622_v57  ;;  %v3408_v30 = vadd.f32 322.0, %v3400_v58  ;;  %v2393_v33 = vor.u32 1.1754944e-38, %v2392_v63  ;;  %v2040_v50 = vmul.f32 %v2032_v59, %v5463_v51 }
 0x1d3   : > { %v2385_v60 = vadd.f32 %v4620_v35, %v2384_v16  ;;  %v2152_v14 = vadd.f32 6769.0, %v2144_v11  ;;  %v5816_v52 = vmul.f32 %v3491_v37, %v5446_v48  ;;  %v5819_v39 = vadd.f32 6.5, %v5463_v51 }
 0x1d4   : > { %v3703_v25 = vadd.f32 %v3690_v28, %v3559_v46  ;;  %v3304_v18 = vadd.f32 15784.881, %v3296_v8  ;;  %vm2391_vm4 = vcmp.eq.f32.partialorder %v2390_v1, 8.507059e+37  ;;  %v3416_v63 = vmul.f32 %v3408_v30, %v5459_v0 }
 0x1d5   : > { %v2389_v27 = vsel %vm2388_vm3, %v4620_v35, %v2385_v60  ;;  %v2160_v13 = vmul.f32 %v2152_v14, %v5463_v51  ;;  %v3363_v46 = vmul.f32 %v3355_v12, %v5446_v48  ;;  %4625 = vrcp.f32 %v5816_v52 }
 0x1d6   : > { %3727 = vrot.lane.b32.xlu0 %v3703_v25, %s5046_s11  ;;  %v2394_v59 = vsel %vm2391_vm4, %v2393_v33, %v2389_v27  ;;  %v2048_v17 = vadd.f32 678289.7, %v2040_v50  ;;  %4627 = vlog2.f32 %v5819_v39  ;;  %v3312_v11 = vmul.f32 %v3304_v18, %v5459_v0 }
 0x1d7   : > { %v2395_v34 = vmul.f32 %v2394_v59, %v2099_v56  ;;  %v2168_v43 = vadd.f32 13132.0, %v2160_v13  ;;  %v2267_v35 = vadd.f32 0.9189385, %v2259_v36  ;;  %v3538_v58 = vmul.f32 0.6931472, %v4624_v4  ;;  %v5835_v4 = vpop.permute.xlu2 %1508 }
 0x1d8   : > { %v3424_v57 = vadd.f32 1960.0, %v3416_v63  ;;  %v3371_v16 = vadd.f32 4162388.0, %v3363_v46  ;;  %v3320_v8 = vadd.f32 129347.26, %v3312_v11  ;;  %v4443_v28 = vadd.f32 -0.5, %v5446_v48 }
 0x1d9   : > { %4629 = vlog2.f32 %v2395_v34  ;;  %v2176_v1 = vmul.f32 %v2168_v43, %v5463_v51  ;;  %v2056_v12 = vmul.f32 %v2048_v17, %v5463_v51  ;;  %v3273_v33 = vadd.f32 52.458332, %v5501_v54 }
 0x1da   : > { %v3432_v56 = vmul.f32 %v3424_v57, %v5459_v0  ;;  %v3328_v60 = vmul.f32 %v3320_v8, %v5459_v0  ;;  %v3393_v36 = vadd.f32 28.0, %v5501_v54  ;;  %v2275_v50 = vsub.f32 %v2267_v35, %v5755_v19 }
 0x1db   : > { %v4626_v37 = vpop.eup %4625  ;;  %v2184_v30 = vadd.f32 13068.0, %v2176_v1  ;;  %v3547_v14 = vmul.f32 %v4443_v28, %v3538_v58  ;;  %v3379_v13 = vmul.f32 %v3371_v16, %v5446_v48  ;;  %v3666_v63 = vand.u32 2147483648, %v5816_v52 }
 0x1dc   : > { %v3656_v25 = vmul.f32 %v4626_v37, %v5816_v52  ;;  %v3440_v18 = vadd.f32 6769.0, %v3432_v56  ;;  %v4628_v27 = vpop.eup %4627  ;;  %v4425_v46 = vadd.f32 -0.5, %v5463_v51  ;;  %v2064_v43 = vadd.f32 2222880.5, %v2056_v12 }
 0x1dd   : > { %v2192_v59 = vmul.f32 %v2184_v30, %v5463_v51  ;;  %v3336_v19 = vadd.f32 678289.7, %v3328_v60  ;;  %v3281_v57 = vmul.f32 %v3273_v33, %v5501_v54  ;;  %v3401_v16 = vmul.f32 %v3393_v36, %v5501_v54 }
 0x1de   : > { %3729 = vrot.lane.b32.xlu0 %v5781_v53, %s5046_s11  ;;  %v3657_v17 = vsub.f32 1.0, %v3656_v25  ;;  %v3448_v11 = vmul.f32 %v3440_v18, %v5459_v0  ;;  %vm3661_vm5 = vweird.f32 %v4626_v37  ;;  %v3664_v53 = vand.u32 2147483647, %v5816_v52 }
 0x1df   : > { %v4630_v34 = vpop.eup %4629  ;;  %v2200_v58 = vadd.f32 5040.0, %v2192_v59  ;;  %vm3660_vm6 = vweird.f32 %v5816_v52  ;;  %v2245_v56 = vmul.f32 0.6931472, %v4628_v27  ;;  %v3667_v60 = vor.u32 1.1754944e-38, %v3666_v63 }
 0x1e0   : > { %v2411_v35 = vmul.f32 0.6931472, %v4630_v34  ;;  %v3658_v1 = vmul.f32 %v4626_v37, %v3657_v17  ;;  %v3456_v8 = vadd.f32 13132.0, %v3448_v11  ;;  %v3344_v25 = vmul.f32 %v3336_v19, %v5459_v0  ;;  %vm3662_vm7 = vmor %vm3660_vm6, %vm3661_vm5  ;;  %v663_v34 = vpop.permute.xlu0 %662  ;;  %v5861_v11 = vpop.permute.xlu2 %2772 }
 0x1e1   : > { %v5853_v12 = vmul.f32 %v2200_v58, %v5463_v51  ;;  %v2072_v36 = vmul.f32 %v2064_v43, %v5463_v51  ;;  %v3409_v52 = vadd.f32 322.0, %v3401_v16  ;;  %v3387_v18 = vadd.f32 3409662.8, %v3379_v13 }
 0x1e2   : > { %v5849_v28 = vadd.f32 %v2411_v35, %v2275_v50  ;;  %v3659_v30 = vadd.f32 %v4626_v37, %v3658_v1  ;;  %v3464_v33 = vmul.f32 %v3456_v8, %v5459_v0  ;;  %v3289_v50 = vadd.f32 1203.8342, %v3281_v57 }
 0x1e3   : > { %4631 = vrcp.f32 %v5853_v12  ;;  %vm3665_vm8 = vcmp.eq.f32.partialorder %v3664_v53, 8.507059e+37  ;;  %v3555_v63 = vadd.f32 0.9189385, %v3547_v14  ;;  %v2256_v19 = vmul.f32 %v4425_v46, %v2245_v56 }
 0x1e4   : > { %8058 = vst [vmem:[#allocation24_spill] sm:$0xff] %v5849_v28  ;;  %2442 = vrot.lane.b32.xlu2 %v5849_v28, %s5045_s10  ;;  %v3663_v59 = vsel %vm3662_vm7, %v4626_v37, %v3659_v30  ;;  %v3472_v27 = vadd.f32 13068.0, %v3464_v33  ;;  %v3352_v58 = vadd.f32 2222880.5, %v3344_v25  ;;  %v2080_v8 = vadd.f32 4162388.0, %v2072_v36 }
 0x1e5   : > { %v3668_v17 = vsel %vm3665_vm8, %v3667_v60, %v3663_v59  ;;  %v3297_v43 = vmul.f32 %v3289_v50, %v5501_v54  ;;  %v3417_v57 = vmul.f32 %v3409_v52, %v5501_v54  ;;  %v5867_v13 = vadd.f32 %v663_v34, %v5253_v21 }
 0x1e6   : > { %v3669_v35 = vmul.f32 %v3668_v17, %v3387_v18  ;;  %v3480_v1 = vmul.f32 %v3472_v27, %v5459_v0  ;;  %v3563_v14 = vsub.f32 %v3555_v63, %v5785_v24  ;;  %v5870_v46 = vadd.f32 0.9189385, %v2256_v19 }
 0x1e7   : > { %v3305_v53 = vadd.f32 15784.881, %v3297_v43  ;;  %v3425_v56 = vadd.f32 1960.0, %v3417_v57  ;;  %v3360_v60 = vmul.f32 %v3352_v58, %v5459_v0  ;;  %v5878_v33 = vadd.f32 6.5, %v5459_v0 }
 0x1e8   : > { %4633 = vlog2.f32 %v3669_v35  ;;  %v3488_v37 = vadd.f32 5040.0, %v3480_v1  ;;  %v2088_v36 = vmul.f32 %v2080_v8, %v5463_v51  ;;  %v5882_v50 = vadd.f32 -0.5, %v5459_v0  ;;  %v675_v28 = vpop.permute.xlu0 %674 }
 0x1e9   : > { %v4632_v16 = vpop.eup %4631  ;;  %v3313_v24 = vmul.f32 %v3305_v53, %v5501_v54  ;;  %v3433_v52 = vmul.f32 %v3425_v56, %v5501_v54  ;;  %v2345_v59 = vand.u32 2147483647, %v5853_v12  ;;  %v1985_v27 = vadd.f32 52.458332, %v5505_v47  ;;  %v5895_v53 = vpop.permute.xlu2 %666 }
 0x1ea   : > { %v2337_v30 = vmul.f32 %v4632_v16, %v5853_v12  ;;  %v5875_v25 = vmul.f32 %v3488_v37, %v5459_v0  ;;  %v2347_v63 = vand.u32 2147483648, %v5853_v12  ;;  %vm2342_vm9 = vweird.f32 %v4632_v16 }
 0x1eb   : > { %v3321_v17 = vadd.f32 129347.26, %v3313_v24  ;;  %v3441_v19 = vadd.f32 6769.0, %v3433_v52  ;;  %v3368_v1 = vadd.f32 4162388.0, %v3360_v60  ;;  %vm2341_vm10 = vweird.f32 %v5853_v12 }
 0x1ec   : > { %v2338_v18 = vsub.f32 1.0, %v2337_v30  ;;  %4635 = vrcp.f32 %v5875_v25  ;;  %v2096_v43 = vadd.f32 3409662.8, %v2088_v36  ;;  %v1993_v30 = vmul.f32 %v1985_v27, %v5505_v47  ;;  %vm2343_vm11 = vmor %vm2341_vm10, %vm2342_vm9 }
 0x1ed   : > { %4637 = vlog2.f32 %v5878_v33  ;;  %v3329_v57 = vmul.f32 %v3321_v17, %v5501_v54  ;;  %v3449_v37 = vmul.f32 %v3441_v19, %v5501_v54  ;;  %v2105_v24 = vadd.f32 28.0, %v5505_v47 }
 0x1ee   : > { %v4634_v35 = vpop.eup %4633  ;;  %v2339_v58 = vmul.f32 %v4632_v16, %v2338_v18  ;;  %vm2346_vm12 = vcmp.eq.f32.partialorder %v2345_v59, 8.507059e+37  ;;  %v2348_v60 = vor.u32 1.1754944e-38, %v2347_v63  ;;  %v3376_v17 = vmul.f32 %v3368_v1, %v5459_v0 }
 0x1ef   : > { %v3698_v8 = vmul.f32 0.6931472, %v4634_v35  ;;  %v3457_v18 = vadd.f32 13132.0, %v3449_v37  ;;  %v2001_v34 = vadd.f32 1203.8342, %v1993_v30  ;;  %v2113_v19 = vmul.f32 %v2105_v24, %v5505_v47 }
 0x1f0   : > { %v2340_v56 = vadd.f32 %v4632_v16, %v2339_v58  ;;  %v3619_v27 = vand.u32 2147483647, %v5875_v25  ;;  %v3337_v21 = vadd.f32 678289.7, %v3329_v57  ;;  %v3621_v1 = vand.u32 2147483648, %v5875_v25 }
 0x1f1   : > { %v3707_v52 = vadd.f32 %v3698_v8, %v3563_v14  ;;  %v3465_v59 = vmul.f32 %v3457_v18, %v5501_v54  ;;  %v2009_v63 = vmul.f32 %v2001_v34, %v5505_v47  ;;  %v3394_v30 = vadd.f32 28.0, %v5534_v3 }
 0x1f2   : > { %v4636_v35 = vpop.eup %4635  ;;  %v2344_v36 = vsel %vm2343_vm11, %v4632_v16, %v2340_v56  ;;  %v2121_v16 = vadd.f32 322.0, %v2113_v19  ;;  %v3274_v56 = vadd.f32 52.458332, %v5534_v3  ;;  %vm3615_vm14 = vweird.f32 %v5875_v25 }
 0x1f3   : > { %3743 = vrot.lane.b32.xlu1 %v3707_v52, %s5046_s11  ;;  %v2349_v58 = vsel %vm2346_vm12, %v2348_v60, %v2344_v36  ;;  %v3611_v12 = vmul.f32 %v4636_v35, %v5875_v25  ;;  %v4638_v14 = vpop.eup %4637  ;;  %v3473_v24 = vadd.f32 13068.0, %v3465_v59  ;;  %v2017_v52 = vadd.f32 15784.881, %v2009_v63  ;;  %v5917_v63 = vpop.permute.xlu2 %1520 }
 0x1f4   : > { %v2350_v8 = vmul.f32 %v2349_v58, %v2096_v43  ;;  %v2129_v60 = vmul.f32 %v2121_v16, %v5505_v47  ;;  %vm3616_vm13 = vweird.f32 %v4636_v35  ;;  %v3345_v43 = vmul.f32 %v3337_v21, %v5501_v54 }
 0x1f5   : > { %v3612_v37 = vsub.f32 1.0, %v3611_v12  ;;  %v3282_v18 = vmul.f32 %v3274_v56, %v5534_v3  ;;  %v3532_v34 = vmul.f32 0.6931472, %v4638_v14  ;;  %v3481_v36 = vmul.f32 %v3473_v24, %v5501_v54  ;;  %v665_v12 = vpop.permute.xlu1 %664  ;;  %vm3617_vm15 = vmor %vm3615_vm14, %vm3616_vm13 }
 0x1f6   : > { %4639 = vlog2.f32 %v2350_v8  ;;  %v2025_v19 = vmul.f32 %v2017_v52, %v5505_v47  ;;  %v2137_v58 = vadd.f32 1960.0, %v2129_v60  ;;  %v3402_v59 = vmul.f32 %v3394_v30, %v5534_v3 }
 0x1f7   : > { %v3613_v57 = vmul.f32 %v4636_v35, %v3612_v37  ;;  %v3290_v8 = vadd.f32 1203.8342, %v3282_v18  ;;  %v3384_v16 = vadd.f32 3409662.8, %v3376_v17  ;;  %v3622_v21 = vor.u32 1.1754944e-38, %v3621_v1 }
 0x1f8   : > { %v3489_v14 = vadd.f32 5040.0, %v3481_v36  ;;  %v2145_v37 = vmul.f32 %v2137_v58, %v5505_v47  ;;  %vm3620_vm0 = vcmp.eq.f32.partialorder %v3619_v27, 8.507059e+37  ;;  %v3353_v24 = vadd.f32 2222880.5, %v3345_v43 }
 0x1f9   : > { %v3614_v48 = vadd.f32 %v4636_v35, %v3613_v57  ;;  %v2033_v52 = vadd.f32 129347.26, %v2025_v19  ;;  %v3298_v30 = vmul.f32 %v3290_v8, %v5534_v3  ;;  %v5926_v23 = vadd.f32 6.5, %v5501_v54 }
 0x1fa   : > { %v5922_v25 = vmul.f32 %v3489_v14, %v5501_v54  ;;  %v2153_v18 = vadd.f32 6769.0, %v2145_v37  ;;  %v3410_v1 = vadd.f32 322.0, %v3402_v59  ;;  %v694_v36 = vmul.f32 1.442695, %v5867_v13 }
 0x1fb   : > { %v3618_v56 = vsel %vm3617_vm15, %v4636_v35, %v3614_v48  ;;  %v3544_v48 = vmul.f32 %v5882_v50, %v3532_v34  ;;  %v8059_v35 = vsub.f32 %v5870_v46, %v5819_v39  ;;  %v2041_v43 = vmul.f32 %v2033_v52, %v5505_v47  ;;  %v5944_v50 = vpop.permute.xlu0 %2774  ;;  %v5948_v37 = vpop.permute.xlu2 %2796 }
 0x1fc   : > { %v4640_v60 = vpop.eup %4639  ;;  %v3623_v57 = vsel %vm3620_vm0, %v3622_v21, %v3618_v56  ;;  %4641 = vrcp.f32 %v5922_v25  ;;  %v2161_v19 = vmul.f32 %v2153_v18, %v5505_v47  ;;  %v3361_v58 = vmul.f32 %v3353_v24, %v5501_v54 }
 0x1fd   : > { %v2405_v0 = vmul.f32 0.6931472, %v4640_v60  ;;  %v3624_v17 = vmul.f32 %v3623_v57, %v3384_v16  ;;  %v3306_v8 = vadd.f32 15784.881, %v3298_v30  ;;  %v686_v59 = vadd.f32 %v665_v12, %v5270_v40  ;;  %v5942_v46 = vpop.permute.xlu1 %2776 }
 0x1fe   : > { %v2169_v13 = vadd.f32 13132.0, %v2161_v19  ;;  %v3418_v39 = vmul.f32 %v3410_v1, %v5534_v3  ;;  %v2049_v34 = vadd.f32 678289.7, %v2041_v43  ;;  %v3369_v56 = vadd.f32 4162388.0, %v3361_v58 }
 0x1ff   : > { %v2416_v27 = vadd.f32 %v2405_v0, %v8059_v35  ;;  %4643 = vlog2.f32 %v3624_v17  ;;  %v3552_v0 = vadd.f32 0.9189385, %v3544_v48  ;;  %v3314_v12 = vmul.f32 %v3306_v8, %v5534_v3 }
 0x200   : > { %4645 = vlog2.f32 %v5926_v23  ;;  %v2177_v16 = vmul.f32 %v2169_v13, %v5505_v47  ;;  %v3426_v21 = vadd.f32 1960.0, %v3418_v39  ;;  %v696_v52 = vmul.f32 1.442695, %v686_v59 }
 0x201   : > { %2436 = vrot.lane.b32.xlu2 %v2416_v27, %s5045_s10  ;;  %3733 = vrot.lane.b32.xlu0 %v2416_v27, %s5046_s11  ;;  %4647 = vpow2.f32 %v694_v36  ;;  %v691_v18 = vadd.f32 %v675_v28, %v5279_v49  ;;  %v3560_v30 = vsub.f32 %v3552_v0, %v5878_v33  ;;  %v2057_v35 = vmul.f32 %v2049_v34, %v5505_v47 }
 0x202   : > { %v4642_v14 = vpop.eup %4641  ;;  %v2185_v57 = vadd.f32 13068.0, %v2177_v16  ;;  %v3434_v1 = vmul.f32 %v3426_v21, %v5534_v3  ;;  %v3322_v43 = vadd.f32 129347.26, %v3314_v12  ;;  %v3377_v8 = vmul.f32 %v3369_v56, %v5501_v54 }
 0x203   : > { %v3626_v60 = vmul.f32 %v4642_v14, %v5922_v25  ;;  %v3636_v59 = vand.u32 2147483648, %v5922_v25  ;;  %vm3631_vm1 = vweird.f32 %v4642_v14  ;;  %v3634_v13 = vand.u32 2147483647, %v5922_v25 }
 0x204   : > { %v2193_v27 = vmul.f32 %v2185_v57, %v5505_v47  ;;  %v3442_v28 = vadd.f32 6769.0, %v3434_v1  ;;  %4649 = vpow2.f32 %v696_v52  ;;  %vm3630_vm2 = vweird.f32 %v5922_v25  ;;  %v5974_v25 = vpop.permute.xlu0 %1510 }
 0x205   : > { %v4644_v24 = vpop.eup %4643  ;;  %v3627_v48 = vsub.f32 1.0, %v3626_v60  ;;  %v2065_v12 = vadd.f32 2222880.5, %v2057_v35  ;;  %v3330_v56 = vmul.f32 %v3322_v43, %v5534_v3  ;;  %v4441_v60 = vadd.f32 -0.5, %v5501_v54  ;;  %vm3632_vm3 = vmor %vm3630_vm2, %vm3631_vm1  ;;  %v5971_v1 = vpop.permute.xlu1 %1512 }
 0x206   : > { %v3692_v17 = vmul.f32 0.6931472, %v4644_v24  ;;  %v4646_v36 = vpop.eup %4645  ;;  %v2201_v39 = vadd.f32 5040.0, %v2193_v27  ;;  %v3450_v34 = vmul.f32 %v3442_v28, %v5534_v3  ;;  %v706_v24 = vmul.f32 1.442695, %v691_v18  ;;  %v5979_v18 = vpop.permute.xlu2 %2778 }
 0x207   : > { %v5956_v19 = vpop.eup %4647  ;;  %v3628_v33 = vmul.f32 %v4642_v14, %v3627_v48  ;;  %v3534_v0 = vmul.f32 0.6931472, %v4646_v36  ;;  %v3637_v57 = vor.u32 1.1754944e-38, %v3636_v59  ;;  %vm3635_vm4 = vcmp.eq.f32.partialorder %v3634_v13, 8.507059e+37 }
 0x208   : > { %8060 = vst [vmem:[#allocation25_spill] sm:$0xff] %v5956_v19  ;;  %v3704_v58 = vadd.f32 %v3692_v17, %v3560_v30  ;;  %v5967_v21 = vmul.f32 %v2201_v39, %v5505_v47  ;;  %v3458_v52 = vadd.f32 13132.0, %v3450_v34  ;;  %v3385_v30 = vadd.f32 3409662.8, %v3377_v8 }
 0x209   : > { %726 = vrot.lane.b32.xlu2 %v5956_v19, %s5047_s12  ;;  %v3629_v16 = vadd.f32 %v4642_v14, %v3628_v33  ;;  %v3545_v36 = vmul.f32 %v4441_v60, %v3534_v0  ;;  %v5977_v35 = vadd.f32 6.5, %v5505_v47  ;;  %v2073_v43 = vmul.f32 %v2065_v12, %v5505_v47 }
 0x20a   : > { %3731 = vrot.lane.b32.xlu1 %v3704_v58, %s5046_s11  ;;  %4651 = vrcp.f32 %v5967_v21  ;;  %v3338_v58 = vadd.f32 678289.7, %v3330_v56  ;;  %v5983_v8 = vpop.eup %4649  ;;  %vm2356_vm6 = vweird.f32 %v5967_v21  ;;  %vm2804_vm13 = vcmask 64512  }
 0x20b   : > { %v3633_v17 = vsel %vm3632_vm3, %v4642_v14, %v3629_v16  ;;  %v3466_v14 = vmul.f32 %v3458_v52, %v5534_v3  ;;  %8061 = vst [vmem:[#allocation26_spill] sm:$0xff] %v5983_v8  ;;  %4653 = vpow2.f32 %v706_v24  ;;  %v3553_v28 = vadd.f32 0.9189385, %v3545_v36 }
 0x20c   : > { %v3638_v48 = vsel %vm3635_vm4, %v3637_v57, %v3633_v17  ;;  %v2081_v13 = vadd.f32 4162388.0, %v2073_v43  ;;  %v3346_v39 = vmul.f32 %v3338_v58, %v5534_v3  ;;  %v2362_v52 = vand.u32 2147483648, %v5967_v21 }
 0x20d   : > { %v3639_v27 = vmul.f32 %v3638_v48, %v3385_v30  ;;  %v3474_v59 = vadd.f32 13068.0, %v3466_v14  ;;  %v3561_v56 = vsub.f32 %v3553_v28, %v5926_v23  ;;  %v5997_v36 = vpop.permute.xlu1 %2800  ;;  %v5999_v48 = vpop.permute.xlu0 %2780  ;;  %v2360_v14 = vand.u32 2147483647, %v5967_v21 }
 0x20e   : > { %v2089_v57 = vmul.f32 %v2081_v13, %v5505_v47  ;;  %v3354_v30 = vadd.f32 2222880.5, %v3346_v39  ;;  %8063 = vst [vmem:[#allocation28_spill] sm:$0xff] %v5997_v36  ;;  %v6002_v23 = vpop.permute.xlu2 %1514  ;;  %v6008_v13 = vadd.f32 6.5, %v5534_v3 }
 0x20f   : > { %4655 = vlog2.f32 %v3639_v27  ;;  %v3482_v0 = vmul.f32 %v3474_v59, %v5534_v3  ;;  %vm2361_vm8 = vcmp.eq.f32.partialorder %v2360_v14, 8.507059e+37 }
 0x210   : > { %4657 = vlog2.f32 %v5977_v35  ;;  %v4652_v33 = vpop.eup %4651 }
 0x211   : > { %1448 = vrot.lane.b32.xlu2 %v5983_v8, %s5048_s13  ;;  %v2352_v34 = vmul.f32 %v4652_v33, %v5967_v21  ;;  %v3490_v16 = vadd.f32 5040.0, %v3482_v0  ;;  %v5991_v12 = vpop.eup %4653  ;;  %vm2357_vm5 = vweird.f32 %v4652_v33  ;;  %v2363_v0 = vor.u32 1.1754944e-38, %v2362_v52 }
 0x212   : > { %8062 = vst [vmem:[#allocation27_spill] sm:$0xff] %v5991_v12  ;;  %vm2358_vm7 = vmor %vm2356_vm6, %vm2357_vm5 }
 0x213   : > { %v2353_v24 = vsub.f32 1.0, %v2352_v34  ;;  %v3498_v17 = vmul.f32 %v3490_v16, %v5534_v3  ;;  %v2097_v34 = vadd.f32 3409662.8, %v2089_v57 }
 0x215   : > { %v4656_v60 = vpop.eup %4655  ;;  %v2354_v58 = vmul.f32 %v4652_v33, %v2353_v24  ;;  %4659 = vrcp.f32 %v3498_v17  ;;  %v3362_v24 = vmul.f32 %v3354_v30, %v5534_v3  ;;  %vm3645_vm10 = vweird.f32 %v3498_v17 }
 0x216   : > { %v4658_v27 = vpop.eup %4657  ;;  %v3694_v43 = vmul.f32 0.6931472, %v4656_v60  ;;  %v4426_v60 = vadd.f32 -0.5, %v5505_v47  ;;  %4661 = vlog2.f32 %v6008_v13  ;;  %v6016_v57 = vpop.permute.xlu2 %2784 }
 0x217   : > { %v2355_v28 = vadd.f32 %v4652_v33, %v2354_v58  ;;  %v2247_v39 = vmul.f32 0.6931472, %v4658_v27  ;;  %v6014_v58 = vpop.permute.xlu1 %2782  ;;  %v669_v27 = vpop.permute.xlu0 %668  ;;  %v3370_v52 = vadd.f32 4162388.0, %v3362_v24 }
 0x218   : > { %v3705_v59 = vadd.f32 %v3694_v43, %v3561_v56 }
 0x219   : > { %738 = vrot.lane.b32.xlu2 %v5991_v12, %s5047_s12  ;;  %v2359_v16 = vsel %vm2358_vm7, %v4652_v33, %v2355_v28  ;;  %v2257_v43 = vmul.f32 %v4426_v60, %v2247_v39  ;;  %v688_v33 = vadd.f32 %v669_v27, %v5315_v42  ;;  %v3651_v28 = vand.u32 2147483648, %v3498_v17 }
 0x21a   : > { %3735 = vrot.lane.b32.xlu1 %v3705_v59, %s5046_s11  ;;  %v2364_v49 = vsel %vm2361_vm8, %v2363_v0, %v2359_v16  ;;  %v3649_v39 = vand.u32 2147483647, %v3498_v17 }
 0x21b   : > { %v2365_v56 = vmul.f32 %v2364_v49, %v2097_v34  ;;  %v4660_v21 = vpop.eup %4659  ;;  %v2265_v14 = vadd.f32 0.9189385, %v2257_v43  ;;  %v700_v0 = vmul.f32 1.442695, %v688_v33  ;;  %v3378_v34 = vmul.f32 %v3370_v52, %v5534_v3 }
 0x21c   : > { %v3641_v59 = vmul.f32 %v4660_v21, %v3498_v17  ;;  %v4662_v49 = vpop.eup %4661  ;;  %vm3646_vm9 = vweird.f32 %v4660_v21  ;;  %v3652_v52 = vor.u32 1.1754944e-38, %v3651_v28  ;;  %vm3650_vm12 = vcmp.eq.f32.partialorder %v3649_v39, 8.507059e+37 }
 0x21d   : > { %4663 = vlog2.f32 %v2365_v56  ;;  %v6027_v56 = vld [vmem:[%s6024_s17 + $0x30] sm:$0xff]  ;;  %v2273_v43 = vsub.f32 %v2265_v14, %v5977_v35  ;;  %vm3647_vm11 = vmor %vm3645_vm10, %vm3646_vm9  ;;  %v4442_v17 = vadd.f32 -0.5, %v5534_v3 }
 0x21e   : > { %v3642_v30 = vsub.f32 1.0, %v3641_v59  ;;  %4665 = vpow2.f32 %v700_v0  ;;  %v3536_v59 = vmul.f32 0.6931472, %v4662_v49  ;;  %v3386_v0 = vadd.f32 3409662.8, %v3378_v34  ;;  %v6033_v36 = vpop.permute.xlu2 %2802 }
 0x21f   : > { %v671_v33 = vpop.permute.xlu1 %670  ;;  %8064 = vst [vmem:[#allocation29_spill] sm:$0xff] %v6033_v36  ;;  %v6038_v35 = vadd.f32 %v5917_v63, %v6027_v56  ;;  %v684_v34 = vadd.f32 %v5790_v26, %v5242_v10 }
 0x220   : > { %v3643_v16 = vmul.f32 %v4660_v21, %v3642_v30  ;;  %v6030_v30 = vpop.permute.xlu0 %1522  ;;  %v689_v40 = vadd.f32 %v671_v33, %v5335_v6 }
 0x221   : > { %v1666_v63 = vadd.f32 28.0, %v6038_v35  ;;  %v692_v39 = vmul.f32 1.442695, %v684_v34 }
 0x222   : > { %v3644_v24 = vadd.f32 %v4660_v21, %v3643_v16  ;;  %v702_v28 = vmul.f32 1.442695, %v689_v40 }
 0x223   : > { %v4664_v60 = vpop.eup %4663 }
 0x224   : > { %v2407_v27 = vmul.f32 0.6931472, %v4664_v60  ;;  %v3648_v42 = vsel %vm3647_vm11, %v4660_v21, %v3644_v24  ;;  %v6040_v49 = vpop.eup %4665  ;;  %v3546_v21 = vmul.f32 %v4442_v17, %v3536_v59 }
 0x225   : > { %v3653_v54 = vsel %vm3650_vm12, %v3652_v52, %v3648_v42  ;;  %8065 = vst [vmem:[#allocation30_spill] sm:$0xff] %v6040_v49  ;;  %732 = vrot.lane.b32.xlu2 %v6040_v49, %s5047_s12  ;;  %v1546_v42 = vadd.f32 52.458332, %v6038_v35 }
 0x226   : > { %v2417_v16 = vadd.f32 %v2407_v27, %v2273_v43  ;;  %v3654_v14 = vmul.f32 %v3653_v54, %v3386_v0  ;;  %v3554_v54 = vadd.f32 0.9189385, %v3546_v21  ;;  %v2791_v43 = vpop.permute.xlu2 %2790  ;;  %v1674_v27 = vmul.f32 %v1666_v63, %v6038_v35 }
 0x227   : > { %v2789_v60 = vpop.permute.xlu1 %2788  ;;  %v1554_v26 = vmul.f32 %v1546_v42, %v6038_v35 }
 0x228   : > { %2438 = vrot.lane.b32.xlu0 %v2417_v16, %s5045_s10  ;;  %4667 = vlog2.f32 %v3654_v14  ;;  %v2799_v40 = vpop.permute.xlu0 %2798  ;;  %v6056_v59 = vsel %vm2804_vm13, %v2789_v60, %v2791_v43  ;;  %v1682_v33 = vadd.f32 322.0, %v1674_v27  ;;  %v3562_v17 = vsub.f32 %v3554_v54, %v6008_v13 }
 0x229   : > { %4669 = vpow2.f32 %v702_v28  ;;  %v6051_v24 = vsel %vm2804_vm13, %v5948_v37, %v2799_v40  ;;  %v1562_v28 = vadd.f32 1203.8342, %v1554_v26  ;;  %v690_v37 = vadd.f32 %v5810_v62, %v5261_v29 }
 0x22a   : > { %4671 = vpow2.f32 %v692_v39  ;;  %v1690_v34 = vmul.f32 %v1682_v33, %v6038_v35 }
 0x22b   : > { %v1570_v63 = vmul.f32 %v1562_v28, %v6038_v35  ;;  %v704_v13 = vmul.f32 1.442695, %v690_v37 }
 0x22c   : > { %v1698_v54 = vadd.f32 1960.0, %v1690_v34 }
 0x22d   : > { %v1578_v39 = vadd.f32 15784.881, %v1570_v63  ;;  %4673 = vpow2.f32 %v704_v13  ;;  %v587_v13 = vld [vmem:[%s6024_s17 + $0x38] sm:$0xff] }
 0x22e   : > { %v4668_v52 = vpop.eup %4667  ;;  %v1706_v62 = vmul.f32 %v1698_v54, %v6038_v35  ;;  %v3720_v10 = vpop.permute.xlu2 %3719 }
 0x22f   : > { %v6058_v0 = vpop.eup %4669  ;;  %v3696_v14 = vmul.f32 0.6931472, %v4668_v52  ;;  %v1586_v43 = vmul.f32 %v1578_v39, %v6038_v35  ;;  %v687_v52 = vadd.f32 %v5895_v53, %v5292_v5  ;;  %v6088_v33 = vpop.permute.xlu1 %1518 }
 0x230   : > { %8066 = vst [vmem:[#allocation31_spill] sm:$0xff] %v6058_v0  ;;  %3737 = vrot.lane.b32.xlu0 %v2417_v16, %s5046_s11  ;;  %1454 = vrot.lane.b32.xlu2 %v6058_v0, %s5048_s13  ;;  %v2787_v42 = vpop.permute.xlu0 %2786  ;;  %v6073_v40 = vpop.eup %4671  ;;  %v1714_v60 = vadd.f32 6769.0, %v1706_v62 }
 0x231   : > { %v3706_v21 = vadd.f32 %v3696_v14, %v3562_v17  ;;  %v6071_v16 = vsel %vm2804_vm13, %v6016_v57, %v2787_v42  ;;  %8067 = vst [vmem:[#allocation32_spill] sm:$0xff] %v6073_v40  ;;  %v1594_v27 = vadd.f32 129347.26, %v1586_v43  ;;  %v698_v28 = vmul.f32 1.442695, %v687_v52  ;;  %v581_v43 = vld [vmem:[%s6024_s17 + $0x8] sm:$0xff] }
 0x232   : > { %v1722_v57 = vmul.f32 %v1714_v60, %v6038_v35 }
 0x233   : > { %3739 = vrot.lane.b32.xlu1 %v3706_v21, %s5046_s11  ;;  %v6081_v26 = vpop.eup %4673  ;;  %v1602_v14 = vmul.f32 %v1594_v27, %v6038_v35  ;;  %4675 = vpow2.f32 %v698_v28  ;;  %v6111_v27 = vadd.f32 %v6030_v30, %v587_v13  ;;  %v6119_v28 = vadd.f32 6.5, %v6038_v35 }
 0x234   : > { %8068 = vst [vmem:[#allocation33_spill] sm:$0xff] %v6081_v26  ;;  %v1730_v17 = vadd.f32 13132.0, %v1722_v57  ;;  %v2806_v57 = vsel %vm2804_vm13, %v5942_v46, %v5979_v18 }
 0x235   : > { %v1610_v21 = vadd.f32 678289.7, %v1602_v14  ;;  %v1547_v14 = vadd.f32 52.458332, %v6111_v27  ;;  %v1667_v46 = vadd.f32 28.0, %v6111_v27 }
 0x236   : > { %v1738_v37 = vmul.f32 %v1730_v17, %v6038_v35  ;;  %v6115_v17 = vadd.f32 %v2806_v57, %v581_v43 }
 0x237   : > { %v2795_v42 = vpop.permute.xlu1 %2794  ;;  %v1618_v54 = vmul.f32 %v1610_v21, %v6038_v35  ;;  %v1555_v21 = vmul.f32 %v1547_v14, %v6111_v27 }
 0x238   : > { %1444 = vrot.lane.b32.xlu0 %v6073_v40, %s5048_s13  ;;  %v1746_v34 = vadd.f32 13068.0, %v1738_v37  ;;  %v6097_v63 = vpop.permute.xlu0 %1516  ;;  %v2830_v13 = vadd.f32 52.458332, %v6115_v17 }
 0x239   : > { %v6104_v60 = vpop.eup %4675  ;;  %v1626_v52 = vadd.f32 2222880.5, %v1618_v54  ;;  %v1563_v43 = vadd.f32 1203.8342, %v1555_v21 }
 0x23a   : > { %v1754_v53 = vmul.f32 %v1746_v34, %v6038_v35  ;;  %8069 = vst [vmem:[#allocation34_spill] sm:$0xff] %v6104_v60  ;;  %v2838_v29 = vmul.f32 %v2830_v13, %v6115_v17 }
 0x23b   : > { %724 = vrot.lane.b32.xlu1 %v6073_v40, %s5047_s12  ;;  %v1634_v18 = vmul.f32 %v1626_v52, %v6038_v35  ;;  %v1571_v14 = vmul.f32 %v1563_v43, %v6111_v27 }
 0x23c   : > { %v1762_v62 = vadd.f32 5040.0, %v1754_v53  ;;  %v1675_v53 = vmul.f32 %v1667_v46, %v6111_v27  ;;  %v2950_v46 = vadd.f32 28.0, %v6115_v17 }
 0x23d   : > { %v1579_v21 = vadd.f32 15784.881, %v1571_v14 }
 0x23e   : > { %v1770_v39 = vmul.f32 %v1762_v62, %v6038_v35  ;;  %v1642_v62 = vadd.f32 4162388.0, %v1634_v18  ;;  %v1683_v57 = vadd.f32 322.0, %v1675_v53 }
 0x23f   : > { %v6125_v30 = vpop.permute.xlu1 %2428 }
 0x240   : > { %1456 = vrot.lane.b32.xlu0 %v6081_v26, %s5048_s13  ;;  %4677 = vrcp.f32 %v1770_v39  ;;  %8070 = vst [vmem:[#allocation35_spill] sm:$0xff] %v6125_v30  ;;  %v2793_v37 = vpop.permute.xlu0 %2792  ;;  %v1650_v6 = vmul.f32 %v1642_v62, %v6038_v35  ;;  %v1935_v43 = vand.u32 2147483647, %v1770_v39  ;;  %v2958_v62 = vmul.f32 %v2950_v46, %v6115_v17  ;;  %v6156_v46 = vld [vmem:[%s6024_s17 + $0x20] sm:$0xff] }
 0x241   : > { %v6129_v34 = vsel %vm2804_vm13, %v2793_v37, %v2795_v42  ;;  %4679 = vlog2.f32 %v6119_v28  ;;  %v1691_v42 = vmul.f32 %v1683_v57, %v6111_v27  ;;  %v2846_v57 = vadd.f32 1203.8342, %v2838_v29 }
 0x242   : > { %vm1931_vm15 = vweird.f32 %v1770_v39  ;;  %vm1936_vm1 = vcmp.eq.f32.partialorder %v1935_v43, 8.507059e+37 }
 0x243   : > { %1446 = vrot.lane.b32.xlu1 %v5956_v19, %s5048_s13  ;;  %v1699_v53 = vadd.f32 1960.0, %v1691_v42 }
 0x245   : > { %v1707_v36 = vmul.f32 %v1699_v53, %v6111_v27 }
 0x246   : > { %v4678_v54 = vpop.eup %4677 }
 0x247   : > { %v1927_v52 = vmul.f32 %v4678_v54, %v1770_v39  ;;  %v4680_v5 = vpop.eup %4679  ;;  %v3718_v18 = vpop.permute.xlu1 %3717  ;;  %vm1932_vm14 = vweird.f32 %v4678_v54  ;;  %v1715_v14 = vadd.f32 6769.0, %v1707_v36 }
 0x248   : > { %728 = vrot.lane.b32.xlu0 %v5983_v8, %s5047_s12  ;;  %v6144_v13 = vsel %vm2804_vm13, %v3718_v18, %v3720_v10  ;;  %v1809_v3 = vmul.f32 0.6931472, %v4680_v5  ;;  %vm1933_vm0 = vmor %vm1931_vm15, %vm1932_vm14  ;;  %v2854_v18 = vmul.f32 %v2846_v57, %v6115_v17  ;;  %v4419_v5 = vadd.f32 -0.5, %v6038_v35  ;;  %v6164_v57 = vpop.permute.xlu2 %2430 }
 0x249   : > { %v1928_v37 = vsub.f32 1.0, %v1927_v52  ;;  %8071 = vst [vmem:[#allocation36_spill] sm:$0xff] %v6144_v13  ;;  %v1587_v52 = vmul.f32 %v1579_v21, %v6111_v27  ;;  %v1723_v21 = vmul.f32 %v1715_v14, %v6111_v27 }
 0x24a   : > { %8072 = vst [vmem:[#allocation37_spill] sm:$0xff] %v6164_v57 }
 0x24b   : > { %736 = vrot.lane.b32.xlu1 %v6081_v26, %s5047_s12  ;;  %v1937_v26 = vand.u32 2147483648, %v1770_v39  ;;  %v1731_v36 = vadd.f32 13132.0, %v1723_v21 }
 0x24d   : > { %v1938_v42 = vor.u32 1.1754944e-38, %v1937_v26  ;;  %v2862_v26 = vadd.f32 15784.881, %v2854_v18 }
 0x250   : > { %1450 = vrot.lane.b32.xlu0 %v6104_v60, %s5048_s13 }
 0x253   : > { %1458 = vrot.lane.b32.xlu1 %v5991_v12, %s5048_s13  ;;  %v1929_v12 = vmul.f32 %v4678_v54, %v1928_v37  ;;  %v1658_v37 = vadd.f32 3409662.8, %v1650_v6  ;;  %v1818_v6 = vmul.f32 %v4419_v5, %v1809_v3 }
 0x255   : > { %v1826_v35 = vadd.f32 0.9189385, %v1818_v6  ;;  %v6175_v6 = vpop.permute.xlu1 %2440 }
 0x256   : > { %8073 = vst [vmem:[#allocation38_spill] sm:$0xff] %v6175_v6 }
 0x257   : > { %v1834_v21 = vsub.f32 %v1826_v35, %v6119_v28 }
 0x258   : > { %734 = vrot.lane.b32.xlu0 %v6058_v0, %s5047_s12  ;;  %v1595_v0 = vadd.f32 129347.26, %v1587_v52 }
 0x25a   : > { %v1603_v29 = vmul.f32 %v1595_v0, %v6111_v27 }
 0x25b   : > { %730 = vrot.lane.b32.xlu1 %v6104_v60, %s5047_s12  ;;  %v1930_v60 = vadd.f32 %v4678_v54, %v1929_v12  ;;  %v2966_v12 = vadd.f32 322.0, %v2958_v62  ;;  %v2870_v62 = vmul.f32 %v2862_v26, %v6115_v17 }
 0x25c   : > { %v1611_v0 = vadd.f32 678289.7, %v1603_v29 }
 0x25d   : > { %v1934_v10 = vsel %vm1933_vm0, %v4678_v54, %v1930_v60  ;;  %v6160_v60 = vadd.f32 %v6097_v63, %v6156_v46  ;;  %v1739_v54 = vmul.f32 %v1731_v36, %v6111_v27  ;;  %v2974_v43 = vmul.f32 %v2966_v12, %v6115_v17 }
 0x25e   : > { %v1939_v53 = vsel %vm1936_vm1, %v1938_v42, %v1934_v10  ;;  %v1619_v14 = vmul.f32 %v1611_v0, %v6111_v27  ;;  %v2878_v5 = vadd.f32 129347.26, %v2870_v62  ;;  %v6179_v0 = vadd.f32 6.5, %v6111_v27 }
 0x25f   : > { %v1940_v39 = vmul.f32 %v1939_v53, %v1658_v37  ;;  %v1747_v52 = vadd.f32 13068.0, %v1739_v54  ;;  %v1544_v42 = vadd.f32 52.458332, %v6160_v60  ;;  %v2982_v37 = vadd.f32 1960.0, %v2974_v43 }
 0x260   : > { %v1664_v10 = vadd.f32 28.0, %v6160_v60 }
 0x261   : > { %4681 = vlog2.f32 %v1940_v39  ;;  %v1755_v3 = vmul.f32 %v1747_v52, %v6111_v27  ;;  %v1552_v53 = vmul.f32 %v1544_v42, %v6160_v60  ;;  %v1627_v39 = vadd.f32 2222880.5, %v1619_v14  ;;  %v6183_v52 = vpop.permute.xlu2 %3725 }
 0x262   : > { %v1672_v12 = vmul.f32 %v1664_v10, %v6160_v60  ;;  %v2990_v26 = vmul.f32 %v2982_v37, %v6115_v17  ;;  %v2886_v14 = vmul.f32 %v2878_v5, %v6115_v17  ;;  %v6193_v10 = vld [vmem:[%s6024_s17 + $0x18] sm:$0xff] }
 0x263   : > { %1452 = vrot.lane.b32.xlu1 %v6040_v49, %s5048_s13  ;;  %v1763_v18 = vadd.f32 5040.0, %v1755_v3  ;;  %v1560_v43 = vadd.f32 1203.8342, %v1552_v53  ;;  %v1635_v3 = vmul.f32 %v1627_v39, %v6111_v27  ;;  %v6200_v39 = vadd.f32 %v6002_v23, %v6193_v10 }
 0x264   : > { %v1680_v28 = vadd.f32 322.0, %v1672_v12  ;;  %v2998_v37 = vadd.f32 6769.0, %v2990_v26 }
 0x265   : > { %v1771_v36 = vmul.f32 %v1763_v18, %v6111_v27  ;;  %v1568_v62 = vmul.f32 %v1560_v43, %v6160_v60  ;;  %v1643_v43 = vadd.f32 4162388.0, %v1635_v3  ;;  %v1543_v40 = vadd.f32 52.458332, %v6200_v39 }
 0x266   : > { %v1688_v42 = vmul.f32 %v1680_v28, %v6160_v60  ;;  %v3006_v53 = vmul.f32 %v2998_v37, %v6115_v17 }
 0x267   : > { %v4682_v63 = vpop.eup %4681  ;;  %4683 = vrcp.f32 %v1771_v36  ;;  %v1651_v23 = vmul.f32 %v1643_v43, %v6111_v27  ;;  %v1952_v49 = vand.u32 2147483648, %v1771_v36  ;;  %vm1946_vm3 = vweird.f32 %v1771_v36 }
 0x268   : > { %v1969_v29 = vmul.f32 0.6931472, %v4682_v63  ;;  %4685 = vlog2.f32 %v6179_v0  ;;  %v1576_v63 = vadd.f32 15784.881, %v1568_v62  ;;  %v1696_v18 = vadd.f32 1960.0, %v1688_v42 }
 0x269   : > { %v3014_v35 = vadd.f32 13132.0, %v3006_v53  ;;  %v4420_v62 = vadd.f32 -0.5, %v6111_v27  ;;  %v6204_v42 = vadd.f32 6.5, %v6115_v17  ;;  %v1659_v43 = vadd.f32 3409662.8, %v1651_v23 }
 0x26a   : > { %v6181_v54 = vadd.f32 %v1969_v29, %v1834_v21  ;;  %v1584_v29 = vmul.f32 %v1576_v63, %v6160_v60  ;;  %v2894_v21 = vadd.f32 678289.7, %v2886_v14  ;;  %v1704_v5 = vmul.f32 %v1696_v18, %v6160_v60 }
 0x26b   : > { %v3022_v18 = vmul.f32 %v3014_v35, %v6115_v17  ;;  %4687 = vlog2.f32 %v6204_v42  ;;  %v1551_v35 = vmul.f32 %v1543_v40, %v6200_v39 }
 0x26c   : > { %8074 = vst [vmem:[#allocation39_spill] sm:$0xff] %v6181_v54  ;;  %v1592_v28 = vadd.f32 129347.26, %v1584_v29  ;;  %v1712_v6 = vadd.f32 6769.0, %v1704_v5  ;;  %v2902_v3 = vmul.f32 %v2894_v21, %v6115_v17  ;;  %v6211_v5 = vpop.permute.xlu2 %2442 }
 0x26d   : > { %v4684_v12 = vpop.eup %4683  ;;  %v1950_v54 = vand.u32 2147483647, %v1771_v36  ;;  %8075 = vst [vmem:[#allocation40_spill] sm:$0xff] %v6211_v5  ;;  %v3030_v8 = vadd.f32 13068.0, %v3022_v18 }
 0x26e   : > { %v1942_v26 = vmul.f32 %v4684_v12, %v1771_v36  ;;  %v4686_v14 = vpop.eup %4685  ;;  %v1600_v37 = vmul.f32 %v1592_v28, %v6160_v60  ;;  %v1720_v29 = vmul.f32 %v1712_v6, %v6160_v60  ;;  %vm1947_vm2 = vweird.f32 %v4684_v12 }
 0x26f   : > { %v3038_v27 = vmul.f32 %v3030_v8, %v6115_v17  ;;  %vm1948_vm4 = vmor %vm1946_vm3, %vm1947_vm2  ;;  %v1953_v6 = vor.u32 1.1754944e-38, %v1952_v49  ;;  %v2910_v57 = vadd.f32 2222880.5, %v2902_v3  ;;  %vm1951_vm5 = vcmp.eq.f32.partialorder %v1950_v54, 8.507059e+37  ;;  %v3724_v54 = vpop.permute.xlu1 %3723 }
 0x270   : > { %v1943_v63 = vsub.f32 1.0, %v1942_v26  ;;  %v1811_v26 = vmul.f32 0.6931472, %v4686_v14  ;;  %v1608_v19 = vadd.f32 678289.7, %v1600_v37  ;;  %v1728_v28 = vadd.f32 13132.0, %v1720_v29 }
 0x271   : > { %v3046_v13 = vadd.f32 5040.0, %v3038_v27  ;;  %v1559_v14 = vadd.f32 1203.8342, %v1551_v35  ;;  %v4688_v40 = vpop.eup %4687  ;;  %v2918_v49 = vmul.f32 %v2910_v57, %v6115_v17  ;;  %v1663_v3 = vadd.f32 28.0, %v6200_v39 }
 0x272   : > { %v1944_v53 = vmul.f32 %v4684_v12, %v1943_v63  ;;  %v1736_v63 = vmul.f32 %v1728_v28, %v6160_v60  ;;  %v1616_v29 = vmul.f32 %v1608_v19, %v6160_v60 }
 0x273   : > { %v6220_v8 = vmul.f32 %v3046_v13, %v6115_v17  ;;  %v2807_v13 = vsel %vm2804_vm13, %v5999_v48, %v6014_v58  ;;  %v1671_v35 = vmul.f32 %v1663_v3, %v6200_v39  ;;  %v3088_v58 = vmul.f32 0.6931472, %v4688_v40 }
 0x274   : > { %v1945_v21 = vadd.f32 %v4684_v12, %v1944_v53  ;;  %v1744_v30 = vadd.f32 13068.0, %v1736_v63  ;;  %v1819_v53 = vmul.f32 %v4420_v62, %v1811_v26  ;;  %v1624_v28 = vadd.f32 2222880.5, %v1616_v29  ;;  %v3722_v62 = vpop.permute.xlu0 %3721  ;;  %v6243_v63 = vld [vmem:[%s6024_s17 + $0x10] sm:$0xff] }
 0x275   : > { %v6236_v27 = vsel %vm2804_vm13, %v3722_v62, %v3724_v54  ;;  %v4430_v29 = vadd.f32 -0.5, %v6115_v17  ;;  %v1679_v3 = vadd.f32 322.0, %v1671_v35  ;;  %v709_v40 = vadd.f32 1.0, %v5272_v41 }
 0x276   : > { %v1949_v18 = vsel %vm1948_vm4, %v4684_v12, %v1945_v21  ;;  %v1752_v23 = vmul.f32 %v1744_v30, %v6160_v60  ;;  %v1567_v12 = vmul.f32 %v1559_v14, %v6200_v39  ;;  %v1827_v26 = vadd.f32 0.9189385, %v1819_v53  ;;  %v6230_v30 = vpop.permute.xlu2 %2436  ;;  %8077 = vst [vmem:[#allocation42_spill] sm:$0xff] %v6236_v27 }
 0x277   : > { %v1954_v37 = vsel %vm1951_vm5, %v1953_v6, %v1949_v18  ;;  %8076 = vst [vmem:[#allocation41_spill] sm:$0xff] %v6230_v30  ;;  %v2926_v21 = vadd.f32 4162388.0, %v2918_v49  ;;  %v1632_v48 = vmul.f32 %v1624_v28, %v6160_v60  ;;  %v6248_v14 = vadd.f32 %v2807_v13, %v6243_v63 }
 0x278   : > { %v1955_v36 = vmul.f32 %v1954_v37, %v1659_v43  ;;  %v1760_v19 = vadd.f32 5040.0, %v1752_v23  ;;  %v6240_v43 = vadd.f32 6.5, %v6160_v60  ;;  %v1575_v6 = vadd.f32 15784.881, %v1567_v12 }
 0x279   : > { %v1835_v37 = vsub.f32 %v1827_v26, %v6179_v0  ;;  %v2934_v23 = vmul.f32 %v2926_v21, %v6115_v17  ;;  %v1640_v28 = vadd.f32 4162388.0, %v1632_v48  ;;  %v1687_v0 = vmul.f32 %v1679_v3, %v6200_v39 }
 0x27a   : > { %4689 = vlog2.f32 %v1955_v36  ;;  %v6233_v57 = vmul.f32 %v1760_v19, %v6160_v60  ;;  %v1583_v49 = vmul.f32 %v1575_v6, %v6200_v39  ;;  %v3102_v19 = vmul.f32 %v4430_v29, %v3088_v58 }
 0x27b   : > { %4691 = vrcp.f32 %v6220_v8  ;;  %v3149_v62 = vand.u32 2147483647, %v6220_v8  ;;  %v3151_v17 = vand.u32 2147483648, %v6220_v8  ;;  %v2831_v26 = vadd.f32 52.458332, %v6248_v14 }
 0x27c   : > { %4693 = vrcp.f32 %v6233_v57  ;;  %v2942_v6 = vadd.f32 3409662.8, %v2934_v23  ;;  %v1695_v41 = vadd.f32 1960.0, %v1687_v0  ;;  %vm3145_vm6 = vweird.f32 %v6220_v8 }
 0x27d   : > { %4695 = vlog2.f32 %v6240_v43  ;;  %v1648_v29 = vmul.f32 %v1640_v28, %v6160_v60  ;;  %vm6272_vm8 = vcmp.eq.f32.partialorder %v3149_v62, 8.507059e+37  ;;  %v3152_v0 = vor.u32 1.1754944e-38, %v3151_v17 }
 0x27e   : > { %v727_v58 = vpop.permute.xlu2 %726  ;;  %v1703_v3 = vmul.f32 %v1695_v41, %v6200_v39  ;;  %v1907_v5 = vand.u32 2147483648, %v6233_v57  ;;  %v4417_v17 = vadd.f32 -0.5, %v6160_v60  ;;  %vm1901_vm11 = vweird.f32 %v6233_v57 }
 0x280   : > { %v4690_v18 = vpop.eup %4689 }
 0x281   : > { %v4692_v53 = vpop.eup %4691  ;;  %v1971_v36 = vmul.f32 0.6931472, %v4690_v18  ;;  %v1591_v18 = vadd.f32 129347.26, %v1583_v49 }
 0x282   : > { %v3141_v54 = vmul.f32 %v4692_v53, %v6220_v8  ;;  %v4694_v21 = vpop.eup %4693  ;;  %vm3146_vm7 = vweird.f32 %v4692_v53 }
 0x283   : > { %v6257_v12 = vadd.f32 %v1971_v36, %v1835_v37  ;;  %v1897_v37 = vmul.f32 %v4694_v21, %v6233_v57  ;;  %v6268_v36 = vmul.f32 %v727_v58, %v709_v40  ;;  %v4696_v20 = vpop.eup %4695  ;;  %vm1902_vm9 = vweird.f32 %v4694_v21  ;;  %vm3147_vm10 = vmor %vm3145_vm6, %vm3146_vm7 }
 0x284   : > { %v3142_v13 = vsub.f32 1.0, %v3141_v54  ;;  %v2839_v54 = vmul.f32 %v2831_v26, %v6248_v14  ;;  %v1599_v40 = vmul.f32 %v1591_v18, %v6200_v39  ;;  %v1711_v26 = vadd.f32 6769.0, %v1703_v3  ;;  %vm1903_vm12 = vmor %vm1901_vm11, %vm1902_vm9 }
 0x285   : > { %8078 = vst [vmem:[#allocation43_spill] sm:$0xff] %v6257_v12  ;;  %v1898_v35 = vsub.f32 1.0, %v1897_v37  ;;  %2678 = vrot.lane.b32.xlu2 %v6268_v36, %s5049_s16  ;;  %v1656_v37 = vadd.f32 3409662.8, %v1648_v29  ;;  %v2951_v18 = vadd.f32 28.0, %v6248_v14  ;;  %v6293_v3 = vadd.f32 %v6051_v24, %v6027_v56 }
 0x286   : > { %v3143_v48 = vmul.f32 %v4692_v53, %v3142_v13  ;;  %8079 = vst [vmem:[#allocation44_spill] sm:$0xff] %v6268_v36  ;;  %v1905_v13 = vand.u32 2147483647, %v6233_v57  ;;  %v2847_v41 = vadd.f32 1203.8342, %v2839_v54  ;;  %v1719_v15 = vmul.f32 %v1711_v26, %v6200_v39 }
 0x287   : > { %v1899_v28 = vmul.f32 %v4694_v21, %v1898_v35  ;;  %v1908_v35 = vor.u32 1.1754944e-38, %v1907_v5  ;;  %v6297_v5 = vadd.f32 6.5, %v6200_v39  ;;  %v2835_v26 = vadd.f32 52.458332, %v6293_v3 }
 0x288   : > { %v3144_v23 = vadd.f32 %v4692_v53, %v3143_v48  ;;  %v1805_v48 = vmul.f32 0.6931472, %v4696_v20  ;;  %vm1906_vm14 = vcmp.eq.f32.partialorder %v1905_v13, 8.507059e+37  ;;  %v1607_v20 = vadd.f32 678289.7, %v1599_v40 }
 0x289   : > { %v1900_v12 = vadd.f32 %v4694_v21, %v1899_v28  ;;  %v1727_v60 = vadd.f32 13132.0, %v1719_v15  ;;  %v2959_v13 = vmul.f32 %v2951_v18, %v6248_v14 }
 0x28a   : > { %v3148_v62 = vsel %vm3147_vm10, %v4692_v53, %v3144_v23  ;;  %v2855_v53 = vmul.f32 %v2847_v41, %v6248_v14  ;;  %v1816_v54 = vmul.f32 %v4417_v17, %v1805_v48  ;;  %v2955_v17 = vadd.f32 28.0, %v6293_v3 }
 0x28b   : > { %v3153_v58 = vsel %vm6272_vm8, %v3152_v0, %v3148_v62  ;;  %v1904_v29 = vsel %vm1903_vm12, %v4694_v21, %v1900_v12  ;;  %v1735_v49 = vmul.f32 %v1727_v60, %v6200_v39  ;;  %v1615_v12 = vmul.f32 %v1607_v20, %v6200_v39 }
 0x28c   : > { %v3154_v8 = vmul.f32 %v3153_v58, %v2942_v6  ;;  %v1909_v57 = vsel %vm1906_vm14, %v1908_v35, %v1904_v29  ;;  %v3110_v6 = vadd.f32 0.9189385, %v3102_v19  ;;  %v2863_v0 = vadd.f32 15784.881, %v2855_v53 }
 0x28d   : > { %v1910_v23 = vmul.f32 %v1909_v57, %v1656_v37  ;;  %v1743_v15 = vadd.f32 13068.0, %v1735_v49  ;;  %v2967_v24 = vadd.f32 322.0, %v2959_v13  ;;  %v1824_v40 = vadd.f32 0.9189385, %v1816_v54 }
 0x28e   : > { %4697 = vlog2.f32 %v3154_v8  ;;  %v2871_v21 = vmul.f32 %v2863_v0, %v6248_v14  ;;  %v3118_v56 = vsub.f32 %v3110_v6, %v6204_v42  ;;  %v1623_v48 = vadd.f32 2222880.5, %v1615_v12 }
 0x28f   : > { %4699 = vlog2.f32 %v1910_v23  ;;  %v1751_v28 = vmul.f32 %v1743_v15, %v6200_v39  ;;  %v2975_v37 = vmul.f32 %v2967_v24, %v6248_v14  ;;  %v2843_v8 = vmul.f32 %v2835_v26, %v6293_v3  ;;  %v6333_v24 = vld [vmem:[%s6024_s17] sm:$0xff] }
 0x290   : > { %v2879_v62 = vadd.f32 129347.26, %v2871_v21  ;;  %4701 = vlog2.f32 %v6297_v5  ;;  %v1832_v18 = vsub.f32 %v1824_v40, %v6240_v43  ;;  %v2963_v23 = vmul.f32 %v2955_v17, %v6293_v3 }
 0x291   : > { %v1759_v58 = vadd.f32 5040.0, %v1751_v28  ;;  %v2983_v35 = vadd.f32 1960.0, %v2975_v37  ;;  %v2851_v60 = vadd.f32 1203.8342, %v2843_v8  ;;  %v1631_v49 = vmul.f32 %v1623_v48, %v6200_v39 }
 0x292   : > { %v2887_v20 = vmul.f32 %v2879_v62, %v6248_v14  ;;  %v6324_v0 = vadd.f32 %v6071_v16, %v6193_v10  ;;  %v6329_v15 = vadd.f32 6.5, %v6248_v14  ;;  %v2971_v28 = vadd.f32 322.0, %v2963_v23 }
 0x293   : > { %v6313_v29 = vmul.f32 %v1759_v58, %v6200_v39  ;;  %v2991_v54 = vmul.f32 %v2983_v35, %v6248_v14  ;;  %v1639_v62 = vadd.f32 4162388.0, %v1631_v49  ;;  %v4416_v48 = vadd.f32 -0.5, %v6200_v39 }
 0x294   : > { %v4698_v19 = vpop.eup %4697  ;;  %v2895_v21 = vadd.f32 678289.7, %v2887_v20  ;;  %v2832_v37 = vadd.f32 52.458332, %v6324_v0  ;;  %v2952_v35 = vadd.f32 28.0, %v6324_v0 }
 0x295   : > { %v3248_v41 = vmul.f32 0.6931472, %v4698_v19  ;;  %v4700_v53 = vpop.eup %4699  ;;  %4703 = vrcp.f32 %v6313_v29  ;;  %v2999_v12 = vadd.f32 6769.0, %v2991_v54  ;;  %vm1886_vm0 = vweird.f32 %v6313_v29 }
 0x296   : > { %v1965_v57 = vmul.f32 0.6931472, %v4700_v53  ;;  %v4702_v43 = vpop.eup %4701  ;;  %4705 = vlog2.f32 %v6329_v15  ;;  %v2903_v58 = vmul.f32 %v2895_v21, %v6248_v14  ;;  %v6347_v53 = vadd.f32 %v5835_v4, %v6333_v24 }
 0x297   : > { %v6309_v42 = vadd.f32 %v3248_v41, %v3118_v56  ;;  %v2859_v56 = vmul.f32 %v2851_v60, %v6293_v3  ;;  %v3007_v40 = vmul.f32 %v2999_v12, %v6248_v14  ;;  %v1803_v16 = vmul.f32 0.6931472, %v4702_v43 }
 0x298   : > { %v6326_v13 = vadd.f32 %v1965_v57, %v1832_v18  ;;  %v2979_v41 = vmul.f32 %v2971_v28, %v6293_v3  ;;  %v6349_v18 = vpop.permute.xlu0 %3741  ;;  %v1647_v57 = vmul.f32 %v1639_v62, %v6200_v39  ;;  %v1890_v12 = vand.u32 2147483647, %v6313_v29 }
 0x299   : > { %8082 = vst [vmem:[#allocation45_spill] sm:$0xff] %v6309_v42  ;;  %v2867_v10 = vadd.f32 15784.881, %v2859_v56  ;;  %v3015_v26 = vadd.f32 13132.0, %v3007_v40  ;;  %v1815_v54 = vmul.f32 %v4416_v48, %v1803_v16  ;;  %v2840_v56 = vmul.f32 %v2832_v37, %v6324_v0  ;;  %v6361_v16 = vpop.permute.xlu1 %2434 }
 0x29a   : > { %8083 = vst [vmem:[#allocation46_spill] sm:$0xff] %v6326_v13  ;;  %v2987_v49 = vadd.f32 1960.0, %v2979_v41  ;;  %v1892_v4 = vand.u32 2147483648, %v6313_v29  ;;  %v2911_v40 = vadd.f32 2222880.5, %v2903_v58  ;;  %vm1891_vm1 = vcmp.eq.f32.partialorder %v1890_v12, 8.507059e+37 }
 0x29b   : > { %v4704_v17 = vpop.eup %4703  ;;  %v2875_v8 = vmul.f32 %v2867_v10, %v6293_v3  ;;  %v3023_v60 = vmul.f32 %v3015_v26, %v6248_v14  ;;  %v2960_v10 = vmul.f32 %v2952_v35, %v6324_v0  ;;  %8084 = vst [vmem:[#allocation47_spill] sm:$0xff] %v6361_v16  ;;  %v1655_v41 = vadd.f32 3409662.8, %v1647_v57 }
 0x29c   : > { %v1882_v20 = vmul.f32 %v4704_v17, %v6313_v29  ;;  %v2995_v28 = vmul.f32 %v2987_v49, %v6293_v3  ;;  %v4706_v19 = vpop.eup %4705  ;;  %vm1887_vm15 = vweird.f32 %v4704_v17  ;;  %v2848_v48 = vadd.f32 1203.8342, %v2840_v56 }
 0x29d   : > { %v2883_v23 = vadd.f32 129347.26, %v2875_v8  ;;  %v3031_v21 = vadd.f32 13068.0, %v3023_v60  ;;  %vm1888_vm2 = vmor %vm1886_vm0, %vm1887_vm15  ;;  %v1893_v35 = vor.u32 1.1754944e-38, %v1892_v4  ;;  %v2919_v60 = vmul.f32 %v2911_v40, %v6248_v14 }
 0x29e   : > { %v1883_v43 = vsub.f32 1.0, %v1882_v20  ;;  %v3003_v37 = vadd.f32 6769.0, %v2995_v28  ;;  %v2968_v20 = vadd.f32 322.0, %v2960_v10  ;;  %v3090_v49 = vmul.f32 0.6931472, %v4706_v19 }
 0x29f   : > { %v3039_v39 = vmul.f32 %v3031_v21, %v6248_v14  ;;  %v2891_v62 = vmul.f32 %v2883_v23, %v6293_v3  ;;  %v2856_v29 = vmul.f32 %v2848_v48, %v6324_v0  ;;  %v2805_v12 = vsel %vm2804_vm13, %v5861_v11, %v5944_v50 }
 0x2a0   : > { %v1884_v26 = vmul.f32 %v4704_v17, %v1883_v43  ;;  %v3011_v43 = vmul.f32 %v3003_v37, %v6293_v3  ;;  %v4431_v4 = vadd.f32 -0.5, %v6248_v14  ;;  %v1660_v40 = vadd.f32 28.0, %v6347_v53  ;;  %v6375_v19 = vpop.permute.xlu0 %2432 }
 0x2a1   : > { %v3047_v58 = vadd.f32 5040.0, %v3039_v39  ;;  %v2899_v57 = vadd.f32 678289.7, %v2891_v62  ;;  %v1823_v39 = vadd.f32 0.9189385, %v1815_v54  ;;  %v6384_v11 = vadd.f32 6.5, %v6293_v3 }
 0x2a2   : > { %v1885_v8 = vadd.f32 %v4704_v17, %v1884_v26  ;;  %v3019_v28 = vadd.f32 13132.0, %v3011_v43  ;;  %v6380_v26 = vld [vmem:[%s6024_s17 + $0x28] sm:$0xff]  ;;  %v3103_v62 = vmul.f32 %v4431_v4, %v3090_v49  ;;  %v2927_v50 = vadd.f32 4162388.0, %v2919_v60 }
 0x2a3   : > { %v6367_v21 = vmul.f32 %v3047_v58, %v6248_v14  ;;  %v2907_v48 = vmul.f32 %v2899_v57, %v6293_v3  ;;  %v6392_v58 = vadd.f32 %v6056_v59, %v6156_v46  ;;  %v6396_v54 = vadd.f32 %v6088_v33, %v6380_v26 }
 0x2a4   : > { %v1889_v23 = vsel %vm1888_vm2, %v4704_v17, %v1885_v8  ;;  %v2976_v17 = vmul.f32 %v2968_v20, %v6324_v0  ;;  %v3027_v37 = vmul.f32 %v3019_v28, %v6293_v3  ;;  %v2864_v8 = vadd.f32 15784.881, %v2856_v29 }
 0x2a5   : > { %v1894_v56 = vsel %vm1891_vm1, %v1893_v35, %v1889_v23  ;;  %4707 = vrcp.f32 %v6367_v21  ;;  %v6399_v35 = vmul.f32 %v1660_v40, %v6347_v53  ;;  %v1831_v43 = vsub.f32 %v1823_v39, %v6297_v5 }
 0x2a6   : > { %v1895_v10 = vmul.f32 %v1894_v56, %v1655_v41  ;;  %v6388_v41 = vadd.f32 %v2805_v12, %v6333_v24  ;;  %v3035_v20 = vadd.f32 13068.0, %v3027_v37  ;;  %v2872_v60 = vmul.f32 %v2864_v8, %v6324_v0  ;;  %v3744_v24 = vpop.permute.xlu1 %3743 }
 0x2a7   : > { %v2984_v49 = vadd.f32 1960.0, %v2976_v17  ;;  %v6403_v23 = vadd.f32 0.9189385, %v3103_v62  ;;  %v2935_v46 = vmul.f32 %v2927_v50, %v6248_v14  ;;  %v2915_v33 = vadd.f32 2222880.5, %v2907_v48 }
 0x2a8   : > { %4709 = vlog2.f32 %v1895_v10  ;;  %v3043_v57 = vmul.f32 %v3035_v20, %v6293_v3  ;;  %v2880_v29 = vadd.f32 129347.26, %v2872_v60  ;;  %v3164_v4 = vand.u32 2147483647, %v6367_v21  ;;  %v6422_v8 = vpop.permute.xlu0 %3727 }
 0x2a9   : > { %4711 = vlog2.f32 %v6384_v11  ;;  %v2992_v12 = vmul.f32 %v2984_v49, %v6324_v0  ;;  %v2833_v5 = vadd.f32 52.458332, %v6392_v58  ;;  %v6414_v10 = vsel %vm2804_vm13, %v6349_v18, %v3744_v24 }
 0x2aa   : > { %v3051_v28 = vadd.f32 5040.0, %v3043_v57  ;;  %8085 = vst [vmem:[#allocation48_spill] sm:$0xff] %v6414_v10  ;;  %v2888_v17 = vmul.f32 %v2880_v29, %v6324_v0  ;;  %v2953_v14 = vadd.f32 28.0, %v6392_v58  ;;  %v3166_v50 = vand.u32 2147483648, %v6367_v21 }
 0x2ab   : > { %v4708_v59 = vpop.eup %4707  ;;  %v3000_v39 = vadd.f32 6769.0, %v2992_v12  ;;  %v2923_v20 = vmul.f32 %v2915_v33, %v6293_v3  ;;  %v2841_v29 = vmul.f32 %v2833_v5, %v6392_v58  ;;  %vm3160_vm4 = vweird.f32 %v6367_v21 }
 0x2ac   : > { %v3156_v56 = vmul.f32 %v4708_v59, %v6367_v21  ;;  %v6420_v48 = vmul.f32 %v3051_v28, %v6293_v3  ;;  %vm3161_vm3 = vweird.f32 %v4708_v59  ;;  %v2896_v60 = vadd.f32 678289.7, %v2888_v17 }
 0x2ad   : > { %v3008_v18 = vmul.f32 %v3000_v39, %v6324_v0  ;;  %v6432_v12 = vadd.f32 -0.5, %v6293_v3  ;;  %v2961_v33 = vmul.f32 %v2953_v14, %v6392_v58  ;;  %v2943_v39 = vadd.f32 3409662.8, %v2935_v46  ;;  %vm3162_vm5 = vmor %vm3160_vm4, %vm3161_vm3 }
 0x2ae   : > { %v4710_v40 = vpop.eup %4709  ;;  %v3157_v37 = vsub.f32 1.0, %v3156_v56  ;;  %4713 = vrcp.f32 %v6420_v48  ;;  %v6435_v56 = vadd.f32 6.5, %v6324_v0  ;;  %v3167_v21 = vor.u32 1.1754944e-38, %v3166_v50 }
 0x2af   : > { %v1963_v62 = vmul.f32 0.6931472, %v4710_v40  ;;  %v4712_v49 = vpop.eup %4711  ;;  %v2904_v40 = vmul.f32 %v2896_v60, %v6324_v0  ;;  %v3016_v17 = vadd.f32 13132.0, %v3008_v18  ;;  %vm3165_vm6 = vcmp.eq.f32.partialorder %v3164_v4, 8.507059e+37  ;;  %v3732_v4 = vpop.permute.xlu1 %3731 }
 0x2b0   : > { %v3158_v57 = vmul.f32 %v4708_v59, %v3157_v37  ;;  %v2849_v14 = vadd.f32 1203.8342, %v2841_v29  ;;  %v3098_v30 = vmul.f32 0.6931472, %v4712_v49  ;;  %4715 = vlog2.f32 %v6435_v56 }
 0x2b1   : > { %v6426_v24 = vadd.f32 %v1963_v62, %v1831_v43  ;;  %v2931_v62 = vadd.f32 4162388.0, %v2923_v20  ;;  %v3024_v6 = vmul.f32 %v3016_v17, %v6324_v0  ;;  %v2912_v28 = vadd.f32 2222880.5, %v2904_v40 }
 0x2b2   : > { %v3159_v43 = vadd.f32 %v4708_v59, %v3158_v57  ;;  %v2969_v57 = vadd.f32 322.0, %v2961_v33  ;;  %v2857_v46 = vmul.f32 %v2849_v14, %v6392_v58  ;;  %v3226_v49 = vand.u32 2147483648, %v6420_v48  ;;  %v3730_v33 = vpop.permute.xlu0 %3729 }
 0x2b3   : > { %8086 = vst [vmem:[#allocation49_spill] sm:$0xff] %v6426_v24  ;;  %v3032_v18 = vadd.f32 13068.0, %v3024_v6  ;;  %v2939_v5 = vmul.f32 %v2931_v62, %v6293_v3  ;;  %v1545_v3 = vadd.f32 52.458332, %v6396_v54  ;;  %vm3220_vm8 = vweird.f32 %v6420_v48 }
 0x2b4   : > { %v3163_v37 = vsel %vm3162_vm5, %v4708_v59, %v3159_v43  ;;  %v4714_v13 = vpop.eup %4713  ;;  %v3224_v59 = vand.u32 2147483647, %v6420_v48  ;;  %v2977_v20 = vmul.f32 %v2969_v57, %v6392_v58  ;;  %v2920_v43 = vmul.f32 %v2912_v28, %v6324_v0 }
 0x2b5   : > { %v3168_v36 = vsel %vm3165_vm6, %v3167_v21, %v3163_v37  ;;  %v3216_v50 = vmul.f32 %v4714_v13, %v6420_v48  ;;  %v3040_v29 = vmul.f32 %v3032_v18, %v6324_v0  ;;  %vm3221_vm7 = vweird.f32 %v4714_v13 }
 0x2b6   : > { %v3169_v60 = vmul.f32 %v3168_v36, %v2943_v39  ;;  %v2865_v36 = vadd.f32 15784.881, %v2857_v46  ;;  %v2985_v40 = vadd.f32 1960.0, %v2977_v20  ;;  %v6456_v39 = vsel %vm2804_vm13, %v3730_v33, %v3732_v4  ;;  %vm3222_vm10 = vmor %vm3220_vm8, %vm3221_vm7 }
 0x2b7   : > { %v3217_v6 = vsub.f32 1.0, %v3216_v50  ;;  %v3048_v17 = vadd.f32 5040.0, %v3040_v29  ;;  %8087 = vst [vmem:[#allocation50_spill] sm:$0xff] %v6456_v39  ;;  %v1553_v14 = vmul.f32 %v1545_v3, %v6396_v54  ;;  %v1665_v57 = vadd.f32 28.0, %v6396_v54 }
 0x2b8   : > { %4717 = vlog2.f32 %v3169_v60  ;;  %v2873_v21 = vmul.f32 %v2865_v36, %v6392_v58  ;;  %v2993_v37 = vmul.f32 %v2985_v40, %v6392_v58  ;;  %v4716_v60 = vpop.eup %4715  ;;  %v2947_v18 = vadd.f32 3409662.8, %v2939_v5 }
 0x2b9   : > { %v3218_v62 = vmul.f32 %v4714_v13, %v3217_v6  ;;  %v6464_v28 = vmul.f32 %v3048_v17, %v6324_v0  ;;  %vm6466_vm9 = vcmp.eq.f32.partialorder %v3224_v59, 8.507059e+37  ;;  %v2928_v20 = vadd.f32 4162388.0, %v2920_v43 }
 0x2ba   : > { %v2881_v46 = vadd.f32 129347.26, %v2873_v21  ;;  %v3001_v29 = vadd.f32 6769.0, %v2993_v37  ;;  %v3227_v6 = vor.u32 1.1754944e-38, %v3226_v49  ;;  %v1673_v48 = vmul.f32 %v1665_v57, %v6396_v54 }
 0x2bb   : > { %v3219_v50 = vadd.f32 %v4714_v13, %v3218_v62  ;;  %4719 = vrcp.f32 %v6464_v28  ;;  %v1561_v5 = vadd.f32 1203.8342, %v1553_v14  ;;  %v6476_v17 = vadd.f32 322.0, %v6399_v35 }
 0x2bc   : > { %v2889_v3 = vmul.f32 %v2881_v46, %v6392_v58  ;;  %v3009_v59 = vmul.f32 %v3001_v29, %v6392_v58  ;;  %v6481_v43 = vsel %vm2804_vm13, %v6183_v52, %v6422_v8  ;;  %v3107_v49 = vmul.f32 %v6432_v12, %v3098_v30 }
 0x2bd   : > { %v3223_v40 = vsel %vm3222_vm10, %v4714_v13, %v3219_v50  ;;  %8090 = vst [vmem:[#allocation51_spill] sm:$0xff] %v6481_v43  ;;  %v8091_v13 = vsub.f32 %v6403_v23, %v6329_v15  ;;  %v2936_v14 = vmul.f32 %v2928_v20, %v6324_v0  ;;  %v6494_v57 = vadd.f32 %v6129_v34, %v6380_v26 }
 0x2be   : > { %v4718_v36 = vpop.eup %4717  ;;  %v3228_v21 = vsel %vm6466_vm9, %v3227_v6, %v3223_v40  ;;  %v3017_v35 = vadd.f32 13132.0, %v3009_v59  ;;  %v6497_v52 = vadd.f32 28.0, %v6388_v41  ;;  %v1569_v30 = vmul.f32 %v1561_v5, %v6396_v54  ;;  %v3736_v5 = vpop.permute.xlu1 %3735 }
 0x2bf   : > { %v3250_v33 = vmul.f32 0.6931472, %v4718_v36  ;;  %v3229_v37 = vmul.f32 %v3228_v21, %v2947_v18  ;;  %v1681_v8 = vadd.f32 322.0, %v1673_v48  ;;  %v2897_v15 = vadd.f32 678289.7, %v2889_v3 }
 0x2c0   : > { %v3025_v23 = vmul.f32 %v3017_v35, %v6392_v58  ;;  %v3115_v46 = vadd.f32 0.9189385, %v3107_v49  ;;  %v4432_v50 = vadd.f32 -0.5, %v6324_v0  ;;  %v1577_v4 = vadd.f32 15784.881, %v1569_v30 }
 0x2c1   : > { %v6489_v62 = vadd.f32 %v3250_v33, %v8091_v13  ;;  %4721 = vlog2.f32 %v3229_v37  ;;  %v4720_v18 = vpop.eup %4719  ;;  %v1689_v34 = vmul.f32 %v1681_v8, %v6396_v54  ;;  %v2944_v26 = vadd.f32 3409662.8, %v2936_v14 }
 0x2c2   : > { %v3092_v20 = vmul.f32 0.6931472, %v4716_v60  ;;  %v3171_v29 = vmul.f32 %v4720_v18, %v6464_v28  ;;  %v3033_v36 = vadd.f32 13068.0, %v3025_v23  ;;  %v3179_v6 = vand.u32 2147483647, %v6464_v28  ;;  %v3734_v60 = vpop.permute.xlu0 %3733 }
 0x2c3   : > { %8092 = vst [vmem:[#allocation52_spill] sm:$0xff] %v6489_v62  ;;  %v1585_v48 = vmul.f32 %v1577_v4, %v6396_v54  ;;  %v1697_v33 = vadd.f32 1960.0, %v1689_v34  ;;  %v2834_v40 = vadd.f32 52.458332, %v6494_v57  ;;  %v3181_v59 = vand.u32 2147483648, %v6464_v28 }
 0x2c4   : > { %v3172_v3 = vsub.f32 1.0, %v3171_v29  ;;  %v2905_v0 = vmul.f32 %v2897_v15, %v6392_v58  ;;  %v3041_v49 = vmul.f32 %v3033_v36, %v6392_v58  ;;  %vm3176_vm11 = vweird.f32 %v4720_v18 }
 0x2c5   : > { %v1705_v21 = vmul.f32 %v1697_v33, %v6396_v54  ;;  %v2842_v13 = vmul.f32 %v2834_v40, %v6494_v57  ;;  %v2954_v37 = vadd.f32 28.0, %v6494_v57  ;;  %v6516_v8 = vsel %vm2804_vm13, %v3734_v60, %v3736_v5 }
 0x2c6   : > { %v3173_v35 = vmul.f32 %v4720_v18, %v3172_v3  ;;  %v3049_v30 = vadd.f32 5040.0, %v3041_v49  ;;  %8093 = vst [vmem:[#allocation53_spill] sm:$0xff] %v6516_v8  ;;  %v1593_v23 = vadd.f32 129347.26, %v1585_v48  ;;  %v3123_v4 = vsub.f32 %v3115_v46, %v6384_v11 }
 0x2c7   : > { %v4722_v14 = vpop.eup %4721  ;;  %v1713_v34 = vadd.f32 6769.0, %v1705_v21  ;;  %v2850_v29 = vadd.f32 1203.8342, %v2842_v13  ;;  %vm3175_vm12 = vweird.f32 %v6464_v28  ;;  %v2913_v33 = vadd.f32 2222880.5, %v2905_v0 }
 0x2c8   : > { %v3258_v15 = vmul.f32 0.6931472, %v4722_v14  ;;  %v3174_v36 = vadd.f32 %v4720_v18, %v3173_v35  ;;  %v6521_v40 = vmul.f32 %v3049_v30, %v6392_v58  ;;  %vm3177_vm14 = vmor %vm3175_vm12, %vm3176_vm11  ;;  %v3182_v5 = vor.u32 1.1754944e-38, %v3181_v59 }
 0x2c9   : > { %v1721_v48 = vmul.f32 %v1713_v34, %v6396_v54  ;;  %v2962_v11 = vmul.f32 %v2954_v37, %v6494_v57  ;;  %vm3180_vm15 = vcmp.eq.f32.partialorder %v3179_v6, 8.507059e+37  ;;  %v2858_v28 = vmul.f32 %v2850_v29, %v6494_v57 }
 0x2ca   : > { %v6523_v12 = vadd.f32 %v3258_v15, %v3123_v4  ;;  %v3178_v46 = vsel %vm3177_vm14, %v4720_v18, %v3174_v36  ;;  %4723 = vrcp.f32 %v6521_v40  ;;  %v6533_v49 = vadd.f32 6.5, %v6392_v58  ;;  %v6538_v18 = vld [vmem:[%s6024_s17 + $0x8] sm:$0xff] }
 0x2cb   : > { %v3183_v0 = vsel %vm3180_vm15, %v3182_v5, %v3178_v46  ;;  %v1601_v60 = vmul.f32 %v1593_v23, %v6396_v54  ;;  %v3104_v59 = vmul.f32 %v4432_v50, %v3092_v20  ;;  %v2921_v13 = vmul.f32 %v2913_v33, %v6392_v58 }
 0x2cc   : > { %8094 = vst [vmem:[#allocation54_spill] sm:$0xff] %v6523_v12  ;;  %v3184_v21 = vmul.f32 %v3183_v0, %v2944_v26  ;;  %v1729_v37 = vadd.f32 13132.0, %v1721_v48  ;;  %v6542_v6 = vadd.f32 %v6538_v18, %v5974_v25  ;;  %v2970_v14 = vadd.f32 322.0, %v2962_v11 }
 0x2cd   : > { %v1684_v35 = vmul.f32 %v6476_v17, %v6347_v53  ;;  %v2866_v4 = vadd.f32 15784.881, %v2858_v28  ;;  %v2957_v50 = vmul.f32 %v6497_v52, %v6388_v41  ;;  %v1609_v26 = vadd.f32 678289.7, %v1601_v60 }
 0x2ce   : > { %4725 = vlog2.f32 %v3184_v21  ;;  %v1737_v30 = vmul.f32 %v1729_v37, %v6396_v54  ;;  %v2978_v20 = vmul.f32 %v2970_v14, %v6494_v57  ;;  %v3112_v15 = vadd.f32 0.9189385, %v3104_v59 }
 0x2cf   : > { %4727 = vlog2.f32 %v6533_v49  ;;  %v2929_v25 = vadd.f32 4162388.0, %v2921_v13  ;;  %v6553_v29 = vadd.f32 %v5971_v1, %v6243_v63  ;;  %v1540_v17 = vadd.f32 52.458332, %v6347_v53 }
 0x2d0   : > { %v4724_v23 = vpop.eup %4723  ;;  %v1745_v34 = vadd.f32 13068.0, %v1737_v30  ;;  %v2986_v33 = vadd.f32 1960.0, %v2978_v20  ;;  %v1661_v52 = vadd.f32 28.0, %v6542_v6  ;;  %v1692_v5 = vadd.f32 1960.0, %v1684_v35 }
 0x2d1   : > { %v3186_v36 = vmul.f32 %v4724_v23, %v6521_v40  ;;  %v2874_v11 = vmul.f32 %v2866_v4, %v6494_v57  ;;  %v2965_v46 = vadd.f32 322.0, %v2957_v50  ;;  %v1617_v0 = vmul.f32 %v1609_v26, %v6396_v54 }
 0x2d2   : > { %v1753_v48 = vmul.f32 %v1745_v34, %v6396_v54  ;;  %v2994_v60 = vmul.f32 %v2986_v33, %v6494_v57  ;;  %v3120_v63 = vsub.f32 %v3112_v15, %v6435_v56  ;;  %v2937_v59 = vmul.f32 %v2929_v25, %v6392_v58 }
 0x2d3   : > { %v3187_v28 = vsub.f32 1.0, %v3186_v36  ;;  %v3196_v21 = vand.u32 2147483648, %v6521_v40  ;;  %vm3191_vm0 = vweird.f32 %v4724_v23  ;;  %v3194_v30 = vand.u32 2147483647, %v6521_v40 }
 0x2d4   : > { %v4726_v1 = vpop.eup %4725  ;;  %v1761_v13 = vadd.f32 5040.0, %v1753_v48  ;;  %v1669_v4 = vmul.f32 %v1661_v52, %v6542_v6  ;;  %v2882_v26 = vadd.f32 129347.26, %v2874_v11  ;;  %v3002_v20 = vadd.f32 6769.0, %v2994_v60 }
 0x2d5   : > { %v4728_v37 = vpop.eup %4727  ;;  %v3252_v14 = vmul.f32 0.6931472, %v4726_v1  ;;  %v3188_v35 = vmul.f32 %v4724_v23, %v3187_v28  ;;  %vm3190_vm1 = vweird.f32 %v6521_v40  ;;  %v1625_v15 = vadd.f32 2222880.5, %v1617_v0  ;;  %v6580_v1 = vpop.permute.xlu0 %2438 }
 0x2d6   : > { %v6568_v50 = vmul.f32 %v1761_v13, %v6396_v54  ;;  %v3094_v25 = vmul.f32 0.6931472, %v4728_v37  ;;  %vm3192_vm2 = vmor %vm3190_vm1, %vm3191_vm0  ;;  %v3197_v36 = vor.u32 1.1754944e-38, %v3196_v21  ;;  %v6574_v33 = vadd.f32 6.5, %v6396_v54  ;;  %8096 = vst [vmem:[#allocation56_spill] sm:$0xff] %v6580_v1 }
 0x2d7   : > { %v6570_v34 = vadd.f32 %v3252_v14, %v3120_v63  ;;  %v3189_v56 = vadd.f32 %v4724_v23, %v3188_v35  ;;  %v2945_v48 = vadd.f32 3409662.8, %v2937_v59  ;;  %vm3195_vm3 = vcmp.eq.f32.partialorder %v3194_v30, 8.507059e+37  ;;  %v3740_v59 = vpop.permute.xlu1 %3739 }
 0x2d8   : > { %4729 = vrcp.f32 %v6568_v50  ;;  %v4433_v28 = vadd.f32 -0.5, %v6392_v58  ;;  %v2890_v40 = vmul.f32 %v2882_v26, %v6494_v57  ;;  %v3010_v0 = vmul.f32 %v3002_v20, %v6494_v57 }
 0x2d9   : > { %8095 = vst [vmem:[#allocation55_spill] sm:$0xff] %v6570_v34  ;;  %v3193_v11 = vsel %vm3192_vm2, %v4724_v23, %v3189_v56  ;;  %v1633_v21 = vmul.f32 %v1625_v15, %v6396_v54  ;;  %v1662_v13 = vadd.f32 28.0, %v6553_v29  ;;  %4731 = vlog2.f32 %v6574_v33 }
 0x2da   : > { %v3198_v60 = vsel %vm3195_vm3, %v3197_v36, %v3193_v11  ;;  %v3105_v37 = vmul.f32 %v4433_v28, %v3094_v25  ;;  %v3018_v23 = vadd.f32 13132.0, %v3010_v0  ;;  %v1548_v14 = vmul.f32 %v1540_v17, %v6347_v53 }
 0x2db   : > { %v3199_v63 = vmul.f32 %v3198_v60, %v2945_v48  ;;  %v1700_v58 = vmul.f32 %v1692_v5, %v6347_v53  ;;  %v2973_v35 = vmul.f32 %v2965_v46, %v6388_v41  ;;  %v1677_v26 = vadd.f32 322.0, %v1669_v4 }
 0x2dc   : > { %v2898_v20 = vadd.f32 678289.7, %v2890_v40  ;;  %v3026_v56 = vmul.f32 %v3018_v23, %v6494_v57  ;;  %v1641_v15 = vadd.f32 4162388.0, %v1633_v21  ;;  %v1670_v25 = vmul.f32 %v1662_v13, %v6553_v29 }
 0x2dd   : > { %4733 = vlog2.f32 %v3199_v63  ;;  %v3113_v48 = vadd.f32 0.9189385, %v3105_v37  ;;  %v708_v28 = vadd.f32 1.0, %v5255_v22  ;;  %v1556_v17 = vadd.f32 1203.8342, %v1548_v14 }
 0x2de   : > { %v4730_v30 = vpop.eup %4729  ;;  %v3034_v11 = vadd.f32 13068.0, %v3026_v56  ;;  %v1708_v60 = vadd.f32 6769.0, %v1700_v58  ;;  %v2981_v5 = vadd.f32 1960.0, %v2973_v35  ;;  %v1685_v63 = vmul.f32 %v1677_v26, %v6542_v6 }
 0x2df   : > { %v1912_v36 = vmul.f32 %v4730_v30, %v6568_v50  ;;  %v4732_v46 = vpop.eup %4731  ;;  %v1922_v4 = vand.u32 2147483648, %v6568_v50  ;;  %v2906_v40 = vmul.f32 %v2898_v20, %v6494_v57  ;;  %v1649_v13 = vmul.f32 %v1641_v15, %v6396_v54 }
 0x2e0   : > { %v3042_v21 = vmul.f32 %v3034_v11, %v6494_v57  ;;  %vm1917_vm4 = vweird.f32 %v4730_v30  ;;  %v1920_v22 = vand.u32 2147483647, %v6568_v50  ;;  %v1678_v14 = vadd.f32 322.0, %v1670_v25  ;;  %v725_v25 = vpop.permute.xlu1 %724 }
 0x2e1   : > { %v1913_v0 = vsub.f32 1.0, %v1912_v36  ;;  %v3121_v58 = vsub.f32 %v3113_v48, %v6533_v49  ;;  %v3738_v36 = vpop.permute.xlu0 %3737  ;;  %v1807_v26 = vmul.f32 0.6931472, %v4732_v46  ;;  %vm1916_vm5 = vweird.f32 %v6568_v50 }
 0x2e2   : > { %v3050_v56 = vadd.f32 5040.0, %v3042_v21  ;;  %v6603_v20 = vsel %vm2804_vm13, %v3738_v36, %v3740_v59  ;;  %vm1918_vm6 = vmor %vm1916_vm5, %vm1917_vm4  ;;  %v1923_v15 = vor.u32 1.1754944e-38, %v1922_v4  ;;  %v1657_v49 = vadd.f32 3409662.8, %v1649_v13 }
 0x2e3   : > { %v4734_v23 = vpop.eup %4733  ;;  %v1914_v37 = vmul.f32 %v4730_v30, %v1913_v0  ;;  %8097 = vst [vmem:[#allocation57_spill] sm:$0xff] %v6603_v20  ;;  %v2914_v0 = vadd.f32 2222880.5, %v2906_v40  ;;  %vm1921_vm7 = vcmp.eq.f32.partialorder %v1920_v22, 8.507059e+37  ;;  %v6610_v21 = vmul.f32 %v725_v25, %v708_v28  ;;  %v1449_v28 = vpop.permute.xlu2 %1448 }
 0x2e4   : > { %v3254_v35 = vmul.f32 0.6931472, %v4734_v23  ;;  %v6608_v52 = vmul.f32 %v3050_v56, %v6494_v57  ;;  %v4418_v59 = vadd.f32 -0.5, %v6396_v54  ;;  %v6617_v4 = vadd.f32 6.5, %v6494_v57 }
 0x2e5   : > { %v1915_v3 = vadd.f32 %v4730_v30, %v1914_v37  ;;  %8099 = vst [vmem:[#allocation59_spill] sm:$0xff] %v6610_v21  ;;  %2676 = vrot.lane.b32.xlu1 %v6610_v21, %s5049_s16  ;;  %v2922_v13 = vmul.f32 %v2914_v0, %v6494_v57  ;;  %v2468_v54 = vadd.f32 1e-08, %v5296_v9  ;;  %v1693_v37 = vadd.f32 1960.0, %v1685_v63 }
 0x2e6   : > { %v6605_v11 = vadd.f32 %v3254_v35, %v3121_v58  ;;  %4735 = vrcp.f32 %v6608_v52  ;;  %v1817_v40 = vmul.f32 %v4418_v59, %v1807_v26  ;;  %v1716_v22 = vmul.f32 %v1708_v60, %v6347_v53 }
 0x2e7   : > { %v1919_v48 = vsel %vm1918_vm6, %v4730_v30, %v1915_v3  ;;  %v1564_v3 = vmul.f32 %v1556_v17, %v6347_v53  ;;  %v2470_v30 = vadd.f32 1e-08, %v5347_v32  ;;  %v2989_v58 = vmul.f32 %v2981_v5, %v6388_v41 }
 0x2e8   : > { %8098 = vst [vmem:[#allocation58_spill] sm:$0xff] %v6605_v11  ;;  %v1924_v46 = vsel %vm1921_vm7, %v1923_v15, %v1919_v48  ;;  %v1686_v35 = vmul.f32 %v1678_v14, %v6553_v29  ;;  %v1470_v36 = vadd.f32 %v1449_v28, %v5347_v32  ;;  %v1825_v0 = vadd.f32 0.9189385, %v1817_v40  ;;  %v1447_v63 = vpop.permute.xlu1 %1446 }
 0x2e9   : > { %v1925_v23 = vmul.f32 %v1924_v46, %v1657_v49  ;;  %v1445_v56 = vpop.permute.xlu0 %1444  ;;  %v6631_v15 = vadd.f32 15784.881, %v1564_v3  ;;  %v2930_v25 = vadd.f32 4162388.0, %v2922_v13  ;;  %v1469_v14 = vadd.f32 %v1447_v63, %v5317_v44 }
 0x2ea   : > { %v1468_v17 = vadd.f32 %v1445_v56, %v5296_v9  ;;  %v1701_v49 = vmul.f32 %v1693_v37, %v6542_v6  ;;  %v1724_v48 = vadd.f32 13132.0, %v1716_v22  ;;  %v2997_v59 = vadd.f32 6769.0, %v2989_v58 }
 0x2eb   : > { %4737 = vlog2.f32 %v1925_v23  ;;  %v1694_v46 = vadd.f32 1960.0, %v1686_v35  ;;  %v1478_v28 = vadd.f32 1e-08, %v1470_v36  ;;  %v1477_v3 = vadd.f32 1e-08, %v1469_v14 }
 0x2ec   : > { %4739 = vlog2.f32 %v6617_v4  ;;  %v4736_v26 = vpop.eup %4735  ;;  %v1476_v5 = vadd.f32 1e-08, %v1468_v17  ;;  %v2938_v13 = vmul.f32 %v2930_v25, %v6494_v57  ;;  %v3209_v37 = vand.u32 2147483647, %v6608_v52 }
 0x2ed   : > { %4741 = vlog2.f32 %v2470_v30  ;;  %v3201_v60 = vmul.f32 %v4736_v26, %v6608_v52  ;;  %v1833_v30 = vsub.f32 %v1825_v0, %v6574_v33  ;;  %vm3206_vm8 = vweird.f32 %v4736_v26 }
 0x2ee   : > { %4743 = vlog2.f32 %v2468_v54  ;;  %v3211_v54 = vand.u32 2147483648, %v6608_v52  ;;  %v1732_v58 = vmul.f32 %v1724_v48, %v6347_v53  ;;  %v2829_v35 = vadd.f32 52.458332, %v6388_v41 }
 0x2ef   : > { %v3202_v56 = vsub.f32 1.0, %v3201_v60  ;;  %4745 = vlog2.f32 %v1476_v5  ;;  %v3005_v36 = vmul.f32 %v2997_v59, %v6388_v41  ;;  %v1709_v25 = vadd.f32 6769.0, %v1701_v49 }
 0x2f0   : > { %4747 = vlog2.f32 %v1477_v3  ;;  %vm3205_vm9 = vweird.f32 %v6608_v52  ;;  %v2469_v5 = vadd.f32 1e-08, %v5317_v44  ;;  %v1702_v14 = vmul.f32 %v1694_v46, %v6553_v29 }
 0x2f1   : > { %v4738_v23 = vpop.eup %4737  ;;  %v3203_v50 = vmul.f32 %v4736_v26, %v3202_v56  ;;  %v6645_v33 = vpop.permute.xlu0 %1456  ;;  %vm3207_vm10 = vmor %vm3205_vm9, %vm3206_vm8  ;;  %v3212_v59 = vor.u32 1.1754944e-38, %v3211_v54  ;;  %4749 = vlog2.f32 %v1478_v28  ;;  %vm3210_vm11 = vcmp.eq.f32.partialorder %v3209_v37, 8.507059e+37 }
 0x2f2   : > { %v1967_v40 = vmul.f32 0.6931472, %v4738_v23  ;;  %v4740_v17 = vpop.eup %4739  ;;  %v737_v56 = vpop.permute.xlu1 %736  ;;  %v1541_v11 = vadd.f32 52.458332, %v6542_v6  ;;  %4751 = vlog2.f32 %v2469_v5  ;;  %v1580_v37 = vmul.f32 %v6631_v15, %v6347_v53 }
 0x2f3   : > { %v4742_v22 = vpop.eup %4741  ;;  %v3204_v60 = vadd.f32 %v4736_v26, %v3203_v50  ;;  %v3096_v23 = vmul.f32 0.6931472, %v4740_v17  ;;  %v4434_v50 = vadd.f32 -0.5, %v6494_v57  ;;  %v1717_v17 = vmul.f32 %v1709_v25, %v6542_v6 }
 0x2f4   : > { %v6643_v63 = vadd.f32 %v1967_v40, %v1833_v30  ;;  %v4744_v0 = vpop.eup %4743  ;;  %v2946_v30 = vadd.f32 3409662.8, %v2938_v13  ;;  %v3013_v57 = vadd.f32 13132.0, %v3005_v36  ;;  %v1710_v13 = vadd.f32 6769.0, %v1702_v14 }
 0x2f5   : > { %v4746_v3 = vpop.eup %4745  ;;  %v3208_v40 = vsel %vm3207_vm10, %v4736_v26, %v3204_v60  ;;  %v6654_v49 = vmul.f32 0.6931472, %v4744_v0  ;;  %v3106_v54 = vmul.f32 %v4434_v50, %v3096_v23  ;;  %v1740_v26 = vadd.f32 13068.0, %v1732_v58  ;;  %v739_v58 = vpop.permute.xlu2 %738 }
 0x2f6   : > { %8100 = vst [vmem:[#allocation60_spill] sm:$0xff] %v6643_v63  ;;  %v3213_v52 = vsel %vm3210_vm11, %v3212_v59, %v3208_v40  ;;  %v1485_v8 = vmul.f32 0.6931472, %v4746_v3  ;;  %v4748_v46 = vpop.eup %4747  ;;  %v2837_v0 = vmul.f32 %v2829_v35, %v6388_v41  ;;  %v1549_v23 = vmul.f32 %v1541_v11, %v6542_v6 }
 0x2f7   : > { %v3214_v48 = vmul.f32 %v3213_v52, %v2946_v30  ;;  %v6659_v28 = vmul.f32 0.6931472, %v4748_v46  ;;  %v4750_v5 = vpop.eup %4749  ;;  %v1725_v59 = vadd.f32 13132.0, %v1717_v17  ;;  %v3114_v36 = vadd.f32 0.9189385, %v3106_v54 }
 0x2f8   : > { %v2492_v10 = vsub.f32 %v6654_v49, %v1485_v8  ;;  %2580 = vrot.lane.b32.xlu1 %v1485_v8, %s5045_s10  ;;  %v715_v8 = vadd.f32 1.0, %v5345_v31  ;;  %v714_v14 = vadd.f32 1.0, %v5287_v61  ;;  %v4752_v35 = vpop.eup %4751  ;;  %v1718_v3 = vmul.f32 %v1710_v13, %v6553_v29 }
 0x2f9   : > { %4753 = vlog2.f32 %v3214_v48  ;;  %v729_v60 = vpop.permute.xlu0 %728  ;;  %2582 = vrot.lane.b32.xlu2 %v6659_v28, %s5045_s10  ;;  %v3021_v48 = vmul.f32 %v3013_v57, %v6388_v41  ;;  %v6677_v30 = vmul.f32 0.6931472, %v4742_v22  ;;  %v1588_v11 = vadd.f32 129347.26, %v1580_v37 }
 0x2fa   : > { %v2500_v25 = vmul.f32 %v2492_v10, %v5296_v9  ;;  %v6672_v15 = vpop.permute.xlu1 %1458  ;;  %v1748_v10 = vmul.f32 %v1740_v26, %v6347_v53  ;;  %v2845_v40 = vadd.f32 1203.8342, %v2837_v0  ;;  %v1542_v31 = vadd.f32 52.458332, %v6553_v29 }
 0x2fb   : > { %8101 = vst [vmem:[#allocation61_spill] sm:$0xff] %v6672_v15  ;;  %v6680_v50 = vmul.f32 %v737_v56, %v714_v14  ;;  %v1557_v52 = vadd.f32 1203.8342, %v1549_v23  ;;  %v1733_v46 = vmul.f32 %v1725_v59, %v6542_v6  ;;  %v1489_v17 = vmul.f32 0.6931472, %v4750_v5 }
 0x2fc   : > { %2516 = vrot.lane.b32.xlu0 %v2500_v25, %s5045_s10  ;;  %8102 = vst [vmem:[#allocation62_spill] sm:$0xff] %v6677_v30  ;;  %v6683_v54 = vmul.f32 %v739_v58, %v715_v8  ;;  %v3122_v26 = vsub.f32 %v3114_v36, %v6617_v4  ;;  %v6686_v25 = vmul.f32 0.6931472, %v4752_v35  ;;  %v710_v22 = vadd.f32 1.0, %v5294_v7 }
 0x2fd   : > { %8103 = vst [vmem:[#allocation63_spill] sm:$0xff] %v6680_v50  ;;  %v1756_v13 = vadd.f32 5040.0, %v1748_v10  ;;  %v3029_v56 = vadd.f32 13068.0, %v3021_v48  ;;  %v1726_v37 = vadd.f32 13132.0, %v1718_v3  ;;  %v2471_v0 = vadd.f32 1e-08, %v5417_v55 }
 0x2fe   : > { %8104 = vst [vmem:[#allocation64_spill] sm:$0xff] %v6683_v54  ;;  %v1550_v23 = vmul.f32 %v1542_v31, %v6553_v29  ;;  %v2493_v4 = vsub.f32 %v6686_v25, %v6659_v28  ;;  %v6697_v59 = vmul.f32 %v729_v60, %v710_v22  ;;  %v1596_v7 = vmul.f32 %v1588_v11, %v6347_v53  ;;  %v733_v22 = vpop.permute.xlu2 %732  ;;  %v8112_v28 = vld [vmem:[#allocation20_spill] sm:$0xff] }
 0x2ff   : > { %v4754_v61 = vpop.eup %4753  ;;  %8105 = vst [vmem:[#allocation65_spill] sm:$0xff] %v6686_v25  ;;  %v2853_v58 = vmul.f32 %v2845_v40, %v6388_v41  ;;  %v1565_v14 = vmul.f32 %v1557_v52, %v6542_v6  ;;  %v1741_v35 = vadd.f32 13068.0, %v1733_v46  ;;  %v2494_v10 = vsub.f32 %v6677_v30, %v1489_v17 }
 0x300   : > { %v3256_v57 = vmul.f32 0.6931472, %v4754_v61  ;;  %2688 = vrot.lane.b32.xlu1 %v6680_v50, %s5049_s16  ;;  %8107 = vst [vmem:[#allocation67_spill] sm:$0xff] %v6697_v59  ;;  %v3037_v48 = vmul.f32 %v3029_v56, %v6388_v41  ;;  %v1734_v3 = vmul.f32 %v1726_v37, %v6553_v29  ;;  %4755 = vlog2.f32 %v2471_v0 }
 0x301   : > { %v1451_v8 = vpop.permute.xlu0 %1450  ;;  %2690 = vrot.lane.b32.xlu2 %v6683_v54, %s5049_s16  ;;  %v6713_v40 = vmul.f32 %v1756_v13, %v6347_v53  ;;  %v1558_v31 = vadd.f32 1203.8342, %v1550_v23  ;;  %v2501_v61 = vmul.f32 %v2493_v4, %v5317_v44  ;;  %v2861_v52 = vadd.f32 15784.881, %v2853_v58 }
 0x302   : > { %v6693_v5 = vadd.f32 %v3256_v57, %v3122_v26  ;;  %v1471_v36 = vadd.f32 %v1451_v8, %v5417_v55  ;;  %v731_v60 = vpop.permute.xlu1 %730  ;;  %v1573_v46 = vadd.f32 15784.881, %v1565_v14  ;;  %v1749_v26 = vmul.f32 %v1741_v35, %v6542_v6 }
 0x303   : > { %v1604_v57 = vadd.f32 678289.7, %v1596_v7  ;;  %v2502_v56 = vmul.f32 %v2494_v10, %v5347_v32  ;;  %v3045_v37 = vadd.f32 5040.0, %v3037_v48  ;;  %v1742_v0 = vadd.f32 13068.0, %v1734_v3 }
 0x304   : > { %8106 = vst [vmem:[#allocation66_spill] sm:$0xff] %v6693_v5  ;;  %2680 = vrot.lane.b32.xlu0 %v6697_v59, %s5049_s16  ;;  %v1479_v11 = vadd.f32 1e-08, %v1471_v36  ;;  %v1566_v13 = vmul.f32 %v1558_v31, %v6553_v29  ;;  %v2869_v4 = vmul.f32 %v2861_v52, %v6388_v41  ;;  %v1581_v8 = vmul.f32 %v1573_v46, %v6542_v6 }
 0x305   : > { %v1757_v58 = vadd.f32 5040.0, %v1749_v26  ;;  %v1612_v7 = vmul.f32 %v1604_v57, %v6347_v53  ;;  %v711_v36 = vadd.f32 1.0, %v5364_v2  ;;  %v6728_v10 = vmul.f32 %v3045_v37, %v6388_v41 }
 0x306   : > { %4757 = vlog2.f32 %v1479_v11  ;;  %v4756_v23 = vpop.eup %4755  ;;  %v1750_v48 = vmul.f32 %v1742_v0, %v6553_v29  ;;  %v712_v3 = vadd.f32 1.0, %v5442_v45  ;;  %v1574_v31 = vadd.f32 15784.881, %v1566_v13 }
 0x307   : > { %4759 = vrcp.f32 %v6713_v40  ;;  %v6735_v46 = vmul.f32 %v731_v60, %v711_v36  ;;  %v2877_v2 = vadd.f32 129347.26, %v2869_v4  ;;  %v6741_v37 = vmul.f32 %v1757_v58, %v6542_v6  ;;  %v1455_v4 = vpop.permute.xlu2 %1454 }
 0x308   : > { %2518 = vrot.lane.b32.xlu1 %v2501_v61, %s5045_s10  ;;  %v6733_v61 = vmul.f32 0.6931472, %v4756_v23  ;;  %v6743_v0 = vmul.f32 %v733_v22, %v712_v3  ;;  %v1620_v13 = vadd.f32 2222880.5, %v1612_v7  ;;  %v1758_v60 = vadd.f32 5040.0, %v1750_v48 }
 0x309   : > { %2520 = vrot.lane.b32.xlu2 %v2502_v56, %s5045_s10  ;;  %8109 = vst [vmem:[#allocation69_spill] sm:$0xff] %v6735_v46  ;;  %v1589_v56 = vadd.f32 129347.26, %v1581_v8  ;;  %v1582_v23 = vmul.f32 %v1574_v31, %v6553_v29  ;;  %v2885_v58 = vmul.f32 %v2877_v2, %v6388_v41  ;;  %vm1841_vm14 = vweird.f32 %v6713_v40 }
 0x30a   : > { %v1453_v14 = vpop.permute.xlu1 %1452  ;;  %8108 = vst [vmem:[#allocation68_spill] sm:$0xff] %v6733_v61  ;;  %v1628_v36 = vmul.f32 %v1620_v13, %v6347_v53  ;;  %vm3130_vm3 = vweird.f32 %v6728_v10  ;;  %vm1856_vm4 = vweird.f32 %v6741_v37 }
 0x30b   : > { %v1472_v11 = vadd.f32 %v1453_v14, %v5463_v51  ;;  %8110 = vst [vmem:[#allocation70_spill] sm:$0xff] %v6743_v0  ;;  %v1597_v7 = vmul.f32 %v1589_v56, %v6542_v6  ;;  %v6761_v14 = vmul.f32 %v1758_v60, %v6553_v29  ;;  %v1590_v48 = vadd.f32 129347.26, %v1582_v23 }
 0x30c   : > { %2584 = vrot.lane.b32.xlu0 %v1489_v17, %s5045_s10  ;;  %v4758_v35 = vpop.eup %4757  ;;  %v2472_v17 = vadd.f32 1e-08, %v5463_v51  ;;  %v2893_v31 = vadd.f32 678289.7, %v2885_v58  ;;  %v713_v56 = vadd.f32 1.0, %v5423_v38 }
 0x30d   : > { %v1491_v52 = vmul.f32 0.6931472, %v4758_v35  ;;  %v1480_v26 = vadd.f32 1e-08, %v1472_v11  ;;  %v6738_v57 = vpop.eup %4759  ;;  %v1473_v35 = vadd.f32 %v1455_v4, %v5505_v47  ;;  %v1598_v23 = vmul.f32 %v1590_v48, %v6553_v29 }
 0x30e   : > { %v1837_v22 = vmul.f32 %v6738_v57, %v6713_v40  ;;  %v2473_v4 = vadd.f32 1e-08, %v5505_v47  ;;  %v2901_v38 = vmul.f32 %v2893_v31, %v6388_v41  ;;  %vm1842_vm12 = vweird.f32 %v6738_v57 }
 0x30f   : > { %v2495_v45 = vsub.f32 %v6733_v61, %v1491_v52  ;;  %4761 = vlog2.f32 %v1480_v26  ;;  %v735_v26 = vpop.permute.xlu0 %734  ;;  %v1481_v13 = vadd.f32 1e-08, %v1473_v35  ;;  %v1606_v31 = vadd.f32 678289.7, %v1598_v23  ;;  %vm6807_vm15 = vmor %vm1841_vm14, %vm1842_vm12 }
 0x310   : > { %2682 = vrot.lane.b32.xlu1 %v6735_v46, %s5049_s16  ;;  %4763 = vrcp.f32 %v6728_v10  ;;  %v1838_v11 = vsub.f32 1.0, %v1837_v22  ;;  %v6773_v22 = vmul.f32 %v735_v26, %v713_v56  ;;  %v6803_v23 = vadd.f32 6.5, %v6542_v6 }
 0x311   : > { %v2503_v8 = vmul.f32 %v2495_v45, %v5417_v55  ;;  %2684 = vrot.lane.b32.xlu2 %v6743_v0, %s5049_s16  ;;  %4765 = vlog2.f32 %v2472_v17  ;;  %v1605_v17 = vadd.f32 678289.7, %v1597_v7  ;;  %vm1871_vm10 = vweird.f32 %v6761_v14 }
 0x312   : > { %4767 = vrcp.f32 %v6741_v37  ;;  %8111 = vst [vmem:[#allocation71_spill] sm:$0xff] %v6773_v22  ;;  %v1839_v7 = vmul.f32 %v6738_v57, %v1838_v11 }
 0x313   : > { %4769 = vrcp.f32 %v6761_v14 }
 0x314   : > { %2522 = vrot.lane.b32.xlu0 %v2503_v8, %s5045_s10  ;;  %v1636_v8 = vadd.f32 4162388.0, %v1628_v36  ;;  %v1613_v36 = vmul.f32 %v1605_v17, %v6542_v6  ;;  %4771 = vlog2.f32 %v1481_v13  ;;  %v1840_v56 = vadd.f32 %v6738_v57, %v1839_v7 }
 0x315   : > { %v4762_v3 = vpop.eup %4761  ;;  %4773 = vlog2.f32 %v2473_v4  ;;  %v6799_v13 = vadd.f32 6.5, %v6388_v41  ;;  %v1845_v7 = vand.u32 2147483647, %v6713_v40 }
 0x316   : > { %v6764_v2 = vpop.eup %4763  ;;  %v1493_v58 = vmul.f32 0.6931472, %v4762_v3  ;;  %v6788_v3 = vadd.f32 6.5, %v6347_v53  ;;  %v1644_v11 = vmul.f32 %v1636_v8, %v6347_v53  ;;  %v1621_v54 = vadd.f32 2222880.5, %v1613_v36 }
 0x317   : > { %v4766_v45 = vpop.eup %4765  ;;  %v3126_v35 = vmul.f32 %v6764_v2, %v6728_v10  ;;  %vm1846_vm0 = vcmp.eq.f32.partialorder %v1845_v7, 8.507059e+37  ;;  %vm3131_vm1 = vweird.f32 %v6764_v2  ;;  %v3276_v7 = vadd.f32 52.458332, %v8112_v28 }
 0x318   : > { %2586 = vrot.lane.b32.xlu1 %v1491_v52, %s5045_s10  ;;  %v6769_v60 = vpop.eup %4767  ;;  %v3396_v52 = vadd.f32 28.0, %v8112_v28  ;;  %v6781_v20 = vmul.f32 0.6931472, %v4766_v45  ;;  %v2909_v45 = vadd.f32 2222880.5, %v2901_v38  ;;  %4775 = vlog2.f32 %v6788_v3  ;;  %vm6847_vm5 = vmor %vm3130_vm3, %vm3131_vm1 }
 0x319   : > { %v1852_v48 = vmul.f32 %v6769_v60, %v6741_v37  ;;  %v6792_v17 = vpop.eup %4769  ;;  %v3127_v8 = vsub.f32 1.0, %v3126_v35  ;;  %v1629_v46 = vmul.f32 %v1621_v54, %v6542_v6  ;;  %4777 = vlog2.f32 %v6799_v13 }
 0x31a   : > { %8113 = vst [vmem:[#allocation20_spill] sm:$0xff] %v6781_v20  ;;  %v2496_v26 = vsub.f32 %v6781_v20, %v1493_v58  ;;  %v3404_v5 = vmul.f32 %v3396_v52, %v8112_v28  ;;  %v1614_v52 = vmul.f32 %v1606_v31, %v6553_v29  ;;  %v1867_v36 = vmul.f32 %v6792_v17, %v6761_v14 }
 0x31b   : > { %v1853_v4 = vsub.f32 1.0, %v1852_v48  ;;  %v1844_v48 = vsel %vm6807_vm15, %v6738_v57, %v1840_v56  ;;  %v3128_v31 = vmul.f32 %v6764_v2, %v3127_v8  ;;  %4779 = vlog2.f32 %v6803_v23 }
 0x31c   : > { %2686 = vrot.lane.b32.xlu0 %v6773_v22, %s5049_s16  ;;  %v1847_v22 = vand.u32 2147483648, %v6713_v40  ;;  %v2504_v35 = vmul.f32 %v2496_v26, %v5463_v51  ;;  %v2917_v40 = vmul.f32 %v2909_v45, %v6388_v41  ;;  %v3412_v12 = vadd.f32 322.0, %v3404_v5 }
 0x31d   : > { %v1854_v26 = vmul.f32 %v6769_v60, %v1853_v4  ;;  %v1652_v39 = vadd.f32 3409662.8, %v1644_v11  ;;  %v1622_v56 = vadd.f32 2222880.5, %v1614_v52  ;;  %v1868_v45 = vsub.f32 1.0, %v1867_v36 }
 0x31e   : > { %v1848_v59 = vor.u32 1.1754944e-38, %v1847_v22  ;;  %v2925_v38 = vadd.f32 4162388.0, %v2917_v40  ;;  %v3134_v54 = vand.u32 2147483647, %v6728_v10  ;;  %v3136_v22 = vand.u32 2147483648, %v6728_v10 }
 0x31f   : > { %v3420_v34 = vmul.f32 %v3412_v12, %v8112_v28  ;;  %v1637_v8 = vadd.f32 4162388.0, %v1629_v46  ;;  %v1855_v11 = vadd.f32 %v6769_v60, %v1854_v26  ;;  %vm1857_vm2 = vweird.f32 %v6769_v60 }
 0x320   : > { %2588 = vrot.lane.b32.xlu1 %v1493_v58, %s5045_s10  ;;  %v4772_v58 = vpop.eup %4771  ;;  %v1849_v57 = vsel %vm1846_vm0, %v1848_v59, %v1844_v48  ;;  %v1862_v4 = vand.u32 2147483648, %v6741_v37  ;;  %v1630_v12 = vmul.f32 %v1622_v56, %v6553_v29  ;;  %v1869_v46 = vmul.f32 %v6792_v17, %v1868_v45  ;;  %vm6854_vm6 = vmor %vm1856_vm4, %vm1857_vm2 }
 0x321   : > { %v4774_v0 = vpop.eup %4773  ;;  %v1495_v5 = vmul.f32 0.6931472, %v4772_v58  ;;  %v1860_v58 = vand.u32 2147483647, %v6741_v37  ;;  %v2933_v48 = vmul.f32 %v2925_v38, %v6388_v41  ;;  %v3428_v10 = vadd.f32 1960.0, %v3420_v34 }
 0x322   : > { %v6831_v50 = vmul.f32 0.6931472, %v4774_v0  ;;  %v4776_v59 = vpop.eup %4775  ;;  %vm3135_vm7 = vcmp.eq.f32.partialorder %v3134_v54, 8.507059e+37  ;;  %v3137_v56 = vor.u32 1.1754944e-38, %v3136_v22  ;;  %v1859_v45 = vsel %vm6854_vm6, %v6769_v60, %v1855_v11 }
 0x323   : > { %v4778_v52 = vpop.eup %4777  ;;  %v6865_v34 = vadd.f32 6.5, %v6553_v29  ;;  %v3284_v38 = vmul.f32 %v3276_v7, %v8112_v28  ;;  %vm1872_vm8 = vweird.f32 %v6792_v17  ;;  %vm1861_vm9 = vcmp.eq.f32.partialorder %v1860_v58, 8.507059e+37 }
 0x324   : > { %2524 = vrot.lane.b32.xlu0 %v2504_v35, %s5045_s10  ;;  %v3129_v35 = vadd.f32 %v6764_v2, %v3128_v31  ;;  %8116 = vst [vmem:[#allocation72_spill] sm:$0xff] %v6831_v50  ;;  %v2497_v0 = vsub.f32 %v6831_v50, %v1495_v5  ;;  %v4780_v36 = vpop.eup %4779  ;;  %v1645_v31 = vmul.f32 %v1637_v8, %v6542_v6  ;;  %v1638_v8 = vadd.f32 4162388.0, %v1630_v12  ;;  %vm1873_vm11 = vmor %vm1871_vm10, %vm1872_vm8 }
 0x325   : > { %v1870_v50 = vadd.f32 %v6792_v17, %v1869_v46  ;;  %v1877_v54 = vand.u32 2147483648, %v6761_v14  ;;  %v3436_v22 = vmul.f32 %v3428_v10, %v8112_v28  ;;  %v1875_v11 = vand.u32 2147483647, %v6761_v14 }
 0x326   : > { %v3133_v37 = vsel %vm6847_vm5, %v6764_v2, %v3129_v35  ;;  %v2505_v40 = vmul.f32 %v2497_v0, %v5505_v47  ;;  %v2941_v35 = vadd.f32 3409662.8, %v2933_v48  ;;  %v1850_v7 = vmul.f32 %v1849_v57, %v1652_v39 }
 0x327   : > { %v3138_v2 = vsel %vm3135_vm7, %v3137_v56, %v3133_v37  ;;  %v3292_v12 = vadd.f32 1203.8342, %v3284_v38  ;;  %v1646_v0 = vmul.f32 %v1638_v8, %v6553_v29  ;;  %4781 = vlog2.f32 %v6865_v34 }
 0x328   : > { %2590 = vrot.lane.b32.xlu1 %v1495_v5, %s5045_s10  ;;  %v1863_v5 = vor.u32 1.1754944e-38, %v1862_v4  ;;  %v1653_v4 = vadd.f32 3409662.8, %v1645_v31  ;;  %v3139_v46 = vmul.f32 %v3138_v2, %v2941_v35  ;;  %v1874_v58 = vsel %vm1873_vm11, %v6792_v17, %v1870_v50 }
 0x329   : > { %v1878_v26 = vor.u32 1.1754944e-38, %v1877_v54  ;;  %v3444_v48 = vadd.f32 6769.0, %v3436_v22  ;;  %v1797_v37 = vmul.f32 0.6931472, %v4776_v59  ;;  %vm1876_vm12 = vcmp.eq.f32.partialorder %v1875_v11, 8.507059e+37 }
 0x32a   : > { %v1864_v60 = vsel %vm1861_vm9, %v1863_v5, %v1859_v45  ;;  %4783 = vlog2.f32 %v1850_v7  ;;  %v3086_v14 = vmul.f32 0.6931472, %v4778_v52  ;;  %v3300_v31 = vmul.f32 %v3292_v12, %v8112_v28 }
 0x32b   : > { %v1865_v10 = vmul.f32 %v1864_v60, %v1653_v4  ;;  %v1879_v56 = vsel %vm1876_vm12, %v1878_v26, %v1874_v58  ;;  %v1799_v39 = vmul.f32 0.6931472, %v4780_v36  ;;  %4785 = vlog2.f32 %v3139_v46 }
 0x32c   : > { %v1654_v57 = vadd.f32 3409662.8, %v1646_v0  ;;  %v4413_v45 = vadd.f32 -0.5, %v6347_v53  ;;  %v4429_v5 = vadd.f32 -0.5, %v6388_v41  ;;  %v3452_v50 = vmul.f32 %v3444_v48, %v8112_v28  ;;  %v8121_v48 = vld [vmem:[#allocation12_spill] sm:$0xff] }
 0x32d   : > { %4787 = vlog2.f32 %v1865_v10  ;;  %v4782_v17 = vpop.eup %4781  ;;  %v4414_v38 = vadd.f32 -0.5, %v6542_v6  ;;  %v3308_v52 = vadd.f32 15784.881, %v3300_v31  ;;  %v4415_v41 = vadd.f32 -0.5, %v6553_v29  ;;  %v6888_v10 = vld [vmem:[%s6024_s17] sm:$0xff] }
 0x32e   : > { %v1880_v59 = vmul.f32 %v1879_v56, %v1654_v57  ;;  %v1812_v8 = vmul.f32 %v4413_v45, %v1797_v37  ;;  %v1801_v36 = vmul.f32 0.6931472, %v4782_v17  ;;  %v3460_v22 = vadd.f32 13132.0, %v3452_v50  ;;  %v8122_v56 = vld [vmem:[#allocation15_spill] sm:$0xff] }
 0x32f   : > { %v1813_v2 = vmul.f32 %v4414_v38, %v1799_v39  ;;  %v3316_v4 = vmul.f32 %v3308_v52, %v8112_v28  ;;  %v6891_v26 = vadd.f32 1.0, %v6888_v10  ;;  %v3781_v37 = vadd.f32 1e-08, %v8121_v48  ;;  %v8123_v38 = vld [vmem:[#allocation16_spill] sm:$0xff] }
 0x330   : > { %2526 = vrot.lane.b32.xlu1 %v2505_v40, %s5045_s10  ;;  %v3101_v40 = vmul.f32 %v4429_v5, %v3086_v14  ;;  %v4784_v54 = vpop.eup %4783  ;;  %4789 = vlog2.f32 %v1880_v59  ;;  %v1820_v53 = vadd.f32 0.9189385, %v1812_v8  ;;  %v1814_v46 = vmul.f32 %v4415_v41, %v1801_v36  ;;  %v6899_v5 = vld [vmem:[%s6024_s17 + $0x10] sm:$0xff]  ;;  %v8124_v41 = vld [vmem:[#allocation14_spill] sm:$0xff] }
 0x331   : > { %v4786_v60 = vpop.eup %4785  ;;  %v1821_v6 = vadd.f32 0.9189385, %v1813_v2  ;;  %v1957_v7 = vmul.f32 0.6931472, %v4784_v54  ;;  %v3468_v0 = vmul.f32 %v3460_v22, %v8112_v28  ;;  %v3782_v31 = vadd.f32 1e-08, %v8122_v56 }
 0x332   : > { %v3109_v11 = vadd.f32 0.9189385, %v3101_v40  ;;  %v3246_v12 = vmul.f32 0.6931472, %v4786_v60  ;;  %v1828_v14 = vsub.f32 %v1820_v53, %v6788_v3  ;;  %v3324_v39 = vadd.f32 129347.26, %v3316_v4 }
 0x333   : > { %v4788_v35 = vpop.eup %4787  ;;  %v1829_v45 = vsub.f32 %v1821_v6, %v6803_v23  ;;  %v6902_v50 = vadd.f32 1.0, %v6899_v5  ;;  %v1124_v17 = vadd.f32 28.0, %v6891_v26  ;;  %v3783_v59 = vadd.f32 1e-08, %v8123_v38 }
 0x334   : > { %v1959_v58 = vmul.f32 0.6931472, %v4788_v35  ;;  %v3117_v29 = vsub.f32 %v3109_v11, %v6799_v13  ;;  %v6906_v8 = vadd.f32 %v1957_v7, %v1828_v14  ;;  %v1822_v13 = vadd.f32 0.9189385, %v1814_v46 }
 0x335   : > { %v3476_v40 = vadd.f32 13068.0, %v3468_v0  ;;  %v1006_v2 = vadd.f32 52.458332, %v6902_v50  ;;  %v1126_v23 = vadd.f32 28.0, %v6902_v50  ;;  %4791 = vlog2.f32 %v3781_v37  ;;  %v8126_v37 = vld [vmem:[#allocation36_spill] sm:$0xff] }
 0x336   : > { %v4790_v57 = vpop.eup %4789  ;;  %v6908_v3 = vadd.f32 %v3246_v12, %v3117_v29  ;;  %v6910_v52 = vadd.f32 %v1959_v58, %v1829_v45  ;;  %v1132_v36 = vmul.f32 %v1124_v17, %v6891_v26  ;;  %4793 = vlog2.f32 %v3782_v31  ;;  %v8125_v12 = vld [vmem:[#allocation35_spill] sm:$0xff] }
 0x337   : > { %v1961_v54 = vmul.f32 0.6931472, %v4790_v57  ;;  %v3332_v22 = vmul.f32 %v3324_v39, %v8112_v28  ;;  %v6917_v60 = vadd.f32 1.0, %v6538_v18  ;;  %v1014_v35 = vmul.f32 %v1006_v2, %v6902_v50  ;;  %v8130_v57 = vld [vmem:[#allocation18_spill] sm:$0xff] }
 0x338   : > { %v1134_v53 = vmul.f32 %v1126_v23, %v6902_v50  ;;  %4795 = vlog2.f32 %v3783_v59  ;;  %v1830_v11 = vsub.f32 %v1822_v13, %v6865_v34  ;;  %v2474_v4 = vadd.f32 1e-08, %v8124_v41  ;;  %v8127_v34 = vld [vmem:[#allocation37_spill] sm:$0xff] }
 0x339   : > { %v1140_v6 = vadd.f32 322.0, %v1132_v36  ;;  %v3484_v7 = vmul.f32 %v3476_v40, %v8112_v28  ;;  %v1022_v0 = vadd.f32 1203.8342, %v1014_v35  ;;  %v3340_v31 = vadd.f32 678289.7, %v3332_v22  ;;  %v8128_v36 = vld [vmem:[#allocation13_spill] sm:$0xff]  ;;  %v2679_v35 = vpop.permute.xlu2 %2678 }
 0x33a   : > { %v1142_v58 = vadd.f32 322.0, %v1134_v53  ;;  %v6928_v14 = vadd.f32 %v1961_v54, %v1830_v11  ;;  %v1125_v59 = vadd.f32 28.0, %v6917_v60  ;;  %4797 = vlog2.f32 %v2474_v4 }
 0x33b   : > { %v1148_v29 = vmul.f32 %v1140_v6, %v6891_v26  ;;  %v4792_v39 = vpop.eup %4791  ;;  %v1030_v45 = vmul.f32 %v1022_v0, %v6902_v50  ;;  %v3492_v23 = vadd.f32 5040.0, %v3484_v7  ;;  %v6939_v22 = vadd.f32 1e-08, %v8128_v36 }
 0x33c   : > { %v1150_v17 = vmul.f32 %v1142_v58, %v6902_v50  ;;  %v4794_v13 = vpop.eup %4793  ;;  %v1133_v6 = vmul.f32 %v1125_v59, %v6917_v60  ;;  %v6943_v58 = vmul.f32 0.6931472, %v4792_v39  ;;  %v3784_v18 = vadd.f32 1e-08, %v8130_v57 }
 0x33d   : > { %v1156_v2 = vadd.f32 1960.0, %v1148_v29  ;;  %8129 = vst [vmem:[#allocation12_spill] sm:$0xff] %v6939_v22  ;;  %v1038_v53 = vadd.f32 15784.881, %v1030_v45  ;;  %v3348_v40 = vmul.f32 %v3340_v31, %v8112_v28  ;;  %v6949_v46 = vmul.f32 0.6931472, %v4794_v13 }
 0x33e   : > { %v4796_v54 = vpop.eup %4795  ;;  %v1158_v11 = vadd.f32 1960.0, %v1150_v17  ;;  %v1141_v29 = vadd.f32 322.0, %v1133_v6  ;;  %v2702_v45 = vadd.f32 %v2679_v35, %v5317_v44  ;;  %v6955_v59 = vmul.f32 %v3492_v23, %v8112_v28 }
 0x33f   : > { %v1164_v0 = vmul.f32 %v1156_v2, %v6891_v26  ;;  %v1046_v4 = vmul.f32 %v1038_v53, %v6902_v50  ;;  %v6952_v1 = vmul.f32 0.6931472, %v4796_v54  ;;  %v2703_v39 = vadd.f32 %v2679_v35, %v8122_v56 }
 0x340   : > { %v1166_v7 = vmul.f32 %v1158_v11, %v6902_v50  ;;  %v1149_v31 = vmul.f32 %v1141_v29, %v6917_v60  ;;  %v6959_v53 = vpop.eup %4797  ;;  %v1004_v11 = vadd.f32 52.458332, %v6891_v26  ;;  %v3356_v6 = vadd.f32 2222880.5, %v3348_v40 }
 0x341   : > { %v1172_v17 = vadd.f32 6769.0, %v1164_v0  ;;  %8131 = vst [vmem:[#allocation15_spill] sm:$0xff] %v6952_v1  ;;  %v1054_v2 = vadd.f32 129347.26, %v1046_v4  ;;  %v6964_v0 = vadd.f32 6.5, %v8112_v28  ;;  %4799 = vrcp.f32 %v6955_v59 }
 0x342   : > { %v1174_v63 = vadd.f32 6769.0, %v1166_v7  ;;  %8132 = vst [vmem:[#allocation16_spill] sm:$0xff] %v6959_v53  ;;  %v6969_v35 = vadd.f32 6.5, %v6902_v50  ;;  %v1157_v4 = vadd.f32 1960.0, %v1149_v31  ;;  %v1012_v29 = vmul.f32 %v1004_v11, %v6891_v26 }
 0x343   : > { %v1180_v13 = vmul.f32 %v1172_v17, %v6891_v26  ;;  %8133 = vst [vmem:[#allocation14_spill] sm:$0xff] %v6964_v0  ;;  %v1062_v54 = vmul.f32 %v1054_v2, %v6902_v50  ;;  %v2718_v7 = vadd.f32 1e-08, %v2702_v45  ;;  %v2719_v15 = vadd.f32 1e-08, %v2703_v39 }
 0x344   : > { %v1182_v23 = vmul.f32 %v1174_v63, %v6902_v50  ;;  %4801 = vlog2.f32 %v3784_v18  ;;  %v1020_v22 = vadd.f32 1203.8342, %v1012_v29  ;;  %v1165_v2 = vmul.f32 %v1157_v4, %v6917_v60 }
 0x345   : > { %v1188_v21 = vadd.f32 13132.0, %v1180_v13  ;;  %v1070_v17 = vadd.f32 678289.7, %v1062_v54  ;;  %4803 = vlog2.f32 %v6964_v0  ;;  %v3364_v31 = vmul.f32 %v3356_v6, %v8112_v28 }
 0x346   : > { %v1190_v40 = vadd.f32 13132.0, %v1182_v23  ;;  %4805 = vlog2.f32 %v6969_v35  ;;  %v1028_v39 = vmul.f32 %v1020_v22, %v6891_v26  ;;  %v6982_v18 = vadd.f32 -0.5, %v8112_v28 }
 0x347   : > { %v1196_v53 = vmul.f32 %v1188_v21, %v6891_v26  ;;  %v1078_v63 = vmul.f32 %v1070_v17, %v6902_v50  ;;  %4807 = vlog2.f32 %v2718_v7  ;;  %v1474_v21 = vadd.f32 %v6645_v33, %v8124_v41  ;;  %v6986_v23 = vpop.eup %4799 }
 0x348   : > { %v1198_v45 = vmul.f32 %v1190_v40, %v6902_v50  ;;  %4809 = vlog2.f32 %v2719_v15  ;;  %v1036_v29 = vadd.f32 15784.881, %v1028_v39  ;;  %v1005_v6 = vadd.f32 52.458332, %v6917_v60 }
 0x349   : > { %v1204_v11 = vadd.f32 13068.0, %v1196_v53  ;;  %v1086_v13 = vadd.f32 2222880.5, %v1078_v63  ;;  %v1173_v7 = vadd.f32 6769.0, %v1165_v2  ;;  %v4405_v44 = vadd.f32 -0.5, %v6891_v26 }
 0x34a   : > { %v1206_v54 = vadd.f32 13068.0, %v1198_v45  ;;  %v6990_v22 = vpop.eup %4801  ;;  %v3372_v15 = vadd.f32 4162388.0, %v3364_v31  ;;  %v8135_v45 = vld [vmem:[#allocation25_spill] sm:$0xff]  ;;  %v1044_v39 = vmul.f32 %v1036_v29, %v6891_v26  ;;  %vm3675_vm9 = vweird.f32 %v6955_v59 }
 0x34b   : > { %v1212_v17 = vmul.f32 %v1204_v11, %v6891_v26  ;;  %8134 = vst [vmem:[#allocation35_spill] sm:$0xff] %v6990_v22  ;;  %v6995_v63 = vpop.eup %4803  ;;  %v2549_v20 = vadd.f32 1e-08, %v8135_v45  ;;  %v1013_v11 = vmul.f32 %v1005_v6, %v6917_v60  ;;  %v1094_v61 = vmul.f32 %v1086_v13, %v6902_v50  ;;  %v8136_v22 = vld [vmem:[#allocation32_spill] sm:$0xff]  ;;  %v8137_v13 = vld [vmem:[#allocation26_spill] sm:$0xff] }
 0x34c   : > { %v1214_v33 = vmul.f32 %v1206_v54, %v6902_v50  ;;  %v4806_v24 = vpop.eup %4805  ;;  %v2548_v43 = vadd.f32 1e-08, %v8136_v22  ;;  %v1052_v45 = vadd.f32 129347.26, %v1044_v39  ;;  %v1181_v29 = vmul.f32 %v1173_v7, %v6917_v60 }
 0x34d   : > { %v1220_v16 = vadd.f32 5040.0, %v1212_v17  ;;  %v7005_v54 = vpop.eup %4807  ;;  %v1265_v47 = vmul.f32 0.6931472, %v4806_v24  ;;  %v1102_v22 = vadd.f32 4162388.0, %v1094_v61  ;;  %v7030_v24 = vadd.f32 6.5, %v6891_v26 }
 0x34e   : > { %v1222_v31 = vadd.f32 5040.0, %v1214_v33  ;;  %v7009_v17 = vpop.eup %4809  ;;  %v4407_v33 = vadd.f32 -0.5, %v6902_v50  ;;  %v1060_v39 = vmul.f32 %v1052_v45, %v6891_v26  ;;  %vm3676_vm11 = vweird.f32 %v6986_v23 }
 0x34f   : > { %v7012_v6 = vmul.f32 %v1220_v16, %v6891_v26  ;;  %v1189_v16 = vadd.f32 13132.0, %v1181_v29  ;;  %vm7229_vm12 = vmor %vm3675_vm9, %vm3676_vm11  ;;  %vm3981_vm11 = vcmask 654336  }
 0x350   : > { %v7016_v62 = vmul.f32 %v1222_v31, %v6902_v50  ;;  %v7035_v29 = vmul.f32 %v4407_v33, %v1265_v47 }
 0x351   : > { %vm1305_vm15 = vweird.f32 %v7012_v6 }
 0x352   : > { %vm1335_vm14 = vweird.f32 %v7016_v62  ;;  %v1341_v30 = vand.u32 2147483648, %v7016_v62 }
 0x357   : > { %v2677_v4 = vpop.permute.xlu1 %2676 }
 0x358   : > { %v2700_v53 = vadd.f32 %v2677_v4, %v5296_v9  ;;  %v2701_v40 = vadd.f32 %v2677_v4, %v8121_v48  ;;  %v7003_v4 = vmul.f32 %v6986_v23, %v6955_v59 }
 0x35a   : > { %v2716_v2 = vadd.f32 1e-08, %v2700_v53  ;;  %v2717_v0 = vadd.f32 1e-08, %v2701_v40  ;;  %v1021_v53 = vadd.f32 1203.8342, %v1013_v11  ;;  %v7025_v11 = vmul.f32 %v3372_v15, %v8112_v28 }
 0x35b   : > { %v2550_v40 = vadd.f32 1e-08, %v8137_v13  ;;  %v1339_v13 = vand.u32 2147483647, %v7016_v62 }
 0x35c   : > { %4811 = vlog2.f32 %v2716_v2  ;;  %v1029_v7 = vmul.f32 %v1021_v53, %v6917_v60  ;;  %v7022_v2 = vadd.f32 1e-08, %v1474_v21 }
 0x35d   : > { %4813 = vlog2.f32 %v2717_v0  ;;  %v1068_v0 = vadd.f32 678289.7, %v1060_v39  ;;  %v1197_v39 = vmul.f32 %v1189_v16, %v6917_v60  ;;  %vm7076_vm4 = vcmp.eq.f32.partialorder %v1339_v13, 8.507059e+37 }
 0x35e   : > { %4815 = vrcp.f32 %v7012_v6  ;;  %8138 = vst [vmem:[#allocation36_spill] sm:$0xff] %v7022_v2  ;;  %v1037_v31 = vadd.f32 15784.881, %v1029_v7  ;;  %v7092_v13 = vadd.f32 6.5, %v6917_v60 }
 0x35f   : > { %4817 = vlog2.f32 %v2549_v20  ;;  %v1110_v20 = vmul.f32 %v1102_v22, %v6902_v50  ;;  %v1311_v22 = vand.u32 2147483648, %v7012_v6 }
 0x360   : > { %4819 = vlog2.f32 %v2548_v43  ;;  %v1076_v43 = vmul.f32 %v1068_v0, %v6891_v26  ;;  %v1045_v50 = vmul.f32 %v1037_v31, %v6917_v60  ;;  %v1309_v31 = vand.u32 2147483647, %v7012_v6 }
 0x361   : > { %4821 = vrcp.f32 %v7016_v62 }
 0x362   : > { %v4812_v45 = vpop.eup %4811  ;;  %4823 = vlog2.f32 %v2550_v40  ;;  %v1084_v61 = vadd.f32 2222880.5, %v1076_v43  ;;  %vm1310_vm3 = vcmp.eq.f32.partialorder %v1309_v31, 8.507059e+37 }
 0x363   : > { %v4814_v15 = vpop.eup %4813  ;;  %v2733_v53 = vmul.f32 0.6931472, %v4812_v45  ;;  %4825 = vlog2.f32 %v7030_v24  ;;  %v1053_v45 = vadd.f32 129347.26, %v1045_v50 }
 0x364   : > { %v4816_v7 = vpop.eup %4815  ;;  %v2735_v21 = vmul.f32 0.6931472, %v4814_v15  ;;  %v1092_v0 = vmul.f32 %v1084_v61, %v6891_v26 }
 0x365   : > { %v7043_v47 = vpop.eup %4817  ;;  %3949 = vrot.lane.b32.xlu0 %v2733_v53, %s5050_s18  ;;  %v3805_v40 = vsub.f32 %v6654_v49, %v2733_v53  ;;  %v1301_v33 = vmul.f32 %v4816_v7, %v7012_v6  ;;  %vm1306_vm0 = vweird.f32 %v4816_v7  ;;  %v1205_v53 = vadd.f32 13068.0, %v1197_v39 }
 0x366   : > { %v4820_v16 = vpop.eup %4819  ;;  %3951 = vrot.lane.b32.xlu1 %v2735_v21, %s5050_s18  ;;  %v3806_v49 = vsub.f32 %v6943_v58, %v2735_v21  ;;  %v1100_v61 = vadd.f32 4162388.0, %v1092_v0  ;;  %v7065_v21 = vpop.permute.xlu2 %2582  ;;  %vm7071_vm2 = vmor %vm1305_vm15, %vm1306_vm0 }
 0x367   : > { %v4822_v43 = vpop.eup %4821  ;;  %v3821_v15 = vmul.f32 %v3805_v40, %v5296_v9  ;;  %v1302_v2 = vsub.f32 1.0, %v1301_v33  ;;  %v1312_v40 = vor.u32 1.1754944e-38, %v1311_v22  ;;  %v1061_v33 = vmul.f32 %v1053_v45, %v6917_v60 }
 0x368   : > { %v7055_v27 = vpop.eup %4823  ;;  %v1331_v42 = vmul.f32 %v4822_v43, %v7016_v62  ;;  %v1213_v58 = vmul.f32 %v1205_v53, %v6917_v60  ;;  %vm1336_vm1 = vweird.f32 %v4822_v43  ;;  %v1108_v9 = vmul.f32 %v1100_v61, %v6891_v26 }
 0x369   : > { %v4826_v25 = vpop.eup %4825  ;;  %3853 = vrot.lane.b32.xlu2 %v3821_v15, %s5046_s11  ;;  %v1303_v50 = vmul.f32 %v4816_v7, %v1302_v2  ;;  %v1118_v2 = vadd.f32 3409662.8, %v1110_v20  ;;  %v3822_v45 = vmul.f32 %v3806_v49, %v8121_v48  ;;  %vm7084_vm5 = vmor %vm1335_vm14, %vm1336_vm1  ;;  %v1342_v20 = vor.u32 1.1754944e-38, %v1341_v30 }
 0x36a   : > { %v7059_v1 = vpop.permute.xlu1 %2580  ;;  %v1332_v39 = vsub.f32 1.0, %v1331_v42  ;;  %v1261_v51 = vmul.f32 0.6931472, %v4826_v25  ;;  %v1116_v42 = vadd.f32 3409662.8, %v1108_v9  ;;  %v1221_v48 = vadd.f32 5040.0, %v1213_v58 }
 0x36b   : > { %v1304_v22 = vadd.f32 %v4816_v7, %v1303_v50  ;;  %v1069_v25 = vadd.f32 678289.7, %v1061_v33  ;;  %v2557_v62 = vmul.f32 0.6931472, %v4820_v16 }
 0x36c   : > { %v1333_v15 = vmul.f32 %v4822_v43, %v1332_v39  ;;  %v1276_v49 = vmul.f32 %v4405_v44, %v1261_v51  ;;  %v7096_v39 = vmul.f32 0.6931472, %v7005_v54  ;;  %v7099_v30 = vmul.f32 %v1221_v48, %v6917_v60 }
 0x36d   : > { %v1308_v31 = vsel %vm7071_vm2, %v4816_v7, %v1304_v22  ;;  %3855 = vrot.lane.b32.xlu0 %v3822_v45, %s5046_s11  ;;  %v1077_v50 = vmul.f32 %v1069_v25, %v6917_v60  ;;  %v7102_v7 = vadd.f32 0.9189385, %v7035_v29  ;;  %v2739_v44 = vmul.f32 0.6931472, %v7009_v17 }
 0x36e   : > { %v7080_v26 = vpop.permute.xlu0 %2516  ;;  %v1334_v9 = vadd.f32 %v4822_v43, %v1333_v15  ;;  %v1313_v61 = vsel %vm1310_vm3, %v1312_v40, %v1308_v31  ;;  %v8145_v40 = vld [vmem:[#allocation17_spill] sm:$0xff]  ;;  %v1284_v45 = vadd.f32 0.9189385, %v1276_v49  ;;  %v7119_v25 = vpop.permute.xlu2 %2690  ;;  %v2604_v6 = vsub.f32 %v2557_v62, %v7059_v1 }
 0x36f   : > { %v1314_v33 = vmul.f32 %v1313_v61, %v1116_v42  ;;  %v1085_v51 = vadd.f32 2222880.5, %v1077_v50  ;;  %v8146_v31 = vsub.f32 1.0, %v7003_v4  ;;  %v2561_v1 = vmul.f32 0.6931472, %v7055_v27 }
 0x370   : > { %v1338_v58 = vsel %vm7084_vm5, %v4822_v43, %v1334_v9  ;;  %v5022_v43 = vld [vmem:[%s6024_s17 + $0x18] sm:$0xff]  ;;  %v1294_v9 = vsub.f32 %v7102_v7, %v6969_v35  ;;  %v1292_v61 = vsub.f32 %v1284_v45, %v7030_v24  ;;  %v1324_v50 = vand.u32 2147483647, %v7099_v30 }
 0x371   : > { %v1343_v16 = vsel %vm7076_vm4, %v1342_v20, %v1338_v58  ;;  %4827 = vlog2.f32 %v1314_v33  ;;  %3953 = vrot.lane.b32.xlu2 %v7096_v39, %s5050_s18  ;;  %v7115_v15 = vadd.f32 1.0, %v5022_v43  ;;  %v1093_v53 = vmul.f32 %v1085_v51, %v6917_v60 }
 0x372   : > { %v2689_v0 = vpop.permute.xlu1 %2688  ;;  %v1344_v29 = vmul.f32 %v1343_v16, %v1118_v2  ;;  %4829 = vlog2.f32 %v7092_v13  ;;  %v7128_v48 = vmul.f32 %v6986_v23, %v8146_v31  ;;  %v3808_v4 = vsub.f32 %v6949_v46, %v2739_v44 }
 0x373   : > { %v2712_v54 = vadd.f32 %v2689_v0, %v8124_v41  ;;  %v2713_v22 = vadd.f32 %v2689_v0, %v8145_v40  ;;  %4831 = vrcp.f32 %v7099_v30  ;;  %v1007_v2 = vadd.f32 52.458332, %v7115_v15 }
 0x374   : > { %4833 = vlog2.f32 %v1344_v29  ;;  %v1101_v58 = vadd.f32 4162388.0, %v1093_v53  ;;  %v1127_v7 = vadd.f32 28.0, %v7115_v15  ;;  %v2612_v51 = vmul.f32 %v6888_v10, %v2604_v6 }
 0x375   : > { %v2728_v17 = vadd.f32 1e-08, %v2712_v54  ;;  %v2729_v42 = vadd.f32 1e-08, %v2713_v22  ;;  %3955 = vrot.lane.b32.xlu0 %v2739_v44, %s5050_s18  ;;  %v1015_v35 = vmul.f32 %v1007_v2, %v7115_v15  ;;  %v4406_v27 = vadd.f32 -0.5, %v6917_v60 }
 0x376   : > { %v7122_v20 = vpop.permute.xlu0 %2680  ;;  %v3824_v24 = vmul.f32 %v3808_v4, %v8122_v56  ;;  %vm1320_vm6 = vweird.f32 %v7099_v30  ;;  %v1326_v46 = vand.u32 2147483648, %v7099_v30  ;;  %v1135_v22 = vmul.f32 %v1127_v7, %v7115_v15 }
 0x377   : > { %4835 = vlog2.f32 %v2728_v17  ;;  %v2705_v49 = vadd.f32 %v7122_v20, %v8123_v38  ;;  %v4828_v62 = vpop.eup %4827  ;;  %v1023_v44 = vadd.f32 1203.8342, %v1015_v35  ;;  %vm7150_vm7 = vcmp.eq.f32.partialorder %v1324_v50, 8.507059e+37  ;;  %v2521_v35 = vpop.permute.xlu2 %2520 }
 0x378   : > { %4837 = vlog2.f32 %v2729_v42  ;;  %v4830_v0 = vpop.eup %4829  ;;  %v1421_v16 = vmul.f32 0.6931472, %v4828_v62  ;;  %v1109_v42 = vmul.f32 %v1101_v58, %v6917_v60  ;;  %v1143_v6 = vadd.f32 322.0, %v1135_v22 }
 0x379   : > { %v2721_v33 = vadd.f32 1e-08, %v2705_v49  ;;  %v4832_v54 = vpop.eup %4831  ;;  %3859 = vrot.lane.b32.xlu2 %v3824_v24, %s5046_s11  ;;  %v1031_v53 = vmul.f32 %v1023_v44, %v7115_v15  ;;  %v8149_v31 = vsub.f32 %v6906_v8, %v8125_v12  ;;  %v8150_v24 = vsub.f32 %v6928_v14, %v6375_v19 }
 0x37a   : > { %v4834_v29 = vpop.eup %4833  ;;  %v7147_v45 = vadd.f32 %v1421_v16, %v1292_v61  ;;  %v1316_v43 = vmul.f32 %v4832_v54, %v7099_v30  ;;  %vm1321_vm8 = vweird.f32 %v4832_v54  ;;  %v1151_v12 = vmul.f32 %v1143_v6, %v7115_v15 }
 0x37b   : > { %4839 = vlog2.f32 %v2721_v33  ;;  %v1425_v17 = vmul.f32 0.6931472, %v4834_v29  ;;  %v1327_v33 = vor.u32 1.1754944e-38, %v1326_v46  ;;  %v1039_v8 = vadd.f32 15784.881, %v1031_v53  ;;  %vm7179_vm10 = vmor %vm1320_vm6, %vm1321_vm8  ;;  %v7200_v53 = vld [vmem:[%s6024_s17 + $0x20] sm:$0xff] }
 0x37c   : > { %v2460_v49 = vsub.f32 %v8149_v31, %v7147_v45  ;;  %v1317_v61 = vsub.f32 1.0, %v1316_v43  ;;  %v1117_v44 = vadd.f32 3409662.8, %v1109_v42  ;;  %v1263_v46 = vmul.f32 0.6931472, %v4830_v0 }
 0x37d   : > { %v4836_v56 = vpop.eup %4835  ;;  %v7164_v62 = vadd.f32 %v1425_v17, %v1294_v9  ;;  %v1047_v14 = vmul.f32 %v1039_v8, %v7115_v15  ;;  %v1159_v0 = vadd.f32 1960.0, %v1151_v12  ;;  %v3674_v30 = vadd.f32 %v6986_v23, %v7128_v48  ;;  %v7196_v17 = vpop.permute.xlu1 %2518 }
 0x37e   : > { %v4838_v2 = vpop.eup %4837  ;;  %v2585_v50 = vpop.permute.xlu0 %2584  ;;  %v7161_v4 = vmul.f32 0.6931472, %v4836_v56  ;;  %v2540_v7 = vadd.f32 %v7080_v26, %v2460_v49  ;;  %v1318_v16 = vmul.f32 %v4832_v54, %v1317_v61  ;;  %v7203_v6 = vadd.f32 1.0, %v7200_v53 }
 0x37f   : > { %v2606_v60 = vsub.f32 %v2561_v1, %v2585_v50  ;;  %v7166_v58 = vmul.f32 0.6931472, %v4838_v2  ;;  %v2462_v9 = vsub.f32 %v8150_v24, %v7164_v62  ;;  %v1167_v42 = vmul.f32 %v1159_v0, %v7115_v15 }
 0x380   : > { %3973 = vrot.lane.b32.xlu0 %v7161_v4, %s5050_s18  ;;  %v7186_v29 = vadd.f32 %v2612_v51, %v2540_v7  ;;  %v1319_v19 = vadd.f32 %v4832_v54, %v1318_v16  ;;  %v1055_v51 = vadd.f32 129347.26, %v1047_v14  ;;  %v2714_v2 = vadd.f32 %v7119_v25, %v8128_v36  ;;  %v7220_v7 = vld [vmem:[%s6024_s17 + $0x28] sm:$0xff] }
 0x381   : > { %v2614_v26 = vmul.f32 %v6899_v5, %v2606_v60  ;;  %3975 = vrot.lane.b32.xlu1 %v7166_v58, %s5050_s18  ;;  %v4840_v22 = vpop.eup %4839  ;;  %v2542_v43 = vadd.f32 %v2521_v35, %v2462_v9  ;;  %v1277_v48 = vmul.f32 %v4406_v27, %v1263_v46  ;;  %v1175_v60 = vadd.f32 6769.0, %v1167_v42 }
 0x382   : > { %v7189_v56 = vmul.f32 0.6931472, %v4840_v22  ;;  %v1323_v5 = vsel %vm7179_vm10, %v4832_v54, %v1319_v19  ;;  %v2715_v54 = vadd.f32 %v7119_v25, %v8112_v28  ;;  %v1063_v50 = vmul.f32 %v1055_v51, %v7115_v15 }
 0x383   : > { %v1328_v31 = vsel %vm7150_vm7, %v1327_v33, %v1323_v5  ;;  %v7209_v49 = vadd.f32 %v2614_v26, %v2542_v43  ;;  %v2704_v35 = vadd.f32 %v7122_v20, %v5347_v32  ;;  %v1128_v27 = vadd.f32 28.0, %v7203_v6 }
 0x384   : > { %3959 = vrot.lane.b32.xlu2 %v7189_v56, %s5050_s18  ;;  %v1329_v61 = vmul.f32 %v1328_v31, %v1117_v44  ;;  %v7223_v10 = vadd.f32 1.0, %v7220_v7  ;;  %v8155_v33 = vand.u32 2147483648, %v6955_v59  ;;  %v1071_v20 = vadd.f32 678289.7, %v1063_v50 }
 0x385   : > { %v1183_v8 = vmul.f32 %v1175_v60, %v7115_v15  ;;  %v3678_v12 = vsel %vm7229_vm12, %v6986_v23, %v3674_v30  ;;  %v2730_v24 = vadd.f32 1e-08, %v2714_v2  ;;  %v1285_v9 = vadd.f32 0.9189385, %v1277_v48 }
 0x386   : > { %v3682_v16 = vor.u32 1.1754944e-38, %v8155_v33  ;;  %4841 = vlog2.f32 %v1329_v61  ;;  %v1136_v44 = vmul.f32 %v1128_v27, %v7203_v6  ;;  %v1129_v46 = vadd.f32 28.0, %v7223_v10  ;;  %v2683_v61 = vpop.permute.xlu1 %2682 }
 0x387   : > { %v2731_v1 = vadd.f32 1e-08, %v2715_v54  ;;  %v1191_v26 = vadd.f32 13132.0, %v1183_v8  ;;  %v3540_v22 = vmul.f32 0.6931472, %v6995_v63  ;;  %v1079_v23 = vmul.f32 %v1071_v20, %v7115_v15  ;;  %v2685_v20 = vpop.permute.xlu2 %2684 }
 0x388   : > { %v8156_v19 = vand.u32 2147483647, %v6955_v59  ;;  %v2720_v14 = vadd.f32 1e-08, %v2704_v35  ;;  %v1144_v0 = vadd.f32 322.0, %v1136_v44  ;;  %v1137_v43 = vmul.f32 %v1129_v46, %v7223_v10 }
 0x389   : > { %v1199_v30 = vmul.f32 %v1191_v26, %v7115_v15  ;;  %v3388_v51 = vadd.f32 3409662.8, %v7025_v11  ;;  %v8157_v42 = vsub.f32 %v6908_v3, %v8126_v37  ;;  %4843 = vlog2.f32 %v2730_v24 }
 0x38a   : > { %vm3680_vm14 = vcmp.eq.f32.partialorder %v8156_v19, 8.507059e+37  ;;  %v1293_v59 = vsub.f32 %v1285_v9, %v7092_v13  ;;  %v1152_v63 = vmul.f32 %v1144_v0, %v7203_v6  ;;  %v1145_v48 = vadd.f32 322.0, %v1137_v43 }
 0x38b   : > { %v3683_v5 = vsel %vm3680_vm14, %v3682_v16, %v3678_v12  ;;  %v7252_v2 = vsub.f32 %v8157_v42, %v7147_v45  ;;  %v2559_v54 = vmul.f32 0.6931472, %v7043_v47  ;;  %4845 = vlog2.f32 %v2731_v1 }
 0x38c   : > { %v4842_v31 = vpop.eup %4841  ;;  %v1207_v50 = vadd.f32 13068.0, %v1199_v30  ;;  %v3684_v60 = vmul.f32 %v3683_v5, %v3388_v51  ;;  %4847 = vlog2.f32 %v2720_v14  ;;  %v1160_v35 = vadd.f32 1960.0, %v1152_v63  ;;  %v5025_v14 = vld [vmem:[%s6024_s17 + $0x8] sm:$0xff] }
 0x38d   : > { %v1423_v11 = vmul.f32 0.6931472, %v4842_v31  ;;  %v1153_v3 = vmul.f32 %v1145_v48, %v7223_v10  ;;  %v2605_v37 = vsub.f32 %v2559_v54, %v7065_v21  ;;  %v1087_v45 = vadd.f32 2222880.5, %v1079_v23  ;;  %v8160_v54 = vld [vmem:[#allocation65_spill] sm:$0xff] }
 0x38e   : > { %v1215_v13 = vmul.f32 %v1207_v50, %v7115_v15  ;;  %v1008_v27 = vadd.f32 52.458332, %v7203_v6  ;;  %v2706_v47 = vadd.f32 %v2683_v61, %v5417_v55  ;;  %v1168_v33 = vmul.f32 %v1160_v35, %v7203_v6 }
 0x38f   : > { %v1437_v25 = vadd.f32 %v1423_v11, %v1293_v59  ;;  %v1161_v16 = vadd.f32 1960.0, %v1153_v3  ;;  %v2707_v8 = vadd.f32 %v2683_v61, %v8130_v57  ;;  %v7266_v21 = vmul.f32 %v6982_v18, %v3540_v22  ;;  %v4844_v9 = vpop.eup %4843  ;;  %v7280_v22 = vpop.permute.xlu0 %2522 }
 0x390   : > { %v1223_v12 = vadd.f32 5040.0, %v1215_v13  ;;  %v1016_v24 = vmul.f32 %v1008_v27, %v7203_v6  ;;  %v8158_v44 = vsub.f32 %v6910_v52, %v8127_v34  ;;  %v1176_v1 = vadd.f32 6769.0, %v1168_v33  ;;  %v8159_v52 = vld [vmem:[#allocation19_spill] sm:$0xff] }
 0x391   : > { %v1169_v26 = vmul.f32 %v1161_v16, %v7223_v10  ;;  %4849 = vlog2.f32 %v3684_v60  ;;  %v4846_v19 = vpop.eup %4845  ;;  %v2613_v0 = vmul.f32 %v5025_v14, %v2605_v37  ;;  %v1095_v43 = vmul.f32 %v1087_v45, %v7115_v15  ;;  %v8161_v37 = vld [vmem:[#allocation10_spill] sm:$0xff]  ;;  %v8162_v13 = vld [vmem:[#allocation15_spill] sm:$0xff] }
 0x392   : > { %v2461_v46 = vsub.f32 %v8158_v44, %v1437_v25  ;;  %v7275_v5 = vmul.f32 %v1223_v12, %v7115_v15  ;;  %v7278_v18 = vadd.f32 6.5, %v7115_v15  ;;  %v4848_v23 = vpop.eup %4847  ;;  %v7283_v34 = vadd.f32 %v2685_v20, %v8159_v52  ;;  %v8164_v12 = vld [vmem:[#allocation62_spill] sm:$0xff] }
 0x393   : > { %v2722_v51 = vadd.f32 1e-08, %v2706_v47  ;;  %v1024_v42 = vadd.f32 1203.8342, %v1016_v24  ;;  %v2723_v59 = vadd.f32 1e-08, %v2707_v8  ;;  %v1184_v63 = vmul.f32 %v1176_v1, %v7203_v6 }
 0x394   : > { %v2541_v30 = vadd.f32 %v7196_v17, %v2461_v46  ;;  %4851 = vrcp.f32 %v7275_v5  ;;  %v1009_v48 = vadd.f32 52.458332, %v7223_v10  ;;  %v3807_v61 = vsub.f32 %v8160_v54, %v7096_v39  ;;  %v8163_v47 = vld [vmem:[#allocation21_spill] sm:$0xff]  ;;  %v8166_v14 = vld [vmem:[#allocation42_spill] sm:$0xff] }
 0x395   : > { %v7293_v50 = vmul.f32 0.6931472, %v4846_v19  ;;  %v1177_v60 = vadd.f32 6769.0, %v1169_v26  ;;  %v1103_v11 = vadd.f32 4162388.0, %v1095_v43  ;;  %4853 = vlog2.f32 %v7278_v18 }
 0x396   : > { %v7289_v31 = vadd.f32 %v2613_v0, %v2541_v30  ;;  %v7296_v17 = vmul.f32 0.6931472, %v4844_v9  ;;  %v2741_v35 = vmul.f32 0.6931472, %v4848_v23  ;;  %4855 = vlog2.f32 %v2722_v51  ;;  %v8165_v19 = vld [vmem:[#allocation45_spill] sm:$0xff] }
 0x397   : > { %v7298_v3 = vpop.eup %4849  ;;  %v3823_v45 = vmul.f32 %v3807_v61, %v8161_v37  ;;  %3979 = vrot.lane.b32.xlu0 %v7293_v50, %s5050_s18  ;;  %v3810_v39 = vsub.f32 %v8162_v13, %v7189_v56  ;;  %v1032_v27 = vmul.f32 %v1024_v42, %v7203_v6  ;;  %v2709_v33 = vadd.f32 %v2685_v20, %v8163_v47  ;;  %v7316_v20 = vpop.permute.xlu0 %2686 }
 0x398   : > { %4857 = vlog2.f32 %v2723_v59  ;;  %v4408_v16 = vadd.f32 -0.5, %v7115_v15  ;;  %3977 = vrot.lane.b32.xlu2 %v7296_v17, %s5050_s18  ;;  %v1192_v8 = vadd.f32 13132.0, %v1184_v63  ;;  %v3809_v24 = vsub.f32 %v8164_v12, %v2741_v35 }
 0x399   : > { %3857 = vrot.lane.b32.xlu1 %v3823_v45, %s5046_s11  ;;  %v1040_v9 = vadd.f32 15784.881, %v1032_v27  ;;  %v1017_v44 = vmul.f32 %v1009_v48, %v7223_v10  ;;  %v1185_v56 = vmul.f32 %v1177_v60, %v7223_v10  ;;  %v1111_v1 = vmul.f32 %v1103_v11, %v7115_v15  ;;  %v8168_v11 = vld [vmem:[#allocation22_spill] sm:$0xff] }
 0x39a   : > { %v4852_v46 = vpop.eup %4851  ;;  %vm1350_vm15 = vweird.f32 %v7275_v5  ;;  %v1200_v26 = vmul.f32 %v1192_v8, %v7203_v6  ;;  %v8167_v0 = vsub.f32 %v8165_v19, %v8166_v14  ;;  %v1354_v30 = vand.u32 2147483647, %v7275_v5 }
 0x39b   : > { %v1346_v23 = vmul.f32 %v4852_v46, %v7275_v5  ;;  %v1356_v51 = vand.u32 2147483648, %v7275_v5  ;;  %v3826_v42 = vmul.f32 %v3810_v39, %v8123_v38  ;;  %v4854_v15 = vpop.eup %4853  ;;  %v1048_v59 = vmul.f32 %v1040_v9, %v7203_v6 }
 0x39c   : > { %v7322_v43 = vsub.f32 %v8167_v0, %v1437_v25  ;;  %v1208_v63 = vadd.f32 13068.0, %v1200_v26  ;;  %v1025_v48 = vadd.f32 1203.8342, %v1017_v44  ;;  %v1193_v54 = vadd.f32 13132.0, %v1185_v56  ;;  %v4856_v61 = vpop.eup %4855 }
 0x39d   : > { %v1347_v60 = vsub.f32 1.0, %v1346_v23  ;;  %vm1351_vm0 = vweird.f32 %v4852_v46  ;;  %v2710_v25 = vadd.f32 %v7316_v20, %v8168_v11  ;;  %v3825_v45 = vmul.f32 %v3809_v24, %v5347_v32 }
 0x39e   : > { %v4858_v13 = vpop.eup %4857  ;;  %v1056_v27 = vadd.f32 129347.26, %v1048_v59  ;;  %v1216_v8 = vmul.f32 %v1208_v63, %v7203_v6  ;;  %v1033_v38 = vmul.f32 %v1025_v48, %v7223_v10  ;;  %v1201_v39 = vmul.f32 %v1193_v54, %v7223_v10  ;;  %vm7341_vm1 = vmor %vm1350_vm15, %vm1351_vm0 }
 0x39f   : > { %v1119_v12 = vadd.f32 3409662.8, %v1111_v1  ;;  %v1267_v9 = vmul.f32 0.6931472, %v4854_v15  ;;  %v1348_v44 = vmul.f32 %v4852_v46, %v1347_v60  ;;  %3863 = vrot.lane.b32.xlu0 %v3826_v42, %s5046_s11  ;;  %v7337_v56 = vadd.f32 6.5, %v7203_v6  ;;  %v8173_v15 = vld [vmem:[#allocation36_spill] sm:$0xff] }
 0x3a0   : > { %vm7345_vm2 = vcmp.eq.f32.partialorder %v1354_v30, 8.507059e+37  ;;  %v1357_v19 = vor.u32 1.1754944e-38, %v1356_v51  ;;  %3861 = vrot.lane.b32.xlu2 %v3825_v45, %s5046_s11  ;;  %v1064_v1 = vmul.f32 %v1056_v27, %v7203_v6  ;;  %v1224_v14 = vadd.f32 5040.0, %v1216_v8 }
 0x3a1   : > { %v1349_v0 = vadd.f32 %v4852_v46, %v1348_v44  ;;  %v2726_v23 = vadd.f32 1e-08, %v2710_v25  ;;  %3957 = vrot.lane.b32.xlu1 %v2741_v35, %s5050_s18  ;;  %v1041_v42 = vadd.f32 15784.881, %v1033_v38  ;;  %v1209_v5 = vadd.f32 13068.0, %v1201_v39  ;;  %v8175_v38 = vld [vmem:[#allocation51_spill] sm:$0xff] }
 0x3a2   : > { %4859 = vlog2.f32 %v8173_v15  ;;  %v1072_v59 = vadd.f32 678289.7, %v1064_v1  ;;  %v7354_v30 = vmul.f32 %v1224_v14, %v7203_v6  ;;  %v7357_v63 = vadd.f32 0.9189385, %v7266_v21  ;;  %v8177_v44 = vld [vmem:[#allocation35_spill] sm:$0xff]  ;;  %v8179_v1 = vld [vmem:[#allocation14_spill] sm:$0xff] }
 0x3a3   : > { %v2724_v51 = vadd.f32 1e-08, %v7283_v34  ;;  %v1279_v48 = vmul.f32 %v4408_v16, %v1267_v9  ;;  %v1353_v54 = vsel %vm7341_vm1, %v4852_v46, %v1349_v0  ;;  %4861 = vlog2.f32 %v7337_v56  ;;  %v8174_v46 = vld [vmem:[#allocation52_spill] sm:$0xff] }
 0x3a4   : > { %v2725_v35 = vadd.f32 1e-08, %v2709_v33  ;;  %v1358_v60 = vsel %vm7345_vm2, %v1357_v19, %v1353_v54  ;;  %v1080_v25 = vmul.f32 %v1072_v59, %v7203_v6  ;;  %4863 = vrcp.f32 %v7354_v30 }
 0x3a5   : > { %v1359_v45 = vmul.f32 %v1358_v60, %v1119_v12  ;;  %4865 = vlog2.f32 %v2726_v23  ;;  %v1049_v21 = vmul.f32 %v1041_v42, %v7223_v10  ;;  %v1217_v34 = vmul.f32 %v1209_v5, %v7223_v10  ;;  %v7387_v5 = vld [vmem:[%s6024_s17 + $0x30] sm:$0xff] }
 0x3a6   : > { %v1088_v16 = vadd.f32 2222880.5, %v1080_v25  ;;  %v2747_v27 = vmul.f32 0.6931472, %v4858_v13  ;;  %v2745_v8 = vmul.f32 0.6931472, %v4856_v61  ;;  %v8176_v33 = vsub.f32 %v8174_v46, %v8175_v38 }
 0x3a7   : > { %v1287_v9 = vadd.f32 0.9189385, %v1279_v48  ;;  %4867 = vlog2.f32 %v1359_v45  ;;  %v3796_v24 = vmul.f32 0.6931472, %v8177_v44  ;;  %v3785_v12 = vadd.f32 1e-08, %v8163_v47 }
 0x3a8   : > { %v7373_v39 = vsub.f32 %v8176_v33, %v7164_v62  ;;  %v7377_v26 = vpop.eup %4859  ;;  %v1096_v19 = vmul.f32 %v1088_v16, %v7203_v6  ;;  %3961 = vrot.lane.b32.xlu0 %v2745_v8, %s5050_s18  ;;  %v8178_v61 = vld [vmem:[#allocation68_spill] sm:$0xff]  ;;  %v3564_v14 = vsub.f32 %v7357_v63, %v8179_v1  ;;  %v3700_v62 = vmul.f32 0.6931472, %v7298_v3  ;;  %v8180_v33 = vld [vmem:[#allocation30_spill] sm:$0xff] }
 0x3a9   : > { %v3811_v13 = vsub.f32 %v8178_v61, %v2745_v8  ;;  %v4862_v0 = vpop.eup %4861  ;;  %4869 = vlog2.f32 %v2724_v51  ;;  %3963 = vrot.lane.b32.xlu1 %v2747_v27, %s5050_s18  ;;  %v1057_v23 = vadd.f32 129347.26, %v1049_v21  ;;  %v1225_v42 = vadd.f32 5040.0, %v1217_v34 }
 0x3aa   : > { %v7390_v15 = vadd.f32 1.0, %v7387_v5  ;;  %v4864_v59 = vpop.eup %4863  ;;  %4871 = vlog2.f32 %v2725_v35  ;;  %v1104_v48 = vadd.f32 4162388.0, %v1096_v19  ;;  %v3812_v60 = vsub.f32 %v3796_v24, %v2747_v27 }
 0x3ab   : > { %v3827_v54 = vmul.f32 %v3811_v13, %v5417_v55  ;;  %v4866_v63 = vpop.eup %4865  ;;  %v1295_v3 = vsub.f32 %v1287_v9, %v7278_v18  ;;  %v1361_v51 = vmul.f32 %v4864_v59, %v7354_v30  ;;  %vm1365_vm3 = vweird.f32 %v7354_v30  ;;  %v7406_v18 = vpop.permute.xlu1 %2586 }
 0x3ac   : > { %v1065_v25 = vmul.f32 %v1057_v23, %v7223_v10  ;;  %v1369_v45 = vand.u32 2147483647, %v7354_v30  ;;  %v1371_v21 = vand.u32 2147483648, %v7354_v30  ;;  %v7401_v35 = vmul.f32 %v1225_v42, %v7223_v10  ;;  %v8185_v30 = vld [vmem:[#allocation49_spill] sm:$0xff] }
 0x3ad   : > { %3865 = vrot.lane.b32.xlu2 %v3827_v54, %s5046_s11  ;;  %v7404_v34 = vadd.f32 6.5, %v7223_v10  ;;  %v4868_v16 = vpop.eup %4867  ;;  %v1112_v27 = vmul.f32 %v1104_v48, %v7203_v6  ;;  %v1362_v8 = vsub.f32 1.0, %v1361_v51  ;;  %vm1366_vm4 = vweird.f32 %v4864_v59 }
 0x3ae   : > { %v1073_v46 = vadd.f32 678289.7, %v1065_v25  ;;  %v1427_v38 = vmul.f32 0.6931472, %v4868_v16  ;;  %v2552_v9 = vadd.f32 1e-08, %v8180_v33  ;;  %v3828_v44 = vmul.f32 %v3812_v60, %v8130_v57  ;;  %vm7420_vm5 = vmor %vm1365_vm3, %vm1366_vm4 }
 0x3af   : > { %4873 = vrcp.f32 %v7401_v35  ;;  %v4870_v24 = vpop.eup %4869  ;;  %v4409_v19 = vadd.f32 -0.5, %v7203_v6  ;;  %v1363_v61 = vmul.f32 %v4864_v59, %v1362_v8  ;;  %v7413_v13 = vmul.f32 0.6931472, %v4866_v63 }
 0x3b0   : > { %v1081_v1 = vmul.f32 %v1073_v46, %v7223_v10  ;;  %v4872_v23 = vpop.eup %4871  ;;  %v7416_v42 = vadd.f32 %v1427_v38, %v1295_v3  ;;  %v1269_v48 = vmul.f32 0.6931472, %v4862_v0  ;;  %vm7424_vm6 = vcmp.eq.f32.partialorder %v1369_v45, 8.507059e+37  ;;  %3867 = vrot.lane.b32.xlu0 %v3828_v44, %s5046_s11  ;;  %v8186_v0 = vld [vmem:[#allocation47_spill] sm:$0xff] }
 0x3b1   : > { %v1372_v6 = vor.u32 1.1754944e-38, %v1371_v21  ;;  %v1120_v60 = vadd.f32 3409662.8, %v1112_v27  ;;  %v1364_v63 = vadd.f32 %v4864_v59, %v1363_v61  ;;  %3969 = vrot.lane.b32.xlu1 %v7413_v13, %s5050_s18  ;;  %4875 = vlog2.f32 %v7404_v34 }
 0x3b2   : > { %v1089_v3 = vadd.f32 2222880.5, %v1081_v1  ;;  %v8187_v51 = vsub.f32 %v8185_v30, %v8186_v0  ;;  %v2749_v45 = vmul.f32 0.6931472, %v4870_v24  ;;  %v3787_v16 = vadd.f32 1e-08, %v8145_v40 }
 0x3b3   : > { %4877 = vlog2.f32 %v3785_v12  ;;  %v1368_v21 = vsel %vm7420_vm5, %v4864_v59, %v1364_v63  ;;  %v3708_v8 = vadd.f32 %v3700_v62, %v3564_v14  ;;  %v1280_v33 = vmul.f32 %v4409_v19, %v1269_v48  ;;  %v8188_v59 = vld [vmem:[#allocation20_spill] sm:$0xff]  ;;  %v2589_v48 = vpop.permute.xlu1 %2588 }
 0x3b4   : > { %v2463_v25 = vsub.f32 %v8187_v51, %v7416_v42  ;;  %4879 = vlog2.f32 %v2552_v9  ;;  %v1097_v27 = vmul.f32 %v1089_v3, %v7223_v10  ;;  %v1373_v44 = vsel %vm7424_vm6, %v1372_v6, %v1368_v21  ;;  %v8190_v51 = vld [vmem:[#allocation12_spill] sm:$0xff] }
 0x3b5   : > { %v4874_v46 = vpop.eup %4873  ;;  %3965 = vrot.lane.b32.xlu2 %v2749_v45, %s5050_s18  ;;  %v1130_v24 = vadd.f32 28.0, %v7390_v15  ;;  %v1374_v12 = vmul.f32 %v1373_v44, %v1120_v60  ;;  %vm1380_vm7 = vweird.f32 %v7401_v35  ;;  %v1384_v14 = vand.u32 2147483647, %v7401_v35  ;;  %v8193_v44 = vld [vmem:[#allocation31_spill] sm:$0xff] }
 0x3b6   : > { %v7441_v38 = vadd.f32 %v7280_v22, %v2463_v25  ;;  %v1105_v9 = vadd.f32 4162388.0, %v1097_v27  ;;  %v1376_v61 = vmul.f32 %v4874_v46, %v7401_v35  ;;  %v1386_v62 = vand.u32 2147483648, %v7401_v35 }
 0x3b7   : > { %v7451_v22 = vmul.f32 0.6931472, %v4872_v23  ;;  %v3813_v19 = vsub.f32 %v8188_v59, %v2749_v45  ;;  %v4876_v1 = vpop.eup %4875  ;;  %4881 = vlog2.f32 %v1374_v12  ;;  %vm1381_vm8 = vweird.f32 %v4874_v46  ;;  %v8189_v23 = vld [vmem:[#allocation16_spill] sm:$0xff] }
 0x3b8   : > { %v1113_v54 = vmul.f32 %v1105_v9, %v7223_v10  ;;  %v1377_v57 = vsub.f32 1.0, %v1376_v61  ;;  %v1288_v60 = vadd.f32 0.9189385, %v1280_v33  ;;  %4883 = vlog2.f32 %v3787_v16  ;;  %vm7467_vm9 = vmor %vm1380_vm7, %vm1381_vm8  ;;  %v2525_v16 = vpop.permute.xlu0 %2524 }
 0x3b9   : > { %v4878_v6 = vpop.eup %4877  ;;  %3967 = vrot.lane.b32.xlu0 %v7451_v22, %s5050_s18  ;;  %v1138_v63 = vmul.f32 %v1130_v24, %v7390_v15  ;;  %v7459_v30 = vmul.f32 0.6931472, %v8189_v23  ;;  %v1497_v0 = vmul.f32 0.6931472, %v7377_v26  ;;  %4885 = vlog2.f32 %v8190_v51  ;;  %3747 = vrot.lane.b32.xlu1 %v3708_v8, %s5046_s11 }
 0x3ba   : > { %v4880_v3 = vpop.eup %4879  ;;  %v1378_v25 = vmul.f32 %v4874_v46, %v1377_v57  ;;  %v4410_v45 = vadd.f32 -0.5, %v7223_v10  ;;  %v1271_v21 = vmul.f32 0.6931472, %v4876_v1  ;;  %v1387_v27 = vor.u32 1.1754944e-38, %v1386_v62 }
 0x3bb   : > { %v3829_v33 = vmul.f32 %v3813_v19, %v8159_v52  ;;  %v2553_v24 = vadd.f32 1e-08, %v8193_v44  ;;  %v1121_v26 = vadd.f32 3409662.8, %v1113_v54  ;;  %vm1385_vm10 = vcmp.eq.f32.partialorder %v1384_v14, 8.507059e+37 }
 0x3bc   : > { %v1379_v12 = vadd.f32 %v4874_v46, %v1378_v25  ;;  %v1296_v9 = vsub.f32 %v1288_v60, %v7337_v56  ;;  %v1146_v10 = vadd.f32 322.0, %v1138_v63  ;;  %v2498_v35 = vsub.f32 %v7459_v30, %v1497_v0  ;;  %v8194_v56 = vld [vmem:[#allocation24_spill] sm:$0xff]  ;;  %v8195_v25 = vld [vmem:[#allocation23_spill] sm:$0xff] }
 0x3bd   : > { %3869 = vrot.lane.b32.xlu2 %v3829_v33, %s5046_s11  ;;  %v4882_v8 = vpop.eup %4881  ;;  %v2565_v62 = vmul.f32 0.6931472, %v4880_v3  ;;  %v1281_v19 = vmul.f32 %v4410_v45, %v1271_v21  ;;  %4887 = vlog2.f32 %v2553_v24  ;;  %v3798_v60 = vmul.f32 0.6931472, %v4878_v6  ;;  %v2591_v3 = vpop.permute.xlu1 %2590  ;;  %v8196_v21 = vld [vmem:[#allocation46_spill] sm:$0xff] }
 0x3be   : > { %v1383_v61 = vsel %vm7467_vm9, %v4874_v46, %v1379_v12  ;;  %v4884_v59 = vpop.eup %4883  ;;  %v1429_v1 = vmul.f32 0.6931472, %v4882_v8  ;;  %v1154_v63 = vmul.f32 %v1146_v10, %v7390_v15  ;;  %v2711_v46 = vadd.f32 %v7316_v20, %v8195_v25  ;;  %v8199_v8 = vld [vmem:[#allocation61_spill] sm:$0xff] }
 0x3bf   : > { %v1388_v57 = vsel %vm1385_vm10, %v1387_v27, %v1383_v61  ;;  %v4886_v23 = vpop.eup %4885  ;;  %v2608_v14 = vsub.f32 %v2565_v62, %v2589_v48  ;;  %v3802_v45 = vmul.f32 0.6931472, %v4884_v59  ;;  %v8197_v48 = vld [vmem:[#allocation41_spill] sm:$0xff]  ;;  %v1289_v44 = vadd.f32 0.9189385, %v1281_v19 }
 0x3c0   : > { %v1389_v54 = vmul.f32 %v1388_v57, %v1121_v26  ;;  %v7478_v51 = vadd.f32 %v1429_v1, %v1296_v9  ;;  %v8198_v27 = vsub.f32 %v8196_v21, %v8197_v48  ;;  %v2506_v24 = vmul.f32 %v2498_v35, %v8124_v41 }
 0x3c1   : > { %3745 = vrot.lane.b32.xlu0 %v8194_v56, %s5046_s11  ;;  %2592 = vrot.lane.b32.xlu1 %v1497_v0, %s5045_s10  ;;  %v3814_v6 = vsub.f32 %v3798_v60, %v7451_v22  ;;  %v3818_v26 = vsub.f32 %v3802_v45, %v7166_v58  ;;  %v7493_v12 = vmul.f32 0.6931472, %v4886_v23  ;;  %v2616_v20 = vmul.f32 %v7200_v53, %v2608_v14  ;;  %v8202_v45 = vld [vmem:[#allocation56_spill] sm:$0xff] }
 0x3c2   : > { %4889 = vlog2.f32 %v1389_v54  ;;  %v2464_v33 = vsub.f32 %v8198_v27, %v7478_v51  ;;  %v1162_v0 = vadd.f32 1960.0, %v1154_v63  ;;  %v1475_v61 = vadd.f32 %v8199_v8, %v8128_v36  ;;  %v8200_v54 = vld [vmem:[#allocation59_spill] sm:$0xff] }
 0x3c3   : > { %v4888_v10 = vpop.eup %4887  ;;  %v2727_v59 = vadd.f32 1e-08, %v2711_v46  ;;  %v1297_v35 = vsub.f32 %v1289_v44, %v7404_v34  ;;  %v3830_v22 = vmul.f32 %v3814_v6, %v8163_v47  ;;  %v3819_v58 = vsub.f32 %v7493_v12, %v7296_v17  ;;  %v7515_v60 = vpop.permute.xlu2 %3853 }
 0x3c4   : > { %v2544_v9 = vadd.f32 %v2525_v16, %v2464_v33  ;;  %v3834_v53 = vmul.f32 %v3818_v26, %v8145_v40  ;;  %v2567_v19 = vmul.f32 0.6931472, %v4888_v10  ;;  %v1170_v23 = vmul.f32 %v1162_v0, %v7390_v15  ;;  %v8201_v16 = vld [vmem:[#allocation60_spill] sm:$0xff] }
 0x3c5   : > { %2528 = vrot.lane.b32.xlu2 %v2506_v24, %s5045_s10  ;;  %v3909_v14 = vadd.f32 1e-08, %v8200_v54  ;;  %v1483_v56 = vadd.f32 1e-08, %v1475_v61  ;;  %4891 = vlog2.f32 %v2727_v59  ;;  %v3835_v17 = vmul.f32 %v3819_v58, %v8128_v36  ;;  %v2527_v63 = vpop.permute.xlu1 %2526  ;;  %v8205_v0 = vld [vmem:[#allocation28_spill] sm:$0xff]  ;;  %v7537_v58 = vld [vmem:[%s6024_s17 + $0x38] sm:$0xff] }
 0x3c6   : > { %v7499_v62 = vadd.f32 %v2616_v20, %v2544_v9  ;;  %v2609_v34 = vsub.f32 %v2567_v19, %v2591_v3  ;;  %v3817_v40 = vsub.f32 %v7459_v30, %v7161_v4  ;;  %v3788_v46 = vadd.f32 1e-08, %v8112_v28  ;;  %v8204_v9 = vld [vmem:[#allocation29_spill] sm:$0xff]  ;;  %v8206_v19 = vld [vmem:[#allocation72_spill] sm:$0xff] }
 0x3c7   : > { %v8203_v21 = vsub.f32 %v8201_v16, %v8202_v45  ;;  %v1178_v3 = vadd.f32 6769.0, %v1170_v23  ;;  %4893 = vlog2.f32 %v1483_v56  ;;  %v1010_v44 = vadd.f32 52.458332, %v7390_v15 }
 0x3c8   : > { %v4890_v1 = vpop.eup %4889  ;;  %4895 = vlog2.f32 %v3909_v14  ;;  %v2617_v27 = vmul.f32 %v7220_v7, %v2609_v34  ;;  %v3833_v4 = vmul.f32 %v3817_v40, %v8124_v41  ;;  %v2812_v7 = vsel %vm2804_vm13, %v8205_v0, %v8204_v9  ;;  %v8207_v40 = vld [vmem:[#allocation44_spill] sm:$0xff] }
 0x3c9   : > { %v1431_v57 = vmul.f32 0.6931472, %v4890_v1  ;;  %3871 = vrot.lane.b32.xlu0 %v3830_v22, %s5046_s11  ;;  %3879 = vrot.lane.b32.xlu1 %v3834_v53, %s5046_s11  ;;  %4897 = vlog2.f32 %v3788_v46  ;;  %v1186_v6 = vmul.f32 %v1178_v3, %v7390_v15  ;;  %v3786_v10 = vadd.f32 1e-08, %v8195_v25 }
 0x3ca   : > { %v1018_v8 = vmul.f32 %v1010_v44, %v7390_v15  ;;  %v7540_v1 = vadd.f32 %v7537_v58, %v2812_v7  ;;  %v8208_v44 = vld [vmem:[#allocation34_spill] sm:$0xff] }
 0x3cb   : > { %v7510_v47 = vadd.f32 %v1431_v57, %v1297_v35  ;;  %v4892_v30 = vpop.eup %4891  ;;  %v3954_v59 = vpop.permute.xlu2 %3953  ;;  %v1194_v35 = vadd.f32 13132.0, %v1186_v6  ;;  %v3815_v57 = vsub.f32 %v8206_v19, %v7413_v13  ;;  %4899 = vlog2.f32 %v3786_v10 }
 0x3cc   : > { %v2755_v26 = vmul.f32 0.6931472, %v4892_v30  ;;  %v1026_v54 = vadd.f32 1203.8342, %v1018_v8  ;;  %v2551_v6 = vadd.f32 1e-08, %v8208_v44 }
 0x3cd   : > { %v2465_v48 = vsub.f32 %v8203_v21, %v7510_v47  ;;  %3881 = vrot.lane.b32.xlu2 %v3835_v17, %s5046_s11  ;;  %v4894_v20 = vpop.eup %4893  ;;  %v1202_v17 = vmul.f32 %v1194_v35, %v7390_v15  ;;  %v3831_v16 = vmul.f32 %v3815_v57, %v8168_v11  ;;  %v2956_v21 = vadd.f32 28.0, %v7540_v1  ;;  %v8211_v44 = vld [vmem:[#allocation50_spill] sm:$0xff] }
 0x3ce   : > { %v4896_v61 = vpop.eup %4895  ;;  %v7542_v53 = vmul.f32 0.6931472, %v4894_v20 }
 0x3cf   : > { %v2545_v33 = vadd.f32 %v2527_v63, %v2465_v48  ;;  %v4898_v22 = vpop.eup %4897  ;;  %v3918_v56 = vmul.f32 0.6931472, %v4896_v61  ;;  %v3910_v63 = vadd.f32 1e-08, %v8207_v40  ;;  %v1034_v48 = vmul.f32 %v1026_v54, %v7390_v15 }
 0x3d0   : > { %v3804_v14 = vmul.f32 0.6931472, %v4898_v22  ;;  %v1210_v3 = vadd.f32 13068.0, %v1202_v17  ;;  %v8209_v22 = vld [vmem:[#allocation63_spill] sm:$0xff]  ;;  %v2836_v40 = vadd.f32 52.458332, %v7540_v1 }
 0x3d1   : > { %v7526_v24 = vadd.f32 %v2617_v27, %v2545_v33  ;;  %3877 = vrot.lane.b32.xlu0 %v3833_v4, %s5046_s11  ;;  %v2964_v27 = vmul.f32 %v2956_v21, %v7540_v1  ;;  %v4900_v33 = vpop.eup %4899  ;;  %4901 = vlog2.f32 %v3910_v63  ;;  %v1042_v9 = vadd.f32 15784.881, %v1034_v48 }
 0x3d2   : > { %v3820_v13 = vsub.f32 %v3804_v14, %v7293_v50  ;;  %v3800_v0 = vmul.f32 0.6931472, %v4900_v33  ;;  %v1218_v10 = vmul.f32 %v1210_v3, %v7390_v15  ;;  %v3915_v19 = vadd.f32 1e-08, %v8209_v22 }
 0x3d3   : > { %v7559_v30 = vpop.permute.xlu2 %3859  ;;  %v2972_v50 = vadd.f32 322.0, %v2964_v27  ;;  %4903 = vlog2.f32 %v2551_v6  ;;  %v1050_v57 = vmul.f32 %v1042_v9, %v7390_v15  ;;  %v2844_v27 = vmul.f32 %v2836_v40, %v7540_v1 }
 0x3d4   : > { %v3836_v4 = vmul.f32 %v3820_v13, %v8112_v28  ;;  %v3816_v28 = vsub.f32 %v3800_v0, %v2755_v26  ;;  %v1226_v54 = vadd.f32 5040.0, %v1218_v10  ;;  %4905 = vlog2.f32 %v3915_v19 }
 0x3d5   : > { %3971 = vrot.lane.b32.xlu2 %v2755_v26, %s5050_s18  ;;  %v2980_v8 = vmul.f32 %v2972_v50, %v7540_v1  ;;  %v1058_v26 = vadd.f32 129347.26, %v1050_v57  ;;  %v8210_v50 = vld [vmem:[#allocation55_spill] sm:$0xff]  ;;  %v2852_v10 = vadd.f32 1203.8342, %v2844_v27  ;;  %v7603_v57 = vld [vmem:[%s6024_s17 + $0x18] sm:$0xff]  ;;  %v2499_v40 = vsub.f32 %v7493_v12, %v7542_v53 }
 0x3d6   : > { %v8212_v6 = vsub.f32 %v8210_v50, %v8211_v44  ;;  %v7625_v12 = vadd.f32 6.5, %v7390_v15 }
 0x3d7   : > { %v3950_v23 = vpop.permute.xlu0 %3949  ;;  %v2988_v35 = vadd.f32 1960.0, %v2980_v8  ;;  %v1066_v3 = vmul.f32 %v1058_v26, %v7390_v15 }
 0x3d8   : > { %v3952_v34 = vpop.permute.xlu1 %3951 }
 0x3d9   : > { %2594 = vrot.lane.b32.xlu0 %v7542_v53, %s5045_s10  ;;  %v3982_v46 = vsel %vm3981_vm11, %v3950_v23, %v3952_v34  ;;  %v4902_v23 = vpop.eup %4901  ;;  %v2996_v14 = vmul.f32 %v2988_v35, %v7540_v1 }
 0x3da   : > { %v3998_v45 = vsub.f32 %v3918_v56, %v3982_v46  ;;  %v3832_v56 = vmul.f32 %v3816_v28, %v8195_v25 }
 0x3db   : > { %v3004_v34 = vadd.f32 6769.0, %v2996_v14 }
 0x3dc   : > { %4014 = vrot.lane.b32.xlu1 %v3998_v45, %s5051_s19  ;;  %v4904_v45 = vpop.eup %4903 }
 0x3dd   : > { %3873 = vrot.lane.b32.xlu2 %v3831_v16, %s5046_s11  ;;  %v7583_v16 = vmul.f32 %v1226_v54, %v7390_v15  ;;  %v3012_v13 = vmul.f32 %v3004_v34, %v7540_v1  ;;  %v2563_v33 = vmul.f32 0.6931472, %v4904_v45  ;;  %v2860_v34 = vmul.f32 %v2852_v10, %v7540_v1 }
 0x3de   : > { %v7579_v63 = vpop.permute.xlu2 %3959 }
 0x3df   : > { %v3856_v20 = vpop.permute.xlu0 %3855  ;;  %v3020_v48 = vadd.f32 13132.0, %v3012_v13  ;;  %4907 = vrcp.f32 %v7583_v16  ;;  %v2607_v9 = vsub.f32 %v2563_v33, %v7406_v18  ;;  %v2868_v13 = vadd.f32 15784.881, %v2860_v34 }
 0x3e0   : > { %v3885_v7 = vsel %vm2804_vm13, %v7515_v60, %v3856_v20  ;;  %v7574_v60 = vadd.f32 1.0, %v7537_v58  ;;  %v7596_v20 = vsub.f32 %v8212_v6, %v7416_v42  ;;  %vm1395_vm12 = vweird.f32 %v7583_v16 }
 0x3e1   : > { %3883 = vrot.lane.b32.xlu0 %v3836_v4, %s5046_s11  ;;  %v7568_v61 = vadd.f32 %v3885_v7, %v7252_v2  ;;  %v3920_v2 = vmul.f32 0.6931472, %v4902_v23  ;;  %v4906_v4 = vpop.eup %4905  ;;  %v3028_v0 = vmul.f32 %v3020_v48, %v7540_v1  ;;  %v1074_v7 = vadd.f32 678289.7, %v1066_v3 }
 0x3e2   : > { %v1131_v25 = vadd.f32 28.0, %v7574_v60  ;;  %v3930_v22 = vmul.f32 0.6931472, %v4906_v4  ;;  %v2615_v23 = vmul.f32 %v7603_v57, %v2607_v9  ;;  %v2507_v48 = vmul.f32 %v2499_v40, %v8128_v36 }
 0x3e3   : > { %v3036_v54 = vadd.f32 13068.0, %v3028_v0  ;;  %v2876_v27 = vmul.f32 %v2868_v13, %v7540_v1  ;;  %v1401_v44 = vand.u32 2147483648, %v7583_v16  ;;  %v1399_v0 = vand.u32 2147483647, %v7583_v16 }
 0x3e5   : > { %v4908_v19 = vpop.eup %4907  ;;  %v3044_v26 = vmul.f32 %v3036_v54, %v7540_v1  ;;  %v2884_v50 = vadd.f32 129347.26, %v2876_v27  ;;  %vm1400_vm0 = vcmp.eq.f32.partialorder %v1399_v0, 8.507059e+37 }
 0x3e6   : > { %vm1396_vm14 = vweird.f32 %v4908_v19 }
 0x3e7   : > { %v3956_v17 = vpop.permute.xlu0 %3955  ;;  %vm7633_vm15 = vmor %vm1395_vm12, %vm1396_vm14 }
 0x3e8   : > { %v3983_v46 = vsel %vm3981_vm11, %v3954_v59, %v3956_v17  ;;  %v1139_v59 = vmul.f32 %v1131_v25, %v7574_v60  ;;  %v2623_v17 = vadd.f32 %v2615_v23, %v7441_v38  ;;  %v8215_v23 = vld [vmem:[#allocation67_spill] sm:$0xff] }
 0x3e9   : > { %3875 = vrot.lane.b32.xlu0 %v3832_v56, %s5046_s11  ;;  %v3999_v21 = vsub.f32 %v3920_v2, %v3983_v46  ;;  %v1082_v56 = vmul.f32 %v1074_v7, %v7390_v15  ;;  %v1391_v2 = vmul.f32 %v4908_v19, %v7583_v16 }
 0x3ea   : > { %v1147_v28 = vadd.f32 322.0, %v1139_v59 }
 0x3eb   : > { %4016 = vrot.lane.b32.xlu2 %v3999_v21, %s5051_s19  ;;  %v1090_v46 = vadd.f32 2222880.5, %v1082_v56  ;;  %v1392_v45 = vsub.f32 1.0, %v1391_v2  ;;  %v3052_v21 = vadd.f32 5040.0, %v3044_v26 }
 0x3ed   : > { %v1098_v3 = vmul.f32 %v1090_v46, %v7390_v15  ;;  %v1393_v59 = vmul.f32 %v4908_v19, %v1392_v45  ;;  %v7628_v53 = vmul.f32 %v3052_v21, %v7540_v1  ;;  %v4411_v21 = vadd.f32 -0.5, %v7390_v15 }
 0x3ef   : > { %v1106_v4 = vadd.f32 4162388.0, %v1098_v3  ;;  %v1394_v9 = vadd.f32 %v4908_v19, %v1393_v59  ;;  %4909 = vrcp.f32 %v7628_v53  ;;  %vm3235_vm2 = vweird.f32 %v7628_v53 }
 0x3f0   : > { %4911 = vlog2.f32 %v7625_v12 }
 0x3f1   : > { %2636 = vrot.lane.b32.xlu0 %v7186_v29, %s5049_s16  ;;  %v1155_v29 = vmul.f32 %v1147_v28, %v7574_v60  ;;  %v1114_v10 = vmul.f32 %v1106_v4, %v7390_v15  ;;  %v1011_v28 = vadd.f32 52.458332, %v7574_v60  ;;  %v1398_v16 = vsel %vm7633_vm15, %v4908_v19, %v1394_v9 }
 0x3f2   : > { %v3974_v8 = vpop.permute.xlu0 %3973  ;;  %v7606_v42 = vpop.permute.xlu2 %3977 }
 0x3f3   : > { %v3976_v35 = vpop.permute.xlu1 %3975  ;;  %v1163_v25 = vadd.f32 1960.0, %v1155_v29  ;;  %v1019_v34 = vmul.f32 %v1011_v28, %v7574_v60 }
 0x3f4   : > { %v3988_v18 = vsel %vm3981_vm11, %v3974_v8, %v3976_v35  ;;  %v2892_v8 = vmul.f32 %v2884_v50, %v7540_v1  ;;  %v1402_v35 = vor.u32 1.1754944e-38, %v1401_v44 }
 0x3f5   : > { %v4004_v14 = vsub.f32 %v3930_v22, %v3988_v18  ;;  %v1171_v38 = vmul.f32 %v1163_v25, %v7574_v60  ;;  %v3911_v18 = vadd.f32 1e-08, %v8215_v23  ;;  %v7651_v29 = vpop.eup %4909  ;;  %v1027_v25 = vadd.f32 1203.8342, %v1019_v34 }
 0x3f6   : > { %v2900_v56 = vadd.f32 678289.7, %v2892_v8  ;;  %v1403_v2 = vsel %vm1400_vm0, %v1402_v35, %v1398_v16  ;;  %v4912_v26 = vpop.eup %4911  ;;  %v3231_v19 = vmul.f32 %v7651_v29, %v7628_v53  ;;  %vm3236_vm1 = vweird.f32 %v7651_v29 }
 0x3f7   : > { %4026 = vrot.lane.b32.xlu1 %v4004_v14, %s5051_s19  ;;  %v1179_v6 = vadd.f32 6769.0, %v1171_v38  ;;  %v1122_v14 = vadd.f32 3409662.8, %v1114_v10  ;;  %4913 = vlog2.f32 %v3911_v18  ;;  %v8216_v38 = vld [vmem:[#allocation69_spill] sm:$0xff]  ;;  %vm3237_vm3 = vmor %vm3235_vm2, %vm3236_vm1  ;;  %vm4265_vm1 = vcmask 195584  }
 0x3f8   : > { %v2908_v13 = vmul.f32 %v2900_v56, %v7540_v1  ;;  %v3912_v59 = vadd.f32 1e-08, %v8216_v38 }
 0x3f9   : > { %2642 = vrot.lane.b32.xlu0 %v2623_v17, %s5049_s16  ;;  %v1187_v22 = vmul.f32 %v1179_v6, %v7574_v60  ;;  %v3232_v6 = vsub.f32 1.0, %v3231_v19 }
 0x3fa   : > { %v3862_v33 = vpop.permute.xlu2 %3861  ;;  %v2916_v44 = vadd.f32 2222880.5, %v2908_v13 }
 0x3fb   : > { %v1195_v17 = vadd.f32 13132.0, %v1187_v22  ;;  %v3233_v28 = vmul.f32 %v7651_v29, %v3232_v6 }
 0x3fc   : > { %v2924_v8 = vmul.f32 %v2916_v44, %v7540_v1 }
 0x3fd   : > { %v1203_v3 = vmul.f32 %v1195_v17, %v7574_v60  ;;  %v4914_v50 = vpop.eup %4913  ;;  %v3234_v34 = vadd.f32 %v7651_v29, %v3233_v28 }
 0x3fe   : > { %v3922_v7 = vmul.f32 0.6931472, %v4914_v50  ;;  %v2932_v56 = vadd.f32 4162388.0, %v2924_v8  ;;  %v8217_v50 = vld [vmem:[#allocation70_spill] sm:$0xff] }
 0x3ff   : > { %2530 = vrot.lane.b32.xlu1 %v2507_v48, %s5045_s10  ;;  %v1273_v48 = vmul.f32 0.6931472, %v4912_v26  ;;  %v1211_v9 = vadd.f32 13068.0, %v1203_v3 }
 0x401   : > { %v1282_v15 = vmul.f32 %v4411_v21, %v1273_v48  ;;  %v1219_v18 = vmul.f32 %v1211_v9, %v7574_v60  ;;  %v3238_v21 = vsel %vm3237_vm3, %v7651_v29, %v3234_v34  ;;  %v8219_v9 = vld [vmem:[#allocation48_spill] sm:$0xff]  ;;  %v8222_v34 = vld [vmem:[#allocation71_spill] sm:$0xff] }
 0x403   : > { %v1290_v23 = vadd.f32 0.9189385, %v1282_v15  ;;  %v8218_v15 = vld [vmem:[#allocation54_spill] sm:$0xff] }
 0x405   : > { %v1298_v17 = vsub.f32 %v1290_v23, %v7625_v12 }
 0x407   : > { %2638 = vrot.lane.b32.xlu1 %v7289_v31, %s5049_s16  ;;  %v7648_v54 = vpop.permute.xlu2 %3865  ;;  %v1404_v31 = vmul.f32 %v1403_v2, %v1122_v14 }
 0x409   : > { %v7653_v40 = vpop.permute.xlu0 %3979  ;;  %4915 = vlog2.f32 %v1404_v31  ;;  %v3239_v31 = vand.u32 2147483647, %v7628_v53 }
 0x40a   : > { %4917 = vlog2.f32 %v3912_v59 }
 0x40b   : > { %v3858_v46 = vpop.permute.xlu1 %3857  ;;  %vm3240_vm4 = vcmp.eq.f32.partialorder %v3239_v31, 8.507059e+37 }
 0x40c   : > { %v3886_v45 = vsel %vm2804_vm13, %v3858_v46, %v7559_v30  ;;  %v1035_v30 = vmul.f32 %v1027_v25, %v7574_v60  ;;  %v1227_v46 = vadd.f32 5040.0, %v1219_v18 }
 0x40d   : > { %v7663_v27 = vadd.f32 %v3886_v45, %v7322_v43  ;;  %v2940_v45 = vmul.f32 %v2932_v56, %v7540_v1 }
 0x40e   : > { %v1043_v35 = vadd.f32 15784.881, %v1035_v30  ;;  %v7700_v59 = vmul.f32 %v1227_v46, %v7574_v60 }
 0x40f   : > { %2640 = vrot.lane.b32.xlu1 %v7209_v49, %s5049_s16  ;;  %v7668_v4 = vpop.permute.xlu2 %3965  ;;  %v4916_v16 = vpop.eup %4915  ;;  %v2948_v29 = vadd.f32 3409662.8, %v2940_v45 }
 0x410   : > { %v4918_v2 = vpop.eup %4917  ;;  %v1433_v26 = vmul.f32 0.6931472, %v4916_v16  ;;  %v8221_v16 = vld [vmem:[#allocation33_spill] sm:$0xff]  ;;  %vm1410_vm5 = vweird.f32 %v7700_v59 }
 0x411   : > { %v3864_v0 = vpop.permute.xlu0 %3863  ;;  %v3924_v25 = vmul.f32 0.6931472, %v4918_v2 }
 0x412   : > { %v3887_v43 = vsel %vm2804_vm13, %v3862_v33, %v3864_v0  ;;  %v1442_v3 = vadd.f32 %v1433_v26, %v1298_v17  ;;  %v8220_v0 = vsub.f32 %v8218_v15, %v8219_v9  ;;  %v4436_v26 = vadd.f32 -0.5, %v7540_v1 }
 0x413   : > { %v3958_v10 = vpop.permute.xlu1 %3957  ;;  %v7673_v49 = vadd.f32 %v3887_v43, %v7373_v39  ;;  %v7685_v39 = vadd.f32 6.5, %v7540_v1  ;;  %v8223_v1 = vld [vmem:[#allocation64_spill] sm:$0xff] }
 0x414   : > { %v3984_v22 = vsel %vm3981_vm11, %v3958_v10, %v7579_v63  ;;  %v1051_v63 = vmul.f32 %v1043_v35, %v7574_v60 }
 0x415   : > { %v4000_v14 = vsub.f32 %v3922_v7, %v3984_v22  ;;  %4919 = vlog2.f32 %v7685_v39  ;;  %v7708_v7 = vsub.f32 %v8220_v0, %v1442_v3 }
 0x416   : > { %v1059_v48 = vadd.f32 129347.26, %v1051_v63  ;;  %4921 = vrcp.f32 %v7700_v59  ;;  %v3914_v63 = vadd.f32 1e-08, %v8222_v34 }
 0x417   : > { %2646 = vrot.lane.b32.xlu1 %v7526_v24, %s5049_s16  ;;  %v7682_v33 = vpop.permute.xlu2 %3869  ;;  %4018 = vrot.lane.b32.xlu2 %v4000_v14, %s5051_s19  ;;  %v3241_v24 = vand.u32 2147483648, %v7628_v53  ;;  %v3913_v53 = vadd.f32 1e-08, %v8217_v50  ;;  %v2554_v14 = vadd.f32 1e-08, %v8221_v16 }
 0x418   : > { %v1067_v43 = vmul.f32 %v1059_v48, %v7574_v60 }
 0x419   : > { %v3242_v38 = vor.u32 1.1754944e-38, %v3241_v24  ;;  %4923 = vlog2.f32 %v3913_v53 }
 0x41a   : > { %v3962_v13 = vpop.permute.xlu0 %3961  ;;  %v1075_v23 = vadd.f32 678289.7, %v1067_v43 }
 0x41b   : > { %v3964_v19 = vpop.permute.xlu1 %3963  ;;  %v3243_v30 = vsel %vm3240_vm4, %v3242_v38, %v3238_v21  ;;  %v4920_v10 = vpop.eup %4919  ;;  %v3916_v38 = vadd.f32 1e-08, %v8223_v1 }
 0x41c   : > { %v3985_v12 = vsel %vm3981_vm11, %v3962_v13, %v3964_v19  ;;  %v3244_v8 = vmul.f32 %v3243_v30, %v2948_v29  ;;  %v3100_v56 = vmul.f32 0.6931472, %v4920_v10  ;;  %v7720_v2 = vpop.eup %4921  ;;  %v1083_v46 = vmul.f32 %v1075_v23, %v7574_v60  ;;  %v8224_v10 = vld [vmem:[#allocation39_spill] sm:$0xff] }
 0x41d   : > { %v4001_v44 = vsub.f32 %v3924_v25, %v3985_v12  ;;  %vm1411_vm6 = vweird.f32 %v7720_v2 }
 0x41e   : > { %4925 = vlog2.f32 %v3244_v8  ;;  %v1091_v21 = vadd.f32 2222880.5, %v1083_v46  ;;  %v8225_v8 = vld [vmem:[#allocation38_spill] sm:$0xff]  ;;  %v1416_v46 = vand.u32 2147483648, %v7700_v59  ;;  %vm7749_vm7 = vmor %vm1410_vm5, %vm1411_vm6 }
 0x41f   : > { %v7703_v6 = vpop.permute.xlu2 %2528  ;;  %4020 = vrot.lane.b32.xlu2 %v4001_v44, %s5051_s19  ;;  %v4924_v24 = vpop.eup %4923  ;;  %4927 = vlog2.f32 %v2554_v14 }
 0x420   : > { %4929 = vlog2.f32 %v3914_v63  ;;  %v3926_v31 = vmul.f32 0.6931472, %v4924_v24  ;;  %v1099_v9 = vmul.f32 %v1091_v21, %v7574_v60  ;;  %v1417_v21 = vor.u32 1.1754944e-38, %v1416_v46 }
 0x421   : > { %4931 = vlog2.f32 %v3916_v38 }
 0x422   : > { %v3868_v28 = vpop.permute.xlu0 %3867 }
 0x423   : > { %v3970_v35 = vpop.permute.xlu1 %3969  ;;  %v3888_v22 = vsel %vm2804_vm13, %v7648_v54, %v3868_v28  ;;  %v3108_v54 = vmul.f32 %v4436_v26, %v3100_v56  ;;  %v8226_v28 = vsub.f32 %v8224_v10, %v8225_v8  ;;  %v1251_v56 = vadd.f32 6.5, %v7574_v60  ;;  %v5029_v10 = vld [vmem:[%s6024_s17 + $0x8] sm:$0xff] }
 0x424   : > { %v7716_v18 = vadd.f32 %v3888_v22, %v7596_v20  ;;  %v1406_v20 = vmul.f32 %v7720_v2, %v7700_v59  ;;  %v4926_v19 = vpop.eup %4925  ;;  %v1107_v26 = vadd.f32 4162388.0, %v1099_v9 }
 0x425   : > { %v3116_v12 = vadd.f32 0.9189385, %v3108_v54  ;;  %v4928_v53 = vpop.eup %4927  ;;  %v3260_v30 = vmul.f32 0.6931472, %v4926_v19  ;;  %v2466_v22 = vsub.f32 %v8226_v28, %v1442_v3  ;;  %v1414_v54 = vand.u32 2147483647, %v7700_v59 }
 0x426   : > { %v1407_v50 = vsub.f32 1.0, %v1406_v20  ;;  %v4930_v15 = vpop.eup %4929  ;;  %4933 = vlog2.f32 %v1251_v56  ;;  %v3989_v59 = vsel %vm3981_vm11, %v7606_v42, %v7653_v40 }
 0x427   : > { %v7722_v17 = vpop.permute.xlu2 %3881  ;;  %v3124_v0 = vsub.f32 %v3116_v12, %v7685_v39  ;;  %v3928_v23 = vmul.f32 0.6931472, %v4930_v15  ;;  %v2546_v20 = vadd.f32 %v7703_v6, %v2466_v22  ;;  %v4932_v19 = vpop.eup %4931  ;;  %vm1415_vm8 = vcmp.eq.f32.partialorder %v1414_v54, 8.507059e+37  ;;  %v8230_v12 = vld [vmem:[#allocation53_spill] sm:$0xff]  ;;  %v8232_v54 = vld [vmem:[#allocation66_spill] sm:$0xff] }
 0x428   : > { %v1408_v43 = vmul.f32 %v7720_v2, %v1407_v50  ;;  %v3932_v6 = vmul.f32 0.6931472, %v4932_v19 }
 0x429   : > { %v3268_v16 = vadd.f32 %v3260_v30, %v3124_v0  ;;  %v4412_v0 = vadd.f32 -0.5, %v7574_v60 }
 0x42a   : > { %v1409_v3 = vadd.f32 %v7720_v2, %v1408_v43  ;;  %v4005_v42 = vsub.f32 %v3932_v6, %v3989_v59  ;;  %v8237_v6 = vld [vmem:[#allocation40_spill] sm:$0xff] }
 0x42b   : > { %v3968_v13 = vpop.permute.xlu0 %3967  ;;  %v3748_v25 = vpop.permute.xlu1 %3747 }
 0x42c   : > { %v3986_v45 = vsel %vm3981_vm11, %v7668_v4, %v3968_v13  ;;  %v2569_v4 = vmul.f32 0.6931472, %v4928_v53 }
 0x42d   : > { %v4002_v48 = vsub.f32 %v3926_v31, %v3986_v45 }
 0x42f   : > { %4022 = vrot.lane.b32.xlu2 %v4002_v48, %s5051_s19  ;;  %v3972_v44 = vpop.permute.xlu2 %3971  ;;  %v8229_v48 = vld [vmem:[#allocation58_spill] sm:$0xff] }
 0x430   : > { %v3987_v29 = vsel %vm3981_vm11, %v3970_v35, %v3972_v44  ;;  %v8231_v1 = vsub.f32 %v8229_v48, %v8230_v12 }
 0x431   : > { %v4003_v39 = vsub.f32 %v3928_v23, %v3987_v29 }
 0x432   : > { %v3777_v38 = vsub.f32 %v8231_v1, %v7478_v51 }
 0x433   : > { %v3746_v14 = vpop.permute.xlu0 %3745  ;;  %v2593_v34 = vpop.permute.xlu1 %2592 }
 0x434   : > { %v3756_v63 = vsel %vm2804_vm13, %v3746_v14, %v3748_v25  ;;  %v2610_v35 = vsub.f32 %v2569_v4, %v2593_v34  ;;  %v1115_v25 = vmul.f32 %v1107_v26, %v7574_v60 }
 0x435   : > { %v3772_v24 = vsub.f32 %v3268_v16, %v3756_v63  ;;  %v5030_v63 = vld [vmem:[%s6024_s17] sm:$0xff] }
 0x436   : > { %v2618_v31 = vmul.f32 %v7387_v5, %v2610_v35  ;;  %v1413_v5 = vsel %vm7749_vm7, %v7720_v2, %v1409_v3  ;;  %v1123_v44 = vadd.f32 3409662.8, %v1115_v25  ;;  %v4934_v2 = vpop.eup %4933 }
 0x437   : > { %4024 = vrot.lane.b32.xlu2 %v4003_v39, %s5051_s19  ;;  %v1418_v30 = vsel %vm1415_vm8, %v1417_v21, %v1413_v5  ;;  %v3874_v15 = vpop.permute.xlu2 %3873  ;;  %v1275_v29 = vmul.f32 0.6931472, %v4934_v2  ;;  %v8236_v5 = vld [vmem:[#allocation43_spill] sm:$0xff] }
 0x438   : > { %v2626_v45 = vadd.f32 %v2618_v31, %v2546_v20  ;;  %v1419_v9 = vmul.f32 %v1418_v30, %v1123_v44  ;;  %v8233_v20 = vld [vmem:[#allocation57_spill] sm:$0xff]  ;;  %v8238_v48 = vsub.f32 %v8236_v5, %v8237_v6 }
 0x439   : > { %v1283_v51 = vmul.f32 %v4412_v0, %v1275_v29  ;;  %v8234_v31 = vsub.f32 %v8232_v54, %v8233_v20  ;;  %v8239_v0 = vld [vmem:[#allocation2_spill] sm:$0xff] }
 0x43a   : > { %2648 = vrot.lane.b32.xlu0 %v2626_v45, %s5049_s16  ;;  %4935 = vlog2.f32 %v1419_v9  ;;  %v8235_v45 = vld [vmem:[#allocation27_spill] sm:$0xff]  ;;  %v900_v29 = vsub.f32 0.0, %v8239_v0 }
 0x43b   : > { %v3872_v50 = vpop.permute.xlu0 %3871  ;;  %v1291_v28 = vadd.f32 0.9189385, %v1283_v51  ;;  %v8243_v0 = vld [vmem:[#allocation7_spill] sm:$0xff] }
 0x43c   : > { %v3889_v53 = vsel %vm2804_vm13, %v7682_v33, %v3872_v50  ;;  %v3880_v33 = vpop.permute.xlu1 %3879 }
 0x43d   : > { %v7767_v40 = vadd.f32 %v3889_v53, %v3777_v38  ;;  %v1299_v60 = vsub.f32 %v1291_v28, %v1251_v56  ;;  %v3778_v56 = vsub.f32 %v8234_v31, %v7510_v47  ;;  %v5031_v53 = vld [vmem:[%s6024_s17 + $0x10] sm:$0xff] }
 0x43f   : > { %4028 = vrot.lane.b32.xlu2 %v4005_v42, %s5051_s19 }
 0x440   : > { %v4936_v23 = vpop.eup %4935 }
 0x441   : > { %v1435_v14 = vmul.f32 0.6931472, %v4936_v23 }
 0x443   : > { %v3878_v4 = vpop.permute.xlu0 %3877  ;;  %v1443_v39 = vadd.f32 %v1435_v14, %v1299_v60 }
 0x444   : > { %v3891_v51 = vsel %vm2804_vm13, %v3878_v4, %v3880_v33  ;;  %v5034_v33 = vld [vmem:[%s6024_s17 + $0x28] sm:$0xff] }
 0x445   : > { %v4017_v43 = vpop.permute.xlu2 %4016  ;;  %v3780_v46 = vsub.f32 %v3772_v24, %v1443_v39  ;;  %v2467_v12 = vsub.f32 %v8238_v48, %v1443_v39 }
 0x446   : > { %v4039_v8 = vmul.f32 %v5029_v10, %v4017_v43  ;;  %v5032_v43 = vld [vmem:[%s6024_s17 + $0x30] sm:$0xff] }
 0x447   : > { %2644 = vrot.lane.b32.xlu2 %v7499_v62, %s5049_s16 }
 0x448   : > { %v4047_v22 = vadd.f32 %v4039_v8, %v7663_v27  ;;  %v3907_v8 = vadd.f32 %v3891_v51, %v7708_v7  ;;  %v8244_v51 = vld [vmem:[#allocation11_spill] sm:$0xff] }
 0x44a   : > { %4064 = vrot.lane.b32.xlu0 %v4047_v22, %s5049_s16 }
 0x44b   : > { %v2595_v16 = vpop.permute.xlu0 %2594 }
 0x44e   : > { %v4015_v34 = vpop.permute.xlu1 %4014 }
 0x44f   : > { %v4038_v26 = vmul.f32 %v5030_v63, %v4015_v34 }
 0x451   : > { %v4046_v35 = vadd.f32 %v4038_v26, %v7568_v61  ;;  %v2555_v61 = vadd.f32 1e-08, %v8235_v45 }
 0x453   : > { %v3884_v3 = vpop.permute.xlu0 %3883  ;;  %4062 = vrot.lane.b32.xlu2 %v4046_v35, %s5049_s16  ;;  %4937 = vlog2.f32 %v2555_v61 }
 0x454   : > { %v3892_v62 = vsel %vm2804_vm13, %v7722_v17, %v3884_v3 }
 0x455   : > { %v3908_v27 = vadd.f32 %v3892_v62, %v3780_v46  ;;  %v8240_v46 = vld [vmem:[#allocation3_spill] sm:$0xff] }
 0x456   : > { %v901_v3 = vsub.f32 0.0, %v8240_v46 }
 0x458   : > { %v917_v20 = vand.u32 2147483647, %v901_v3 }
 0x459   : > { %v4938_v24 = vpop.eup %4937 }
 0x45a   : > { %v2571_v59 = vmul.f32 0.6931472, %v4938_v24 }
 0x45b   : > { %v3876_v13 = vpop.permute.xlu0 %3875 }
 0x45c   : > { %v3890_v19 = vsel %vm2804_vm13, %v3874_v15, %v3876_v13  ;;  %v2611_v17 = vsub.f32 %v2571_v59, %v2595_v16  ;;  %v925_v13 = vsub.f32 0.0, %v917_v20  ;;  %v8242_v59 = vld [vmem:[#allocation8_spill] sm:$0xff] }
 0x45d   : > { %v3906_v25 = vadd.f32 %v3890_v19, %v3778_v56 }
 0x45e   : > { %v2619_v38 = vmul.f32 %v7537_v58, %v2611_v17  ;;  %v934_v61 = vmul.f32 1.442695, %v925_v13  ;;  %v988_v17 = vsub.f32 0.0, %v8242_v59 }
 0x469   : > { %v4027_v21 = vpop.permute.xlu1 %4026 }
 0x46a   : > { %v4044_v10 = vmul.f32 %v5032_v43, %v4027_v21  ;;  %v905_v43 = vsub.f32 0.0, %v8244_v51 }
 0x46c   : > { %v4052_v28 = vadd.f32 %v4044_v10, %v3907_v8 }
 0x471   : > { %v2531_v1 = vpop.permute.xlu1 %2530  ;;  %v4019_v50 = vpop.permute.xlu2 %4018 }
 0x472   : > { %v2547_v47 = vadd.f32 %v2531_v1, %v2467_v12  ;;  %v4040_v44 = vmul.f32 %v5031_v53, %v4019_v50 }
 0x474   : > { %v2627_v42 = vadd.f32 %v2619_v38, %v2547_v47  ;;  %v4048_v30 = vadd.f32 %v4040_v44, %v7673_v49  ;;  %v916_v49 = vand.u32 2147483647, %v900_v29 }
 0x476   : > { %4066 = vrot.lane.b32.xlu2 %v4048_v30, %s5049_s16  ;;  %v924_v22 = vsub.f32 0.0, %v916_v49 }
 0x479   : > { %v4021_v2 = vpop.permute.xlu2 %4020 }
 0x47a   : > { %v4041_v15 = vmul.f32 %v7603_v57, %v4021_v2  ;;  %v5033_v57 = vld [vmem:[%s6024_s17 + $0x20] sm:$0xff] }
 0x47c   : > { %v4049_v9 = vadd.f32 %v4041_v15, %v7716_v18  ;;  %v932_v18 = vmul.f32 1.442695, %v924_v22 }
 0x47e   : > { %4068 = vrot.lane.b32.xlu1 %v4049_v9, %s5049_s16  ;;  %4939 = vpow2.f32 %v932_v18  ;;  %v909_v18 = vmax.f32 %v901_v3, 0.0 }
 0x484   : > { %v4940_v63 = vpop.eup %4939 }
 0x485   : > { %v948_v7 = vadd.f32 1.0, %v4940_v63  ;;  %v8245_v63 = vld [vmem:[#allocation4_spill] sm:$0xff] }
 0x486   : > { %4074 = vrot.lane.b32.xlu1 %v4052_v28, %s5049_s16 }
 0x487   : > { %4941 = vlog2.f32 %v948_v7  ;;  %v906_v7 = vsub.f32 0.0, %v8245_v63 }
 0x488   : > { %4943 = vpow2.f32 %v934_v61 }
 0x489   : > { %v4023_v23 = vpop.permute.xlu2 %4022  ;;  %v922_v20 = vand.u32 2147483647, %v906_v7 }
 0x48a   : > { %v4042_v16 = vmul.f32 %v5033_v57, %v4023_v23  ;;  %v921_v23 = vand.u32 2147483647, %v905_v43  ;;  %v2639_v57 = vpop.permute.xlu1 %2638 }
 0x48b   : > { %v930_v59 = vsub.f32 0.0, %v922_v20 }
 0x48c   : > { %v4050_v60 = vadd.f32 %v4042_v16, %v7767_v40  ;;  %v8241_v40 = vld [vmem:[#allocation5_spill] sm:$0xff] }
 0x48d   : > { %v902_v62 = vsub.f32 0.0, %v8241_v40  ;;  %v4942_v54 = vpop.eup %4941 }
 0x48e   : > { %4070 = vrot.lane.b32.xlu0 %v4050_v60, %s5049_s16  ;;  %v957_v31 = vmul.f32 0.6931472, %v4942_v54  ;;  %v4944_v47 = vpop.eup %4943  ;;  %v989_v54 = vsub.f32 0.0, %v8161_v37  ;;  %v990_v37 = vsub.f32 0.0, %v5347_v32  ;;  %v5052_v32 = vmov 0.0  }
 0x48f   : > { %v918_v56 = vand.u32 2147483647, %v902_v62 }
 0x491   : > { %v4025_v4 = vpop.permute.xlu2 %4024 }
 0x492   : > { %v4043_v14 = vmul.f32 %v5034_v33, %v4025_v4 }
 0x494   : > { %v4051_v34 = vadd.f32 %v4043_v14, %v3906_v25  ;;  %v908_v25 = vmax.f32 %v900_v29, 0.0  ;;  %v903_v29 = vsub.f32 0.0, %v8243_v0  ;;  %v929_v14 = vsub.f32 0.0, %v921_v23 }
 0x495   : > { %v993_v0 = vsub.f32 0.0, %v8168_v11 }
 0x496   : > { %4072 = vrot.lane.b32.xlu2 %v4051_v34, %s5049_s16  ;;  %v972_v45 = vadd.f32 %v957_v31, %v908_v25  ;;  %v919_v49 = vand.u32 2147483647, %v903_v29  ;;  %v910_v34 = vmax.f32 %v902_v62, 0.0  ;;  %v942_v40 = vmul.f32 1.442695, %v929_v14 }
 0x498   : > { %v980_v24 = vsub.f32 0.0, %v972_v45  ;;  %v927_v60 = vsub.f32 0.0, %v919_v49  ;;  %v7830_v45 = vstv %s4445_s20 }
 0x499   : > { %v4029_v26 = vpop.permute.xlu2 %4028 }
 0x49a   : > { %v4045_v39 = vmul.f32 %v7537_v58, %v4029_v26  ;;  %v926_v58 = vsub.f32 0.0, %v918_v56  ;;  %v4183_v56 = vlaneseq }
 0x49c   : > { %v4053_v35 = vadd.f32 %v4045_v39, %v3908_v27  ;;  %v2637_v27 = vpop.permute.xlu0 %2636  ;;  %v936_v21 = vmul.f32 1.442695, %v926_v58  ;;  %v938_v39 = vmul.f32 1.442695, %v927_v60  ;;  %v2641_v58 = vpop.permute.xlu1 %2640  ;;  %v7832_v61 = vshrl.u32 %v4183_v56, 7 }
 0x49d   : > { %v2660_v6 = vadd.f32 %v2637_v27, %v980_v24  ;;  %v8246_v27 = vld [vmem:[#allocation9_spill] sm:$0xff] }
 0x49e   : > { %2650 = vrot.lane.b32.xlu2 %v2627_v42, %s5049_s16  ;;  %4076 = vrot.lane.b32.xlu0 %v4053_v35, %s5049_s16  ;;  %4945 = vpow2.f32 %v936_v21  ;;  %v949_v42 = vadd.f32 1.0, %v4944_v47  ;;  %v904_v24 = vsub.f32 0.0, %v8246_v27  ;;  %v4185_v14 = vadd.s32 8, %v7832_v61 }
 0x4a0   : > { %v4194_v20 = vadd.s32 %v7830_v45, %v4185_v14 }
 0x4a1   : > { %v7812_v19 = vpop.permute.xlu2 %2644 }
 0x4a2   : > { %vm4202_vm9 = vcmp.lt.s32.totalorder %v4194_v20, 200 }
 0x4a4   : > { %v4946_v44 = vpop.eup %4945  ;;  %v7815_v15 = vpop.permute.xlu0 %2642 }
 0x4a5   : > { %v950_v30 = vadd.f32 1.0, %v4946_v44 }
 0x4ac   : > { %v7823_v16 = vpop.permute.xlu0 %2648 }
 0x4ad   : > { %v4063_v5 = vpop.permute.xlu2 %4062 }
 0x4ae   : > { %v4086_v48 = vadd.f32 %v4063_v5, %v988_v17 }
 0x4b0   : > { %v4094_v12 = vmax.f32 %v2660_v6, %v4086_v48 }
 0x4b2   : > { %v4102_v1 = vsub.f32 %v2660_v6, %v4094_v12  ;;  %v4126_v38 = vsub.f32 %v4086_v48, %v4094_v12  ;;  %v4193_v6 = vadd.s32 %v7830_v45, %v7832_v61 }
 0x4b4   : > { %v4110_v50 = vmul.f32 1.442695, %v4102_v1  ;;  %v4134_v53 = vmul.f32 1.442695, %v4126_v38  ;;  %vm4201_vm13 = vcmp.lt.s32.totalorder %v4193_v6, 200  ;;  %v4447_v6 = vsel %vm4202_vm9, 1.0, %v5052_v32 }
 0x4b6   : > { %4947 = vpow2.f32 %v4110_v50 }
 0x4b7   : > { %4949 = vpow2.f32 %v4134_v53 }
 0x4b8   : > { %4951 = vlog2.f32 %v949_v42  ;;  %v4446_v42 = vsel %vm4201_vm13, 1.0, %v5052_v32 }
 0x4b9   : > { %4953 = vlog2.f32 %v950_v30 }
 0x4bc   : > { %v4948_v2 = vpop.eup %4947  ;;  %v4065_v3 = vpop.permute.xlu0 %4064 }
 0x4bd   : > { %v4950_v9 = vpop.eup %4949  ;;  %v4087_v25 = vadd.f32 %v4065_v3, %v989_v54  ;;  %v4186_v54 = vadd.s32 16, %v7832_v61 }
 0x4be   : > { %v4150_v10 = vadd.f32 %v4950_v9, %v4948_v2  ;;  %v4952_v8 = vpop.eup %4951  ;;  %v944_v2 = vmul.f32 1.442695, %v930_v59 }
 0x4bf   : > { %v4954_v28 = vpop.eup %4953  ;;  %v959_v22 = vmul.f32 0.6931472, %v4952_v8 }
 0x4c0   : > { %4955 = vlog2.f32 %v4150_v10  ;;  %v961_v4 = vmul.f32 0.6931472, %v4954_v28 }
 0x4c1   : > { %v973_v33 = vadd.f32 %v959_v22, %v909_v18  ;;  %4957 = vpow2.f32 %v938_v39 }
 0x4c2   : > { %v974_v35 = vadd.f32 %v961_v4, %v910_v34  ;;  %4959 = vpow2.f32 %v942_v40 }
 0x4c3   : > { %v981_v46 = vsub.f32 0.0, %v973_v33 }
 0x4c4   : > { %v982_v62 = vsub.f32 0.0, %v974_v35  ;;  %v8247_v35 = vld [vmem:[#allocation6_spill] sm:$0xff] }
 0x4c5   : > { %v2661_v13 = vadd.f32 %v2639_v57, %v981_v46  ;;  %v907_v46 = vsub.f32 0.0, %v8247_v35 }
 0x4c6   : > { %v4956_v26 = vpop.eup %4955  ;;  %v2662_v48 = vadd.f32 %v2641_v58, %v982_v62  ;;  %v4195_v62 = vadd.s32 %v7830_v45, %v4186_v54 }
 0x4c7   : > { %v4159_v31 = vmul.f32 0.6931472, %v4956_v26  ;;  %v7836_v21 = vmax.f32 %v2661_v13, %v4087_v25  ;;  %v4958_v30 = vpop.eup %4957 }
 0x4c8   : > { %v4960_v10 = vpop.eup %4959  ;;  %v951_v18 = vadd.f32 1.0, %v4958_v30  ;;  %vm4203_vm10 = vcmp.lt.s32.totalorder %v4195_v62, 200 }
 0x4c9   : > { %v4174_v17 = vadd.f32 %v4159_v31, %v4094_v12  ;;  %v4103_v38 = vsub.f32 %v2661_v13, %v7836_v21  ;;  %v4127_v47 = vsub.f32 %v4087_v25, %v7836_v21  ;;  %v920_v12 = vand.u32 2147483647, %v904_v24 }
 0x4ca   : > { %v953_v57 = vadd.f32 1.0, %v4960_v10  ;;  %v923_v13 = vand.u32 2147483647, %v907_v46 }
 0x4cb   : > { %v4112_v53 = vmul.f32 1.442695, %v4103_v38  ;;  %v4136_v44 = vmul.f32 1.442695, %v4127_v47  ;;  %v4225_v9 = vmul.f32 %v4446_v42, %v4174_v17  ;;  %v928_v23 = vsub.f32 0.0, %v920_v12  ;;  %v2647_v38 = vpop.permute.xlu1 %2646 }
 0x4cd   : > { %4961 = vpow2.f32 %v4112_v53  ;;  %4241 = vrot.lane.b32.xlu1 %v4225_v9, %s5050_s18  ;;  %v940_v33 = vmul.f32 1.442695, %v928_v23 }
 0x4ce   : > { %4963 = vpow2.f32 %v4136_v44  ;;  %v911_v44 = vmax.f32 %v903_v29, 0.0 }
 0x4cf   : > { %4965 = vpow2.f32 %v944_v2 }
 0x4d0   : > { %v4067_v5 = vpop.permute.xlu2 %4066 }
 0x4d1   : > { %v4088_v1 = vadd.f32 %v4067_v5, %v990_v37 }
 0x4d3   : > { %v7842_v50 = vmax.f32 %v2662_v48, %v4088_v1  ;;  %v4962_v60 = vpop.eup %4961 }
 0x4d4   : > { %v4964_v4 = vpop.eup %4963 }
 0x4d5   : > { %v4104_v8 = vsub.f32 %v2662_v48, %v7842_v50  ;;  %v4128_v49 = vsub.f32 %v4088_v1, %v7842_v50  ;;  %v4151_v34 = vadd.f32 %v4964_v4, %v4962_v60  ;;  %v4966_v26 = vpop.eup %4965  ;;  %v931_v48 = vsub.f32 0.0, %v923_v13 }
 0x4d6   : > { %v954_v31 = vadd.f32 1.0, %v4966_v26  ;;  %v913_v1 = vmax.f32 %v905_v43, 0.0 }
 0x4d7   : > { %v4114_v28 = vmul.f32 1.442695, %v4104_v8  ;;  %v4138_v22 = vmul.f32 1.442695, %v4128_v49  ;;  %v4448_v8 = vsel %vm4203_vm10, 1.0, %v5052_v32 }
 0x4d8   : > { %v946_v49 = vmul.f32 1.442695, %v931_v48 }
 0x4d9   : > { %4967 = vpow2.f32 %v4114_v28 }
 0x4da   : > { %4969 = vpow2.f32 %v4138_v22  ;;  %v991_v22 = vsub.f32 0.0, %v5417_v55 }
 0x4db   : > { %4971 = vlog2.f32 %v953_v57 }
 0x4dc   : > { %4973 = vlog2.f32 %v951_v18  ;;  %v914_v18 = vmax.f32 %v906_v7, 0.0 }
 0x4dd   : > { %4975 = vlog2.f32 %v4151_v34 }
 0x4de   : > { %4977 = vpow2.f32 %v940_v33 }
 0x4df   : > { %v4968_v39 = vpop.eup %4967 }
 0x4e0   : > { %v4970_v40 = vpop.eup %4969 }
 0x4e1   : > { %v4152_v3 = vadd.f32 %v4970_v40, %v4968_v39  ;;  %v4972_v56 = vpop.eup %4971 }
 0x4e2   : > { %v4974_v25 = vpop.eup %4973  ;;  %v967_v59 = vmul.f32 0.6931472, %v4972_v56 }
 0x4e3   : > { %4979 = vlog2.f32 %v4152_v3  ;;  %v4976_v58 = vpop.eup %4975  ;;  %v963_v5 = vmul.f32 0.6931472, %v4974_v25  ;;  %v912_v25 = vmax.f32 %v904_v24, 0.0  ;;  %v992_v24 = vsub.f32 0.0, %v8159_v52 }
 0x4e4   : > { %4981 = vlog2.f32 %v954_v31  ;;  %v4978_v37 = vpop.eup %4977  ;;  %v4161_v17 = vmul.f32 0.6931472, %v4976_v58  ;;  %v977_v30 = vadd.f32 %v967_v59, %v913_v1 }
 0x4e5   : > { %v952_v42 = vadd.f32 1.0, %v4978_v37  ;;  %v975_v10 = vadd.f32 %v963_v5, %v911_v44 }
 0x4e6   : > { %v4175_v47 = vadd.f32 %v4161_v17, %v7836_v21  ;;  %v985_v43 = vsub.f32 0.0, %v977_v30 }
 0x4e7   : > { %4983 = vlog2.f32 %v952_v42  ;;  %v983_v29 = vsub.f32 0.0, %v975_v10 }
 0x4e8   : > { %v4226_v2 = vmul.f32 %v4447_v6, %v4175_v47  ;;  %4985 = vpow2.f32 %v946_v49  ;;  %v2665_v57 = vadd.f32 %v2647_v38, %v985_v43 }
 0x4e9   : > { %v4980_v53 = vpop.eup %4979  ;;  %v2663_v4 = vadd.f32 %v7815_v15, %v983_v29  ;;  %v994_v15 = vsub.f32 0.0, %v8124_v41 }
 0x4ea   : > { %v4163_v12 = vmul.f32 0.6931472, %v4980_v53  ;;  %v4982_v9 = vpop.eup %4981  ;;  %4243 = vrot.lane.b32.xlu2 %v4226_v2, %s5050_s18  ;;  %v4187_v53 = vadd.s32 24, %v7832_v61 }
 0x4eb   : > { %v969_v21 = vmul.f32 0.6931472, %v4982_v9  ;;  %v4189_v9 = vadd.s32 40, %v7832_v61 }
 0x4ec   : > { %v4176_v51 = vadd.f32 %v4163_v12, %v7842_v50  ;;  %v4196_v52 = vadd.s32 %v7830_v45, %v4187_v53 }
 0x4ed   : > { %v978_v14 = vadd.f32 %v969_v21, %v914_v18  ;;  %v4984_v11 = vpop.eup %4983  ;;  %v4198_v21 = vadd.s32 %v7830_v45, %v4189_v9 }
 0x4ee   : > { %v4227_v28 = vmul.f32 %v4448_v8, %v4176_v51  ;;  %v4986_v40 = vpop.eup %4985  ;;  %v965_v54 = vmul.f32 0.6931472, %v4984_v11  ;;  %vm4204_vm11 = vcmp.lt.s32.totalorder %v4196_v52, 200  ;;  %v4190_v11 = vadd.s32 48, %v7832_v61 }
 0x4ef   : > { %v986_v20 = vsub.f32 0.0, %v978_v14  ;;  %v955_v58 = vadd.f32 1.0, %v4986_v40  ;;  %vm4206_vm12 = vcmp.lt.s32.totalorder %v4198_v21, 200  ;;  %v4191_v40 = vadd.s32 56, %v7832_v61 }
 0x4f0   : > { %v4073_v23 = vpop.permute.xlu2 %4072  ;;  %4245 = vrot.lane.b32.xlu0 %v4227_v28, %s5050_s18  ;;  %v4069_v50 = vpop.permute.xlu1 %4068  ;;  %v976_v17 = vadd.f32 %v965_v54, %v912_v25  ;;  %v4199_v54 = vadd.s32 %v7830_v45, %v4190_v11 }
 0x4f1   : > { %v4091_v60 = vadd.f32 %v4073_v23, %v993_v0  ;;  %v4089_v33 = vadd.f32 %v4069_v50, %v991_v22  ;;  %v2666_v37 = vadd.f32 %v7823_v16, %v986_v20  ;;  %v915_v22 = vmax.f32 %v907_v46, 0.0 }
 0x4f2   : > { %v984_v27 = vsub.f32 0.0, %v976_v17  ;;  %vm4207_vm14 = vcmp.lt.s32.totalorder %v4199_v54, 200 }
 0x4f3   : > { %v7872_v34 = vmax.f32 %v2665_v57, %v4091_v60  ;;  %v7874_v26 = vmax.f32 %v2663_v4, %v4089_v33 }
 0x4f4   : > { %v2664_v42 = vadd.f32 %v7812_v19, %v984_v27 }
 0x4f5   : > { %v4107_v55 = vsub.f32 %v2665_v57, %v7872_v34  ;;  %v4131_v39 = vsub.f32 %v4091_v60, %v7872_v34  ;;  %v4105_v63 = vsub.f32 %v2663_v4, %v7874_v26  ;;  %v4129_v7 = vsub.f32 %v4089_v33, %v7874_v26 }
 0x4f6   : > { %v4449_v33 = vsel %vm4204_vm11, 1.0, %v5052_v32 }
 0x4f7   : > { %v4120_v31 = vmul.f32 1.442695, %v4107_v55  ;;  %v4116_v3 = vmul.f32 1.442695, %v4105_v63  ;;  %v4140_v56 = vmul.f32 1.442695, %v4129_v7 }
 0x4f8   : > { %v4144_v13 = vmul.f32 1.442695, %v4131_v39  ;;  %v4075_v62 = vpop.permute.xlu1 %4074  ;;  %v4188_v55 = vadd.s32 32, %v7832_v61  ;;  %v2651_v46 = vpop.permute.xlu2 %2650  ;;  %v4451_v39 = vsel %vm4206_vm12, 1.0, %v5052_v32 }
 0x4f9   : > { %4987 = vpow2.f32 %v4120_v31  ;;  %v4092_v59 = vadd.f32 %v4075_v62, %v994_v15 }
 0x4fa   : > { %4989 = vpow2.f32 %v4116_v3  ;;  %v4197_v20 = vadd.s32 %v7830_v45, %v4188_v55  ;;  %v995_v3 = vsub.f32 0.0, %v8128_v36 }
 0x4fb   : > { %4991 = vpow2.f32 %v4140_v56  ;;  %v7884_v5 = vmax.f32 %v2666_v37, %v4092_v59  ;;  %v4200_v56 = vadd.s32 %v7830_v45, %v4191_v40 }
 0x4fc   : > { %4993 = vpow2.f32 %v4144_v13  ;;  %vm4205_vm15 = vcmp.lt.s32.totalorder %v4197_v20, 200 }
 0x4fd   : > { %4995 = vlog2.f32 %v955_v58  ;;  %v4108_v41 = vsub.f32 %v2666_v37, %v7884_v5  ;;  %v4132_v6 = vsub.f32 %v4092_v59, %v7884_v5  ;;  %v4452_v58 = vsel %vm4207_vm14, 1.0, %v5052_v32 }
 0x4fe   : > { %v4450_v37 = vsel %vm4205_vm15, 1.0, %v5052_v32  ;;  %vm4208_vm0 = vcmp.lt.s32.totalorder %v4200_v56, 200 }
 0x4ff   : > { %v4988_v48 = vpop.eup %4987  ;;  %v4122_v38 = vmul.f32 1.442695, %v4108_v41  ;;  %v4146_v47 = vmul.f32 1.442695, %v4132_v6  ;;  %v4453_v17 = vsel %vm4208_vm0, 1.0, %v5052_v32 }
 0x500   : > { %v4990_v1 = vpop.eup %4989  ;;  %v4071_v16 = vpop.permute.xlu0 %4070 }
 0x501   : > { %v4992_v44 = vpop.eup %4991  ;;  %v4090_v30 = vadd.f32 %v4071_v16, %v992_v24  ;;  %4997 = vpow2.f32 %v4122_v38 }
 0x502   : > { %v4994_v12 = vpop.eup %4993  ;;  %v4153_v2 = vadd.f32 %v4992_v44, %v4990_v1  ;;  %4999 = vpow2.f32 %v4146_v47 }
 0x503   : > { %v4996_v10 = vpop.eup %4995  ;;  %v4155_v8 = vadd.f32 %v4994_v12, %v4988_v48  ;;  %v7892_v49 = vmax.f32 %v2664_v42, %v4090_v30 }
 0x504   : > { %5001 = vlog2.f32 %v4153_v2  ;;  %v971_v19 = vmul.f32 0.6931472, %v4996_v10 }
 0x505   : > { %5003 = vlog2.f32 %v4155_v8  ;;  %v4106_v51 = vsub.f32 %v2664_v42, %v7892_v49  ;;  %v4130_v43 = vsub.f32 %v4090_v30, %v7892_v49 }
 0x506   : > { %v979_v50 = vadd.f32 %v971_v19, %v915_v22 }
 0x507   : > { %v4118_v28 = vmul.f32 1.442695, %v4106_v51  ;;  %v4142_v0 = vmul.f32 1.442695, %v4130_v43  ;;  %v4998_v29 = vpop.eup %4997 }
 0x508   : > { %v5000_v23 = vpop.eup %4999  ;;  %v987_v7 = vsub.f32 0.0, %v979_v50 }
 0x509   : > { %5005 = vpow2.f32 %v4118_v28  ;;  %v4156_v18 = vadd.f32 %v5000_v23, %v4998_v29 }
 0x50a   : > { %v5002_v57 = vpop.eup %5001  ;;  %5007 = vpow2.f32 %v4142_v0 }
 0x50b   : > { %v5004_v60 = vpop.eup %5003  ;;  %v4165_v4 = vmul.f32 0.6931472, %v5002_v57  ;;  %5009 = vlog2.f32 %v4156_v18 }
 0x50c   : > { %v4169_v14 = vmul.f32 0.6931472, %v5004_v60 }
 0x50d   : > { %v4177_v35 = vadd.f32 %v4165_v4, %v7874_v26  ;;  %v2667_v26 = vadd.f32 %v2651_v46, %v987_v7 }
 0x50e   : > { %v4179_v63 = vadd.f32 %v4169_v14, %v7872_v34 }
 0x50f   : > { %v5006_v31 = vpop.eup %5005  ;;  %v4228_v15 = vmul.f32 %v4449_v33, %v4177_v35 }
 0x510   : > { %v5008_v13 = vpop.eup %5007  ;;  %v4230_v25 = vmul.f32 %v4451_v39, %v4179_v63  ;;  %v4077_v62 = vpop.permute.xlu0 %4076 }
 0x511   : > { %v4154_v61 = vadd.f32 %v5008_v13, %v5006_v31  ;;  %4247 = vrot.lane.b32.xlu1 %v4228_v15, %s5050_s18  ;;  %v4093_v34 = vadd.f32 %v4077_v62, %v995_v3  ;;  %v5010_v59 = vpop.eup %5009 }
 0x512   : > { %4251 = vrot.lane.b32.xlu0 %v4230_v25, %s5050_s18  ;;  %v4171_v36 = vmul.f32 0.6931472, %v5010_v59 }
 0x513   : > { %5011 = vlog2.f32 %v4154_v61  ;;  %v4101_v45 = vmax.f32 %v2667_v26, %v4093_v34 }
 0x514   : > { %v4180_v41 = vadd.f32 %v4171_v36, %v7884_v5 }
 0x515   : > { %v4109_v6 = vsub.f32 %v2667_v26, %v4101_v45  ;;  %v4133_v48 = vsub.f32 %v4093_v34, %v4101_v45 }
 0x516   : > { %v4231_v1 = vmul.f32 %v4452_v58, %v4180_v41 }
 0x517   : > { %v4124_v27 = vmul.f32 1.442695, %v4109_v6  ;;  %v4148_v24 = vmul.f32 1.442695, %v4133_v48 }
 0x519   : > { %v5012_v38 = vpop.eup %5011  ;;  %5013 = vpow2.f32 %v4124_v27  ;;  %4253 = vrot.lane.b32.xlu1 %v4231_v1, %s5050_s18 }
 0x51a   : > { %v4167_v47 = vmul.f32 0.6931472, %v5012_v38  ;;  %5015 = vpow2.f32 %v4148_v24 }
 0x51c   : > { %v4178_v16 = vadd.f32 %v4167_v47, %v7892_v49 }
 0x51e   : > { %v4229_v53 = vmul.f32 %v4450_v37, %v4178_v16 }
 0x51f   : > { %v5014_v44 = vpop.eup %5013 }
 0x520   : > { %v5016_v42 = vpop.eup %5015  ;;  %4249 = vrot.lane.b32.xlu2 %v4229_v53, %s5050_s18 }
 0x521   : > { %v4157_v32 = vadd.f32 %v5016_v42, %v5014_v44 }
 0x523   : > { %5017 = vlog2.f32 %v4157_v32 }
 0x529   : > { %v5018_v5 = vpop.eup %5017 }
 0x52a   : > { %v4173_v30 = vmul.f32 0.6931472, %v5018_v5 }
 0x52c   : > { %v4181_v12 = vadd.f32 %v4173_v30, %v4101_v45 }
 0x52e   : > { %v4232_v2 = vmul.f32 %v4453_v17, %v4181_v12 }
 0x530   : > { %4255 = vrot.lane.b32.xlu2 %v4232_v2, %s5050_s18 }
 0x53f   : > { %v4242_v10 = vpop.permute.xlu1 %4241 }
 0x540   : > { %v4266_v52 = vsel %vm4265_vm1, %v4242_v10, 0.0 }
 0x544   : > { %v4244_v9 = vpop.permute.xlu2 %4243 }
 0x545   : > { %v4267_v49 = vsel %vm4265_vm1, %v4244_v9, 0.0 }
 0x546   : > { %v4268_v43 = vadd.f32 %v4267_v49, %v4266_v52 }
 0x562   : > { %v4246_v8 = vpop.permute.xlu0 %4245 }
 0x563   : > { %v4269_v51 = vsel %vm4265_vm1, %v4246_v8, 0.0 }
 0x564   : > { %v4270_v19 = vadd.f32 %v4269_v51, %v4268_v43 }
 0x57a   : > { %v4250_v21 = vpop.permute.xlu2 %4249 }
 0x57b   : > { %v4273_v22 = vsel %vm4265_vm1, %v4250_v21, 0.0 }
 0x583   : > { %v4248_v28 = vpop.permute.xlu1 %4247 }
 0x584   : > { %v4271_v0 = vsel %vm4265_vm1, %v4248_v28, 0.0  ;;  %v4252_v23 = vpop.permute.xlu0 %4251 }
 0x585   : > { %v4272_v29 = vadd.f32 %v4271_v0, %v4270_v19  ;;  %v4275_v18 = vsel %vm4265_vm1, %v4252_v23, 0.0 }
 0x587   : > { %v4274_v57 = vadd.f32 %v4273_v22, %v4272_v29 }
 0x589   : > { %v4276_v50 = vadd.f32 %v4275_v18, %v4274_v57 }
 0x58a   : > { %v4256_v4 = vpop.permute.xlu2 %4255 }
 0x58b   : > { %v4254_v60 = vpop.permute.xlu1 %4253  ;;  %v4279_v11 = vsel %vm4265_vm1, %v4256_v4, 0.0 }
 0x58c   : > { %v4277_v33 = vsel %vm4265_vm1, %v4254_v60, 0.0 }
 0x58d   : > { %v4278_v14 = vadd.f32 %v4277_v33, %v4276_v50 }
 0x58f   : > { %v4280_v55 = vadd.f32 %v4279_v11, %v4278_v14 }
 0x591   : > { %4281 = vadd.xlane.f32.xlu0 %v4280_v55 }
 0x604   : > { %v4282_v35 = vpop.xlane.xlu0 %4281 }
 0x605   : > { %v4283_v46 = vrot.slane %v4282_v35, 4 }
 0x607   : > { %v4284_v39 = vadd.f32 %v4283_v46, %v4282_v35 }
 0x609   : > { %v4285_v40 = vrot.slane %v4284_v39, 2 }
 0x60b   : > { %v4286_v63 = vadd.f32 %v4285_v40, %v4284_v39 }
 0x60d   : > { %v4287_v7 = vrot.slane %v4286_v63, 1 }
 0x60f   : > { %v4288_v54 = vadd.f32 %v4287_v7, %v4286_v63 }
 0x611   : > { %4468 = vpush %v4288_v54 }
 0x642   : > { %s4469_s25 = spop %4468 }
 0x643   : > { %v4290_v20 = vstv %s4469_s25 }
 0x644   : > { %4291 = vst [vmem:[%s349_s24] sm:$0xff] %v4290_v20 }
 0x645 PF: > { %s18_s27 = sadd.s32 1, %s5041_s27  }
 0x646   : > { %p15_p5 = scmp.ge.s32.totalorder %s18_s27, 6  }
 0x648   :  { %17 = sbr.rel (!%p15_p5) target bundleno = 1 (0x1), region = 88 }

</bundles_post_ra>
